<compile_context>
chip_gen: v6e
topology: v6e:2x2x1
jax: 0.10.0
libtpu: 0.0.40
codegen_flags: <defaults>
</compile_context>

<pallas_src>
import functools

import jax
import jax.numpy as jnp
from jax.experimental import pallas as pl
from jax.experimental.pallas import tpu as pltpu

# ---- module-default dimensions (from GNNCon.__init__) ----------------------
OUTPUT_DIM = 512        # output_dim  (encoder embedding size, pre_head input)
N_OUTPUT = 512          # n_output    (pre_head output size)
H1 = 2048               # pre_head hidden 1
H2 = 1024               # pre_head hidden 2
NODE_FEAT_DIM = 78      # node feature size (num_features_xt)
NODE_FEAT_PAD = 128     # lane-aligned padding of the encoder K dim
EDGE_FEAT_DIM = 4


def _round_up(n, m):
    return ((n + m - 1) // m) * m


# Explicit (import-time, one-shot) capability check for single-buffered
# grid-invariant BlockSpecs, instead of a per-call try/except.
def _buffered_supported():
    if not hasattr(pl, "Buffered"):
        return False
    try:
        pl.BlockSpec((8, 128), lambda i: (0, 0), pipeline_mode=pl.Buffered(1))
        return True
    except TypeError:
        return False


_HAS_BUFFERED = _buffered_supported()


def _const_spec(shape):
    """BlockSpec for a grid-invariant operand (weights / scales / biases).

    Single-buffered so the ~3.5 MiB int8 weight set is not duplicated by the
    default double-buffer.  Even on the fallback path (default buffering) the
    duplicated int8 weights are only ~7 MiB, well inside the 24 MiB cap.
    """
    if _HAS_BUFFERED:
        return pl.BlockSpec(shape, lambda i: (0, 0),
                            pipeline_mode=pl.Buffered(1))
    return pl.BlockSpec(shape, lambda i: (0, 0))


# ============================================================================
# Pallas kernel: fused pre_head MLP
# (int8 weights -> in-kernel bf16 dequant, f32 MXU accumulation,
#  per-channel f32 scale + bias + ReLU epilogue)
# ============================================================================
def _pre_head_kernel(x_ref, w1_ref, s1_ref, b1_ref, w2_ref, s2_ref, b2_ref,
                     w3_ref, s3_ref, b3_ref, o_ref):
    x_bf = x_ref[...].astype(jnp.bfloat16)

    # Linear(512 -> 2048): bf16 MXU, f32 accumulate, per-column scale + bias.
    h = jnp.dot(x_bf, w1_ref[...].astype(jnp.bfloat16),
                preferred_element_type=jnp.float32)
    h = jnp.maximum(h * s1_ref[...] + b1_ref[...], 0.0)
    # Dropout(p=0.2) is identity in eval mode.
    # TODO(synk): training-mode dropout via pltpu.prng_seed/prng_random_bits.

    # Linear(2048 -> 1024)
    h = jnp.dot(h.astype(jnp.bfloat16), w2_ref[...].astype(jnp.bfloat16),
                preferred_element_type=jnp.float32)
    h = jnp.maximum(h * s2_ref[...] + b2_ref[...], 0.0)
    # TODO(synk): if B ever grows enough to be MXU-bound, chunk H1 with an
    #             inner fori_loop instead of materialising the full f32 h.

    # Linear(1024 -> 512)
    o = jnp.dot(h.astype(jnp.bfloat16), w3_ref[...].astype(jnp.bfloat16),
                preferred_element_type=jnp.float32)
    o_ref[...] = (o * s3_ref[...] + b3_ref[...]).astype(o_ref.dtype)


def pre_head(x, params):
    """x: [B, OUTPUT_DIM] f32  ->  [B, N_OUTPUT] f32 via the fused Pallas MLP.

    Handles any B by padding rows up to the tile (no divisibility assert).
    """
    B = x.shape[0]
    block_rows = min(256, _round_up(B, 8))
    B_pad = _round_up(B, block_rows)
    if B_pad != B:
        x = jnp.pad(x, ((0, B_pad - B), (0, 0)))

    w1, s1, b1, w2, s2, b2, w3, s3, b3 = params
    grid_steps = B_pad // block_rows
    grid = (grid_steps,)

    weight_bytes = (w1.size * w1.dtype.itemsize
                    + w2.size * w2.dtype.itemsize
                    + w3.size * w3.dtype.itemsize)
    scale_bias_bytes = (s1.size + b1.size + s2.size + b2.size
                        + s3.size + b3.size) * 4
    io_bytes = B_pad * (OUTPUT_DIM + N_OUTPUT) * 4
    cost = pl.CostEstimate(
        flops=2 * B_pad * (OUTPUT_DIM * H1 + H1 * H2 + H2 * N_OUTPUT),
        transcendentals=0,
        bytes_accessed=weight_bytes + scale_bias_bytes + io_bytes,
    )

    # Only shard the row-block axis across cores when there is enough work;
    # otherwise each v7x TensorCore would re-DMA the full weight set for a
    # 1-2 step grid (pure HBM-traffic loss on a weight-streaming-bound kernel).
    dim_sem = ("parallel",) if grid_steps >= 4 else ("arbitrary",)

    out = pl.pallas_call(
        _pre_head_kernel,
        out_shape=jax.ShapeDtypeStruct((B_pad, N_OUTPUT), jnp.float32),
        grid_spec=pltpu.PrefetchScalarGridSpec(
            num_scalar_prefetch=0,
            grid=grid,
            in_specs=[
                pl.BlockSpec((block_rows, OUTPUT_DIM), lambda i: (i, 0)),
                _const_spec((OUTPUT_DIM, H1)),   # w1 int8
                _const_spec((1, H1)),            # s1 f32
                _const_spec((1, H1)),            # b1 f32
                _const_spec((H1, H2)),           # w2 int8
                _const_spec((1, H2)),            # s2 f32
                _const_spec((1, H2)),            # b2 f32
                _const_spec((H2, N_OUTPUT)),     # w3 int8
                _const_spec((1, N_OUTPUT)),      # s3 f32
                _const_spec((1, N_OUTPUT)),      # b3 f32
            ],
            out_specs=pl.BlockSpec((block_rows, N_OUTPUT), lambda i: (i, 0)),
        ),
        compiler_params=pltpu.CompilerParams(
            dimension_semantics=dim_sem,
            # Footprint: ~3.5 MiB int8 weights (<=7 MiB if the single-buffer
            # hint is not honored) + activations/IO; 24 MiB leaves headroom
            # on v7x's 64 MiB physical VMEM and is generous on v5e/v6e.
            vmem_limit_bytes=24 << 20,
        ),
        cost_estimate=cost,
    )(x, w1, s1, b1, w2, s2, b2, w3, s3, b3)
    return out[:B]


def pre_head_reference(x, params):
    """Pure-JAX f32 reference of the fused MLP (dequantised weights)."""
    w1, s1, b1, w2, s2, b2, w3, s3, b3 = params
    h = jnp.maximum(x @ (w1.astype(jnp.float32) * s1) + b1, 0.0)
    h = jnp.maximum(h @ (w2.astype(jnp.float32) * s2) + b2, 0.0)
    return h @ (w3.astype(jnp.float32) * s3) + b3


# ============================================================================
# Plain-JAX deterministic stand-ins for the injected encoders
# (encoder1 / encoder2 are constructor-injected modules, not defined in
#  GNNCon itself; they are glue here, not the Pallas hot path.)
# ============================================================================
def _segment_mean(vals, seg_ids, num_segments):
    s = jax.ops.segment_sum(vals, seg_ids, num_segments=num_segments)
    c = jax.ops.segment_sum(jnp.ones((vals.shape[0],), vals.dtype), seg_ids,
                            num_segments=num_segments)
    return s / jnp.maximum(c, 1.0)[:, None]


def gat_encoder(x, edge_index, edge_attr, batch, num_graphs, params):
    """GAT-style stand-in.  Returns (x1 [G, OUTPUT_DIM],
    (edge_index_with_self_loops, alpha [E+N, 1]))."""
    del edge_attr  # TODO(synk): edge-attr conditioning of the real GAT encoder
    wg, a_src, a_dst = params
    n = x.shape[0]
    h = x @ wg                                            # [N, D] (K padded to 128)
    src, dst = edge_index[0], edge_index[1]
    loops = jnp.arange(n, dtype=src.dtype)
    src_sl = jnp.concatenate([src, loops])                # self-loops appended
    dst_sl = jnp.concatenate([dst, loops])
    score = jax.nn.leaky_relu(h[src_sl] @ a_src + h[dst_sl] @ a_dst, 0.2)
    # segment softmax over destination nodes
    smax = jax.ops.segment_max(score, dst_sl, num_segments=n)
    ex = jnp.exp(score - smax[dst_sl])
    denom = jax.ops.segment_sum(ex, dst_sl, num_segments=n)
    alpha = ex / jnp.maximum(denom[dst_sl], 1e-16)        # [E+N]
    out = jax.ops.segment_sum(alpha[:, None] * h[src_sl], dst_sl,
                              num_segments=n)
    out = jax.nn.relu(out)
    x1 = _segment_mean(out, batch, num_graphs)            # global mean pool
    weight = (jnp.stack([src_sl, dst_sl]), alpha[:, None])
    return x1, weight


def gin_encoder(x, edge_index, edge_attr, batch, num_graphs, params, eps=0.0):
    """GIN-style stand-in.  Returns x2 [G, OUTPUT_DIM]."""
    del edge_attr  # TODO(synk): edge-attr conditioning of the real GIN encoder
    w_in, w1, w2 = params
    n = x.shape[0]
    h0 = x @ w_in                                         # [N, D] (K padded to 128)
    src, dst = edge_index[0], edge_index[1]
    agg = jax.ops.segment_sum(h0[src], dst, num_segments=n)
    h = (1.0 + eps) * h0 + agg
    h = jax.nn.relu(h @ w1)
    h = h @ w2
    return _segment_mean(h, batch, num_graphs)            # global mean pool


# ============================================================================
# GNNCon forward
# ============================================================================
def gnncon_forward(x, edge_index, batch, edge_attr, num_graphs, params):
    # Lane-align the encoder projection K dim (78 -> 128); weights are stored
    # zero-padded to match, so the result is numerically identical.
    x_p = jnp.pad(x, ((0, 0), (0, NODE_FEAT_PAD - x.shape[1])))

    x1, weight = gat_encoder(x_p, edge_index, edge_attr, batch, num_graphs,
                             params["gat"])
    x2 = gin_encoder(x_p, edge_index, edge_attr, batch, num_graphs,
                     params["gin"])

    # Fused pre_head: one pallas_call over the stacked [2G, 512] batch so the
    # ~3.5 MiB int8 weight set is streamed from HBM once instead of twice.
    # TODO(synk): P10 cross-call weight prefetch to start this DMA behind the
    #             encoder compute.
    out12 = pre_head(jnp.concatenate([x1, x2], axis=0), params["pre_head"])
    out1 = out12[:num_graphs]
    out2 = out12[num_graphs:]

    len_w = edge_index.shape[1]
    w1 = weight[1]
    ew1 = w1[:len_w]
    xw1 = w1[len_w:]
    return x1, out1, x2, out2, ew1, xw1


# ============================================================================
# Parameter init (pre_head weights quantised to int8 + per-channel scales)
# ============================================================================
def _quantize_per_col(w):
    """Symmetric per-output-channel int8 quantisation; returns (q, scale)."""
    amax = jnp.max(jnp.abs(w), axis=0, keepdims=True)        # [1, out]
    scale = jnp.maximum(amax, 1e-8) / 127.0
    q = jnp.clip(jnp.round(w / scale), -127.0, 127.0).astype(jnp.int8)
    return q, scale.astype(jnp.float32)


def init_params(key):
    ks = jax.random.split(key, 12)
    s = lambda fan_in: 1.0 / jnp.sqrt(jnp.float32(fan_in))
    # pre_head weights stored int8 with per-channel f32 scales; biases f32.
    # (The model's "true" weights ARE the dequantised values scale * q.)
    w1q, s1 = _quantize_per_col(
        jax.random.normal(ks[0], (OUTPUT_DIM, H1), jnp.float32) * s(OUTPUT_DIM))
    w2q, s2 = _quantize_per_col(
        jax.random.normal(ks[2], (H1, H2), jnp.float32) * s(H1))
    w3q, s3 = _quantize_per_col(
        jax.random.normal(ks[4], (H2, N_OUTPUT), jnp.float32) * s(H2))
    pre = (
        w1q, s1, jax.random.normal(ks[1], (1, H1), jnp.float32) * 0.01,
        w2q, s2, jax.random.normal(ks[3], (1, H2), jnp.float32) * 0.01,
        w3q, s3, jax.random.normal(ks[5], (1, N_OUTPUT), jnp.float32) * 0.01,
    )
    k_pad = NODE_FEAT_PAD - NODE_FEAT_DIM   # zero-pad encoder input weights
    gat = (
        jnp.pad(jax.random.normal(ks[6], (NODE_FEAT_DIM, OUTPUT_DIM),
                                  jnp.float32) * s(NODE_FEAT_DIM),
                ((0, k_pad), (0, 0))),
        jax.random.normal(ks[7], (OUTPUT_DIM,), jnp.float32) * s(OUTPUT_DIM),
        jax.random.normal(ks[8], (OUTPUT_DIM,), jnp.float32) * s(OUTPUT_DIM),
    )
    gin = (
        jnp.pad(jax.random.normal(ks[9], (NODE_FEAT_DIM, OUTPUT_DIM),
                                  jnp.float32) * s(NODE_FEAT_DIM),
                ((0, k_pad), (0, 0))),
        jax.random.normal(ks[10], (OUTPUT_DIM, OUTPUT_DIM), jnp.float32)
        * s(OUTPUT_DIM),
        jax.random.normal(ks[11], (OUTPUT_DIM, OUTPUT_DIM), jnp.float32)
        * s(OUTPUT_DIM),
    )
    return {"pre_head": pre, "gat": gat, "gin": gin}


if __name__ == "__main__":
    key = jax.random.PRNGKey(0)
    k_param, k_x, k_e, k_ea = jax.random.split(key, 4)

    num_graphs = 8
    nodes_per_graph = 4
    n_nodes = num_graphs * nodes_per_graph          # 32
    edges_per_graph = 8
    n_edges = num_graphs * edges_per_graph          # 64

    # node features
    x = jax.random.normal(k_x, (n_nodes, NODE_FEAT_DIM), jnp.float32)
    # batch vector: graph id per node
    batch = jnp.repeat(jnp.arange(num_graphs, dtype=jnp.int32),
                       nodes_per_graph)
    # within-graph random edges
    local = jax.random.randint(k_e, (2, n_edges), 0, nodes_per_graph,
                               dtype=jnp.int32)
    graph_of_edge = jnp.repeat(jnp.arange(num_graphs, dtype=jnp.int32),
                               edges_per_graph)
    edge_index = local + graph_of_edge[None, :] * nodes_per_graph  # [2, E]
    edge_attr = jax.random.normal(k_ea, (n_edges, EDGE_FEAT_DIM), jnp.float32)

    params = init_params(k_param)

    fwd = jax.jit(functools.partial(gnncon_forward, num_graphs=num_graphs,
                                    params=params))
    x1, out1, x2, out2, ew1, xw1 = fwd(x, edge_index, batch, edge_attr)
    jax.block_until_ready((x1, out1, x2, out2, ew1, xw1))

    assert x1.shape == (num_graphs, OUTPUT_DIM)
    assert out1.shape == (num_graphs, N_OUTPUT)
    assert x2.shape == (num_graphs, OUTPUT_DIM)
    assert out2.shape == (num_graphs, N_OUTPUT)
    assert ew1.shape == (n_edges, 1)
    assert xw1.shape == (n_nodes, 1)
    assert bool(jnp.all(jnp.isfinite(out1))) and bool(jnp.all(jnp.isfinite(out2)))

    # Correctness: Pallas (bf16 MXU, int8-dequant weights) vs pure-f32 JAX ref.
    ref1 = pre_head_reference(x1, params["pre_head"])
    ref2 = pre_head_reference(x2, params["pre_head"])
    scale = jnp.maximum(jnp.max(jnp.abs(jnp.concatenate([ref1, ref2]))), 1e-6)
    rel_err = float(jnp.max(jnp.abs(jnp.concatenate([out1, out2])
                                    - jnp.concatenate([ref1, ref2]))) / scale)
    assert rel_err < 5e-2, f"pre_head mismatch vs f32 reference: {rel_err}"

    print("KERNEL_OK")
</pallas_src>

<mosaic_0001>
module attributes {stable_mosaic.version = 11 : i64} {
  func.func private @main(%arg0: i32) attributes {dimension_semantics = [#tpu.dimension_semantics<core_parallel>], iteration_bounds = array<i64: 2>, tpu.core_type = #tpu.core_type<sc_scalar_subcore>, window_params = []} {
    return
  }
}

module attributes {stable_mosaic.version = 11 : i64} {
  func.func private @main(%arg0: i32) attributes {dimension_semantics = [#tpu.dimension_semantics<core_parallel>], iteration_bounds = array<i64: 2>, tpu.core_type = #tpu.core_type<sc_scalar_subcore>, window_params = []} {
    return
  }
}

module attributes {stable_mosaic.version = 11 : i64} {
  func.func @_pre_head_kernel(%arg0: i32, %arg1: memref<16x512xf32, #tpu.memory_space<vmem>>, %arg2: memref<512x2048xi8, #tpu.memory_space<vmem>>, %arg3: memref<1x2048xf32, #tpu.memory_space<vmem>>, %arg4: memref<1x2048xf32, #tpu.memory_space<vmem>>, %arg5: memref<2048x1024xi8, #tpu.memory_space<vmem>>, %arg6: memref<1x1024xf32, #tpu.memory_space<vmem>>, %arg7: memref<1x1024xf32, #tpu.memory_space<vmem>>, %arg8: memref<1024x512xi8, #tpu.memory_space<vmem>>, %arg9: memref<1x512xf32, #tpu.memory_space<vmem>>, %arg10: memref<1x512xf32, #tpu.memory_space<vmem>>, %arg11: memref<16x512xf32, #tpu.memory_space<vmem>>) attributes {dimension_semantics = [#tpu.dimension_semantics<arbitrary>], iteration_bounds = array<i64: 1>, scalar_prefetch = 0 : i64, scratch_operands = 0 : i64, tpu.core_type = #tpu.core_type<tc>, window_params = [{transform_indices = @transform_0, window_bounds = array<i64: 16, 512>}, {pipeline_mode = #tpu.pipeline_mode<synchronous>, transform_indices = @transform_1, window_bounds = array<i64: 512, 2048>}, {pipeline_mode = #tpu.pipeline_mode<synchronous>, transform_indices = @transform_2, window_bounds = array<i64: 1, 2048>}, {pipeline_mode = #tpu.pipeline_mode<synchronous>, transform_indices = @transform_3, window_bounds = array<i64: 1, 2048>}, {pipeline_mode = #tpu.pipeline_mode<synchronous>, transform_indices = @transform_4, window_bounds = array<i64: 2048, 1024>}, {pipeline_mode = #tpu.pipeline_mode<synchronous>, transform_indices = @transform_5, window_bounds = array<i64: 1, 1024>}, {pipeline_mode = #tpu.pipeline_mode<synchronous>, transform_indices = @transform_6, window_bounds = array<i64: 1, 1024>}, {pipeline_mode = #tpu.pipeline_mode<synchronous>, transform_indices = @transform_7, window_bounds = array<i64: 1024, 512>}, {pipeline_mode = #tpu.pipeline_mode<synchronous>, transform_indices = @transform_8, window_bounds = array<i64: 1, 512>}, {pipeline_mode = #tpu.pipeline_mode<synchronous>, transform_indices = @transform_9, window_bounds = array<i64: 1, 512>}, {transform_indices = @transform_10, window_bounds = array<i64: 16, 512>}]} {
    %c0 = arith.constant 0 : index
    %c0_0 = arith.constant 0 : index
    %0 = vector.load %arg1[%c0, %c0_0] : memref<16x512xf32, #tpu.memory_space<vmem>>, vector<16x512xf32>
    %1 = arith.truncf %0 : vector<16x512xf32> to vector<16x512xbf16>
    %c0_1 = arith.constant 0 : index
    %c0_2 = arith.constant 0 : index
    %2 = vector.load %arg2[%c0_1, %c0_2] : memref<512x2048xi8, #tpu.memory_space<vmem>>, vector<512x2048xi8>
    %3 = arith.sitofp %2 : vector<512x2048xi8> to vector<512x2048xbf16>
    %cst = arith.constant dense<0.000000e+00> : vector<16x2048xf32>
    %4 = tpu.matmul %1, %3, %cst {dimension_numbers = #tpu.dot_dimension_numbers<[1], [0], [0], [1], [0, 0, 1, 1], [], []>} : vector<16x512xbf16>, vector<512x2048xbf16>, vector<16x2048xf32> -> vector<16x2048xf32>
    %c0_3 = arith.constant 0 : index
    %c0_4 = arith.constant 0 : index
    %5 = vector.load %arg3[%c0_3, %c0_4] : memref<1x2048xf32, #tpu.memory_space<vmem>>, vector<1x2048xf32>
    %6 = vector.broadcast %5 : vector<1x2048xf32> to vector<16x2048xf32>
    %7 = arith.mulf %4, %6 : vector<16x2048xf32>
    %c0_5 = arith.constant 0 : index
    %c0_6 = arith.constant 0 : index
    %8 = vector.load %arg4[%c0_5, %c0_6] : memref<1x2048xf32, #tpu.memory_space<vmem>>, vector<1x2048xf32>
    %9 = vector.broadcast %8 : vector<1x2048xf32> to vector<16x2048xf32>
    %10 = arith.addf %7, %9 : vector<16x2048xf32>
    %cst_7 = arith.constant 0.000000e+00 : f32
    %11 = vector.broadcast %cst_7 : f32 to vector<16x2048xf32>
    %12 = arith.maximumf %10, %11 : vector<16x2048xf32>
    %13 = arith.truncf %12 : vector<16x2048xf32> to vector<16x2048xbf16>
    %c0_8 = arith.constant 0 : index
    %c0_9 = arith.constant 0 : index
    %14 = vector.load %arg5[%c0_8, %c0_9] : memref<2048x1024xi8, #tpu.memory_space<vmem>>, vector<2048x1024xi8>
    %15 = arith.sitofp %14 : vector<2048x1024xi8> to vector<2048x1024xbf16>
    %cst_10 = arith.constant dense<0.000000e+00> : vector<16x1024xf32>
    %16 = tpu.matmul %13, %15, %cst_10 {dimension_numbers = #tpu.dot_dimension_numbers<[1], [0], [0], [1], [0, 0, 1, 1], [], []>} : vector<16x2048xbf16>, vector<2048x1024xbf16>, vector<16x1024xf32> -> vector<16x1024xf32>
    %c0_11 = arith.constant 0 : index
    %c0_12 = arith.constant 0 : index
    %17 = vector.load %arg6[%c0_11, %c0_12] : memref<1x1024xf32, #tpu.memory_space<vmem>>, vector<1x1024xf32>
    %18 = vector.broadcast %17 : vector<1x1024xf32> to vector<16x1024xf32>
    %19 = arith.mulf %16, %18 : vector<16x1024xf32>
    %c0_13 = arith.constant 0 : index
    %c0_14 = arith.constant 0 : index
    %20 = vector.load %arg7[%c0_13, %c0_14] : memref<1x1024xf32, #tpu.memory_space<vmem>>, vector<1x1024xf32>
    %21 = vector.broadcast %20 : vector<1x1024xf32> to vector<16x1024xf32>
    %22 = arith.addf %19, %21 : vector<16x1024xf32>
    %cst_15 = arith.constant 0.000000e+00 : f32
    %23 = vector.broadcast %cst_15 : f32 to vector<16x1024xf32>
    %24 = arith.maximumf %22, %23 : vector<16x1024xf32>
    %25 = arith.truncf %24 : vector<16x1024xf32> to vector<16x1024xbf16>
    %c0_16 = arith.constant 0 : index
    %c0_17 = arith.constant 0 : index
    %26 = vector.load %arg8[%c0_16, %c0_17] : memref<1024x512xi8, #tpu.memory_space<vmem>>, vector<1024x512xi8>
    %27 = arith.sitofp %26 : vector<1024x512xi8> to vector<1024x512xbf16>
    %cst_18 = arith.constant dense<0.000000e+00> : vector<16x512xf32>
    %28 = tpu.matmul %25, %27, %cst_18 {dimension_numbers = #tpu.dot_dimension_numbers<[1], [0], [0], [1], [0, 0, 1, 1], [], []>} : vector<16x1024xbf16>, vector<1024x512xbf16>, vector<16x512xf32> -> vector<16x512xf32>
    %c0_19 = arith.constant 0 : index
    %c0_20 = arith.constant 0 : index
    %29 = vector.load %arg9[%c0_19, %c0_20] : memref<1x512xf32, #tpu.memory_space<vmem>>, vector<1x512xf32>
    %30 = vector.broadcast %29 : vector<1x512xf32> to vector<16x512xf32>
    %31 = arith.mulf %28, %30 : vector<16x512xf32>
    %c0_21 = arith.constant 0 : index
    %c0_22 = arith.constant 0 : index
    %32 = vector.load %arg10[%c0_21, %c0_22] : memref<1x512xf32, #tpu.memory_space<vmem>>, vector<1x512xf32>
    %33 = vector.broadcast %32 : vector<1x512xf32> to vector<16x512xf32>
    %34 = arith.addf %31, %33 : vector<16x512xf32>
    %c0_23 = arith.constant 0 : index
    %c0_24 = arith.constant 0 : index
    %35 = vector.load %arg11[%c0_23, %c0_24] : memref<16x512xf32, #tpu.memory_space<vmem>>, vector<16x512xf32>
    tpu.vector_store %arg11[%c0_23, %c0_24], %34 {strides = array<i32>} : memref<16x512xf32, #tpu.memory_space<vmem>>, vector<16x512xf32>,
    return
  }
  func.func @transform_0(%arg0: i32) -> (i32, i32) {
    %c0_i32 = arith.constant 0 : i32
    %c0_i32_0 = arith.constant 0 : i32
    return %arg0, %c0_i32 : i32, i32
  }
  func.func @transform_1(%arg0: i32) -> (i32, i32) {
    %c0_i32 = arith.constant 0 : i32
    %c0_i32_0 = arith.constant 0 : i32
    %c0_i32_1 = arith.constant 0 : i32
    return %c0_i32, %c0_i32_0 : i32, i32
  }
  func.func @transform_2(%arg0: i32) -> (i32, i32) {
    %c0_i32 = arith.constant 0 : i32
    %c0_i32_0 = arith.constant 0 : i32
    %c0_i32_1 = arith.constant 0 : i32
    return %c0_i32, %c0_i32_0 : i32, i32
  }
  func.func @transform_3(%arg0: i32) -> (i32, i32) {
    %c0_i32 = arith.constant 0 : i32
    %c0_i32_0 = arith.constant 0 : i32
    %c0_i32_1 = arith.constant 0 : i32
    return %c0_i32, %c0_i32_0 : i32, i32
  }
  func.func @transform_4(%arg0: i32) -> (i32, i32) {
    %c0_i32 = arith.constant 0 : i32
    %c0_i32_0 = arith.constant 0 : i32
    %c0_i32_1 = arith.constant 0 : i32
    return %c0_i32, %c0_i32_0 : i32, i32
  }
  func.func @transform_5(%arg0: i32) -> (i32, i32) {
    %c0_i32 = arith.constant 0 : i32
    %c0_i32_0 = arith.constant 0 : i32
    %c0_i32_1 = arith.constant 0 : i32
    return %c0_i32, %c0_i32_0 : i32, i32
  }
  func.func @transform_6(%arg0: i32) -> (i32, i32) {
    %c0_i32 = arith.constant 0 : i32
    %c0_i32_0 = arith.constant 0 : i32
    %c0_i32_1 = arith.constant 0 : i32
    return %c0_i32, %c0_i32_0 : i32, i32
  }
  func.func @transform_7(%arg0: i32) -> (i32, i32) {
    %c0_i32 = arith.constant 0 : i32
    %c0_i32_0 = arith.constant 0 : i32
    %c0_i32_1 = arith.constant 0 : i32
    return %c0_i32, %c0_i32_0 : i32, i32
  }
  func.func @transform_8(%arg0: i32) -> (i32, i32) {
    %c0_i32 = arith.constant 0 : i32
    %c0_i32_0 = arith.constant 0 : i32
    %c0_i32_1 = arith.constant 0 : i32
    return %c0_i32, %c0_i32_0 : i32, i32
  }
  func.func @transform_9(%arg0: i32) -> (i32, i32) {
    %c0_i32 = arith.constant 0 : i32
    %c0_i32_0 = arith.constant 0 : i32
    %c0_i32_1 = arith.constant 0 : i32
    return %c0_i32, %c0_i32_0 : i32, i32
  }
  func.func @transform_10(%arg0: i32) -> (i32, i32) {
    %c0_i32 = arith.constant 0 : i32
    %c0_i32_0 = arith.constant 0 : i32
    return %arg0, %c0_i32 : i32, i32
  }
}

</mosaic_0001>

<bundles_post_ra>
// kernel: gnncon_forward.1
= control target key start
LH: loop header
LB: loop body
LE: loop exit
PB: predicated region body
PF: predicated region fallthrough
CT: control target
= control target key end

     0   :  { %s9080_s1 = inlined_call_operand.vmem [shape: s8[512,2048], index: 1, kind: input, shape index: {}]   ;;  %s9081_s0 = inlined_call_operand.vmem [shape: f32[16,512], index: 0, kind: input, shape index: {}]   ;;  %s9082_s2 = inlined_call_operand.vmem [shape: f32[1,2048], index: 2, kind: input, shape index: {}]   ;;  %s9083_s3 = inlined_call_operand.vmem [shape: f32[1,2048], index: 3, kind: input, shape index: {}]   ;;  %s9084_s4 = inlined_call_operand.vmem [shape: s8[2048,1024], index: 4, kind: input, shape index: {}]   ;;  %s9085_s5 = inlined_call_operand.vmem [shape: f32[1,1024], index: 5, kind: input, shape index: {}]   ;;  %s9086_s6 = inlined_call_operand.vmem [shape: f32[1,1024], index: 6, kind: input, shape index: {}]   ;;  %s9087_s7 = inlined_call_operand.vmem [shape: s8[1024,512], index: 7, kind: input, shape index: {}]   ;;  %s9088_s8 = inlined_call_operand.vmem [shape: f32[1,512], index: 8, kind: input, shape index: {}]   ;;  %s9089_s9 = inlined_call_operand.vmem [shape: f32[1,512], index: 9, kind: input, shape index: {}]   ;;  %s9090_s10 = inlined_call_operand.vmem [shape: f32[16,512], index: 10, kind: output, shape index: {}]  }
   0x1   :  { %v96_v0 = vld [vmem:[%s9080_s1 + $0x188] sm:$0xff]  ;;  %v95_v2 = vld [vmem:[%s9080_s1 + $0x180] sm:$0xff]  ;;  %v38_v32 = vld [vmem:[%s9081_s0 + $0x18] sm:$0xff] }
   0x2   :  { %v224_v1 = vld [vmem:[%s9080_s1 + $0x588] sm:$0xff]  ;;  %v400_v3 = vunpack.c.l.s8.bf16 %v96_v0  ;;  %v416_v4 = vunpack.c.h.s8.bf16 %v96_v0  ;;  %v223_v7 = vld [vmem:[%s9080_s1 + $0x580] sm:$0xff]  ;;  %v415_v8 = vunpack.c.h.s8.bf16 %v95_v2  ;;  %v399_v12 = vunpack.c.l.s8.bf16 %v95_v2  ;;  %v42_v33 = vld [vmem:[%s9081_s0 + $0x38] sm:$0xff] }
   0x3   :  { %v656_v5 = vunpack.c.l.s8.bf16 %v224_v1  ;;  %v672_v6 = vunpack.c.h.s8.bf16 %v224_v1  ;;  %v671_v9 = vunpack.c.h.s8.bf16 %v223_v7  ;;  %v80_v10 = vld [vmem:[%s9080_s1 + $0x108] sm:$0xff]  ;;  %v655_v13 = vunpack.c.l.s8.bf16 %v223_v7  ;;  %v79_v16 = vld [vmem:[%s9080_s1 + $0x100] sm:$0xff] }
   0x4   :  { %v208_v11 = vld [vmem:[%s9080_s1 + $0x508] sm:$0xff]  ;;  %815 = vmatprep.subr.bf16.mxu0 %v416_v4  ;;  %v384_v14 = vunpack.c.h.s8.bf16 %v80_v10  ;;  %v207_v17 = vld [vmem:[%s9080_s1 + $0x500] sm:$0xff]  ;;  %v383_v18 = vunpack.c.h.s8.bf16 %v79_v16  ;;  %v368_v20 = vunpack.c.l.s8.bf16 %v80_v10  ;;  %v367_v24 = vunpack.c.l.s8.bf16 %v79_v16 }
   0x5   :  { %858 = vmatprep.subr.bf16.mxu1 %v672_v6  ;;  %816 = vmatpush1.bf16.msra.mxu0 %v415_v8  ;;  %v640_v15 = vunpack.c.h.s8.bf16 %v208_v11  ;;  %v639_v19 = vunpack.c.h.s8.bf16 %v207_v17  ;;  %v624_v21 = vunpack.c.l.s8.bf16 %v208_v11  ;;  %v64_v22 = vld [vmem:[%s9080_s1 + $0x88] sm:$0xff]  ;;  %v623_v25 = vunpack.c.l.s8.bf16 %v207_v17  ;;  %v63_v28 = vld [vmem:[%s9080_s1 + $0x80] sm:$0xff] }
   0x6   :  { %859 = vmatpush1.bf16.msra.mxu1 %v671_v9  ;;  %817 = vmatprep.subr.bf16.mxu0 %v400_v3  ;;  %v192_v23 = vld [vmem:[%s9080_s1 + $0x488] sm:$0xff]  ;;  %v352_v26 = vunpack.c.h.s8.bf16 %v64_v22  ;;  %v191_v29 = vld [vmem:[%s9080_s1 + $0x480] sm:$0xff]  ;;  %v351_v34 = vunpack.c.h.s8.bf16 %v63_v28  ;;  %v336_v36 = vunpack.c.l.s8.bf16 %v64_v22  ;;  %v5750_v39 = vpack.c.bf16 %v42_v33, %v38_v32 }
   0x7   :  { %860 = vmatprep.subr.bf16.mxu1 %v656_v5  ;;  %v608_v27 = vunpack.c.h.s8.bf16 %v192_v23  ;;  %v36_v30 = vld [vmem:[%s9081_s0 + $0x8] sm:$0xff]  ;;  %v607_v35 = vunpack.c.h.s8.bf16 %v191_v29  ;;  %v592_v37 = vunpack.c.l.s8.bf16 %v192_v23  ;;  %v335_v42 = vunpack.c.l.s8.bf16 %v63_v28  ;;  %v47_v46 = vld [vmem:[%s9080_s1] sm:$0xff] }
   0x8   :  { %v40_v31 = vld [vmem:[%s9081_s0 + $0x28] sm:$0xff]  ;;  %890 = vmatprep.mubr.bf16.mxu1 %v5750_v39  ;;  %v591_v43 = vunpack.c.l.s8.bf16 %v191_v29  ;;  %v175_v47 = vld [vmem:[%s9080_s1 + $0x400] sm:$0xff]  ;;  %v319_v48 = vunpack.c.h.s8.bf16 %v47_v46  ;;  %v303_v54 = vunpack.c.l.s8.bf16 %v47_v46 }
   0x9   :  { %818 = vmatpush1.bf16.msra.mxu0 %v399_v12  ;;  %v5748_v38 = vpack.c.bf16 %v40_v31, %v36_v30  ;;  %v48_v40 = vld [vmem:[%s9080_s1 + $0x8] sm:$0xff]  ;;  %v575_v49 = vunpack.c.h.s8.bf16 %v175_v47  ;;  %v559_v55 = vunpack.c.l.s8.bf16 %v175_v47  ;;  %v159_v58 = vld [vmem:[%s9080_s1 + $0x380] sm:$0xff] }
   0xa   :  { %861 = vmatpush1.bf16.msra.mxu1 %v655_v13  ;;  %819 = vmatprep.subr.bf16.mxu0 %v384_v14  ;;  %v176_v41 = vld [vmem:[%s9080_s1 + $0x408] sm:$0xff]  ;;  %v320_v44 = vunpack.c.h.s8.bf16 %v48_v40  ;;  %v304_v50 = vunpack.c.l.s8.bf16 %v48_v40  ;;  %v287_v59 = vld [vmem:[%s9080_s1 + $0x780] sm:$0xff]  ;;  %v543_v60 = vunpack.c.h.s8.bf16 %v159_v58  ;;  %v527_v2 = vunpack.c.l.s8.bf16 %v159_v58 }
   0xb   :  { %862 = vmatprep.subr.bf16.mxu1 %v640_v15  ;;  %847 = vmatprep.mubr.bf16.mxu0 %v5748_v38  ;;  %v576_v45 = vunpack.c.h.s8.bf16 %v176_v41  ;;  %v560_v51 = vunpack.c.l.s8.bf16 %v176_v41  ;;  %v160_v52 = vld [vmem:[%s9080_s1 + $0x388] sm:$0xff]  ;;  %v799_v61 = vunpack.c.h.s8.bf16 %v287_v59  ;;  %v783_v3 = vunpack.c.l.s8.bf16 %v287_v59  ;;  %v143_v6 = vld [vmem:[%s9080_s1 + $0x300] sm:$0xff] }
   0xc   :  { %v288_v53 = vld [vmem:[%s9080_s1 + $0x788] sm:$0xff]  ;;  %v544_v56 = vunpack.c.h.s8.bf16 %v160_v52  ;;  %v528_v62 = vunpack.c.l.s8.bf16 %v160_v52  ;;  %v271_v7 = vld [vmem:[%s9080_s1 + $0x700] sm:$0xff]  ;;  %v511_v8 = vunpack.c.h.s8.bf16 %v143_v6  ;;  %v495_v14 = vunpack.c.l.s8.bf16 %v143_v6 }
   0xd   :  { %820 = vmatpush1.bf16.msra.mxu0 %v383_v18  ;;  %v800_v57 = vunpack.c.h.s8.bf16 %v288_v53  ;;  %v784_v63 = vunpack.c.l.s8.bf16 %v288_v53  ;;  %v144_v0 = vld [vmem:[%s9080_s1 + $0x308] sm:$0xff]  ;;  %v767_v9 = vunpack.c.h.s8.bf16 %v271_v7  ;;  %v751_v15 = vunpack.c.l.s8.bf16 %v271_v7  ;;  %v127_v18 = vld [vmem:[%s9080_s1 + $0x280] sm:$0xff] }
   0xe   :  { %863 = vmatpush1.bf16.msra.mxu1 %v639_v19  ;;  %821 = vmatprep.subr.bf16.mxu0 %v368_v20  ;;  %v272_v1 = vld [vmem:[%s9080_s1 + $0x708] sm:$0xff]  ;;  %v512_v4 = vunpack.c.h.s8.bf16 %v144_v0  ;;  %v496_v10 = vunpack.c.l.s8.bf16 %v144_v0  ;;  %v255_v19 = vld [vmem:[%s9080_s1 + $0x680] sm:$0xff]  ;;  %v479_v20 = vunpack.c.h.s8.bf16 %v127_v18 }
   0xf   :  { %864 = vmatprep.subr.bf16.mxu1 %v624_v21  ;;  %v768_v5 = vunpack.c.h.s8.bf16 %v272_v1  ;;  %v752_v11 = vunpack.c.l.s8.bf16 %v272_v1  ;;  %v128_v12 = vld [vmem:[%s9080_s1 + $0x288] sm:$0xff]  ;;  %v735_v21 = vunpack.c.h.s8.bf16 %v255_v19  ;;  %v111_v30 = vld [vmem:[%s9080_s1 + $0x200] sm:$0xff] }
  0x10   :  { %v256_v13 = vld [vmem:[%s9080_s1 + $0x688] sm:$0xff]  ;;  %v480_v16 = vunpack.c.h.s8.bf16 %v128_v12  ;;  %v464_v22 = vunpack.c.l.s8.bf16 %v128_v12  ;;  %v239_v31 = vld [vmem:[%s9080_s1 + $0x600] sm:$0xff]  ;;  %v447_v32 = vunpack.c.h.s8.bf16 %v111_v30  ;;  %v431_v41 = vunpack.c.l.s8.bf16 %v111_v30 }
  0x11   :  { %822 = vmatpush1.bf16.msra.mxu0 %v367_v24  ;;  %v736_v17 = vunpack.c.h.s8.bf16 %v256_v13  ;;  %v720_v23 = vunpack.c.l.s8.bf16 %v256_v13  ;;  %v112_v24 = vld [vmem:[%s9080_s1 + $0x208] sm:$0xff]  ;;  %v703_v33 = vunpack.c.h.s8.bf16 %v239_v31  ;;  %v35_v40 = vld [vmem:[%s9081_s0] sm:$0xff] }
  0x12   :  { %865 = vmatpush1.bf16.msra.mxu1 %v623_v25  ;;  %823 = vmatprep.subr.bf16.mxu0 %v352_v26  ;;  %v240_v25 = vld [vmem:[%s9080_s1 + $0x608] sm:$0xff]  ;;  %v463_v26 = vunpack.c.l.s8.bf16 %v127_v18  ;;  %v448_v28 = vunpack.c.h.s8.bf16 %v112_v24 }
  0x13   :  { %866 = vmatprep.subr.bf16.mxu1 %v608_v27  ;;  %v719_v27 = vunpack.c.l.s8.bf16 %v255_v19  ;;  %v704_v29 = vunpack.c.h.s8.bf16 %v240_v25 }
  0x15   :  { %824 = vmatpush1.bf16.msra.mxu0 %v351_v34  ;;  %v432_v34 = vunpack.c.l.s8.bf16 %v112_v24 }
  0x16   :  { %867 = vmatpush1.bf16.msra.mxu1 %v607_v35  ;;  %825 = vmatprep.subr.bf16.mxu0 %v336_v36  ;;  %v688_v35 = vunpack.c.l.s8.bf16 %v240_v25  ;;  %v98_v36 = vld [vmem:[%s9080_s1 + $0x198] sm:$0xff] }
  0x17   :  { %868 = vmatprep.subr.bf16.mxu1 %v592_v37  ;;  %v226_v37 = vld [vmem:[%s9080_s1 + $0x598] sm:$0xff]  ;;  %v418_v46 = vunpack.c.h.s8.bf16 %v98_v36 }
  0x18   :  { %v674_v47 = vunpack.c.h.s8.bf16 %v226_v37 }
  0x19   :  { %826 = vmatpush1.bf16.msra.mxu0 %v335_v42  ;;  %v687_v42 = vunpack.c.l.s8.bf16 %v239_v31 }
  0x1a   :  { %869 = vmatpush1.bf16.msra.mxu1 %v591_v43  ;;  %827 = vmatprep.subr.bf16.mxu0 %v320_v44  ;;  %v39_v43 = vld [vmem:[%s9081_s0 + $0x20] sm:$0xff]  ;;  %v37_v44 = vld [vmem:[%s9081_s0 + $0x10] sm:$0xff] }
  0x1b   :  { %870 = vmatprep.subr.bf16.mxu1 %v576_v45  ;;  %v41_v45 = vld [vmem:[%s9081_s0 + $0x30] sm:$0xff] }
  0x1d   :  { %828 = vmatpush1.bf16.msra.mxu0 %v319_v48  ;;  %v97_v48 = vld [vmem:[%s9080_s1 + $0x190] sm:$0xff] }
  0x1e   :  { %871 = vmatpush1.bf16.msra.mxu1 %v575_v49  ;;  %829 = vmatprep.subr.bf16.mxu0 %v304_v50  ;;  %v225_v49 = vld [vmem:[%s9080_s1 + $0x590] sm:$0xff]  ;;  %v5838_v50 = vpack.c.bf16 %v39_v43, %v35_v40  ;;  %v417_v52 = vunpack.c.h.s8.bf16 %v97_v48  ;;  %v401_v58 = vunpack.c.l.s8.bf16 %v97_v48  ;;  %v274_v43 = vld [vmem:[%s9080_s1 + $0x718] sm:$0xff] }
  0x1f   :  { %872 = vmatprep.subr.bf16.mxu1 %v560_v51  ;;  %v5840_v51 = vpack.c.bf16 %v41_v45, %v37_v44  ;;  %v673_v53 = vunpack.c.h.s8.bf16 %v225_v49  ;;  %v657_v59 = vunpack.c.l.s8.bf16 %v225_v49  ;;  %v145_v48 = vld [vmem:[%s9080_s1 + $0x310] sm:$0xff] }
  0x20   :  { %v273_v49 = vld [vmem:[%s9080_s1 + $0x710] sm:$0xff] }
  0x21   :  { %830 = vmatpush1.bf16.msra.mxu0 %v303_v54  ;;  %v402_v54 = vunpack.c.l.s8.bf16 %v98_v36 }
  0x22   :  { %873 = vmatpush1.bf16.msra.mxu1 %v559_v55  ;;  %831 = vmatprep.subr.bf16.mxu0 %v544_v56  ;;  %v658_v55 = vunpack.c.l.s8.bf16 %v226_v37  ;;  %v82_v56 = vld [vmem:[%s9080_s1 + $0x118] sm:$0xff] }
  0x23   :  { %874 = vmatprep.subr.bf16.mxu1 %v800_v57  ;;  %v210_v57 = vld [vmem:[%s9080_s1 + $0x518] sm:$0xff] }
  0x25   :  { %832 = vmatpush2.bf16.msra.mxu0 %v543_v60  ;;  %v386_v60 = vunpack.c.h.s8.bf16 %v82_v56 }
  0x26   :  { %875 = vmatpush2.bf16.msra.mxu1 %v799_v61  ;;  %833 = vmatprep.subr.bf16.mxu0 %v528_v62  ;;  %v642_v61 = vunpack.c.h.s8.bf16 %v210_v57  ;;  %v81_v62 = vld [vmem:[%s9080_s1 + $0x110] sm:$0xff] }
  0x27   :  { %876 = vmatprep.subr.bf16.mxu1 %v784_v63  ;;  %v209_v63 = vld [vmem:[%s9080_s1 + $0x510] sm:$0xff]  ;;  %v385_v0 = vunpack.c.h.s8.bf16 %v81_v62  ;;  %v369_v6 = vunpack.c.l.s8.bf16 %v81_v62 }
  0x28   :  { %v641_v1 = vunpack.c.h.s8.bf16 %v209_v63  ;;  %v625_v7 = vunpack.c.l.s8.bf16 %v209_v63  ;;  %v129_v62 = vld [vmem:[%s9080_s1 + $0x290] sm:$0xff] }
  0x29   :  { %834 = vmatpush2.bf16.msra.mxu0 %v527_v2  ;;  %v370_v2 = vunpack.c.l.s8.bf16 %v82_v56  ;;  %v130_v56 = vld [vmem:[%s9080_s1 + $0x298] sm:$0xff]  ;;  %v257_v63 = vld [vmem:[%s9080_s1 + $0x690] sm:$0xff] }
  0x2a   :  { %877 = vmatpush2.bf16.msra.mxu1 %v783_v3  ;;  %835 = vmatprep.subr.bf16.mxu0 %v512_v4  ;;  %v626_v3 = vunpack.c.l.s8.bf16 %v210_v57  ;;  %v66_v4 = vld [vmem:[%s9080_s1 + $0x98] sm:$0xff] }
  0x2b   :  { %878 = vmatprep.subr.bf16.mxu1 %v768_v5  ;;  %v194_v5 = vld [vmem:[%s9080_s1 + $0x498] sm:$0xff] }
  0x2c   :  { %v258_v57 = vld [vmem:[%s9080_s1 + $0x698] sm:$0xff] }
  0x2d   :  { %836 = vmatpush2.bf16.msra.mxu0 %v511_v8  ;;  %v354_v8 = vunpack.c.h.s8.bf16 %v66_v4 }
  0x2e   :  { %879 = vmatpush2.bf16.msra.mxu1 %v767_v9  ;;  %837 = vmatprep.subr.bf16.mxu0 %v496_v10  ;;  %v610_v9 = vunpack.c.h.s8.bf16 %v194_v5  ;;  %v65_v10 = vld [vmem:[%s9080_s1 + $0x90] sm:$0xff] }
  0x2f   :  { %880 = vmatprep.subr.bf16.mxu1 %v752_v11  ;;  %v193_v11 = vld [vmem:[%s9080_s1 + $0x490] sm:$0xff]  ;;  %v353_v12 = vunpack.c.h.s8.bf16 %v65_v10  ;;  %v337_v18 = vunpack.c.l.s8.bf16 %v65_v10 }
  0x30   :  { %v609_v13 = vunpack.c.h.s8.bf16 %v193_v11  ;;  %v593_v19 = vunpack.c.l.s8.bf16 %v193_v11  ;;  %v113_v10 = vld [vmem:[%s9080_s1 + $0x210] sm:$0xff] }
  0x31   :  { %838 = vmatpush2.bf16.msra.mxu0 %v495_v14  ;;  %v338_v14 = vunpack.c.l.s8.bf16 %v66_v4  ;;  %v114_v4 = vld [vmem:[%s9080_s1 + $0x218] sm:$0xff]  ;;  %v241_v11 = vld [vmem:[%s9080_s1 + $0x610] sm:$0xff] }
  0x32   :  { %881 = vmatpush2.bf16.msra.mxu1 %v751_v15  ;;  %839 = vmatprep.subr.bf16.mxu0 %v480_v16  ;;  %v594_v15 = vunpack.c.l.s8.bf16 %v194_v5  ;;  %v50_v16 = vld [vmem:[%s9080_s1 + $0x18] sm:$0xff] }
  0x33   :  { %882 = vmatprep.subr.bf16.mxu1 %v736_v17  ;;  %v178_v17 = vld [vmem:[%s9080_s1 + $0x418] sm:$0xff] }
  0x34   :  { %v242_v5 = vld [vmem:[%s9080_s1 + $0x618] sm:$0xff] }
  0x35   :  { %840 = vmatpush2.bf16.msra.mxu0 %v479_v20  ;;  %v322_v20 = vunpack.c.h.s8.bf16 %v50_v16 }
  0x36   :  { %883 = vmatpush2.bf16.msra.mxu1 %v735_v21  ;;  %841 = vmatprep.subr.bf16.mxu0 %v464_v22  ;;  %v578_v21 = vunpack.c.h.s8.bf16 %v178_v17  ;;  %v49_v22 = vld [vmem:[%s9080_s1 + $0x10] sm:$0xff] }
  0x37   :  { %884 = vmatprep.subr.bf16.mxu1 %v720_v23  ;;  %v177_v23 = vld [vmem:[%s9080_s1 + $0x410] sm:$0xff]  ;;  %v321_v24 = vunpack.c.h.s8.bf16 %v49_v22  ;;  %v305_v30 = vunpack.c.l.s8.bf16 %v49_v22  ;;  %v99_v22 = vld [vmem:[%s9080_s1 + $0x1a0] sm:$0xff] }
  0x38   :  { %v577_v25 = vunpack.c.h.s8.bf16 %v177_v23  ;;  %v561_v31 = vunpack.c.l.s8.bf16 %v177_v23  ;;  %v227_v23 = vld [vmem:[%s9080_s1 + $0x5a0] sm:$0xff] }
  0x39   :  { %842 = vmatpush2.bf16.msra.mxu0 %v463_v26  ;;  %v306_v26 = vunpack.c.l.s8.bf16 %v50_v16  ;;  %v100_v16 = vld [vmem:[%s9080_s1 + $0x1a8] sm:$0xff] }
  0x3a   :  { %885 = vmatpush2.bf16.msra.mxu1 %v719_v27  ;;  %843 = vmatprep.subr.bf16.mxu0 %v448_v28  ;;  %v562_v27 = vunpack.c.l.s8.bf16 %v178_v17  ;;  %v162_v28 = vld [vmem:[%s9080_s1 + $0x398] sm:$0xff]  ;;  %v228_v17 = vld [vmem:[%s9080_s1 + $0x5a8] sm:$0xff] }
  0x3b   :  { %886 = vmatprep.subr.bf16.mxu1 %v704_v29  ;;  %v290_v29 = vld [vmem:[%s9080_s1 + $0x798] sm:$0xff]  ;;  %v530_v40 = vunpack.c.l.s8.bf16 %v162_v28 }
  0x3d   :  { %844 = vmatpush2.bf16.msra.mxu0 %v447_v32  ;;  %v546_v32 = vunpack.c.h.s8.bf16 %v162_v28  ;;  %v84_v28 = vld [vmem:[%s9080_s1 + $0x128] sm:$0xff] }
  0x3e   :  { %887 = vmatpush2.bf16.msra.mxu1 %v703_v33  ;;  %845 = vmatprep.subr.bf16.mxu0 %v432_v34  ;;  %v802_v33 = vunpack.c.h.s8.bf16 %v290_v29  ;;  %v161_v34 = vld [vmem:[%s9080_s1 + $0x390] sm:$0xff] }
  0x3f   :  { %888 = vmatprep.subr.bf16.mxu1 %v688_v35  ;;  %v289_v35 = vld [vmem:[%s9080_s1 + $0x790] sm:$0xff]  ;;  %v545_v36 = vunpack.c.h.s8.bf16 %v161_v34  ;;  %v529_v44 = vunpack.c.l.s8.bf16 %v161_v34  ;;  %v83_v34 = vld [vmem:[%s9080_s1 + $0x120] sm:$0xff] }
  0x40   :  { %v801_v37 = vunpack.c.h.s8.bf16 %v289_v35  ;;  %v785_v45 = vunpack.c.l.s8.bf16 %v289_v35  ;;  %v211_v35 = vld [vmem:[%s9080_s1 + $0x520] sm:$0xff] }
  0x41   :  { %846 = vmatpush2.bf16.msra.mxu0 %v431_v41  ;;  %v786_v41 = vunpack.c.l.s8.bf16 %v290_v29  ;;  %v212_v29 = vld [vmem:[%s9080_s1 + $0x528] sm:$0xff] }
  0x42   :  { %889 = vmatpush2.bf16.msra.mxu1 %v687_v42  ;;  %901 = vmatprep.subr.bf16.mxu0 %v418_v46  ;;  %v146_v42 = vld [vmem:[%s9080_s1 + $0x318] sm:$0xff] }
  0x43   :  { %944 = vmatprep.subr.bf16.mxu1 %v674_v47  ;;  %v514_v46 = vunpack.c.h.s8.bf16 %v146_v42  ;;  %v770_v47 = vunpack.c.h.s8.bf16 %v274_v43 }
  0x44   :  { %848 = vmatmul.mubr.bf16.vlgmr.msra.gmra.mxu0 %v5838_v50 }
  0x45   :  { %891 = vmatmul.mubr.bf16.vlgmr.msra.gmra.mxu1 %v5840_v51  ;;  %902 = vmatpush1.bf16.msra.mxu0 %v417_v52  ;;  %v513_v52 = vunpack.c.h.s8.bf16 %v145_v48 }
  0x46   :  { %945 = vmatpush1.bf16.msra.mxu1 %v673_v53  ;;  %903 = vmatprep.subr.bf16.mxu0 %v402_v54  ;;  %v769_v53 = vunpack.c.h.s8.bf16 %v273_v49  ;;  %v498_v54 = vunpack.c.l.s8.bf16 %v146_v42  ;;  %v68_v42 = vld [vmem:[%s9080_s1 + $0xa8] sm:$0xff] }
  0x47   :  { %946 = vmatprep.subr.bf16.mxu1 %v658_v55  ;;  %933 = vmatprep.mubr.bf16.mxu0 %v5748_v38  ;;  %v754_v55 = vunpack.c.l.s8.bf16 %v274_v43  ;;  %v196_v43 = vld [vmem:[%s9080_s1 + $0x4a8] sm:$0xff] }
  0x48   :  { %976 = vmatprep.mubr.bf16.mxu1 %v5750_v39 }
  0x49   :  { %904 = vmatpush1.bf16.msra.mxu0 %v401_v58  ;;  %v497_v58 = vunpack.c.l.s8.bf16 %v145_v48  ;;  %v67_v48 = vld [vmem:[%s9080_s1 + $0xa0] sm:$0xff] }
  0x4a   :  { %947 = vmatpush1.bf16.msra.mxu1 %v657_v59  ;;  %905 = vmatprep.subr.bf16.mxu0 %v386_v60  ;;  %v753_v59 = vunpack.c.l.s8.bf16 %v273_v49  ;;  %v482_v60 = vunpack.c.h.s8.bf16 %v130_v56  ;;  %v195_v49 = vld [vmem:[%s9080_s1 + $0x4a0] sm:$0xff] }
  0x4b   :  { %948 = vmatprep.subr.bf16.mxu1 %v642_v61  ;;  %v738_v61 = vunpack.c.h.s8.bf16 %v258_v57 }
  0x4d   :  { %906 = vmatpush1.bf16.msra.mxu0 %v385_v0  ;;  %v481_v0 = vunpack.c.h.s8.bf16 %v129_v62 }
  0x4e   :  { %949 = vmatpush1.bf16.msra.mxu1 %v641_v1  ;;  %907 = vmatprep.subr.bf16.mxu0 %v370_v2  ;;  %v737_v1 = vunpack.c.h.s8.bf16 %v257_v63  ;;  %v466_v2 = vunpack.c.l.s8.bf16 %v130_v56  ;;  %v52_v56 = vld [vmem:[%s9080_s1 + $0x28] sm:$0xff] }
  0x4f   :  { %950 = vmatprep.subr.bf16.mxu1 %v626_v3  ;;  %v722_v3 = vunpack.c.l.s8.bf16 %v258_v57  ;;  %v180_v57 = vld [vmem:[%s9080_s1 + $0x428] sm:$0xff] }
  0x51   :  { %908 = vmatpush1.bf16.msra.mxu0 %v369_v6  ;;  %v465_v6 = vunpack.c.l.s8.bf16 %v129_v62  ;;  %v51_v62 = vld [vmem:[%s9080_s1 + $0x20] sm:$0xff] }
  0x52   :  { %951 = vmatpush1.bf16.msra.mxu1 %v625_v7  ;;  %909 = vmatprep.subr.bf16.mxu0 %v354_v8  ;;  %v721_v7 = vunpack.c.l.s8.bf16 %v257_v63  ;;  %v450_v8 = vunpack.c.h.s8.bf16 %v114_v4  ;;  %v179_v63 = vld [vmem:[%s9080_s1 + $0x420] sm:$0xff] }
  0x53   :  { %952 = vmatprep.subr.bf16.mxu1 %v610_v9  ;;  %v706_v9 = vunpack.c.h.s8.bf16 %v242_v5 }
  0x55   :  { %910 = vmatpush1.bf16.msra.mxu0 %v353_v12  ;;  %v449_v12 = vunpack.c.h.s8.bf16 %v113_v10 }
  0x56   :  { %953 = vmatpush1.bf16.msra.mxu1 %v609_v13  ;;  %911 = vmatprep.subr.bf16.mxu0 %v338_v14  ;;  %v705_v13 = vunpack.c.h.s8.bf16 %v241_v11  ;;  %v434_v14 = vunpack.c.l.s8.bf16 %v114_v4  ;;  %v164_v4 = vld [vmem:[%s9080_s1 + $0x3a8] sm:$0xff] }
  0x57   :  { %954 = vmatprep.subr.bf16.mxu1 %v594_v15  ;;  %v690_v15 = vunpack.c.l.s8.bf16 %v242_v5  ;;  %v292_v5 = vld [vmem:[%s9080_s1 + $0x7a8] sm:$0xff] }
  0x59   :  { %912 = vmatpush1.bf16.msra.mxu0 %v337_v18  ;;  %v433_v18 = vunpack.c.l.s8.bf16 %v113_v10  ;;  %v163_v10 = vld [vmem:[%s9080_s1 + $0x3a0] sm:$0xff] }
  0x5a   :  { %955 = vmatpush1.bf16.msra.mxu1 %v593_v19  ;;  %913 = vmatprep.subr.bf16.mxu0 %v322_v20  ;;  %v689_v19 = vunpack.c.l.s8.bf16 %v241_v11  ;;  %v420_v20 = vunpack.c.h.s8.bf16 %v100_v16  ;;  %v291_v11 = vld [vmem:[%s9080_s1 + $0x7a0] sm:$0xff] }
  0x5b   :  { %956 = vmatprep.subr.bf16.mxu1 %v578_v21  ;;  %v676_v21 = vunpack.c.h.s8.bf16 %v228_v17 }
  0x5d   :  { %914 = vmatpush1.bf16.msra.mxu0 %v321_v24  ;;  %v419_v24 = vunpack.c.h.s8.bf16 %v99_v22 }
  0x5e   :  { %957 = vmatpush1.bf16.msra.mxu1 %v577_v25  ;;  %915 = vmatprep.subr.bf16.mxu0 %v306_v26  ;;  %v675_v25 = vunpack.c.h.s8.bf16 %v227_v23  ;;  %v404_v26 = vunpack.c.l.s8.bf16 %v100_v16  ;;  %v148_v16 = vld [vmem:[%s9080_s1 + $0x328] sm:$0xff] }
  0x5f   :  { %958 = vmatprep.subr.bf16.mxu1 %v562_v27  ;;  %v660_v27 = vunpack.c.l.s8.bf16 %v228_v17  ;;  %v276_v17 = vld [vmem:[%s9080_s1 + $0x728] sm:$0xff] }
  0x61   :  { %916 = vmatpush1.bf16.msra.mxu0 %v305_v30  ;;  %v403_v30 = vunpack.c.l.s8.bf16 %v99_v22  ;;  %v147_v22 = vld [vmem:[%s9080_s1 + $0x320] sm:$0xff] }
  0x62   :  { %959 = vmatpush1.bf16.msra.mxu1 %v561_v31  ;;  %917 = vmatprep.subr.bf16.mxu0 %v546_v32  ;;  %v659_v31 = vunpack.c.l.s8.bf16 %v227_v23  ;;  %v388_v32 = vunpack.c.h.s8.bf16 %v84_v28  ;;  %v275_v23 = vld [vmem:[%s9080_s1 + $0x720] sm:$0xff] }
  0x63   :  { %960 = vmatprep.subr.bf16.mxu1 %v802_v33  ;;  %v644_v33 = vunpack.c.h.s8.bf16 %v212_v29 }
  0x65   :  { %918 = vmatpush2.bf16.msra.mxu0 %v545_v36  ;;  %v387_v36 = vunpack.c.h.s8.bf16 %v83_v34 }
  0x66   :  { %961 = vmatpush2.bf16.msra.mxu1 %v801_v37  ;;  %919 = vmatprep.subr.bf16.mxu0 %v530_v40  ;;  %v643_v37 = vunpack.c.h.s8.bf16 %v211_v35  ;;  %v372_v40 = vunpack.c.l.s8.bf16 %v84_v28  ;;  %v132_v28 = vld [vmem:[%s9080_s1 + $0x2a8] sm:$0xff] }
  0x67   :  { %962 = vmatprep.subr.bf16.mxu1 %v786_v41  ;;  %v628_v41 = vunpack.c.l.s8.bf16 %v212_v29  ;;  %v260_v29 = vld [vmem:[%s9080_s1 + $0x6a8] sm:$0xff] }
  0x69   :  { %920 = vmatpush2.bf16.msra.mxu0 %v529_v44  ;;  %v371_v44 = vunpack.c.l.s8.bf16 %v83_v34  ;;  %v131_v34 = vld [vmem:[%s9080_s1 + $0x2a0] sm:$0xff] }
  0x6a   :  { %963 = vmatpush2.bf16.msra.mxu1 %v785_v45  ;;  %921 = vmatprep.subr.bf16.mxu0 %v514_v46  ;;  %v627_v45 = vunpack.c.l.s8.bf16 %v211_v35  ;;  %v356_v46 = vunpack.c.h.s8.bf16 %v68_v42  ;;  %v259_v35 = vld [vmem:[%s9080_s1 + $0x6a0] sm:$0xff] }
  0x6b   :  { %964 = vmatprep.subr.bf16.mxu1 %v770_v47  ;;  %v612_v47 = vunpack.c.h.s8.bf16 %v196_v43 }
  0x6d   :  { %922 = vmatpush2.bf16.msra.mxu0 %v513_v52  ;;  %v355_v52 = vunpack.c.h.s8.bf16 %v67_v48 }
  0x6e   :  { %965 = vmatpush2.bf16.msra.mxu1 %v769_v53  ;;  %923 = vmatprep.subr.bf16.mxu0 %v498_v54  ;;  %v611_v53 = vunpack.c.h.s8.bf16 %v195_v49  ;;  %v340_v54 = vunpack.c.l.s8.bf16 %v68_v42  ;;  %v116_v42 = vld [vmem:[%s9080_s1 + $0x228] sm:$0xff] }
  0x6f   :  { %966 = vmatprep.subr.bf16.mxu1 %v754_v55  ;;  %v596_v55 = vunpack.c.l.s8.bf16 %v196_v43  ;;  %v244_v43 = vld [vmem:[%s9080_s1 + $0x628] sm:$0xff] }
  0x71   :  { %924 = vmatpush2.bf16.msra.mxu0 %v497_v58  ;;  %v339_v58 = vunpack.c.l.s8.bf16 %v67_v48  ;;  %v115_v48 = vld [vmem:[%s9080_s1 + $0x220] sm:$0xff] }
  0x72   :  { %967 = vmatpush2.bf16.msra.mxu1 %v753_v59  ;;  %925 = vmatprep.subr.bf16.mxu0 %v482_v60  ;;  %v595_v59 = vunpack.c.l.s8.bf16 %v195_v49  ;;  %v324_v60 = vunpack.c.h.s8.bf16 %v52_v56  ;;  %v243_v49 = vld [vmem:[%s9080_s1 + $0x620] sm:$0xff] }
  0x73   :  { %968 = vmatprep.subr.bf16.mxu1 %v738_v61  ;;  %v580_v61 = vunpack.c.h.s8.bf16 %v180_v57 }
  0x75   :  { %926 = vmatpush2.bf16.msra.mxu0 %v481_v0  ;;  %v323_v0 = vunpack.c.h.s8.bf16 %v51_v62 }
  0x76   :  { %969 = vmatpush2.bf16.msra.mxu1 %v737_v1  ;;  %927 = vmatprep.subr.bf16.mxu0 %v466_v2  ;;  %v579_v1 = vunpack.c.h.s8.bf16 %v179_v63  ;;  %v308_v2 = vunpack.c.l.s8.bf16 %v52_v56  ;;  %v102_v56 = vld [vmem:[%s9080_s1 + $0x1b8] sm:$0xff] }
  0x77   :  { %970 = vmatprep.subr.bf16.mxu1 %v722_v3  ;;  %v564_v3 = vunpack.c.l.s8.bf16 %v180_v57  ;;  %v230_v57 = vld [vmem:[%s9080_s1 + $0x5b8] sm:$0xff] }
  0x79   :  { %928 = vmatpush2.bf16.msra.mxu0 %v465_v6  ;;  %v307_v6 = vunpack.c.l.s8.bf16 %v51_v62  ;;  %v101_v62 = vld [vmem:[%s9080_s1 + $0x1b0] sm:$0xff] }
  0x7a   :  { %971 = vmatpush2.bf16.msra.mxu1 %v721_v7  ;;  %929 = vmatprep.subr.bf16.mxu0 %v450_v8  ;;  %v563_v7 = vunpack.c.l.s8.bf16 %v179_v63  ;;  %v548_v8 = vunpack.c.h.s8.bf16 %v164_v4  ;;  %v229_v63 = vld [vmem:[%s9080_s1 + $0x5b0] sm:$0xff] }
  0x7b   :  { %972 = vmatprep.subr.bf16.mxu1 %v706_v9  ;;  %v804_v9 = vunpack.c.h.s8.bf16 %v292_v5 }
  0x7d   :  { %930 = vmatpush2.bf16.msra.mxu0 %v449_v12  ;;  %v547_v12 = vunpack.c.h.s8.bf16 %v163_v10 }
  0x7e   :  { %973 = vmatpush2.bf16.msra.mxu1 %v705_v13  ;;  %931 = vmatprep.subr.bf16.mxu0 %v434_v14  ;;  %v803_v13 = vunpack.c.h.s8.bf16 %v291_v11  ;;  %v532_v14 = vunpack.c.l.s8.bf16 %v164_v4  ;;  %v86_v4 = vld [vmem:[%s9080_s1 + $0x138] sm:$0xff] }
  0x7f   :  { %974 = vmatprep.subr.bf16.mxu1 %v690_v15  ;;  %v788_v15 = vunpack.c.l.s8.bf16 %v292_v5  ;;  %v214_v5 = vld [vmem:[%s9080_s1 + $0x538] sm:$0xff] }
  0x81   :  { %932 = vmatpush2.bf16.msra.mxu0 %v433_v18  ;;  %v531_v18 = vunpack.c.l.s8.bf16 %v163_v10  ;;  %v85_v10 = vld [vmem:[%s9080_s1 + $0x130] sm:$0xff] }
  0x82   :  { %975 = vmatpush2.bf16.msra.mxu1 %v689_v19  ;;  %987 = vmatprep.subr.bf16.mxu0 %v420_v20  ;;  %v787_v19 = vunpack.c.l.s8.bf16 %v291_v11  ;;  %v516_v20 = vunpack.c.h.s8.bf16 %v148_v16  ;;  %v213_v11 = vld [vmem:[%s9080_s1 + $0x530] sm:$0xff] }
  0x83   :  { %1030 = vmatprep.subr.bf16.mxu1 %v676_v21  ;;  %v772_v21 = vunpack.c.h.s8.bf16 %v276_v17 }
  0x84   :  { %934 = vmatmul.mubr.bf16.vlgmr.msra.gmra.mxu0 %v5838_v50 }
  0x85   :  { %977 = vmatmul.mubr.bf16.vlgmr.msra.gmra.mxu1 %v5840_v51  ;;  %988 = vmatpush1.bf16.msra.mxu0 %v419_v24  ;;  %v515_v24 = vunpack.c.h.s8.bf16 %v147_v22 }
  0x86   :  { %1031 = vmatpush1.bf16.msra.mxu1 %v675_v25  ;;  %989 = vmatprep.subr.bf16.mxu0 %v404_v26  ;;  %v771_v25 = vunpack.c.h.s8.bf16 %v275_v23  ;;  %v500_v26 = vunpack.c.l.s8.bf16 %v148_v16  ;;  %v70_v16 = vld [vmem:[%s9080_s1 + $0xb8] sm:$0xff] }
  0x87   :  { %1032 = vmatprep.subr.bf16.mxu1 %v660_v27  ;;  %1019 = vmatprep.mubr.bf16.mxu0 %v5748_v38  ;;  %v756_v27 = vunpack.c.l.s8.bf16 %v276_v17  ;;  %v198_v17 = vld [vmem:[%s9080_s1 + $0x4b8] sm:$0xff] }
  0x88   :  { %1062 = vmatprep.mubr.bf16.mxu1 %v5750_v39 }
  0x89   :  { %990 = vmatpush1.bf16.msra.mxu0 %v403_v30  ;;  %v499_v30 = vunpack.c.l.s8.bf16 %v147_v22  ;;  %v69_v22 = vld [vmem:[%s9080_s1 + $0xb0] sm:$0xff] }
  0x8a   :  { %1033 = vmatpush1.bf16.msra.mxu1 %v659_v31  ;;  %991 = vmatprep.subr.bf16.mxu0 %v388_v32  ;;  %v755_v31 = vunpack.c.l.s8.bf16 %v275_v23  ;;  %v484_v32 = vunpack.c.h.s8.bf16 %v132_v28  ;;  %v197_v23 = vld [vmem:[%s9080_s1 + $0x4b0] sm:$0xff] }
  0x8b   :  { %1034 = vmatprep.subr.bf16.mxu1 %v644_v33  ;;  %v740_v33 = vunpack.c.h.s8.bf16 %v260_v29 }
  0x8d   :  { %992 = vmatpush1.bf16.msra.mxu0 %v387_v36  ;;  %v483_v36 = vunpack.c.h.s8.bf16 %v131_v34 }
  0x8e   :  { %1035 = vmatpush1.bf16.msra.mxu1 %v643_v37  ;;  %993 = vmatprep.subr.bf16.mxu0 %v372_v40  ;;  %v739_v37 = vunpack.c.h.s8.bf16 %v259_v35  ;;  %v468_v40 = vunpack.c.l.s8.bf16 %v132_v28  ;;  %v54_v28 = vld [vmem:[%s9080_s1 + $0x38] sm:$0xff] }
  0x8f   :  { %1036 = vmatprep.subr.bf16.mxu1 %v628_v41  ;;  %v724_v41 = vunpack.c.l.s8.bf16 %v260_v29  ;;  %v182_v29 = vld [vmem:[%s9080_s1 + $0x438] sm:$0xff] }
  0x91   :  { %994 = vmatpush1.bf16.msra.mxu0 %v371_v44  ;;  %v467_v44 = vunpack.c.l.s8.bf16 %v131_v34  ;;  %v53_v34 = vld [vmem:[%s9080_s1 + $0x30] sm:$0xff] }
  0x92   :  { %1037 = vmatpush1.bf16.msra.mxu1 %v627_v45  ;;  %995 = vmatprep.subr.bf16.mxu0 %v356_v46  ;;  %v723_v45 = vunpack.c.l.s8.bf16 %v259_v35  ;;  %v452_v46 = vunpack.c.h.s8.bf16 %v116_v42  ;;  %v181_v35 = vld [vmem:[%s9080_s1 + $0x430] sm:$0xff] }
  0x93   :  { %1038 = vmatprep.subr.bf16.mxu1 %v612_v47  ;;  %v708_v47 = vunpack.c.h.s8.bf16 %v244_v43 }
  0x95   :  { %996 = vmatpush1.bf16.msra.mxu0 %v355_v52  ;;  %v451_v52 = vunpack.c.h.s8.bf16 %v115_v48 }
  0x96   :  { %1039 = vmatpush1.bf16.msra.mxu1 %v611_v53  ;;  %997 = vmatprep.subr.bf16.mxu0 %v340_v54  ;;  %v707_v53 = vunpack.c.h.s8.bf16 %v243_v49  ;;  %v436_v54 = vunpack.c.l.s8.bf16 %v116_v42  ;;  %v166_v42 = vld [vmem:[%s9080_s1 + $0x3b8] sm:$0xff] }
  0x97   :  { %1040 = vmatprep.subr.bf16.mxu1 %v596_v55  ;;  %v692_v55 = vunpack.c.l.s8.bf16 %v244_v43  ;;  %v294_v43 = vld [vmem:[%s9080_s1 + $0x7b8] sm:$0xff] }
  0x99   :  { %998 = vmatpush1.bf16.msra.mxu0 %v339_v58  ;;  %v435_v58 = vunpack.c.l.s8.bf16 %v115_v48  ;;  %v165_v48 = vld [vmem:[%s9080_s1 + $0x3b0] sm:$0xff] }
  0x9a   :  { %1041 = vmatpush1.bf16.msra.mxu1 %v595_v59  ;;  %999 = vmatprep.subr.bf16.mxu0 %v324_v60  ;;  %v691_v59 = vunpack.c.l.s8.bf16 %v243_v49  ;;  %v422_v60 = vunpack.c.h.s8.bf16 %v102_v56  ;;  %v293_v49 = vld [vmem:[%s9080_s1 + $0x7b0] sm:$0xff] }
  0x9b   :  { %1042 = vmatprep.subr.bf16.mxu1 %v580_v61  ;;  %v678_v61 = vunpack.c.h.s8.bf16 %v230_v57 }
  0x9d   :  { %1000 = vmatpush1.bf16.msra.mxu0 %v323_v0  ;;  %v421_v0 = vunpack.c.h.s8.bf16 %v101_v62 }
  0x9e   :  { %1043 = vmatpush1.bf16.msra.mxu1 %v579_v1  ;;  %1001 = vmatprep.subr.bf16.mxu0 %v308_v2  ;;  %v677_v1 = vunpack.c.h.s8.bf16 %v229_v63  ;;  %v406_v2 = vunpack.c.l.s8.bf16 %v102_v56  ;;  %v150_v56 = vld [vmem:[%s9080_s1 + $0x338] sm:$0xff] }
  0x9f   :  { %1044 = vmatprep.subr.bf16.mxu1 %v564_v3  ;;  %v662_v3 = vunpack.c.l.s8.bf16 %v230_v57  ;;  %v278_v57 = vld [vmem:[%s9080_s1 + $0x738] sm:$0xff] }
  0xa1   :  { %1002 = vmatpush1.bf16.msra.mxu0 %v307_v6  ;;  %v405_v6 = vunpack.c.l.s8.bf16 %v101_v62  ;;  %v149_v62 = vld [vmem:[%s9080_s1 + $0x330] sm:$0xff] }
  0xa2   :  { %1045 = vmatpush1.bf16.msra.mxu1 %v563_v7  ;;  %1003 = vmatprep.subr.bf16.mxu0 %v548_v8  ;;  %v661_v7 = vunpack.c.l.s8.bf16 %v229_v63  ;;  %v390_v8 = vunpack.c.h.s8.bf16 %v86_v4  ;;  %v277_v63 = vld [vmem:[%s9080_s1 + $0x730] sm:$0xff] }
  0xa3   :  { %1046 = vmatprep.subr.bf16.mxu1 %v804_v9  ;;  %v646_v9 = vunpack.c.h.s8.bf16 %v214_v5 }
  0xa5   :  { %1004 = vmatpush2.bf16.msra.mxu0 %v547_v12  ;;  %v389_v12 = vunpack.c.h.s8.bf16 %v85_v10 }
  0xa6   :  { %1047 = vmatpush2.bf16.msra.mxu1 %v803_v13  ;;  %1005 = vmatprep.subr.bf16.mxu0 %v532_v14  ;;  %v645_v13 = vunpack.c.h.s8.bf16 %v213_v11  ;;  %v374_v14 = vunpack.c.l.s8.bf16 %v86_v4  ;;  %v134_v4 = vld [vmem:[%s9080_s1 + $0x2b8] sm:$0xff] }
  0xa7   :  { %1048 = vmatprep.subr.bf16.mxu1 %v788_v15  ;;  %v630_v15 = vunpack.c.l.s8.bf16 %v214_v5  ;;  %v262_v5 = vld [vmem:[%s9080_s1 + $0x6b8] sm:$0xff] }
  0xa9   :  { %1006 = vmatpush2.bf16.msra.mxu0 %v531_v18  ;;  %v373_v18 = vunpack.c.l.s8.bf16 %v85_v10  ;;  %v133_v10 = vld [vmem:[%s9080_s1 + $0x2b0] sm:$0xff] }
  0xaa   :  { %1049 = vmatpush2.bf16.msra.mxu1 %v787_v19  ;;  %1007 = vmatprep.subr.bf16.mxu0 %v516_v20  ;;  %v629_v19 = vunpack.c.l.s8.bf16 %v213_v11  ;;  %v358_v20 = vunpack.c.h.s8.bf16 %v70_v16  ;;  %v261_v11 = vld [vmem:[%s9080_s1 + $0x6b0] sm:$0xff] }
  0xab   :  { %1050 = vmatprep.subr.bf16.mxu1 %v772_v21  ;;  %v614_v21 = vunpack.c.h.s8.bf16 %v198_v17 }
  0xad   :  { %1008 = vmatpush2.bf16.msra.mxu0 %v515_v24  ;;  %v357_v24 = vunpack.c.h.s8.bf16 %v69_v22 }
  0xae   :  { %1051 = vmatpush2.bf16.msra.mxu1 %v771_v25  ;;  %1009 = vmatprep.subr.bf16.mxu0 %v500_v26  ;;  %v613_v25 = vunpack.c.h.s8.bf16 %v197_v23  ;;  %v342_v26 = vunpack.c.l.s8.bf16 %v70_v16  ;;  %v118_v16 = vld [vmem:[%s9080_s1 + $0x238] sm:$0xff] }
  0xaf   :  { %1052 = vmatprep.subr.bf16.mxu1 %v756_v27  ;;  %v598_v27 = vunpack.c.l.s8.bf16 %v198_v17  ;;  %v246_v17 = vld [vmem:[%s9080_s1 + $0x638] sm:$0xff] }
  0xb1   :  { %1010 = vmatpush2.bf16.msra.mxu0 %v499_v30  ;;  %v341_v30 = vunpack.c.l.s8.bf16 %v69_v22  ;;  %v117_v22 = vld [vmem:[%s9080_s1 + $0x230] sm:$0xff] }
  0xb2   :  { %1053 = vmatpush2.bf16.msra.mxu1 %v755_v31  ;;  %1011 = vmatprep.subr.bf16.mxu0 %v484_v32  ;;  %v597_v31 = vunpack.c.l.s8.bf16 %v197_v23  ;;  %v326_v32 = vunpack.c.h.s8.bf16 %v54_v28  ;;  %v245_v23 = vld [vmem:[%s9080_s1 + $0x630] sm:$0xff] }
  0xb3   :  { %1054 = vmatprep.subr.bf16.mxu1 %v740_v33  ;;  %v582_v33 = vunpack.c.h.s8.bf16 %v182_v29 }
  0xb5   :  { %1012 = vmatpush2.bf16.msra.mxu0 %v483_v36  ;;  %v325_v36 = vunpack.c.h.s8.bf16 %v53_v34 }
  0xb6   :  { %1055 = vmatpush2.bf16.msra.mxu1 %v739_v37  ;;  %1013 = vmatprep.subr.bf16.mxu0 %v468_v40  ;;  %v581_v37 = vunpack.c.h.s8.bf16 %v181_v35  ;;  %v310_v40 = vunpack.c.l.s8.bf16 %v54_v28  ;;  %v694_v28 = vunpack.c.l.s8.bf16 %v246_v17 }
  0xb7   :  { %1056 = vmatprep.subr.bf16.mxu1 %v724_v41  ;;  %v566_v41 = vunpack.c.l.s8.bf16 %v182_v29 }
  0xb9   :  { %1014 = vmatpush2.bf16.msra.mxu0 %v467_v44  ;;  %v309_v44 = vunpack.c.l.s8.bf16 %v53_v34 }
  0xba   :  { %1057 = vmatpush2.bf16.msra.mxu1 %v723_v45  ;;  %1015 = vmatprep.subr.bf16.mxu0 %v452_v46  ;;  %v565_v45 = vunpack.c.l.s8.bf16 %v181_v35  ;;  %v550_v46 = vunpack.c.h.s8.bf16 %v166_v42 }
  0xbb   :  { %1058 = vmatprep.subr.bf16.mxu1 %v708_v47  ;;  %v806_v47 = vunpack.c.h.s8.bf16 %v294_v43 }
  0xbd   :  { %1016 = vmatpush2.bf16.msra.mxu0 %v451_v52  ;;  %v549_v52 = vunpack.c.h.s8.bf16 %v165_v48 }
  0xbe   :  { %1059 = vmatpush2.bf16.msra.mxu1 %v707_v53  ;;  %1017 = vmatprep.subr.bf16.mxu0 %v436_v54  ;;  %v805_v53 = vunpack.c.h.s8.bf16 %v293_v49  ;;  %v534_v54 = vunpack.c.l.s8.bf16 %v166_v42 }
  0xbf   :  { %1060 = vmatprep.subr.bf16.mxu1 %v692_v55  ;;  %v790_v55 = vunpack.c.l.s8.bf16 %v294_v43 }
  0xc1   :  { %1018 = vmatpush2.bf16.msra.mxu0 %v435_v58  ;;  %v533_v58 = vunpack.c.l.s8.bf16 %v165_v48  ;;  %v216_v48 = vld [vmem:[%s9080_s1 + $0x548] sm:$0xff] }
  0xc2   :  { %1061 = vmatpush2.bf16.msra.mxu1 %v691_v59  ;;  %1073 = vmatprep.subr.bf16.mxu0 %v422_v60  ;;  %v789_v59 = vunpack.c.l.s8.bf16 %v293_v49  ;;  %v518_v60 = vunpack.c.h.s8.bf16 %v150_v56 }
  0xc3   :  { %1116 = vmatprep.subr.bf16.mxu1 %v678_v61  ;;  %v774_v61 = vunpack.c.h.s8.bf16 %v278_v57 }
  0xc4   :  { %1020 = vmatmul.mubr.bf16.vlgmr.msra.gmra.mxu0 %v5838_v50 }
  0xc5   :  { %1063 = vmatmul.mubr.bf16.vlgmr.msra.gmra.mxu1 %v5840_v51  ;;  %1074 = vmatpush1.bf16.msra.mxu0 %v421_v0  ;;  %v517_v0 = vunpack.c.h.s8.bf16 %v149_v62 }
  0xc6   :  { %1117 = vmatpush1.bf16.msra.mxu1 %v677_v1  ;;  %1075 = vmatprep.subr.bf16.mxu0 %v406_v2  ;;  %v773_v1 = vunpack.c.h.s8.bf16 %v277_v63  ;;  %v502_v2 = vunpack.c.l.s8.bf16 %v150_v56 }
  0xc7   :  { %1118 = vmatprep.subr.bf16.mxu1 %v662_v3  ;;  %1105 = vmatprep.mubr.bf16.mxu0 %v5748_v38  ;;  %v758_v3 = vunpack.c.l.s8.bf16 %v278_v57 }
  0xc8   :  { %1148 = vmatprep.mubr.bf16.mxu1 %v5750_v39 }
  0xc9   :  { %1076 = vmatpush1.bf16.msra.mxu0 %v405_v6  ;;  %v501_v6 = vunpack.c.l.s8.bf16 %v149_v62  ;;  %v215_v62 = vld [vmem:[%s9080_s1 + $0x540] sm:$0xff] }
  0xca   :  { %1119 = vmatpush1.bf16.msra.mxu1 %v661_v7  ;;  %1077 = vmatprep.subr.bf16.mxu0 %v390_v8  ;;  %v757_v7 = vunpack.c.l.s8.bf16 %v277_v63  ;;  %v486_v8 = vunpack.c.h.s8.bf16 %v134_v4 }
  0xcb   :  { %1120 = vmatprep.subr.bf16.mxu1 %v646_v9  ;;  %v742_v9 = vunpack.c.h.s8.bf16 %v262_v5 }
  0xcd   :  { %1078 = vmatpush1.bf16.msra.mxu0 %v389_v12  ;;  %v485_v12 = vunpack.c.h.s8.bf16 %v133_v10 }
  0xce   :  { %1121 = vmatpush1.bf16.msra.mxu1 %v645_v13  ;;  %1079 = vmatprep.subr.bf16.mxu0 %v374_v14  ;;  %v741_v13 = vunpack.c.h.s8.bf16 %v261_v11  ;;  %v470_v14 = vunpack.c.l.s8.bf16 %v134_v4 }
  0xcf   :  { %1122 = vmatprep.subr.bf16.mxu1 %v630_v15  ;;  %v726_v15 = vunpack.c.l.s8.bf16 %v262_v5  ;;  %v647_v5 = vunpack.c.h.s8.bf16 %v215_v62 }
  0xd1   :  { %1080 = vmatpush1.bf16.msra.mxu0 %v373_v18  ;;  %v469_v18 = vunpack.c.l.s8.bf16 %v133_v10  ;;  %v72_v10 = vld [vmem:[%s9080_s1 + $0xc8] sm:$0xff] }
  0xd2   :  { %1123 = vmatpush1.bf16.msra.mxu1 %v629_v19  ;;  %1081 = vmatprep.subr.bf16.mxu0 %v358_v20  ;;  %v725_v19 = vunpack.c.l.s8.bf16 %v261_v11  ;;  %v454_v20 = vunpack.c.h.s8.bf16 %v118_v16  ;;  %v200_v11 = vld [vmem:[%s9080_s1 + $0x4c8] sm:$0xff] }
  0xd3   :  { %1124 = vmatprep.subr.bf16.mxu1 %v614_v21  ;;  %v710_v21 = vunpack.c.h.s8.bf16 %v246_v17  ;;  %v71_v17 = vld [vmem:[%s9080_s1 + $0xc0] sm:$0xff] }
  0xd5   :  { %1082 = vmatpush1.bf16.msra.mxu0 %v357_v24  ;;  %v1507_v24 = vlaneseq }
  0xd6   :  { %1125 = vmatpush1.bf16.msra.mxu1 %v613_v25  ;;  %1083 = vmatprep.subr.bf16.mxu0 %v342_v26  ;;  %v453_v25 = vunpack.c.h.s8.bf16 %v117_v22  ;;  %v709_v26 = vunpack.c.h.s8.bf16 %v245_v23 }
  0xd7   :  { %1126 = vmatprep.subr.bf16.mxu1 %v598_v27  ;;  %v438_v27 = vunpack.c.l.s8.bf16 %v118_v16  ;;  %v6130_v29 = vshrl.u32 %v1507_v24, 7  ;;  %v616_v16 = vunpack.c.h.s8.bf16 %v200_v11  ;;  %v344_v24 = vunpack.c.l.s8.bf16 %v72_v10 }
  0xd9   :  { %1084 = vmatpush1.bf16.msra.mxu0 %v341_v30  ;;  %v104_v30 = vld [vmem:[%s9080_s1 + $0x1c8] sm:$0xff] }
  0xda   :  { %1127 = vmatpush1.bf16.msra.mxu1 %v597_v31  ;;  %1085 = vmatprep.subr.bf16.mxu0 %v326_v32  ;;  %v232_v31 = vld [vmem:[%s9080_s1 + $0x5c8] sm:$0xff]  ;;  %v437_v32 = vunpack.c.l.s8.bf16 %v117_v22  ;;  %v424_v34 = vunpack.c.h.s8.bf16 %v104_v30  ;;  %v359_v22 = vunpack.c.h.s8.bf16 %v71_v17 }
  0xdb   :  { %1128 = vmatprep.subr.bf16.mxu1 %v582_v33  ;;  %v693_v33 = vunpack.c.l.s8.bf16 %v245_v23  ;;  %v680_v35 = vunpack.c.h.s8.bf16 %v232_v31 }
  0xdd   :  { %1086 = vmatpush1.bf16.msra.mxu0 %v325_v36  ;;  %v103_v36 = vld [vmem:[%s9080_s1 + $0x1c0] sm:$0xff] }
  0xde   :  { %1129 = vmatpush1.bf16.msra.mxu1 %v581_v37  ;;  %1087 = vmatprep.subr.bf16.mxu0 %v310_v40  ;;  %v231_v37 = vld [vmem:[%s9080_s1 + $0x5c0] sm:$0xff]  ;;  %v6145_v40 = vsub.s32 0, %v6130_v29  ;;  %v423_v42 = vunpack.c.h.s8.bf16 %v103_v36 }
  0xdf   :  { %1130 = vmatprep.subr.bf16.mxu1 %v566_v41  ;;  %v6150_v41 = vld [vmem:[%s9082_s2] sm:$0xff]  ;;  %v679_v43 = vunpack.c.h.s8.bf16 %v231_v37  ;;  %v663_v56 = vunpack.c.l.s8.bf16 %v231_v37 }
  0xe0   :  { %9107 = vst [vmem:[#allocation2_spill] sm:$0xff] %v6145_v40 }
  0xe1   :  { %1088 = vmatpush1.bf16.msra.mxu0 %v309_v44  ;;  %v408_v44 = vunpack.c.l.s8.bf16 %v104_v30 }
  0xe2   :  { %1131 = vmatpush1.bf16.msra.mxu1 %v565_v45  ;;  %1089 = vmatprep.subr.bf16.mxu0 %v550_v46  ;;  %v664_v45 = vunpack.c.l.s8.bf16 %v232_v31  ;;  %v1510_v46 = vrot.slane %v6150_v41, %v6145_v40 }
  0xe3   :  { %1132 = vmatprep.subr.bf16.mxu1 %v806_v47  ;;  %v88_v47 = vld [vmem:[%s9080_s1 + $0x148] sm:$0xff] }
  0xe5   :  { %1090 = vmatpush2.bf16.msra.mxu0 %v549_v52 }
  0xe6   :  { %1133 = vmatpush2.bf16.msra.mxu1 %v805_v53  ;;  %1091 = vmatprep.subr.bf16.mxu0 %v534_v54  ;;  %v6163_v53 = vld [vmem:[%s9083_s3] sm:$0xff] }
  0xe7   :  { %1134 = vmatprep.subr.bf16.mxu1 %v790_v55  ;;  %v407_v55 = vunpack.c.l.s8.bf16 %v103_v36 }
  0xe9   :  { %1092 = vmatpush2.bf16.msra.mxu0 %v533_v58 }
  0xea   :  { %1135 = vmatpush2.bf16.msra.mxu1 %v789_v59  ;;  %1093 = vmatprep.subr.bf16.mxu0 %v518_v60  ;;  %v392_v59 = vunpack.c.h.s8.bf16 %v88_v47  ;;  %v648_v60 = vunpack.c.h.s8.bf16 %v216_v48 }
  0xeb   :  { %1136 = vmatprep.subr.bf16.mxu1 %v774_v61  ;;  %v87_v61 = vld [vmem:[%s9080_s1 + $0x140] sm:$0xff] }
  0xec   :  { %v391_v4 = vunpack.c.h.s8.bf16 %v87_v61 }
  0xed   :  { %1094 = vmatpush2.bf16.msra.mxu0 %v517_v0  ;;  %v1626_v0 = vrot.slane %v6163_v53, %v6145_v40 }
  0xee   :  { %1137 = vmatpush2.bf16.msra.mxu1 %v773_v1  ;;  %1095 = vmatprep.subr.bf16.mxu0 %v502_v2 }
  0xef   :  { %1138 = vmatprep.subr.bf16.mxu1 %v758_v3 }
  0xf1   :  { %1096 = vmatpush2.bf16.msra.mxu0 %v501_v6  ;;  %v376_v6 = vunpack.c.l.s8.bf16 %v88_v47 }
  0xf2   :  { %1139 = vmatpush2.bf16.msra.mxu1 %v757_v7  ;;  %1097 = vmatprep.subr.bf16.mxu0 %v486_v8  ;;  %v632_v7 = vunpack.c.l.s8.bf16 %v216_v48 }
  0xf3   :  { %1140 = vmatprep.subr.bf16.mxu1 %v742_v9 }
  0xf5   :  { %1098 = vmatpush2.bf16.msra.mxu0 %v485_v12 }
  0xf6   :  { %1141 = vmatpush2.bf16.msra.mxu1 %v741_v13  ;;  %1099 = vmatprep.subr.bf16.mxu0 %v470_v14  ;;  %v375_v13 = vunpack.c.l.s8.bf16 %v87_v61  ;;  %v631_v14 = vunpack.c.l.s8.bf16 %v215_v62  ;;  %v280_v61 = vld [vmem:[%s9080_s1 + $0x748] sm:$0xff] }
  0xf7   :  { %1142 = vmatprep.subr.bf16.mxu1 %v726_v15  ;;  %v360_v15 = vunpack.c.h.s8.bf16 %v72_v10 }
  0xf9   :  { %1100 = vmatpush2.bf16.msra.mxu0 %v469_v18  ;;  %v199_v18 = vld [vmem:[%s9080_s1 + $0x4c0] sm:$0xff] }
  0xfa   :  { %1143 = vmatpush2.bf16.msra.mxu1 %v725_v19  ;;  %1101 = vmatprep.subr.bf16.mxu0 %v454_v20  ;;  %v615_v23 = vunpack.c.h.s8.bf16 %v199_v18  ;;  %v599_v30 = vunpack.c.l.s8.bf16 %v199_v18 }
  0xfb   :  { %1144 = vmatprep.subr.bf16.mxu1 %v710_v21 }
  0xfd   :  { %1102 = vmatpush2.bf16.msra.mxu0 %v453_v25  ;;  %v600_v25 = vunpack.c.l.s8.bf16 %v200_v11 }
  0xfe   :  { %1145 = vmatpush2.bf16.msra.mxu1 %v709_v26  ;;  %1103 = vmatprep.subr.bf16.mxu0 %v438_v27  ;;  %v56_v26 = vld [vmem:[%s9080_s1 + $0x48] sm:$0xff] }
  0xff   :  { %1146 = vmatprep.subr.bf16.mxu1 %v694_v28  ;;  %v184_v27 = vld [vmem:[%s9080_s1 + $0x448] sm:$0xff]  ;;  %v343_v28 = vunpack.c.l.s8.bf16 %v71_v17  ;;  %v328_v31 = vunpack.c.h.s8.bf16 %v56_v26  ;;  %v312_v37 = vunpack.c.l.s8.bf16 %v56_v26 }
 0x101   :  { %1104 = vmatpush2.bf16.msra.mxu0 %v437_v32  ;;  %v584_v32 = vunpack.c.h.s8.bf16 %v184_v27 }
 0x102   :  { %1147 = vmatpush2.bf16.msra.mxu1 %v693_v33  ;;  %1159 = vmatprep.subr.bf16.mxu0 %v424_v34  ;;  %v55_v33 = vld [vmem:[%s9080_s1 + $0x40] sm:$0xff] }
 0x103   :  { %1202 = vmatprep.subr.bf16.mxu1 %v680_v35  ;;  %v183_v34 = vld [vmem:[%s9080_s1 + $0x440] sm:$0xff]  ;;  %v327_v35 = vunpack.c.h.s8.bf16 %v55_v33 }
 0x104   :  { %v849_v49 = vpop.f32.mrf.mxu0  ;;  %1106 = vmatmul.mubr.bf16.vlgmr.msra.gmra.mxu0 %v5838_v50  ;;  %v583_v36 = vunpack.c.h.s8.bf16 %v183_v34 }
 0x105   :  { %v892_v52 = vpop.f32.mrf.mxu1  ;;  %1149 = vmatmul.mubr.bf16.vlgmr.msra.gmra.mxu1 %v5840_v51  ;;  %1160 = vmatpush1.bf16.msra.mxu0 %v423_v42  ;;  %v568_v42 = vunpack.c.l.s8.bf16 %v184_v27  ;;  %v119_v27 = vld [vmem:[%s9080_s1 + $0x240] sm:$0xff] }
 0x106   :  { %v893_v54 = vadd.f32 %v892_v52, %v849_v49  ;;  %1203 = vmatpush1.bf16.msra.mxu1 %v679_v43  ;;  %v6167_v57 = vpop.f32.mrf.mxu0  ;;  %1161 = vmatprep.subr.bf16.mxu0 %v408_v44  ;;  %v168_v43 = vld [vmem:[%s9080_s1 + $0x3c8] sm:$0xff]  ;;  %v167_v49 = vld [vmem:[%s9080_s1 + $0x3c0] sm:$0xff] }
 0x107   :  { %v6169_v58 = vpop.f32.mrf.mxu1  ;;  %1204 = vmatprep.subr.bf16.mxu1 %v664_v45  ;;  %1191 = vmatprep.mubr.bf16.mxu0 %v5748_v38  ;;  %v296_v44 = vld [vmem:[%s9080_s1 + $0x7c8] sm:$0xff]  ;;  %v311_v45 = vunpack.c.l.s8.bf16 %v55_v33  ;;  %v552_v47 = vunpack.c.h.s8.bf16 %v168_v43  ;;  %v295_v52 = vld [vmem:[%s9080_s1 + $0x7c0] sm:$0xff]  ;;  %v535_v62 = vunpack.c.l.s8.bf16 %v167_v49 }
 0x108   :  { %v1587_v63 = vmul.f32 %v1510_v46, %v893_v54  ;;  %1234 = vmatprep.mubr.bf16.mxu1 %v5750_v39  ;;  %v853_v1 = vpop.f32.mrf.mxu0  ;;  %v808_v48 = vunpack.c.h.s8.bf16 %v296_v44  ;;  %v551_v54 = vunpack.c.h.s8.bf16 %v167_v49 }
 0x109   :  { %v896_v2 = vpop.f32.mrf.mxu1  ;;  %1162 = vmatpush1.bf16.msra.mxu0 %v407_v55  ;;  %v807_v55 = vunpack.c.h.s8.bf16 %v295_v52 }
 0x10a   :  { %v897_v3 = vadd.f32 %v896_v2, %v853_v1  ;;  %1205 = vmatpush1.bf16.msra.mxu1 %v663_v56  ;;  %1163 = vmatprep.subr.bf16.mxu0 %v392_v59  ;;  %v1703_v8 = vadd.f32 %v1626_v0, %v1587_v63  ;;  %v536_v56 = vunpack.c.l.s8.bf16 %v168_v43  ;;  %v792_v59 = vunpack.c.l.s8.bf16 %v296_v44  ;;  %v151_v2 = vld [vmem:[%s9080_s1 + $0x340] sm:$0xff]  ;;  %v105_v44 = vld [vmem:[%s9080_s1 + $0x1d0] sm:$0xff]  ;;  %v6270_v49 = vpop.f32.mrf.mxu0 }
 0x10b   :  { %1206 = vmatprep.subr.bf16.mxu1 %v648_v60  ;;  %v152_v60 = vld [vmem:[%s9080_s1 + $0x348] sm:$0xff]  ;;  %v791_v63 = vunpack.c.l.s8.bf16 %v295_v52  ;;  %v776_v1 = vunpack.c.h.s8.bf16 %v280_v61  ;;  %v503_v10 = vunpack.c.l.s8.bf16 %v151_v2  ;;  %v6272_v52 = vpop.f32.mrf.mxu1 }
 0x10c   :  { %v1603_v9 = vmul.f32 %v1510_v46, %v897_v3  ;;  %v1735_v19 = vmax.f32 %v1703_v8, 0.0  ;;  %v567_v46 = vunpack.c.l.s8.bf16 %v183_v34  ;;  %v279_v3 = vld [vmem:[%s9080_s1 + $0x740] sm:$0xff]  ;;  %v136_v8 = vld [vmem:[%s9080_s1 + $0x2c8] sm:$0xff]  ;;  %v106_v34 = vld [vmem:[%s9080_s1 + $0x1d8] sm:$0xff] }
 0x10d   :  { %1164 = vmatpush1.bf16.msra.mxu0 %v391_v4  ;;  %v519_v4 = vunpack.c.h.s8.bf16 %v151_v2  ;;  %v759_v11 = vunpack.c.l.s8.bf16 %v279_v3  ;;  %v472_v18 = vunpack.c.l.s8.bf16 %v136_v8 }
 0x10e   :  { %v1719_v12 = vadd.f32 %v1626_v0, %v1603_v9  ;;  %1207 = vmatpush1.bf16.msra.mxu1 %v647_v5  ;;  %1165 = vmatprep.subr.bf16.mxu0 %v376_v6  ;;  %v520_v0 = vunpack.c.h.s8.bf16 %v152_v60  ;;  %v775_v5 = vunpack.c.h.s8.bf16 %v279_v3  ;;  %v504_v6 = vunpack.c.l.s8.bf16 %v152_v60  ;;  %v264_v9 = vld [vmem:[%s9080_s1 + $0x6c8] sm:$0xff]  ;;  %v218_v60 = vld [vmem:[%s9080_s1 + $0x558] sm:$0xff] }
 0x10f   :  { %1208 = vmatprep.subr.bf16.mxu1 %v632_v7  ;;  %v760_v7 = vunpack.c.l.s8.bf16 %v280_v61 }
 0x110   :  { %v1751_v20 = vmax.f32 %v1719_v12, 0.0  ;;  %v488_v12 = vunpack.c.h.s8.bf16 %v136_v8 }
 0x111   :  { %1166 = vmatpush1.bf16.msra.mxu0 %v375_v13  ;;  %v744_v13 = vunpack.c.h.s8.bf16 %v264_v9 }
 0x112   :  { %v6193_v21 = vpack.c.bf16 %v1751_v20, %v1735_v19  ;;  %1209 = vmatpush1.bf16.msra.mxu1 %v631_v14  ;;  %1167 = vmatprep.subr.bf16.mxu0 %v360_v15  ;;  %v135_v14 = vld [vmem:[%s9080_s1 + $0x2c0] sm:$0xff]  ;;  %v728_v19 = vunpack.c.l.s8.bf16 %v264_v9  ;;  %v120_v20 = vld [vmem:[%s9080_s1 + $0x248] sm:$0xff] }
 0x113   :  { %1210 = vmatprep.subr.bf16.mxu1 %v616_v16  ;;  %v263_v15 = vld [vmem:[%s9080_s1 + $0x6c0] sm:$0xff]  ;;  %v487_v16 = vunpack.c.h.s8.bf16 %v135_v14 }
 0x114   :  { %v743_v17 = vunpack.c.h.s8.bf16 %v263_v15 }
 0x115   :  { %1168 = vmatpush1.bf16.msra.mxu0 %v359_v22  ;;  %v248_v22 = vld [vmem:[%s9080_s1 + $0x648] sm:$0xff] }
 0x116   :  { %1211 = vmatpush1.bf16.msra.mxu1 %v615_v23  ;;  %1169 = vmatprep.subr.bf16.mxu0 %v344_v24  ;;  %v471_v23 = vunpack.c.l.s8.bf16 %v135_v14  ;;  %v727_v24 = vunpack.c.l.s8.bf16 %v263_v15  ;;  %v712_v26 = vunpack.c.h.s8.bf16 %v248_v22  ;;  %v696_v33 = vunpack.c.l.s8.bf16 %v248_v22 }
 0x117   :  { %1212 = vmatprep.subr.bf16.mxu1 %v600_v25  ;;  %v456_v25 = vunpack.c.h.s8.bf16 %v120_v20 }
 0x119   :  { %1170 = vmatpush1.bf16.msra.mxu0 %v343_v28  ;;  %v247_v28 = vld [vmem:[%s9080_s1 + $0x640] sm:$0xff] }
 0x11a   :  { %1213 = vmatpush1.bf16.msra.mxu1 %v599_v30  ;;  %1171 = vmatprep.subr.bf16.mxu0 %v328_v31  ;;  %v455_v30 = vunpack.c.h.s8.bf16 %v119_v27  ;;  %v711_v31 = vunpack.c.h.s8.bf16 %v247_v28 }
 0x11b   :  { %1214 = vmatprep.subr.bf16.mxu1 %v584_v32  ;;  %v440_v32 = vunpack.c.l.s8.bf16 %v120_v20  ;;  %v202_v20 = vld [vmem:[%s9080_s1 + $0x4d8] sm:$0xff] }
 0x11d   :  { %1172 = vmatpush1.bf16.msra.mxu0 %v327_v35  ;;  %v234_v35 = vld [vmem:[%s9080_s1 + $0x5d8] sm:$0xff] }
 0x11e   :  { %1215 = vmatpush1.bf16.msra.mxu1 %v583_v36  ;;  %1173 = vmatprep.subr.bf16.mxu0 %v312_v37  ;;  %v439_v36 = vunpack.c.l.s8.bf16 %v119_v27  ;;  %v695_v37 = vunpack.c.l.s8.bf16 %v247_v28  ;;  %v682_v43 = vunpack.c.h.s8.bf16 %v234_v35  ;;  %v73_v27 = vld [vmem:[%s9080_s1 + $0xd0] sm:$0xff] }
 0x11f   :  { %1216 = vmatprep.subr.bf16.mxu1 %v568_v42  ;;  %v426_v42 = vunpack.c.h.s8.bf16 %v106_v34  ;;  %v201_v28 = vld [vmem:[%s9080_s1 + $0x4d0] sm:$0xff] }
 0x121   :  { %1174 = vmatpush1.bf16.msra.mxu0 %v311_v45  ;;  %v233_v45 = vld [vmem:[%s9080_s1 + $0x5d0] sm:$0xff] }
 0x122   :  { %1217 = vmatpush1.bf16.msra.mxu1 %v567_v46  ;;  %1175 = vmatprep.subr.bf16.mxu0 %v552_v47  ;;  %v6268_v46 = vsub.s32 2, %v6130_v29  ;;  %v425_v47 = vunpack.c.h.s8.bf16 %v105_v44 }
 0x123   :  { %1218 = vmatprep.subr.bf16.mxu1 %v808_v48  ;;  %v681_v48 = vunpack.c.h.s8.bf16 %v233_v45 }
 0x124   :  { %9108 = vst [vmem:[#allocation3_spill] sm:$0xff] %v6268_v46  ;;  %v1634_v9 = vrot.slane %v6163_v53, %v6268_v46 }
 0x125   :  { %1176 = vmatpush2.bf16.msra.mxu0 %v551_v54  ;;  %v410_v54 = vunpack.c.l.s8.bf16 %v106_v34  ;;  %v617_v34 = vunpack.c.h.s8.bf16 %v201_v28 }
 0x126   :  { %1219 = vmatpush2.bf16.msra.mxu1 %v807_v55  ;;  %1177 = vmatprep.subr.bf16.mxu0 %v536_v56  ;;  %v666_v55 = vunpack.c.l.s8.bf16 %v234_v35  ;;  %v1518_v56 = vrot.slane %v6150_v41, %v6268_v46 }
 0x127   :  { %1220 = vmatprep.subr.bf16.mxu1 %v792_v59  ;;  %v90_v59 = vld [vmem:[%s9080_s1 + $0x158] sm:$0xff] }
 0x128   :  { %v378_v15 = vunpack.c.l.s8.bf16 %v90_v59 }
 0x129   :  { %1178 = vmatpush2.bf16.msra.mxu0 %v535_v62 }
 0x12a   :  { %1221 = vmatpush2.bf16.msra.mxu1 %v791_v63  ;;  %1179 = vmatprep.subr.bf16.mxu0 %v520_v0  ;;  %v409_v0 = vunpack.c.l.s8.bf16 %v105_v44  ;;  %v601_v44 = vunpack.c.l.s8.bf16 %v201_v28 }
 0x12b   :  { %1222 = vmatprep.subr.bf16.mxu1 %v776_v1  ;;  %v665_v1 = vunpack.c.l.s8.bf16 %v233_v45 }
 0x12d   :  { %1180 = vmatpush2.bf16.msra.mxu0 %v519_v4  ;;  %v394_v4 = vunpack.c.h.s8.bf16 %v90_v59 }
 0x12e   :  { %1223 = vmatpush2.bf16.msra.mxu1 %v775_v5  ;;  %1181 = vmatprep.subr.bf16.mxu0 %v504_v6  ;;  %v650_v5 = vunpack.c.h.s8.bf16 %v218_v60  ;;  %v89_v6 = vld [vmem:[%s9080_s1 + $0x150] sm:$0xff] }
 0x12f   :  { %1224 = vmatprep.subr.bf16.mxu1 %v760_v7  ;;  %v217_v7 = vld [vmem:[%s9080_s1 + $0x550] sm:$0xff] }
 0x130   :  { %v649_v14 = vunpack.c.h.s8.bf16 %v217_v7 }
 0x131   :  { %1182 = vmatpush2.bf16.msra.mxu0 %v503_v10 }
 0x132   :  { %1225 = vmatpush2.bf16.msra.mxu1 %v759_v11  ;;  %1183 = vmatprep.subr.bf16.mxu0 %v488_v12 }
 0x133   :  { %1226 = vmatprep.subr.bf16.mxu1 %v744_v13  ;;  %v393_v13 = vunpack.c.h.s8.bf16 %v89_v6 }
 0x135   :  { %1184 = vmatpush2.bf16.msra.mxu0 %v487_v16  ;;  %v634_v16 = vunpack.c.l.s8.bf16 %v218_v60 }
 0x136   :  { %1227 = vmatpush2.bf16.msra.mxu1 %v743_v17  ;;  %1185 = vmatprep.subr.bf16.mxu0 %v472_v18 }
 0x137   :  { %1228 = vmatprep.subr.bf16.mxu1 %v728_v19  ;;  %v74_v19 = vld [vmem:[%s9080_s1 + $0xd8] sm:$0xff] }
 0x138   :  { %v346_v35 = vunpack.c.l.s8.bf16 %v74_v19 }
 0x139   :  { %1186 = vmatpush2.bf16.msra.mxu0 %v471_v23  ;;  %v377_v23 = vunpack.c.l.s8.bf16 %v89_v6  ;;  %v297_v6 = vld [vmem:[%s9080_s1 + $0x7d0] sm:$0xff] }
 0x13a   :  { %1229 = vmatpush2.bf16.msra.mxu1 %v727_v24  ;;  %1187 = vmatprep.subr.bf16.mxu0 %v456_v25  ;;  %v633_v24 = vunpack.c.l.s8.bf16 %v217_v7  ;;  %v362_v25 = vunpack.c.h.s8.bf16 %v74_v19 }
 0x13b   :  { %1230 = vmatprep.subr.bf16.mxu1 %v712_v26  ;;  %v618_v26 = vunpack.c.h.s8.bf16 %v202_v20 }
 0x13d   :  { %1188 = vmatpush2.bf16.msra.mxu0 %v455_v30 }
 0x13e   :  { %1231 = vmatpush2.bf16.msra.mxu1 %v711_v31  ;;  %1189 = vmatprep.subr.bf16.mxu0 %v440_v32 }
 0x13f   :  { %1232 = vmatprep.subr.bf16.mxu1 %v696_v33  ;;  %v361_v33 = vunpack.c.h.s8.bf16 %v73_v27 }
 0x141   :  { %1190 = vmatpush2.bf16.msra.mxu0 %v439_v36  ;;  %v602_v36 = vunpack.c.l.s8.bf16 %v202_v20 }
 0x142   :  { %1233 = vmatpush2.bf16.msra.mxu1 %v695_v37  ;;  %1245 = vmatprep.subr.bf16.mxu0 %v426_v42  ;;  %v58_v37 = vld [vmem:[%s9080_s1 + $0x58] sm:$0xff] }
 0x143   :  { %1288 = vmatprep.subr.bf16.mxu1 %v682_v43  ;;  %v186_v42 = vld [vmem:[%s9080_s1 + $0x458] sm:$0xff]  ;;  %v345_v43 = vunpack.c.l.s8.bf16 %v73_v27  ;;  %v330_v45 = vunpack.c.h.s8.bf16 %v58_v37  ;;  %v314_v59 = vunpack.c.l.s8.bf16 %v58_v37 }
 0x144   :  { %v935_v61 = vpop.f32.mrf.mxu0  ;;  %1192 = vmatmul.mubr.bf16.vlgmr.msra.gmra.mxu0 %v5838_v50  ;;  %v570_v60 = vunpack.c.l.s8.bf16 %v186_v42 }
 0x145   :  { %v978_v62 = vpop.f32.mrf.mxu1  ;;  %1235 = vmatmul.mubr.bf16.vlgmr.msra.gmra.mxu1 %v5840_v51  ;;  %1246 = vmatpush1.bf16.msra.mxu0 %v425_v47  ;;  %v586_v47 = vunpack.c.h.s8.bf16 %v186_v42  ;;  %v122_v42 = vld [vmem:[%s9080_s1 + $0x258] sm:$0xff] }
 0x146   :  { %v979_v63 = vadd.f32 %v978_v62, %v935_v61  ;;  %1289 = vmatpush1.bf16.msra.mxu1 %v681_v48  ;;  %v6284_v2 = vpop.f32.mrf.mxu0  ;;  %1247 = vmatprep.subr.bf16.mxu0 %v410_v54  ;;  %v57_v48 = vld [vmem:[%s9080_s1 + $0x50] sm:$0xff]  ;;  %v170_v61 = vld [vmem:[%s9080_s1 + $0x3d8] sm:$0xff] }
 0x147   :  { %v6286_v3 = vpop.f32.mrf.mxu1  ;;  %1290 = vmatprep.subr.bf16.mxu1 %v666_v55  ;;  %1277 = vmatprep.mubr.bf16.mxu0 %v5748_v38  ;;  %v185_v54 = vld [vmem:[%s9080_s1 + $0x450] sm:$0xff]  ;;  %v329_v55 = vunpack.c.h.s8.bf16 %v57_v48  ;;  %v298_v62 = vld [vmem:[%s9080_s1 + $0x7d8] sm:$0xff] }
 0x148   :  { %v1589_v8 = vmul.f32 %v1518_v56, %v979_v63  ;;  %1320 = vmatprep.mubr.bf16.mxu1 %v5750_v39  ;;  %v939_v10 = vpop.f32.mrf.mxu0  ;;  %v313_v63 = vunpack.c.l.s8.bf16 %v57_v48 }
 0x149   :  { %v982_v11 = vpop.f32.mrf.mxu1  ;;  %1248 = vmatpush1.bf16.msra.mxu0 %v409_v0  ;;  %v569_v0 = vunpack.c.l.s8.bf16 %v185_v54 }
 0x14a   :  { %v983_v12 = vadd.f32 %v982_v11, %v939_v10  ;;  %1291 = vmatpush1.bf16.msra.mxu1 %v665_v1  ;;  %1249 = vmatprep.subr.bf16.mxu0 %v394_v4  ;;  %v1705_v17 = vadd.f32 %v1634_v9, %v1589_v8  ;;  %v554_v1 = vunpack.c.h.s8.bf16 %v170_v61  ;;  %v810_v4 = vunpack.c.h.s8.bf16 %v298_v62  ;;  %v154_v11 = vld [vmem:[%s9080_s1 + $0x358] sm:$0xff] }
 0x14b   :  { %1292 = vmatprep.subr.bf16.mxu1 %v650_v5  ;;  %v169_v5 = vld [vmem:[%s9080_s1 + $0x3d0] sm:$0xff]  ;;  %v809_v8 = vunpack.c.h.s8.bf16 %v297_v6  ;;  %v794_v10 = vunpack.c.l.s8.bf16 %v298_v62  ;;  %v108_v62 = vld [vmem:[%s9080_s1 + $0x1e8] sm:$0xff] }
 0x14c   :  { %v1605_v18 = vmul.f32 %v1518_v56, %v983_v12  ;;  %v1737_v30 = vmax.f32 %v1705_v17, 0.0  ;;  %v585_v56 = vunpack.c.h.s8.bf16 %v185_v54  ;;  %v553_v7 = vunpack.c.h.s8.bf16 %v169_v5  ;;  %v282_v12 = vld [vmem:[%s9080_s1 + $0x758] sm:$0xff]  ;;  %v153_v17 = vld [vmem:[%s9080_s1 + $0x350] sm:$0xff] }
 0x14d   :  { %1250 = vmatpush1.bf16.msra.mxu0 %v393_v13  ;;  %v537_v13 = vunpack.c.l.s8.bf16 %v169_v5  ;;  %v521_v19 = vunpack.c.h.s8.bf16 %v153_v17  ;;  %v121_v54 = vld [vmem:[%s9080_s1 + $0x250] sm:$0xff] }
 0x14e   :  { %v1721_v22 = vadd.f32 %v1634_v9, %v1605_v18  ;;  %1293 = vmatpush1.bf16.msra.mxu1 %v649_v14  ;;  %1251 = vmatprep.subr.bf16.mxu0 %v378_v15  ;;  %v538_v9 = vunpack.c.l.s8.bf16 %v170_v61  ;;  %v793_v14 = vunpack.c.l.s8.bf16 %v297_v6  ;;  %v522_v15 = vunpack.c.h.s8.bf16 %v154_v11  ;;  %v281_v18 = vld [vmem:[%s9080_s1 + $0x750] sm:$0xff]  ;;  %v107_v6 = vld [vmem:[%s9080_s1 + $0x1e0] sm:$0xff] }
 0x14f   :  { %1294 = vmatprep.subr.bf16.mxu1 %v634_v16  ;;  %v778_v16 = vunpack.c.h.s8.bf16 %v282_v12  ;;  %v777_v20 = vunpack.c.h.s8.bf16 %v281_v18  ;;  %v761_v27 = vunpack.c.l.s8.bf16 %v281_v18 }
 0x150   :  { %v1753_v31 = vmax.f32 %v1721_v22, 0.0  ;;  %v506_v22 = vunpack.c.l.s8.bf16 %v154_v11  ;;  %v6387_v11 = vpop.f32.mrf.mxu0 }
 0x151   :  { %1252 = vmatpush1.bf16.msra.mxu0 %v377_v23  ;;  %v762_v23 = vunpack.c.l.s8.bf16 %v282_v12  ;;  %v6389_v12 = vpop.f32.mrf.mxu1 }
 0x152   :  { %v6310_v32 = vpack.c.bf16 %v1753_v31, %v1737_v30  ;;  %1295 = vmatpush1.bf16.msra.mxu1 %v633_v24  ;;  %1253 = vmatprep.subr.bf16.mxu0 %v362_v25  ;;  %v138_v24 = vld [vmem:[%s9080_s1 + $0x2d8] sm:$0xff]  ;;  %v137_v31 = vld [vmem:[%s9080_s1 + $0x2d0] sm:$0xff] }
 0x153   :  { %1296 = vmatprep.subr.bf16.mxu1 %v618_v26  ;;  %v266_v25 = vld [vmem:[%s9080_s1 + $0x6d8] sm:$0xff]  ;;  %v505_v26 = vunpack.c.l.s8.bf16 %v153_v17  ;;  %v490_v28 = vunpack.c.h.s8.bf16 %v138_v24  ;;  %v220_v17 = vld [vmem:[%s9080_s1 + $0x568] sm:$0xff] }
 0x154   :  { %v746_v30 = vunpack.c.h.s8.bf16 %v266_v25  ;;  %v730_v37 = vunpack.c.l.s8.bf16 %v266_v25 }
 0x155   :  { %1254 = vmatpush1.bf16.msra.mxu0 %v361_v33  ;;  %v265_v33 = vld [vmem:[%s9080_s1 + $0x6d0] sm:$0xff] }
 0x156   :  { %1297 = vmatpush1.bf16.msra.mxu1 %v617_v34  ;;  %1255 = vmatprep.subr.bf16.mxu0 %v346_v35  ;;  %v489_v34 = vunpack.c.h.s8.bf16 %v137_v31  ;;  %v745_v35 = vunpack.c.h.s8.bf16 %v265_v33 }
 0x157   :  { %1298 = vmatprep.subr.bf16.mxu1 %v602_v36  ;;  %v474_v36 = vunpack.c.l.s8.bf16 %v138_v24 }
 0x159   :  { %1256 = vmatpush1.bf16.msra.mxu0 %v345_v43  ;;  %v250_v43 = vld [vmem:[%s9080_s1 + $0x658] sm:$0xff] }
 0x15a   :  { %1299 = vmatpush1.bf16.msra.mxu1 %v601_v44  ;;  %1257 = vmatprep.subr.bf16.mxu0 %v330_v45  ;;  %v473_v44 = vunpack.c.l.s8.bf16 %v137_v31  ;;  %v729_v45 = vunpack.c.l.s8.bf16 %v265_v33  ;;  %v714_v48 = vunpack.c.h.s8.bf16 %v250_v43  ;;  %v698_v61 = vunpack.c.l.s8.bf16 %v250_v43 }
 0x15b   :  { %1300 = vmatprep.subr.bf16.mxu1 %v586_v47  ;;  %v458_v47 = vunpack.c.h.s8.bf16 %v122_v42  ;;  %v636_v43 = vunpack.c.l.s8.bf16 %v220_v17 }
 0x15d   :  { %1258 = vmatpush1.bf16.msra.mxu0 %v329_v55  ;;  %v249_v55 = vld [vmem:[%s9080_s1 + $0x650] sm:$0xff] }
 0x15e   :  { %1301 = vmatpush1.bf16.msra.mxu1 %v585_v56  ;;  %1259 = vmatprep.subr.bf16.mxu0 %v314_v59  ;;  %v457_v56 = vunpack.c.h.s8.bf16 %v121_v54  ;;  %v713_v59 = vunpack.c.h.s8.bf16 %v249_v55 }
 0x15f   :  { %1302 = vmatprep.subr.bf16.mxu1 %v570_v60  ;;  %v442_v60 = vunpack.c.l.s8.bf16 %v122_v42 }
 0x161   :  { %1260 = vmatpush1.bf16.msra.mxu0 %v313_v63  ;;  %v236_v63 = vld [vmem:[%s9080_s1 + $0x5e8] sm:$0xff] }
 0x162   :  { %1303 = vmatpush1.bf16.msra.mxu1 %v569_v0  ;;  %1261 = vmatprep.subr.bf16.mxu0 %v554_v1  ;;  %v441_v0 = vunpack.c.l.s8.bf16 %v121_v54  ;;  %v697_v1 = vunpack.c.l.s8.bf16 %v249_v55  ;;  %v684_v5 = vunpack.c.h.s8.bf16 %v236_v63 }
 0x163   :  { %1304 = vmatprep.subr.bf16.mxu1 %v810_v4  ;;  %v428_v4 = vunpack.c.h.s8.bf16 %v108_v62 }
 0x165   :  { %1262 = vmatpush2.bf16.msra.mxu0 %v553_v7  ;;  %v235_v7 = vld [vmem:[%s9080_s1 + $0x5e0] sm:$0xff] }
 0x166   :  { %1305 = vmatpush2.bf16.msra.mxu1 %v809_v8  ;;  %1263 = vmatprep.subr.bf16.mxu0 %v538_v9  ;;  %v6385_v8 = vsub.s32 4, %v6130_v29  ;;  %v427_v9 = vunpack.c.h.s8.bf16 %v107_v6 }
 0x167   :  { %1306 = vmatprep.subr.bf16.mxu1 %v794_v10  ;;  %v683_v10 = vunpack.c.h.s8.bf16 %v235_v7 }
 0x168   :  { %v1642_v31 = vrot.slane %v6163_v53, %v6385_v8  ;;  %v76_v53 = vld [vmem:[%s9080_s1 + $0xe8] sm:$0xff] }
 0x169   :  { %1264 = vmatpush2.bf16.msra.mxu0 %v537_v13  ;;  %v412_v13 = vunpack.c.l.s8.bf16 %v108_v62 }
 0x16a   :  { %1307 = vmatpush2.bf16.msra.mxu1 %v793_v14  ;;  %1265 = vmatprep.subr.bf16.mxu0 %v522_v15  ;;  %v668_v14 = vunpack.c.l.s8.bf16 %v236_v63  ;;  %v1526_v15 = vrot.slane %v6150_v41, %v6385_v8 }
 0x16b   :  { %1308 = vmatprep.subr.bf16.mxu1 %v778_v16  ;;  %v92_v16 = vld [vmem:[%s9080_s1 + $0x168] sm:$0xff] }
 0x16c   :  { %v396_v25 = vunpack.c.h.s8.bf16 %v92_v16  ;;  %v380_v42 = vunpack.c.l.s8.bf16 %v92_v16  ;;  %v59_v16 = vld [vmem:[%s9080_s1 + $0x60] sm:$0xff] }
 0x16d   :  { %1266 = vmatpush2.bf16.msra.mxu0 %v521_v19 }
 0x16e   :  { %1309 = vmatpush2.bf16.msra.mxu1 %v777_v20  ;;  %1267 = vmatprep.subr.bf16.mxu0 %v506_v22  ;;  %v411_v22 = vunpack.c.l.s8.bf16 %v107_v6 }
 0x16f   :  { %1310 = vmatprep.subr.bf16.mxu1 %v762_v23  ;;  %v667_v23 = vunpack.c.l.s8.bf16 %v235_v7  ;;  %v60_v7 = vld [vmem:[%s9080_s1 + $0x68] sm:$0xff] }
 0x171   :  { %1268 = vmatpush2.bf16.msra.mxu0 %v505_v26  ;;  %v652_v26 = vunpack.c.h.s8.bf16 %v220_v17  ;;  %v187_v17 = vld [vmem:[%s9080_s1 + $0x460] sm:$0xff] }
 0x172   :  { %1311 = vmatpush2.bf16.msra.mxu1 %v761_v27  ;;  %1269 = vmatprep.subr.bf16.mxu0 %v490_v28  ;;  %v91_v27 = vld [vmem:[%s9080_s1 + $0x160] sm:$0xff] }
 0x173   :  { %1312 = vmatprep.subr.bf16.mxu1 %v746_v30  ;;  %v219_v28 = vld [vmem:[%s9080_s1 + $0x560] sm:$0xff]  ;;  %v379_v54 = vunpack.c.l.s8.bf16 %v91_v27 }
 0x174   :  { %v635_v55 = vunpack.c.l.s8.bf16 %v219_v28 }
 0x175   :  { %1270 = vmatpush2.bf16.msra.mxu0 %v489_v34 }
 0x176   :  { %1313 = vmatpush2.bf16.msra.mxu1 %v745_v35  ;;  %1271 = vmatprep.subr.bf16.mxu0 %v474_v36  ;;  %v395_v36 = vunpack.c.h.s8.bf16 %v91_v27  ;;  %v571_v27 = vunpack.c.l.s8.bf16 %v187_v17 }
 0x177   :  { %1314 = vmatprep.subr.bf16.mxu1 %v730_v37  ;;  %v651_v37 = vunpack.c.h.s8.bf16 %v219_v28 }
 0x179   :  { %1272 = vmatpush2.bf16.msra.mxu0 %v473_v44 }
 0x17a   :  { %1315 = vmatpush2.bf16.msra.mxu1 %v729_v45  ;;  %1273 = vmatprep.subr.bf16.mxu0 %v458_v47  ;;  %v204_v47 = vld [vmem:[%s9080_s1 + $0x4e8] sm:$0xff] }
 0x17b   :  { %1316 = vmatprep.subr.bf16.mxu1 %v714_v48  ;;  %v604_v6 = vunpack.c.l.s8.bf16 %v204_v47 }
 0x17d   :  { %1274 = vmatpush2.bf16.msra.mxu0 %v457_v56  ;;  %v364_v56 = vunpack.c.h.s8.bf16 %v76_v53 }
 0x17e   :  { %1317 = vmatpush2.bf16.msra.mxu1 %v713_v59  ;;  %1275 = vmatprep.subr.bf16.mxu0 %v442_v60  ;;  %v620_v59 = vunpack.c.h.s8.bf16 %v204_v47  ;;  %v75_v60 = vld [vmem:[%s9080_s1 + $0xe0] sm:$0xff] }
 0x17f   :  { %1318 = vmatprep.subr.bf16.mxu1 %v698_v61  ;;  %v203_v61 = vld [vmem:[%s9080_s1 + $0x4e0] sm:$0xff] }
 0x181   :  { %1276 = vmatpush2.bf16.msra.mxu0 %v441_v0 }
 0x182   :  { %1319 = vmatpush2.bf16.msra.mxu1 %v697_v1  ;;  %1331 = vmatprep.subr.bf16.mxu0 %v428_v4  ;;  %v363_v1 = vunpack.c.h.s8.bf16 %v75_v60  ;;  %v619_v4 = vunpack.c.h.s8.bf16 %v203_v61 }
 0x183   :  { %1374 = vmatprep.subr.bf16.mxu1 %v684_v5  ;;  %v348_v5 = vunpack.c.l.s8.bf16 %v76_v53 }
 0x184   :  { %v1021_v18 = vpop.f32.mrf.mxu0  ;;  %1278 = vmatmul.mubr.bf16.vlgmr.msra.gmra.mxu0 %v5838_v50 }
 0x185   :  { %v1064_v19 = vpop.f32.mrf.mxu1  ;;  %1321 = vmatmul.mubr.bf16.vlgmr.msra.gmra.mxu1 %v5840_v51  ;;  %1332 = vmatpush1.bf16.msra.mxu0 %v427_v9  ;;  %v188_v9 = vld [vmem:[%s9080_s1 + $0x468] sm:$0xff] }
 0x186   :  { %v1065_v20 = vadd.f32 %v1064_v19, %v1021_v18  ;;  %1375 = vmatpush1.bf16.msra.mxu1 %v683_v10  ;;  %v6401_v41 = vpop.f32.mrf.mxu0  ;;  %1333 = vmatprep.subr.bf16.mxu0 %v412_v13  ;;  %v347_v10 = vunpack.c.l.s8.bf16 %v75_v60  ;;  %v603_v13 = vunpack.c.l.s8.bf16 %v203_v61  ;;  %v331_v18 = vunpack.c.h.s8.bf16 %v59_v16  ;;  %v140_v61 = vld [vmem:[%s9080_s1 + $0x2e8] sm:$0xff] }
 0x187   :  { %v6403_v24 = vpop.f32.mrf.mxu1  ;;  %1376 = vmatprep.subr.bf16.mxu1 %v668_v14  ;;  %1363 = vmatprep.mubr.bf16.mxu0 %v5748_v38  ;;  %v332_v14 = vunpack.c.h.s8.bf16 %v60_v7  ;;  %v587_v19 = vunpack.c.h.s8.bf16 %v187_v17 }
 0x188   :  { %v1591_v30 = vmul.f32 %v1526_v15, %v1065_v20  ;;  %1406 = vmatprep.mubr.bf16.mxu1 %v5750_v39  ;;  %v1025_v33 = vpop.f32.mrf.mxu0  ;;  %v316_v20 = vunpack.c.l.s8.bf16 %v60_v7  ;;  %v267_v7 = vld [vmem:[%s9080_s1 + $0x6e0] sm:$0xff] }
 0x189   :  { %v1068_v34 = vpop.f32.mrf.mxu1  ;;  %1334 = vmatpush1.bf16.msra.mxu0 %v411_v22  ;;  %v572_v22 = vunpack.c.l.s8.bf16 %v188_v9 }
 0x18a   :  { %v1069_v35 = vadd.f32 %v1068_v34, %v1025_v33  ;;  %1377 = vmatpush1.bf16.msra.mxu1 %v667_v23  ;;  %1335 = vmatprep.subr.bf16.mxu0 %v396_v25  ;;  %v1707_v44 = vadd.f32 %v1642_v31, %v1591_v30  ;;  %v172_v23 = vld [vmem:[%s9080_s1 + $0x3e8] sm:$0xff]  ;;  %v299_v33 = vld [vmem:[%s9080_s1 + $0x7e0] sm:$0xff] }
 0x18b   :  { %1378 = vmatprep.subr.bf16.mxu1 %v652_v26  ;;  %v300_v25 = vld [vmem:[%s9080_s1 + $0x7e8] sm:$0xff]  ;;  %v315_v26 = vunpack.c.l.s8.bf16 %v59_v16  ;;  %v556_v28 = vunpack.c.h.s8.bf16 %v172_v23 }
 0x18c   :  { %v1607_v45 = vmul.f32 %v1526_v15, %v1069_v35  ;;  %v1739_v62 = vmax.f32 %v1707_v44, 0.0  ;;  %v588_v15 = vunpack.c.h.s8.bf16 %v188_v9  ;;  %v812_v30 = vunpack.c.h.s8.bf16 %v300_v25  ;;  %v252_v16 = vld [vmem:[%s9080_s1 + $0x668] sm:$0xff] }
 0x18d   :  { %1336 = vmatpush1.bf16.msra.mxu0 %v395_v36  ;;  %v811_v35 = vunpack.c.h.s8.bf16 %v299_v33  ;;  %v540_v36 = vunpack.c.l.s8.bf16 %v172_v23  ;;  %v251_v23 = vld [vmem:[%s9080_s1 + $0x660] sm:$0xff] }
 0x18e   :  { %v1723_v48 = vadd.f32 %v1642_v31, %v1607_v45  ;;  %1379 = vmatpush1.bf16.msra.mxu1 %v651_v37  ;;  %1337 = vmatprep.subr.bf16.mxu0 %v380_v42  ;;  %v171_v31 = vld [vmem:[%s9080_s1 + $0x3e0] sm:$0xff]  ;;  %v796_v37 = vunpack.c.l.s8.bf16 %v300_v25  ;;  %v156_v42 = vld [vmem:[%s9080_s1 + $0x368] sm:$0xff]  ;;  %v795_v45 = vunpack.c.l.s8.bf16 %v299_v33 }
 0x18f   :  { %1380 = vmatprep.subr.bf16.mxu1 %v636_v43  ;;  %v555_v34 = vunpack.c.h.s8.bf16 %v171_v31  ;;  %v284_v43 = vld [vmem:[%s9080_s1 + $0x768] sm:$0xff]  ;;  %v539_v44 = vunpack.c.l.s8.bf16 %v171_v31  ;;  %v524_v53 = vunpack.c.h.s8.bf16 %v156_v42  ;;  %v238_v31 = vld [vmem:[%s9080_s1 + $0x5f8] sm:$0xff] }
 0x190   :  { %v1755_v63 = vmax.f32 %v1723_v48, 0.0  ;;  %v780_v47 = vunpack.c.h.s8.bf16 %v284_v43  ;;  %v155_v48 = vld [vmem:[%s9080_s1 + $0x360] sm:$0xff]  ;;  %v764_v60 = vunpack.c.l.s8.bf16 %v284_v43  ;;  %v6502_v43 = vsub.s32 6, %v6130_v29 }
 0x191   :  { %1338 = vmatpush1.bf16.msra.mxu0 %v379_v54  ;;  %v283_v54 = vld [vmem:[%s9080_s1 + $0x760] sm:$0xff] }
 0x192   :  { %v6427_v0 = vpack.c.bf16 %v1755_v63, %v1739_v62  ;;  %1381 = vmatpush1.bf16.msra.mxu1 %v635_v55  ;;  %1339 = vmatprep.subr.bf16.mxu0 %v364_v56  ;;  %v523_v55 = vunpack.c.h.s8.bf16 %v155_v48  ;;  %v779_v56 = vunpack.c.h.s8.bf16 %v283_v54  ;;  %v268_v62 = vld [vmem:[%s9080_s1 + $0x6e8] sm:$0xff]  ;;  %v507_v63 = vunpack.c.l.s8.bf16 %v155_v48  ;;  %9109 = vst [vmem:[#allocation4_spill] sm:$0xff] %v6502_v43 }
 0x193   :  { %1382 = vmatprep.subr.bf16.mxu1 %v620_v59  ;;  %v508_v59 = vunpack.c.l.s8.bf16 %v156_v42  ;;  %v237_v42 = vld [vmem:[%s9080_s1 + $0x5f0] sm:$0xff] }
 0x195   :  { %1340 = vmatpush1.bf16.msra.mxu0 %v363_v1  ;;  %v763_v1 = vunpack.c.l.s8.bf16 %v283_v54  ;;  %v670_v54 = vunpack.c.l.s8.bf16 %v238_v31 }
 0x196   :  { %1383 = vmatpush1.bf16.msra.mxu1 %v619_v4  ;;  %1341 = vmatprep.subr.bf16.mxu0 %v348_v5  ;;  %v492_v4 = vunpack.c.h.s8.bf16 %v140_v61  ;;  %v748_v5 = vunpack.c.h.s8.bf16 %v268_v62 }
 0x197   :  { %1384 = vmatprep.subr.bf16.mxu1 %v604_v6  ;;  %v139_v6 = vld [vmem:[%s9080_s1 + $0x2e0] sm:$0xff] }
 0x198   :  { %v491_v9 = vunpack.c.h.s8.bf16 %v139_v6  ;;  %v475_v17 = vunpack.c.l.s8.bf16 %v139_v6 }
 0x199   :  { %1342 = vmatpush1.bf16.msra.mxu0 %v347_v10  ;;  %v747_v10 = vunpack.c.h.s8.bf16 %v267_v7 }
 0x19a   :  { %1385 = vmatpush1.bf16.msra.mxu1 %v603_v13  ;;  %1343 = vmatprep.subr.bf16.mxu0 %v332_v14  ;;  %v476_v13 = vunpack.c.l.s8.bf16 %v140_v61  ;;  %v732_v14 = vunpack.c.l.s8.bf16 %v268_v62 }
 0x19b   :  { %1386 = vmatprep.subr.bf16.mxu1 %v588_v15  ;;  %v124_v15 = vld [vmem:[%s9080_s1 + $0x268] sm:$0xff] }
 0x19d   :  { %1344 = vmatpush1.bf16.msra.mxu0 %v331_v18  ;;  %v731_v18 = vunpack.c.l.s8.bf16 %v267_v7 }
 0x19e   :  { %1387 = vmatpush1.bf16.msra.mxu1 %v587_v19  ;;  %1345 = vmatprep.subr.bf16.mxu0 %v316_v20  ;;  %v460_v19 = vunpack.c.h.s8.bf16 %v124_v15  ;;  %v716_v20 = vunpack.c.h.s8.bf16 %v252_v16 }
 0x19f   :  { %1388 = vmatprep.subr.bf16.mxu1 %v572_v22  ;;  %v123_v22 = vld [vmem:[%s9080_s1 + $0x260] sm:$0xff] }
 0x1a0   :  { %v459_v25 = vunpack.c.h.s8.bf16 %v123_v22  ;;  %v443_v33 = vunpack.c.l.s8.bf16 %v123_v22 }
 0x1a1   :  { %1346 = vmatpush1.bf16.msra.mxu0 %v315_v26  ;;  %v715_v26 = vunpack.c.h.s8.bf16 %v251_v23 }
 0x1a2   :  { %1389 = vmatpush1.bf16.msra.mxu1 %v571_v27  ;;  %1347 = vmatprep.subr.bf16.mxu0 %v556_v28  ;;  %v444_v27 = vunpack.c.l.s8.bf16 %v124_v15  ;;  %v700_v28 = vunpack.c.l.s8.bf16 %v252_v16  ;;  %v6536_v15 = vld [vmem:[%s9083_s3] sm:$0xff] }
 0x1a3   :  { %1390 = vmatprep.subr.bf16.mxu1 %v812_v30  ;;  %v110_v30 = vld [vmem:[%s9080_s1 + $0x1f8] sm:$0xff]  ;;  %v1650_v16 = vrot.slane %v6536_v15, %v6502_v43 }
 0x1a4   :  { %v414_v48 = vunpack.c.l.s8.bf16 %v110_v30 }
 0x1a5   :  { %1348 = vmatpush2.bf16.msra.mxu0 %v555_v34  ;;  %v699_v34 = vunpack.c.l.s8.bf16 %v251_v23 }
 0x1a6   :  { %1391 = vmatpush2.bf16.msra.mxu1 %v811_v35  ;;  %1349 = vmatprep.subr.bf16.mxu0 %v540_v36  ;;  %v430_v35 = vunpack.c.h.s8.bf16 %v110_v30  ;;  %v686_v36 = vunpack.c.h.s8.bf16 %v238_v31 }
 0x1a7   :  { %1392 = vmatprep.subr.bf16.mxu1 %v796_v37  ;;  %v109_v37 = vld [vmem:[%s9080_s1 + $0x1f0] sm:$0xff] }
 0x1a9   :  { %1350 = vmatpush2.bf16.msra.mxu0 %v539_v44  ;;  %v429_v44 = vunpack.c.h.s8.bf16 %v109_v37 }
 0x1aa   :  { %1393 = vmatpush2.bf16.msra.mxu1 %v795_v45  ;;  %1351 = vmatprep.subr.bf16.mxu0 %v524_v53  ;;  %v685_v45 = vunpack.c.h.s8.bf16 %v237_v42  ;;  %v6504_v53 = vpop.f32.mrf.mxu0 }
 0x1ab   :  { %1394 = vmatprep.subr.bf16.mxu1 %v780_v47  ;;  %v6506_v47 = vpop.f32.mrf.mxu1 }
 0x1ad   :  { %1352 = vmatpush2.bf16.msra.mxu0 %v523_v55  ;;  %v6511_v55 = vld [vmem:[%s9082_s2] sm:$0xff] }
 0x1ae   :  { %1395 = vmatpush2.bf16.msra.mxu1 %v779_v56  ;;  %1353 = vmatprep.subr.bf16.mxu0 %v508_v59  ;;  %v1534_v56 = vrot.slane %v6511_v55, %v6502_v43  ;;  %v94_v59 = vld [vmem:[%s9080_s1 + $0x178] sm:$0xff] }
 0x1af   :  { %1396 = vmatprep.subr.bf16.mxu1 %v764_v60  ;;  %v222_v60 = vld [vmem:[%s9080_s1 + $0x578] sm:$0xff]  ;;  %v398_v7 = vunpack.c.h.s8.bf16 %v94_v59  ;;  %v382_v23 = vunpack.c.l.s8.bf16 %v94_v59 }
 0x1b0   :  { %v62_v59 = vld [vmem:[%s9080_s1 + $0x78] sm:$0xff] }
 0x1b1   :  { %1354 = vmatpush2.bf16.msra.mxu0 %v507_v63 }
 0x1b2   :  { %1397 = vmatpush2.bf16.msra.mxu1 %v763_v1  ;;  %1355 = vmatprep.subr.bf16.mxu0 %v492_v4  ;;  %v413_v1 = vunpack.c.l.s8.bf16 %v109_v37  ;;  %v669_v4 = vunpack.c.l.s8.bf16 %v237_v42 }
 0x1b3   :  { %1398 = vmatprep.subr.bf16.mxu1 %v748_v5 }
 0x1b5   :  { %1356 = vmatpush2.bf16.msra.mxu0 %v491_v9  ;;  %v654_v9 = vunpack.c.h.s8.bf16 %v222_v60 }
 0x1b6   :  { %1399 = vmatpush2.bf16.msra.mxu1 %v747_v10  ;;  %1357 = vmatprep.subr.bf16.mxu0 %v476_v13  ;;  %v93_v10 = vld [vmem:[%s9080_s1 + $0x170] sm:$0xff] }
 0x1b7   :  { %1400 = vmatprep.subr.bf16.mxu1 %v732_v14  ;;  %v221_v13 = vld [vmem:[%s9080_s1 + $0x570] sm:$0xff]  ;;  %v381_v30 = vunpack.c.l.s8.bf16 %v93_v10 }
 0x1b8   :  { %v653_v22 = vunpack.c.h.s8.bf16 %v221_v13  ;;  %v637_v31 = vunpack.c.l.s8.bf16 %v221_v13  ;;  %v318_v13 = vunpack.c.l.s8.bf16 %v62_v59 }
 0x1b9   :  { %1358 = vmatpush2.bf16.msra.mxu0 %v475_v17 }
 0x1ba   :  { %1401 = vmatpush2.bf16.msra.mxu1 %v731_v18  ;;  %1359 = vmatprep.subr.bf16.mxu0 %v460_v19 }
 0x1bb   :  { %1402 = vmatprep.subr.bf16.mxu1 %v716_v20  ;;  %v397_v20 = vunpack.c.h.s8.bf16 %v93_v10 }
 0x1bd   :  { %1360 = vmatpush2.bf16.msra.mxu0 %v459_v25  ;;  %v638_v25 = vunpack.c.l.s8.bf16 %v222_v60  ;;  %v190_v60 = vld [vmem:[%s9080_s1 + $0x478] sm:$0xff] }
 0x1be   :  { %1403 = vmatpush2.bf16.msra.mxu1 %v715_v26  ;;  %1361 = vmatprep.subr.bf16.mxu0 %v444_v27 }
 0x1bf   :  { %1404 = vmatprep.subr.bf16.mxu1 %v700_v28  ;;  %v78_v28 = vld [vmem:[%s9080_s1 + $0xf8] sm:$0xff] }
 0x1c1   :  { %1362 = vmatpush2.bf16.msra.mxu0 %v443_v33  ;;  %v366_v33 = vunpack.c.h.s8.bf16 %v78_v28 }
 0x1c2   :  { %1405 = vmatpush2.bf16.msra.mxu1 %v699_v34  ;;  %1417 = vmatprep.subr.bf16.mxu0 %v430_v35  ;;  %v77_v35 = vld [vmem:[%s9080_s1 + $0xf0] sm:$0xff] }
 0x1c3   :  { %1460 = vmatprep.subr.bf16.mxu1 %v686_v36  ;;  %v205_v36 = vld [vmem:[%s9080_s1 + $0x4f0] sm:$0xff] }
 0x1c4   :  { %v1107_v61 = vpop.f32.mrf.mxu0  ;;  %1364 = vmatmul.mubr.bf16.vlgmr.msra.gmra.mxu0 %v5838_v50 }
 0x1c5   :  { %v1150_v62 = vpop.f32.mrf.mxu1  ;;  %1407 = vmatmul.mubr.bf16.vlgmr.msra.gmra.mxu1 %v5840_v51  ;;  %1418 = vmatpush1.bf16.msra.mxu0 %v429_v44 }
 0x1c6   :  { %v1151_v63 = vadd.f32 %v1150_v62, %v1107_v61  ;;  %1461 = vmatpush1.bf16.msra.mxu1 %v685_v45  ;;  %v6523_v5 = vpop.f32.mrf.mxu0  ;;  %1419 = vmatprep.subr.bf16.mxu0 %v414_v48  ;;  %v365_v45 = vunpack.c.h.s8.bf16 %v77_v35  ;;  %v621_v48 = vunpack.c.h.s8.bf16 %v205_v36  ;;  %v349_v61 = vunpack.c.l.s8.bf16 %v77_v35 }
 0x1c7   :  { %v6525_v6 = vpop.f32.mrf.mxu1  ;;  %1462 = vmatprep.subr.bf16.mxu1 %v670_v54  ;;  %1449 = vmatprep.mubr.bf16.mxu0 %v5748_v38  ;;  %v206_v38 = vld [vmem:[%s9080_s1 + $0x4f8] sm:$0xff]  ;;  %v350_v54 = vunpack.c.l.s8.bf16 %v78_v28  ;;  %v605_v62 = vunpack.c.l.s8.bf16 %v205_v36  ;;  %v157_v36 = vld [vmem:[%s9080_s1 + $0x370] sm:$0xff] }
 0x1c8   :  { %v1593_v14 = vmul.f32 %v1534_v56, %v1151_v63  ;;  %1492 = vmatprep.mubr.bf16.mxu1 %v5750_v39  ;;  %v1111_v17 = vpop.f32.mrf.mxu0  ;;  %v622_v34 = vunpack.c.h.s8.bf16 %v206_v38  ;;  %v334_v63 = vunpack.c.h.s8.bf16 %v62_v59  ;;  %v270_v59 = vld [vmem:[%s9080_s1 + $0x6f8] sm:$0xff] }
 0x1c9   :  { %v1154_v18 = vpop.f32.mrf.mxu1  ;;  %1420 = vmatpush1.bf16.msra.mxu0 %v413_v1  ;;  %v590_v1 = vunpack.c.h.s8.bf16 %v190_v60 }
 0x1ca   :  { %v1155_v19 = vadd.f32 %v1154_v18, %v1111_v17  ;;  %1463 = vmatpush1.bf16.msra.mxu1 %v669_v4  ;;  %1421 = vmatprep.subr.bf16.mxu0 %v398_v7  ;;  %v1709_v26 = vadd.f32 %v1650_v16, %v1593_v14  ;;  %v61_v4 = vld [vmem:[%s9080_s1 + $0x70] sm:$0xff]  ;;  %v574_v14 = vunpack.c.l.s8.bf16 %v190_v60  ;;  %v302_v17 = vld [vmem:[%s9080_s1 + $0x7f8] sm:$0xff]  ;;  %v509_v60 = vunpack.c.l.s8.bf16 %v157_v36 }
 0x1cb   :  { %1464 = vmatprep.subr.bf16.mxu1 %v654_v9  ;;  %v189_v7 = vld [vmem:[%s9080_s1 + $0x470] sm:$0xff]  ;;  %v333_v9 = vunpack.c.h.s8.bf16 %v61_v4  ;;  %v317_v18 = vunpack.c.l.s8.bf16 %v61_v4 }
 0x1cc   :  { %v1609_v27 = vmul.f32 %v1534_v56, %v1155_v19  ;;  %v1741_v37 = vmax.f32 %v1709_v26, 0.0  ;;  %v606_v56 = vunpack.c.l.s8.bf16 %v206_v38  ;;  %v589_v10 = vunpack.c.h.s8.bf16 %v189_v7  ;;  %v269_v4 = vld [vmem:[%s9080_s1 + $0x6f0] sm:$0xff] }
 0x1cd   :  { %1422 = vmatpush1.bf16.msra.mxu0 %v397_v20  ;;  %v573_v19 = vunpack.c.l.s8.bf16 %v189_v7  ;;  %v798_v38 = vunpack.c.l.s8.bf16 %v302_v17  ;;  %v6605_v7 = vsub.s32 1, %v6130_v29 }
 0x1ce   :  { %v1725_v39 = vadd.f32 %v1650_v16, %v1609_v27  ;;  %1465 = vmatpush1.bf16.msra.mxu1 %v653_v22  ;;  %1423 = vmatprep.subr.bf16.mxu0 %v382_v23  ;;  %v174_v16 = vld [vmem:[%s9080_s1 + $0x3f8] sm:$0xff]  ;;  %v814_v22 = vunpack.c.h.s8.bf16 %v302_v17  ;;  %v173_v23 = vld [vmem:[%s9080_s1 + $0x3f0] sm:$0xff]  ;;  %v899_v17 = vadd.f32 %v6272_v52, %v6270_v49  ;;  %v733_v52 = vunpack.c.l.s8.bf16 %v269_v4 }
 0x1cf   :  { %1466 = vmatprep.subr.bf16.mxu1 %v638_v25  ;;  %v558_v20 = vunpack.c.h.s8.bf16 %v174_v16  ;;  %v301_v25 = vld [vmem:[%s9080_s1 + $0x7f0] sm:$0xff]  ;;  %v557_v26 = vunpack.c.h.s8.bf16 %v173_v23  ;;  %v542_v28 = vunpack.c.l.s8.bf16 %v174_v16  ;;  %9110 = vst [vmem:[#allocation5_spill] sm:$0xff] %v6605_v7  ;;  %v734_v16 = vunpack.c.l.s8.bf16 %v270_v59 }
 0x1d0   :  { %v1757_v42 = vmax.f32 %v1725_v39, 0.0  ;;  %v813_v27 = vunpack.c.h.s8.bf16 %v301_v25  ;;  %v158_v39 = vld [vmem:[%s9080_s1 + $0x378] sm:$0xff] }
 0x1d1   :  { %1424 = vmatpush1.bf16.msra.mxu0 %v381_v30  ;;  %v286_v30 = vld [vmem:[%s9080_s1 + $0x778] sm:$0xff] }
 0x1d2   :  { %v6554_v44 = vpack.c.bf16 %v1757_v42, %v1741_v37  ;;  %1467 = vmatpush1.bf16.msra.mxu1 %v637_v31  ;;  %1425 = vmatprep.subr.bf16.mxu0 %v366_v33  ;;  %v541_v31 = vunpack.c.l.s8.bf16 %v173_v23  ;;  %v797_v33 = vunpack.c.l.s8.bf16 %v301_v25  ;;  %v782_v35 = vunpack.c.h.s8.bf16 %v286_v30  ;;  %v285_v37 = vld [vmem:[%s9080_s1 + $0x770] sm:$0xff] }
 0x1d3   :  { %1468 = vmatprep.subr.bf16.mxu1 %v622_v34  ;;  %v526_v34 = vunpack.c.h.s8.bf16 %v158_v39  ;;  %v525_v42 = vunpack.c.h.s8.bf16 %v157_v36  ;;  %v1514_v23 = vrot.slane %v6511_v55, %v6605_v7  ;;  %v981_v25 = vadd.f32 %v6286_v3, %v6284_v2  ;;  %v1808_v36 = vld [vmem:[%s9084_s4 + $0xc8] sm:$0xff] }
 0x1d4   :  { %v1630_v2 = vrot.slane %v6536_v15, %v6605_v7 }
 0x1d5   :  { %1426 = vmatpush1.bf16.msra.mxu0 %v365_v45  ;;  %v781_v45 = vunpack.c.h.s8.bf16 %v285_v37 }
 0x1d6   :  { %1469 = vmatpush1.bf16.msra.mxu1 %v621_v48  ;;  %1427 = vmatprep.subr.bf16.mxu0 %v350_v54  ;;  %v510_v48 = vunpack.c.l.s8.bf16 %v158_v39  ;;  %v766_v54 = vunpack.c.l.s8.bf16 %v286_v30 }
 0x1d7   :  { %1470 = vmatprep.subr.bf16.mxu1 %v606_v56  ;;  %v142_v56 = vld [vmem:[%s9080_s1 + $0x2f8] sm:$0xff] }
 0x1d9   :  { %1428 = vmatpush1.bf16.msra.mxu0 %v349_v61  ;;  %v765_v61 = vunpack.c.l.s8.bf16 %v285_v37  ;;  %v1872_v37 = vld [vmem:[%s9084_s4 + $0x2c8] sm:$0xff] }
 0x1da   :  { %1471 = vmatpush1.bf16.msra.mxu1 %v605_v62  ;;  %1429 = vmatprep.subr.bf16.mxu0 %v334_v63  ;;  %v494_v62 = vunpack.c.h.s8.bf16 %v142_v56  ;;  %v750_v63 = vunpack.c.h.s8.bf16 %v270_v59  ;;  %v2352_v59 = vunpack.c.h.s8.bf16 %v1808_v36 }
 0x1db   :  { %1472 = vmatprep.subr.bf16.mxu1 %v590_v1  ;;  %v141_v1 = vld [vmem:[%s9080_s1 + $0x2f0] sm:$0xff] }
 0x1dc   :  { %v477_v49 = vunpack.c.l.s8.bf16 %v141_v1 }
 0x1dd   :  { %1430 = vmatpush1.bf16.msra.mxu0 %v333_v9  ;;  %v493_v9 = vunpack.c.h.s8.bf16 %v141_v1 }
 0x1de   :  { %1473 = vmatpush1.bf16.msra.mxu1 %v589_v10  ;;  %1431 = vmatprep.subr.bf16.mxu0 %v318_v13  ;;  %v749_v10 = vunpack.c.h.s8.bf16 %v269_v4  ;;  %v6608_v13 = vsub.s32 3, %v6130_v29  ;;  %v6653_v4 = vld [vmem:[%s9082_s2 + $0x8] sm:$0xff] }
 0x1df   :  { %1474 = vmatprep.subr.bf16.mxu1 %v574_v14  ;;  %v478_v14 = vunpack.c.l.s8.bf16 %v142_v56 }
 0x1e0   :  { %9111 = vst [vmem:[#allocation6_spill] sm:$0xff] %v6608_v13 }
 0x1e1   :  { %1432 = vmatpush1.bf16.msra.mxu0 %v317_v18  ;;  %v126_v18 = vld [vmem:[%s9080_s1 + $0x278] sm:$0xff] }
 0x1e2   :  { %1475 = vmatpush1.bf16.msra.mxu1 %v573_v19  ;;  %1433 = vmatprep.subr.bf16.mxu0 %v558_v20  ;;  %v254_v19 = vld [vmem:[%s9080_s1 + $0x678] sm:$0xff]  ;;  %v985_v20 = vadd.f32 %v6389_v12, %v6387_v11  ;;  %v1604_v12 = vmul.f32 %v1514_v23, %v899_v17  ;;  %v6657_v17 = vpop.f32.mrf.mxu1 }
 0x1e3   :  { %1476 = vmatprep.subr.bf16.mxu1 %v814_v22  ;;  %v895_v22 = vadd.f32 %v6169_v58, %v6167_v57  ;;  %v718_v11 = vunpack.c.h.s8.bf16 %v254_v19  ;;  %v125_v57 = vld [vmem:[%s9080_s1 + $0x270] sm:$0xff] }
 0x1e4   :  { %v253_v58 = vld [vmem:[%s9080_s1 + $0x670] sm:$0xff]  ;;  %v461_v3 = vunpack.c.h.s8.bf16 %v125_v57 }
 0x1e5   :  { %1434 = vmatpush2.bf16.msra.mxu0 %v557_v26  ;;  %v1522_v26 = vrot.slane %v6511_v55, %v6608_v13  ;;  %v717_v39 = vunpack.c.h.s8.bf16 %v253_v58 }
 0x1e6   :  { %1477 = vmatpush2.bf16.msra.mxu1 %v813_v27  ;;  %1435 = vmatprep.subr.bf16.mxu0 %v542_v28  ;;  %v462_v27 = vunpack.c.h.s8.bf16 %v126_v18 }
 0x1e7   :  { %1478 = vmatprep.subr.bf16.mxu1 %v798_v38  ;;  %v1606_v28 = vmul.f32 %v1522_v26, %v985_v20  ;;  %v1588_v38 = vmul.f32 %v1514_v23, %v895_v22  ;;  %v1590_v30 = vmul.f32 %v1522_v26, %v981_v25  ;;  %v1542_v20 = vrot.slane %v6653_v4, %v6145_v40 }
 0x1e8   :  { %v2344_v22 = vunpack.c.l.s8.bf16 %v1808_v36  ;;  %v2472_v23 = vunpack.c.l.s8.bf16 %v1872_v37 }
 0x1e9   :  { %1436 = vmatpush2.bf16.msra.mxu0 %v541_v31  ;;  %v1638_v31 = vrot.slane %v6536_v15, %v6608_v13 }
 0x1ea   :  { %1479 = vmatpush2.bf16.msra.mxu1 %v797_v33  ;;  %1437 = vmatprep.subr.bf16.mxu0 %v526_v34  ;;  %v446_v33 = vunpack.c.l.s8.bf16 %v126_v18  ;;  %v702_v34 = vunpack.c.l.s8.bf16 %v254_v19 }
 0x1eb   :  { %1480 = vmatprep.subr.bf16.mxu1 %v782_v35  ;;  %v1720_v35 = vadd.f32 %v1630_v2, %v1604_v12  ;;  %v1706_v56 = vadd.f32 %v1638_v31, %v1590_v30  ;;  %v1863_v30 = vld [vmem:[%s9084_s4 + $0x280] sm:$0xff] }
 0x1ec   :  { %v2463_v36 = vunpack.c.h.s8.bf16 %v1863_v30 }
 0x1ed   :  { %1438 = vmatpush2.bf16.msra.mxu0 %v525_v42  ;;  %v1722_v42 = vadd.f32 %v1638_v31, %v1606_v28 }
 0x1ee   :  { %1481 = vmatpush2.bf16.msra.mxu1 %v781_v45  ;;  %1439 = vmatprep.subr.bf16.mxu0 %v510_v48  ;;  %v1704_v45 = vadd.f32 %v1630_v2, %v1588_v38  ;;  %v445_v48 = vunpack.c.l.s8.bf16 %v125_v57 }
 0x1ef   :  { %1482 = vmatprep.subr.bf16.mxu1 %v766_v54  ;;  %v701_v54 = vunpack.c.l.s8.bf16 %v253_v58  ;;  %v1754_v1 = vmax.f32 %v1722_v42, 0.0 }
 0x1f1   :  { %1440 = vmatpush2.bf16.msra.mxu0 %v509_v60  ;;  %v2480_v60 = vunpack.c.h.s8.bf16 %v1872_v37 }
 0x1f2   :  { %1483 = vmatpush2.bf16.msra.mxu1 %v765_v61  ;;  %1441 = vmatprep.subr.bf16.mxu0 %v494_v62  ;;  %v1807_v61 = vld [vmem:[%s9084_s4 + $0xc0] sm:$0xff]  ;;  %v1752_v62 = vmax.f32 %v1720_v35, 0.0 }
 0x1f3   :  { %1484 = vmatprep.subr.bf16.mxu1 %v750_v63  ;;  %v1871_v63 = vld [vmem:[%s9084_s4 + $0x2c0] sm:$0xff]  ;;  %v2343_v58 = vunpack.c.l.s8.bf16 %v1807_v61 }
 0x1f4   :  { %v2479_v18 = vunpack.c.h.s8.bf16 %v1871_v63  ;;  %v2471_v38 = vunpack.c.l.s8.bf16 %v1871_v63  ;;  %v1791_v63 = vld [vmem:[%s9084_s4 + $0x40] sm:$0xff] }
 0x1f5   :  { %1442 = vmatpush2.bf16.msra.mxu0 %v493_v9  ;;  %v1736_v9 = vmax.f32 %v1704_v45, 0.0 }
 0x1f6   :  { %1485 = vmatpush2.bf16.msra.mxu1 %v749_v10  ;;  %1443 = vmatprep.subr.bf16.mxu0 %v478_v14  ;;  %v2351_v10 = vunpack.c.h.s8.bf16 %v1807_v61  ;;  %v1738_v14 = vmax.f32 %v1706_v56, 0.0  ;;  %v1856_v56 = vld [vmem:[%s9084_s4 + $0x248] sm:$0xff]  ;;  %v2455_v61 = vunpack.c.l.s8.bf16 %v1863_v30 }
 0x1f7   :  { %1486 = vmatprep.subr.bf16.mxu1 %v734_v16  ;;  %v6655_v16 = vpop.f32.mrf.mxu0  ;;  %v6659_v19 = vpack.c.bf16 %v1752_v62, %v1736_v9 }
 0x1f9   :  { %1444 = vmatpush2.bf16.msra.mxu0 %v477_v49  ;;  %v1800_v49 = vld [vmem:[%s9084_s4 + $0x88] sm:$0xff] }
 0x1fa   :  { %1487 = vmatpush2.bf16.msra.mxu1 %v733_v52  ;;  %1445 = vmatprep.subr.bf16.mxu0 %v462_v27  ;;  %v6666_v52 = vpack.c.bf16 %v1754_v1, %v1738_v14  ;;  %v6671_v27 = vld [vmem:[%s9083_s3 + $0x8] sm:$0xff]  ;;  %v2328_v37 = vunpack.c.l.s8.bf16 %v1800_v49  ;;  %v1855_v14 = vld [vmem:[%s9084_s4 + $0x240] sm:$0xff] }
 0x1fb   :  { %1488 = vmatprep.subr.bf16.mxu1 %v718_v11  ;;  %v1864_v11 = vld [vmem:[%s9084_s4 + $0x288] sm:$0xff] }
 0x1fd   :  { %1446 = vmatpush2.bf16.msra.mxu0 %v461_v3  ;;  %v1658_v3 = vrot.slane %v6671_v27, %v6145_v40 }
 0x1fe   :  { %1489 = vmatpush2.bf16.msra.mxu1 %v717_v39  ;;  %1447 = vmatprep.subr.bf16.mxu0 %v446_v33  ;;  %v2464_v39 = vunpack.c.h.s8.bf16 %v1864_v11 }
 0x1ff   :  { %1490 = vmatprep.subr.bf16.mxu1 %v702_v34 }
 0x201   :  { %1448 = vmatpush2.bf16.msra.mxu0 %v445_v48  ;;  %v2456_v48 = vunpack.c.l.s8.bf16 %v1864_v11  ;;  %v2311_v11 = vunpack.c.l.s8.bf16 %v1791_v63 }
 0x202   :  { %1491 = vmatpush2.bf16.msra.mxu1 %v701_v54  ;;  %3319 = vmatprep.subr.bf16.mxu0 %v2352_v59  ;;  %v1792_v54 = vld [vmem:[%s9084_s4 + $0x48] sm:$0xff] }
 0x203   :  { %3362 = vmatprep.subr.bf16.mxu1 %v2480_v60  ;;  %v2320_v62 = vunpack.c.h.s8.bf16 %v1792_v54 }
 0x204   :  { %v1193_v25 = vpop.f32.mrf.mxu0  ;;  %1450 = vmatmul.mubr.bf16.vlgmr.msra.gmra.mxu0 %v5838_v50  ;;  %v2336_v50 = vunpack.c.h.s8.bf16 %v1800_v49  ;;  %v2440_v49 = vunpack.c.l.s8.bf16 %v1856_v56 }
 0x205   :  { %v1236_v26 = vpop.f32.mrf.mxu1  ;;  %1493 = vmatmul.mubr.bf16.vlgmr.msra.gmra.mxu1 %v5840_v51  ;;  %3320 = vmatpush1.bf16.msra.mxu0 %v2351_v10  ;;  %v1799_v51 = vld [vmem:[%s9084_s4 + $0x80] sm:$0xff]  ;;  %v2448_v10 = vunpack.c.h.s8.bf16 %v1856_v56 }
 0x206   :  { %v1237_v57 = vadd.f32 %v1236_v26, %v1193_v25  ;;  %3351 = vmatprep.mubr.bf16.mxu0 %v6659_v19  ;;  %3363 = vmatpush1.bf16.msra.mxu1 %v2479_v18  ;;  %v6680_v12 = vpop.f32.mrf.mxu0  ;;  %v2335_v35 = vunpack.c.h.s8.bf16 %v1799_v51  ;;  %v2327_v60 = vunpack.c.l.s8.bf16 %v1799_v51  ;;  %v1784_v25 = vld [vmem:[%s9084_s4 + $0x8] sm:$0xff]  ;;  %v1847_v51 = vld [vmem:[%s9084_s4 + $0x200] sm:$0xff] }
 0x207   :  { %3394 = vmatprep.mubr.bf16.mxu1 %v6666_v52  ;;  %v6682_v28 = vpop.f32.mrf.mxu1  ;;  %3321 = vmatprep.subr.bf16.mxu0 %v2344_v22  ;;  %v2447_v22 = vunpack.c.h.s8.bf16 %v1855_v14  ;;  %v1848_v26 = vld [vmem:[%s9084_s4 + $0x208] sm:$0xff] }
 0x208   :  { %v1595_v2 = vmul.f32 %v1542_v20, %v1237_v57  ;;  %3364 = vmatprep.subr.bf16.mxu1 %v2472_v23  ;;  %v1197_v31 = vpop.f32.mrf.mxu0  ;;  %v2312_v23 = vunpack.c.l.s8.bf16 %v1792_v54  ;;  %v2439_v57 = vunpack.c.l.s8.bf16 %v1855_v14  ;;  %v2424_v30 = vunpack.c.l.s8.bf16 %v1848_v26  ;;  %v1895_v14 = vld [vmem:[%s9084_s4 + $0x380] sm:$0xff] }
 0x209   :  { %v1240_v33 = vpop.f32.mrf.mxu1  ;;  %3322 = vmatpush1.bf16.msra.mxu0 %v2343_v58  ;;  %v2304_v58 = vunpack.c.h.s8.bf16 %v1784_v25 }
 0x20a   :  { %v1241_v34 = vadd.f32 %v1240_v33, %v1197_v31  ;;  %3365 = vmatpush1.bf16.msra.mxu1 %v2471_v38  ;;  %3323 = vmatprep.subr.bf16.mxu0 %v2336_v50  ;;  %v1711_v42 = vadd.f32 %v1658_v3, %v1595_v2  ;;  %v1783_v38 = vld [vmem:[%s9084_s4] sm:$0xff]  ;;  %v2432_v50 = vunpack.c.h.s8.bf16 %v1848_v26  ;;  %v1840_v31 = vld [vmem:[%s9084_s4 + $0x1c8] sm:$0xff] }
 0x20b   :  { %3366 = vmatprep.subr.bf16.mxu1 %v2464_v39  ;;  %v2303_v2 = vunpack.c.h.s8.bf16 %v1783_v38  ;;  %v2296_v39 = vunpack.c.l.s8.bf16 %v1784_v25  ;;  %v1904_v33 = vld [vmem:[%s9084_s4 + $0x3c8] sm:$0xff]  ;;  %v2408_v56 = vunpack.c.l.s8.bf16 %v1840_v31 }
 0x20c   :  { %v1611_v45 = vmul.f32 %v1542_v20, %v1241_v34  ;;  %v1743_v1 = vmax.f32 %v1711_v42, 0.0  ;;  %v2319_v20 = vunpack.c.h.s8.bf16 %v1791_v63  ;;  %v2295_v34 = vunpack.c.l.s8.bf16 %v1783_v38  ;;  %v1824_v25 = vld [vmem:[%s9084_s4 + $0x148] sm:$0xff]  ;;  %v1823_v38 = vld [vmem:[%s9084_s4 + $0x140] sm:$0xff] }
 0x20d   :  { %3324 = vmatpush1.bf16.msra.mxu0 %v2335_v35  ;;  %v2423_v35 = vunpack.c.l.s8.bf16 %v1847_v51  ;;  %v2544_v42 = vunpack.c.h.s8.bf16 %v1904_v33  ;;  %v1888_v26 = vld [vmem:[%s9084_s4 + $0x348] sm:$0xff] }
 0x20e   :  { %v1727_v59 = vadd.f32 %v1658_v3, %v1611_v45  ;;  %3367 = vmatpush1.bf16.msra.mxu1 %v2463_v36  ;;  %3325 = vmatprep.subr.bf16.mxu0 %v2328_v37  ;;  %v2431_v3 = vunpack.c.h.s8.bf16 %v1847_v51  ;;  %v2416_v36 = vunpack.c.h.s8.bf16 %v1840_v31  ;;  %v1839_v37 = vld [vmem:[%s9084_s4 + $0x1c0] sm:$0xff]  ;;  %v6758_v31 = vsub.s32 7, %v6130_v29 }
 0x20f   :  { %3368 = vmatprep.subr.bf16.mxu1 %v2456_v48  ;;  %v1903_v45 = vld [vmem:[%s9084_s4 + $0x3c0] sm:$0xff]  ;;  %v2415_v48 = vunpack.c.h.s8.bf16 %v1839_v37 }
 0x210   :  { %v1759_v9 = vmax.f32 %v1727_v59, 0.0  ;;  %v2543_v54 = vunpack.c.h.s8.bf16 %v1903_v45  ;;  %v2536_v59 = vunpack.c.l.s8.bf16 %v1904_v33  ;;  %v2535_v63 = vunpack.c.l.s8.bf16 %v1903_v45  ;;  %v1887_v51 = vld [vmem:[%s9084_s4 + $0x340] sm:$0xff]  ;;  %9113 = vst [vmem:[#allocation8_spill] sm:$0xff] %v6758_v31 }
 0x211   :  { %3326 = vmatpush1.bf16.msra.mxu0 %v2327_v60  ;;  %v1832_v60 = vld [vmem:[%s9084_s4 + $0x188] sm:$0xff]  ;;  %v2504_v33 = vunpack.c.l.s8.bf16 %v1888_v26 }
 0x212   :  { %v6704_v18 = vpack.c.bf16 %v1759_v9, %v1743_v1  ;;  %3369 = vmatpush1.bf16.msra.mxu1 %v2455_v61  ;;  %3327 = vmatprep.subr.bf16.mxu0 %v2320_v62  ;;  %v1896_v61 = vld [vmem:[%s9084_s4 + $0x388] sm:$0xff]  ;;  %v2407_v62 = vunpack.c.l.s8.bf16 %v1839_v37  ;;  %v2400_v1 = vunpack.c.h.s8.bf16 %v1832_v60  ;;  %v1831_v9 = vld [vmem:[%s9084_s4 + $0x180] sm:$0xff]  ;;  %v1157_v37 = vadd.f32 %v6657_v17, %v6655_v16 }
 0x213   :  { %3370 = vmatprep.subr.bf16.mxu1 %v2448_v10  ;;  %v2528_v10 = vunpack.c.h.s8.bf16 %v1896_v61  ;;  %v1538_v16 = vrot.slane %v6511_v55, %v6758_v31 }
 0x215   :  { %3328 = vmatpush1.bf16.msra.mxu0 %v2319_v20  ;;  %v2399_v20 = vunpack.c.h.s8.bf16 %v1831_v9 }
 0x216   :  { %3371 = vmatpush1.bf16.msra.mxu1 %v2447_v22  ;;  %3329 = vmatprep.subr.bf16.mxu0 %v2312_v23  ;;  %v2527_v22 = vunpack.c.h.s8.bf16 %v1895_v14  ;;  %v2392_v23 = vunpack.c.l.s8.bf16 %v1832_v60 }
 0x217   :  { %3372 = vmatprep.subr.bf16.mxu1 %v2440_v49  ;;  %v2520_v49 = vunpack.c.l.s8.bf16 %v1896_v61 }
 0x219   :  { %3330 = vmatpush1.bf16.msra.mxu0 %v2311_v11  ;;  %v2391_v11 = vunpack.c.l.s8.bf16 %v1831_v9 }
 0x21a   :  { %3373 = vmatpush1.bf16.msra.mxu1 %v2439_v57  ;;  %3331 = vmatprep.subr.bf16.mxu0 %v2304_v58  ;;  %v2519_v57 = vunpack.c.l.s8.bf16 %v1895_v14  ;;  %v2384_v58 = vunpack.c.h.s8.bf16 %v1824_v25 }
 0x21b   :  { %3374 = vmatprep.subr.bf16.mxu1 %v2432_v50  ;;  %v2512_v50 = vunpack.c.h.s8.bf16 %v1888_v26 }
 0x21d   :  { %3332 = vmatpush1.bf16.msra.mxu0 %v2303_v2  ;;  %v2383_v2 = vunpack.c.h.s8.bf16 %v1823_v38 }
 0x21e   :  { %3375 = vmatpush1.bf16.msra.mxu1 %v2431_v3  ;;  %3333 = vmatprep.subr.bf16.mxu0 %v2296_v39  ;;  %v6755_v3 = vsub.s32 5, %v6130_v29  ;;  %v2511_v39 = vunpack.c.h.s8.bf16 %v1887_v51  ;;  %v1067_v29 = vadd.f32 %v6403_v24, %v6401_v41  ;;  %v1879_v41 = vld [vmem:[%s9084_s4 + $0x300] sm:$0xff] }
 0x21f   :  { %3376 = vmatprep.subr.bf16.mxu1 %v2424_v30  ;;  %v2376_v30 = vunpack.c.l.s8.bf16 %v1824_v25 }
 0x220   :  { %9112 = vst [vmem:[#allocation7_spill] sm:$0xff] %v6755_v3  ;;  %v1530_v45 = vrot.slane %v6511_v55, %v6755_v3  ;;  %v1646_v61 = vrot.slane %v6536_v15, %v6755_v3  ;;  %v1654_v55 = vrot.slane %v6536_v15, %v6758_v31  ;;  %v1935_v15 = vld [vmem:[%s9084_s4 + $0x4c0] sm:$0xff] }
 0x221   :  { %3334 = vmatpush1.bf16.msra.mxu0 %v2295_v34  ;;  %v1816_v34 = vld [vmem:[%s9084_s4 + $0x108] sm:$0xff] }
 0x222   :  { %3377 = vmatpush1.bf16.msra.mxu1 %v2423_v35  ;;  %3335 = vmatprep.subr.bf16.mxu0 %v2416_v36  ;;  %v1071_v35 = vadd.f32 %v6506_v47, %v6504_v53  ;;  %v1880_v36 = vld [vmem:[%s9084_s4 + $0x308] sm:$0xff]  ;;  %v1815_v53 = vld [vmem:[%s9084_s4 + $0x100] sm:$0xff]  ;;  %v1153_v47 = vadd.f32 %v6525_v6, %v6523_v5  ;;  %v1592_v60 = vmul.f32 %v1530_v45, %v1067_v29  ;;  %v2495_v5 = vunpack.c.h.s8.bf16 %v1879_v41 }
 0x223   :  { %3378 = vmatprep.subr.bf16.mxu1 %v2544_v42  ;;  %v2375_v42 = vunpack.c.l.s8.bf16 %v1823_v38  ;;  %v2496_v17 = vunpack.c.h.s8.bf16 %v1880_v36  ;;  %v2360_v6 = vunpack.c.l.s8.bf16 %v1816_v34  ;;  %v2607_v38 = vunpack.c.h.s8.bf16 %v1935_v15 }
 0x224   :  { %v1608_v24 = vmul.f32 %v1530_v45, %v1071_v35  ;;  %v1928_v35 = vld [vmem:[%s9084_s4 + $0x488] sm:$0xff] }
 0x225   :  { %3336 = vmatpush2.bf16.msra.mxu0 %v2415_v48  ;;  %v2503_v48 = vunpack.c.l.s8.bf16 %v1887_v51  ;;  %v6800_v51 = vpop.f32.mrf.mxu0  ;;  %v1992_v45 = vld [vmem:[%s9084_s4 + $0x688] sm:$0xff] }
 0x226   :  { %3379 = vmatpush2.bf16.msra.mxu1 %v2543_v54  ;;  %3337 = vmatprep.subr.bf16.mxu0 %v2408_v56  ;;  %v2368_v54 = vunpack.c.h.s8.bf16 %v1816_v34  ;;  %v1610_v56 = vmul.f32 %v1538_v16, %v1157_v37  ;;  %v1724_v9 = vadd.f32 %v1646_v61, %v1608_v24  ;;  %v1927_v24 = vld [vmem:[%s9084_s4 + $0x480] sm:$0xff] }
 0x227   :  { %3380 = vmatprep.subr.bf16.mxu1 %v2536_v59  ;;  %v2367_v59 = vunpack.c.h.s8.bf16 %v1815_v53 }
 0x228   :  { %v1726_v14 = vadd.f32 %v1654_v55, %v1610_v56 }
 0x229   :  { %3338 = vmatpush2.bf16.msra.mxu0 %v2407_v62  ;;  %v1594_v62 = vmul.f32 %v1538_v16, %v1153_v47 }
 0x22a   :  { %3381 = vmatpush2.bf16.msra.mxu1 %v2535_v63  ;;  %3339 = vmatprep.subr.bf16.mxu0 %v2400_v1  ;;  %v2488_v63 = vunpack.c.l.s8.bf16 %v1880_v36  ;;  %v1936_v1 = vld [vmem:[%s9084_s4 + $0x4c8] sm:$0xff] }
 0x22b   :  { %3382 = vmatprep.subr.bf16.mxu1 %v2528_v10  ;;  %v2000_v10 = vld [vmem:[%s9084_s4 + $0x6c8] sm:$0xff]  ;;  %v1710_v25 = vadd.f32 %v1654_v55, %v1594_v62  ;;  %v2600_v34 = vunpack.c.l.s8.bf16 %v1936_v1  ;;  %v2591_v55 = vunpack.c.h.s8.bf16 %v1927_v24 }
 0x22c   :  { %v2736_v26 = vunpack.c.h.s8.bf16 %v2000_v10  ;;  %v2728_v29 = vunpack.c.l.s8.bf16 %v2000_v10 }
 0x22d   :  { %3340 = vmatpush2.bf16.msra.mxu0 %v2399_v20  ;;  %v2359_v20 = vunpack.c.l.s8.bf16 %v1815_v53  ;;  %v2599_v53 = vunpack.c.l.s8.bf16 %v1935_v15 }
 0x22e   :  { %3383 = vmatpush2.bf16.msra.mxu1 %v2527_v22  ;;  %3341 = vmatprep.subr.bf16.mxu0 %v2392_v23  ;;  %v1708_v22 = vadd.f32 %v1646_v61, %v1592_v60  ;;  %v2487_v23 = vunpack.c.l.s8.bf16 %v1879_v41  ;;  %v2592_v41 = vunpack.c.h.s8.bf16 %v1928_v35  ;;  %v2720_v60 = vunpack.c.h.s8.bf16 %v1992_v45  ;;  %v1991_v61 = vld [vmem:[%s9084_s4 + $0x680] sm:$0xff] }
 0x22f   :  { %3384 = vmatprep.subr.bf16.mxu1 %v2520_v49  ;;  %v2608_v49 = vunpack.c.h.s8.bf16 %v1936_v1  ;;  %v2584_v1 = vunpack.c.l.s8.bf16 %v1928_v35  ;;  %v2711_v15 = vunpack.c.l.s8.bf16 %v1991_v61  ;;  %v1912_v35 = vld [vmem:[%s9084_s4 + $0x408] sm:$0xff] }
 0x231   :  { %3342 = vmatpush2.bf16.msra.mxu0 %v2391_v11  ;;  %v1999_v11 = vld [vmem:[%s9084_s4 + $0x6c0] sm:$0xff] }
 0x232   :  { %3385 = vmatpush2.bf16.msra.mxu1 %v2519_v57  ;;  %3343 = vmatprep.subr.bf16.mxu0 %v2384_v58  ;;  %v1756_v57 = vmax.f32 %v1724_v9, 0.0  ;;  %v1758_v58 = vmax.f32 %v1726_v14, 0.0  ;;  %v2712_v14 = vunpack.c.l.s8.bf16 %v1992_v45  ;;  %v2560_v45 = vunpack.c.h.s8.bf16 %v1912_v35 }
 0x233   :  { %3386 = vmatprep.subr.bf16.mxu1 %v2512_v50  ;;  %v1740_v50 = vmax.f32 %v1708_v22, 0.0  ;;  %v1984_v22 = vld [vmem:[%s9084_s4 + $0x648] sm:$0xff] }
 0x235   :  { %3344 = vmatpush2.bf16.msra.mxu0 %v2383_v2  ;;  %v6802_v2 = vpop.f32.mrf.mxu1  ;;  %v6809_v36 = vpack.c.bf16 %v1756_v57, %v1740_v50 }
 0x236   :  { %3387 = vmatpush2.bf16.msra.mxu1 %v2511_v39  ;;  %3345 = vmatprep.subr.bf16.mxu0 %v2376_v30  ;;  %v2735_v39 = vunpack.c.h.s8.bf16 %v1999_v11  ;;  %v1742_v30 = vmax.f32 %v1710_v25, 0.0 }
 0x237   :  { %3388 = vmatprep.subr.bf16.mxu1 %v2504_v33  ;;  %v1550_v33 = vrot.slane %v6653_v4, %v6268_v46 }
 0x239   :  { %3346 = vmatpush2.bf16.msra.mxu0 %v2375_v42 }
 0x23a   :  { %3389 = vmatpush2.bf16.msra.mxu1 %v2503_v48  ;;  %3347 = vmatprep.subr.bf16.mxu0 %v2368_v54  ;;  %v6815_v48 = vpack.c.bf16 %v1758_v58, %v1742_v30  ;;  %v2704_v58 = vunpack.c.h.s8.bf16 %v1984_v22 }
 0x23b   :  { %3390 = vmatprep.subr.bf16.mxu1 %v2496_v17  ;;  %v2727_v17 = vunpack.c.l.s8.bf16 %v1999_v11 }
 0x23d   :  { %3348 = vmatpush2.bf16.msra.mxu0 %v2367_v59  ;;  %v1666_v59 = vrot.slane %v6671_v27, %v6268_v46 }
 0x23e   :  { %3391 = vmatpush2.bf16.msra.mxu1 %v2495_v5  ;;  %3349 = vmatprep.subr.bf16.mxu0 %v2360_v6 }
 0x23f   :  { %3392 = vmatprep.subr.bf16.mxu1 %v2488_v63  ;;  %v2719_v63 = vunpack.c.h.s8.bf16 %v1991_v61  ;;  %v2032_v61 = vld [vmem:[%s9084_s4 + $0x7c8] sm:$0xff] }
 0x241   :  { %3350 = vmatpush2.bf16.msra.mxu0 %v2359_v20  ;;  %v1920_v20 = vld [vmem:[%s9084_s4 + $0x448] sm:$0xff] }
 0x242   :  { %3393 = vmatpush2.bf16.msra.mxu1 %v2487_v23  ;;  %3405 = vmatprep.subr.bf16.mxu0 %v2608_v49  ;;  %v2583_v49 = vunpack.c.l.s8.bf16 %v1927_v24  ;;  %v2576_v25 = vunpack.c.h.s8.bf16 %v1920_v20 }
 0x243   :  { %3448 = vmatprep.subr.bf16.mxu1 %v2736_v26  ;;  %v1919_v26 = vld [vmem:[%s9084_s4 + $0x440] sm:$0xff] }
 0x244   :  { %v1279_v37 = vpop.f32.mrf.mxu0  ;;  %3352 = vmatmul.mubr.bf16.vlgmr.msra.gmra.mxu0 %v6193_v21 }
 0x245   :  { %v1322_v42 = vpop.f32.mrf.mxu1  ;;  %3395 = vmatmul.mubr.bf16.vlgmr.msra.gmra.mxu1 %v6310_v32  ;;  %3406 = vmatpush1.bf16.msra.mxu0 %v2607_v38  ;;  %v1983_v38 = vld [vmem:[%s9084_s4 + $0x640] sm:$0xff] }
 0x246   :  { %v1323_v54 = vadd.f32 %v1322_v42, %v1279_v37  ;;  %3437 = vmatprep.mubr.bf16.mxu0 %v6809_v36  ;;  %3449 = vmatpush1.bf16.msra.mxu1 %v2735_v39  ;;  %v6819_v47 = vpop.f32.mrf.mxu0  ;;  %v2575_v39 = vunpack.c.h.s8.bf16 %v1919_v26  ;;  %v2703_v30 = vunpack.c.h.s8.bf16 %v1983_v38  ;;  %v1976_v37 = vld [vmem:[%s9084_s4 + $0x608] sm:$0xff]  ;;  %v2567_v42 = vunpack.c.l.s8.bf16 %v1919_v26  ;;  %v1959_v26 = vld [vmem:[%s9084_s4 + $0x580] sm:$0xff] }
 0x247   :  { %v6821_v16 = vpop.f32.mrf.mxu1  ;;  %3480 = vmatprep.mubr.bf16.mxu1 %v6815_v48  ;;  %3407 = vmatprep.subr.bf16.mxu0 %v2600_v34  ;;  %v2696_v34 = vunpack.c.l.s8.bf16 %v1984_v22  ;;  %v1960_v22 = vld [vmem:[%s9084_s4 + $0x588] sm:$0xff] }
 0x248   :  { %v1597_v56 = vmul.f32 %v1550_v33, %v1323_v54  ;;  %v1283_v5 = vpop.f32.mrf.mxu0  ;;  %3450 = vmatprep.subr.bf16.mxu1 %v2728_v29  ;;  %v2695_v29 = vunpack.c.l.s8.bf16 %v1983_v38  ;;  %v1911_v54 = vld [vmem:[%s9084_s4 + $0x400] sm:$0xff] }
 0x249   :  { %v1326_v6 = vpop.f32.mrf.mxu1  ;;  %3408 = vmatpush1.bf16.msra.mxu0 %v2599_v53  ;;  %v2688_v53 = vunpack.c.h.s8.bf16 %v1976_v37 }
 0x24a   :  { %v1327_v62 = vadd.f32 %v1326_v6, %v1283_v5  ;;  %3451 = vmatpush1.bf16.msra.mxu1 %v2727_v17  ;;  %3409 = vmatprep.subr.bf16.mxu0 %v2592_v41  ;;  %v1713_v9 = vadd.f32 %v1666_v59, %v1597_v56  ;;  %v1975_v17 = vld [vmem:[%s9084_s4 + $0x600] sm:$0xff]  ;;  %v2559_v41 = vunpack.c.h.s8.bf16 %v1911_v54  ;;  %v2552_v56 = vunpack.c.l.s8.bf16 %v1912_v35 }
 0x24b   :  { %3452 = vmatprep.subr.bf16.mxu1 %v2720_v60  ;;  %v2687_v24 = vunpack.c.h.s8.bf16 %v1975_v17  ;;  %v1968_v60 = vld [vmem:[%s9084_s4 + $0x5c8] sm:$0xff]  ;;  %v2551_v5 = vunpack.c.l.s8.bf16 %v1911_v54  ;;  %v2679_v6 = vunpack.c.l.s8.bf16 %v1975_v17  ;;  %v2647_v35 = vunpack.c.l.s8.bf16 %v1959_v26  ;;  %v2015_v54 = vld [vmem:[%s9084_s4 + $0x740] sm:$0xff]  ;;  %v1285_v17 = vpop.f32.mrf.mxu0 }
 0x24c   :  { %v1613_v10 = vmul.f32 %v1550_v33, %v1327_v62  ;;  %v1745_v11 = vmax.f32 %v1713_v9, 0.0  ;;  %v2568_v33 = vunpack.c.l.s8.bf16 %v1920_v20  ;;  %v2672_v62 = vunpack.c.h.s8.bf16 %v1968_v60 }
 0x24d   :  { %3410 = vmatpush1.bf16.msra.mxu0 %v2591_v55  ;;  %v1967_v55 = vld [vmem:[%s9084_s4 + $0x5c0] sm:$0xff]  ;;  %v2792_v20 = vunpack.c.l.s8.bf16 %v2032_v61 }
 0x24e   :  { %v1729_v23 = vadd.f32 %v1666_v59, %v1613_v10  ;;  %3453 = vmatpush1.bf16.msra.mxu1 %v2719_v63  ;;  %3411 = vmatprep.subr.bf16.mxu0 %v2584_v1  ;;  %v2680_v59 = vunpack.c.l.s8.bf16 %v1976_v37  ;;  %v2800_v63 = vunpack.c.h.s8.bf16 %v2032_v61  ;;  %v2031_v1 = vld [vmem:[%s9084_s4 + $0x7c0] sm:$0xff]  ;;  %v2671_v9 = vunpack.c.h.s8.bf16 %v1967_v55 }
 0x24f   :  { %3454 = vmatprep.subr.bf16.mxu1 %v2712_v14  ;;  %v2799_v10 = vunpack.c.h.s8.bf16 %v2031_v1  ;;  %v2664_v14 = vunpack.c.l.s8.bf16 %v1968_v60  ;;  %v1944_v60 = vld [vmem:[%s9084_s4 + $0x508] sm:$0xff]  ;;  %v1243_v61 = vadd.f32 %v6802_v2, %v6800_v51  ;;  %v1943_v51 = vld [vmem:[%s9084_s4 + $0x500] sm:$0xff]  ;;  %v1325_v2 = vadd.f32 %v6821_v16, %v6819_v47 }
 0x250   :  { %v1761_v57 = vmax.f32 %v1729_v23, 0.0  ;;  %v2024_v23 = vld [vmem:[%s9084_s4 + $0x788] sm:$0xff]  ;;  %v2616_v16 = vunpack.c.l.s8.bf16 %v1944_v60 }
 0x251   :  { %3412 = vmatpush1.bf16.msra.mxu0 %v2583_v49  ;;  %v2663_v49 = vunpack.c.l.s8.bf16 %v1967_v55  ;;  %v1239_v55 = vadd.f32 %v6682_v28, %v6680_v12  ;;  %v2007_v12 = vld [vmem:[%s9084_s4 + $0x700] sm:$0xff] }
 0x252   :  { %v6844_v50 = vpack.c.bf16 %v1761_v57, %v1745_v11  ;;  %3455 = vmatpush1.bf16.msra.mxu1 %v2711_v15  ;;  %3413 = vmatprep.subr.bf16.mxu0 %v2576_v25  ;;  %v2791_v15 = vunpack.c.l.s8.bf16 %v2031_v1  ;;  %v2656_v25 = vunpack.c.h.s8.bf16 %v1960_v22  ;;  %v2784_v11 = vunpack.c.h.s8.bf16 %v2024_v23  ;;  %v2023_v57 = vld [vmem:[%s9084_s4 + $0x780] sm:$0xff] }
 0x253   :  { %3456 = vmatprep.subr.bf16.mxu1 %v2704_v58  ;;  %v2655_v58 = vunpack.c.h.s8.bf16 %v1959_v26  ;;  %v2783_v38 = vunpack.c.h.s8.bf16 %v2023_v57  ;;  %v2775_v37 = vunpack.c.l.s8.bf16 %v2023_v57  ;;  %v2759_v1 = vunpack.c.l.s8.bf16 %v2015_v54 }
 0x254   :  { %v2751_v47 = vunpack.c.h.s8.bf16 %v2007_v12 }
 0x255   :  { %3414 = vmatpush1.bf16.msra.mxu0 %v2575_v39  ;;  %v2648_v39 = vunpack.c.l.s8.bf16 %v1960_v22  ;;  %v2623_v22 = vunpack.c.h.s8.bf16 %v1943_v51 }
 0x256   :  { %3457 = vmatpush1.bf16.msra.mxu1 %v2703_v30  ;;  %3415 = vmatprep.subr.bf16.mxu0 %v2568_v33  ;;  %v2776_v30 = vunpack.c.l.s8.bf16 %v2024_v23  ;;  %v1952_v33 = vld [vmem:[%s9084_s4 + $0x548] sm:$0xff] }
 0x257   :  { %3458 = vmatprep.subr.bf16.mxu1 %v2696_v34  ;;  %v2016_v34 = vld [vmem:[%s9084_s4 + $0x748] sm:$0xff] }
 0x259   :  { %3416 = vmatpush1.bf16.msra.mxu0 %v2567_v42  ;;  %v2640_v42 = vunpack.c.h.s8.bf16 %v1952_v33 }
 0x25a   :  { %3459 = vmatpush1.bf16.msra.mxu1 %v2695_v29  ;;  %3417 = vmatprep.subr.bf16.mxu0 %v2560_v45  ;;  %v1951_v29 = vld [vmem:[%s9084_s4 + $0x540] sm:$0xff]  ;;  %v2768_v45 = vunpack.c.h.s8.bf16 %v2016_v34 }
 0x25b   :  { %3460 = vmatprep.subr.bf16.mxu1 %v2688_v53  ;;  %v2639_v53 = vunpack.c.h.s8.bf16 %v1951_v29 }
 0x25d   :  { %3418 = vmatpush1.bf16.msra.mxu0 %v2559_v41  ;;  %v1328_v41 = vpop.f32.mrf.mxu1 }
 0x25e   :  { %3461 = vmatpush1.bf16.msra.mxu1 %v2687_v24  ;;  %3419 = vmatprep.subr.bf16.mxu0 %v2552_v56  ;;  %v2767_v24 = vunpack.c.h.s8.bf16 %v2015_v54  ;;  %v2632_v56 = vunpack.c.l.s8.bf16 %v1952_v33  ;;  %v2743_v33 = vunpack.c.l.s8.bf16 %v2007_v12 }
 0x25f   :  { %3462 = vmatprep.subr.bf16.mxu1 %v2680_v59  ;;  %v2760_v59 = vunpack.c.l.s8.bf16 %v2016_v34 }
 0x261   :  { %3420 = vmatpush1.bf16.msra.mxu0 %v2551_v5  ;;  %v2008_v5 = vld [vmem:[%s9084_s4 + $0x708] sm:$0xff] }
 0x262   :  { %3463 = vmatpush1.bf16.msra.mxu1 %v2679_v6  ;;  %3421 = vmatprep.subr.bf16.mxu0 %v2672_v62  ;;  %v1329_v6 = vadd.f32 %v1328_v41, %v1285_v17  ;;  %v2631_v62 = vunpack.c.l.s8.bf16 %v1951_v29  ;;  %v2744_v26 = vunpack.c.l.s8.bf16 %v2008_v5  ;;  %v2127_v29 = vld [vmem:[%s9084_s4 + $0xac0] sm:$0xff] }
 0x263   :  { %3464 = vmatprep.subr.bf16.mxu1 %v2800_v63  ;;  %v1546_v63 = vrot.slane %v6653_v4, %v6605_v7  ;;  %v2991_v41 = vunpack.c.h.s8.bf16 %v2127_v29 }
 0x265   :  { %3422 = vmatpush2.bf16.msra.mxu0 %v2671_v9  ;;  %v2624_v9 = vunpack.c.h.s8.bf16 %v1944_v60  ;;  %v1612_v28 = vmul.f32 %v1546_v63, %v1243_v61  ;;  %v1596_v23 = vmul.f32 %v1546_v63, %v1239_v55  ;;  %v2056_v60 = vld [vmem:[%s9084_s4 + $0x888] sm:$0xff] }
 0x266   :  { %3465 = vmatpush2.bf16.msra.mxu1 %v2799_v10  ;;  %3423 = vmatprep.subr.bf16.mxu0 %v2664_v14  ;;  %v1554_v10 = vrot.slane %v6653_v4, %v6608_v13  ;;  %v2752_v14 = vunpack.c.h.s8.bf16 %v2008_v5  ;;  %v2120_v55 = vld [vmem:[%s9084_s4 + $0xa88] sm:$0xff] }
 0x267   :  { %3466 = vmatprep.subr.bf16.mxu1 %v2792_v20 }
 0x268   :  { %v1614_v20 = vmul.f32 %v1554_v10, %v1329_v6 }
 0x269   :  { %3424 = vmatpush2.bf16.msra.mxu0 %v2663_v49  ;;  %v1662_v49 = vrot.slane %v6671_v27, %v6605_v7  ;;  %v2052_v7 = vld [vmem:[%s9084_s4 + $0x868] sm:$0xff] }
 0x26a   :  { %3467 = vmatpush2.bf16.msra.mxu1 %v2791_v15  ;;  %3425 = vmatprep.subr.bf16.mxu0 %v2656_v25  ;;  %v1598_v15 = vmul.f32 %v1554_v10, %v1325_v2  ;;  %v1670_v25 = vrot.slane %v6671_v27, %v6608_v13  ;;  %v2983_v2 = vunpack.c.l.s8.bf16 %v2127_v29  ;;  %v2848_v10 = vunpack.c.h.s8.bf16 %v2056_v60  ;;  %v2111_v29 = vld [vmem:[%s9084_s4 + $0xa40] sm:$0xff] }
 0x26b   :  { %3468 = vmatprep.subr.bf16.mxu1 %v2784_v11  ;;  %v2064_v11 = vld [vmem:[%s9084_s4 + $0x8c8] sm:$0xff]  ;;  %v1728_v57 = vadd.f32 %v1662_v49, %v1612_v28  ;;  %v1674_v28 = vrot.slane %v6671_v27, %v6385_v8 }
 0x26c   :  { %v2864_v34 = vunpack.c.h.s8.bf16 %v2064_v11 }
 0x26d   :  { %3426 = vmatpush2.bf16.msra.mxu0 %v2655_v58  ;;  %v2128_v58 = vld [vmem:[%s9084_s4 + $0xac8] sm:$0xff] }
 0x26e   :  { %3469 = vmatpush2.bf16.msra.mxu1 %v2783_v38  ;;  %3427 = vmatprep.subr.bf16.mxu0 %v2648_v39  ;;  %v1730_v38 = vadd.f32 %v1670_v25, %v1614_v20  ;;  %v2615_v39 = vunpack.c.l.s8.bf16 %v1943_v51  ;;  %v2976_v20 = vunpack.c.h.s8.bf16 %v2120_v55 }
 0x26f   :  { %3470 = vmatprep.subr.bf16.mxu1 %v2776_v30  ;;  %v1712_v30 = vadd.f32 %v1662_v49, %v1596_v23 }
 0x270   :  { %v1762_v54 = vmax.f32 %v1730_v38, 0.0 }
 0x271   :  { %3428 = vmatpush2.bf16.msra.mxu0 %v2647_v35  ;;  %v2063_v35 = vld [vmem:[%s9084_s4 + $0x8c0] sm:$0xff]  ;;  %v1744_v17 = vmax.f32 %v1712_v30, 0.0 }
 0x272   :  { %3471 = vmatpush2.bf16.msra.mxu1 %v2775_v37  ;;  %3429 = vmatprep.subr.bf16.mxu0 %v2640_v42  ;;  %v1714_v37 = vadd.f32 %v1670_v25, %v1598_v15  ;;  %v2992_v42 = vunpack.c.h.s8.bf16 %v2128_v58  ;;  %v2840_v25 = vunpack.c.l.s8.bf16 %v2056_v60  ;;  %v2951_v60 = vunpack.c.l.s8.bf16 %v2111_v29 }
 0x273   :  { %3472 = vmatprep.subr.bf16.mxu1 %v2768_v45  ;;  %v1760_v45 = vmax.f32 %v1728_v57, 0.0  ;;  %v2048_v57 = vld [vmem:[%s9084_s4 + $0x848] sm:$0xff] }
 0x275   :  { %3430 = vmatpush2.bf16.msra.mxu0 %v2639_v53  ;;  %v2863_v53 = vunpack.c.h.s8.bf16 %v2063_v35  ;;  %v6937_v61 = vpack.c.bf16 %v1760_v45, %v1744_v17  ;;  %v2824_v17 = vunpack.c.l.s8.bf16 %v2048_v57 }
 0x276   :  { %3473 = vmatpush2.bf16.msra.mxu1 %v2767_v24  ;;  %3431 = vmatprep.subr.bf16.mxu0 %v2632_v56  ;;  %v1746_v24 = vmax.f32 %v1714_v37, 0.0  ;;  %v1558_v56 = vrot.slane %v6653_v4, %v6385_v8 }
 0x277   :  { %3474 = vmatprep.subr.bf16.mxu1 %v2760_v59  ;;  %v2856_v59 = vunpack.c.l.s8.bf16 %v2064_v11  ;;  %v2968_v11 = vunpack.c.l.s8.bf16 %v2120_v55  ;;  %v2103_v55 = vld [vmem:[%s9084_s4 + $0xa00] sm:$0xff] }
 0x278   :  { %v6943_v63 = vpack.c.bf16 %v1762_v54, %v1746_v24  ;;  %v2040_v24 = vld [vmem:[%s9084_s4 + $0x808] sm:$0xff] }
 0x279   :  { %3432 = vmatpush2.bf16.msra.mxu0 %v2631_v62  ;;  %v2984_v62 = vunpack.c.l.s8.bf16 %v2128_v58  ;;  %v2112_v58 = vld [vmem:[%s9084_s4 + $0xa48] sm:$0xff] }
 0x27a   :  { %3475 = vmatpush2.bf16.msra.mxu1 %v2759_v1  ;;  %3433 = vmatprep.subr.bf16.mxu0 %v2624_v9  ;;  %v2855_v1 = vunpack.c.l.s8.bf16 %v2063_v35 }
 0x27b   :  { %3476 = vmatprep.subr.bf16.mxu1 %v2752_v14  ;;  %v2055_v14 = vld [vmem:[%s9084_s4 + $0x880] sm:$0xff] }
 0x27d   :  { %3434 = vmatpush2.bf16.msra.mxu0 %v2623_v22  ;;  %v2119_v22 = vld [vmem:[%s9084_s4 + $0xa80] sm:$0xff] }
 0x27e   :  { %3477 = vmatpush2.bf16.msra.mxu1 %v2751_v47  ;;  %3435 = vmatprep.subr.bf16.mxu0 %v2616_v16  ;;  %v2847_v16 = vunpack.c.h.s8.bf16 %v2055_v14  ;;  %v2975_v15 = vunpack.c.h.s8.bf16 %v2119_v22  ;;  %v2967_v30 = vunpack.c.l.s8.bf16 %v2119_v22 }
 0x27f   :  { %3478 = vmatprep.subr.bf16.mxu1 %v2744_v26 }
 0x281   :  { %3436 = vmatpush2.bf16.msra.mxu0 %v2615_v39  ;;  %v2839_v39 = vunpack.c.l.s8.bf16 %v2055_v14  ;;  %v2096_v14 = vld [vmem:[%s9084_s4 + $0x9c8] sm:$0xff] }
 0x282   :  { %3479 = vmatpush2.bf16.msra.mxu1 %v2743_v33  ;;  %3491 = vmatprep.subr.bf16.mxu0 %v2864_v34  ;;  %v2832_v33 = vunpack.c.h.s8.bf16 %v2048_v57  ;;  %v2047_v34 = vld [vmem:[%s9084_s4 + $0x840] sm:$0xff]  ;;  %v2928_v22 = vunpack.c.h.s8.bf16 %v2096_v14 }
 0x283   :  { %3534 = vmatprep.subr.bf16.mxu1 %v2992_v42  ;;  %v2960_v42 = vunpack.c.h.s8.bf16 %v2112_v58  ;;  %v2831_v54 = vunpack.c.h.s8.bf16 %v2047_v34 }
 0x284   :  { %v1365_v5 = vpop.f32.mrf.mxu0  ;;  %3438 = vmatmul.mubr.bf16.vlgmr.msra.gmra.mxu0 %v6427_v0 }
 0x285   :  { %v1408_v6 = vpop.f32.mrf.mxu1  ;;  %3481 = vmatmul.mubr.bf16.vlgmr.msra.gmra.mxu1 %v6554_v44  ;;  %3492 = vmatpush1.bf16.msra.mxu0 %v2863_v53  ;;  %v2959_v53 = vunpack.c.h.s8.bf16 %v2111_v29  ;;  %v2080_v29 = vld [vmem:[%s9084_s4 + $0x948] sm:$0xff] }
 0x286   :  { %v1409_v4 = vadd.f32 %v1408_v6, %v1365_v5  ;;  %3523 = vmatprep.mubr.bf16.mxu0 %v6937_v61  ;;  %3535 = vmatpush1.bf16.msra.mxu1 %v2991_v41  ;;  %v6947_v9 = vpop.f32.mrf.mxu0  ;;  %v2952_v41 = vunpack.c.l.s8.bf16 %v2112_v58  ;;  %v2816_v5 = vunpack.c.h.s8.bf16 %v2040_v24  ;;  %v2039_v6 = vld [vmem:[%s9084_s4 + $0x800] sm:$0xff] }
 0x287   :  { %v6949_v51 = vpop.f32.mrf.mxu1  ;;  %3566 = vmatprep.mubr.bf16.mxu1 %v6943_v63  ;;  %3493 = vmatprep.subr.bf16.mxu0 %v2856_v59  ;;  %v2823_v59 = vunpack.c.l.s8.bf16 %v2047_v34 }
 0x288   :  { %v1599_v12 = vmul.f32 %v1558_v56, %v1409_v4  ;;  %v1369_v23 = vpop.f32.mrf.mxu0  ;;  %3536 = vmatprep.subr.bf16.mxu1 %v2984_v62  ;;  %v2815_v4 = vunpack.c.h.s8.bf16 %v2039_v6 }
 0x289   :  { %v1412_v49 = vpop.f32.mrf.mxu1  ;;  %3494 = vmatpush1.bf16.msra.mxu0 %v2855_v1  ;;  %v2943_v1 = vunpack.c.h.s8.bf16 %v2103_v55 }
 0x28a   :  { %v1413_v47 = vadd.f32 %v1412_v49, %v1369_v23  ;;  %3537 = vmatpush1.bf16.msra.mxu1 %v2983_v2  ;;  %3495 = vmatprep.subr.bf16.mxu0 %v2848_v10  ;;  %v1715_v26 = vadd.f32 %v1674_v28, %v1599_v12  ;;  %v2808_v2 = vunpack.c.l.s8.bf16 %v2040_v24  ;;  %v2160_v12 = vld [vmem:[%s9084_s4 + $0xbc8] sm:$0xff]  ;;  %v2095_v23 = vld [vmem:[%s9084_s4 + $0x9c0] sm:$0xff] }
 0x28b   :  { %3538 = vmatprep.subr.bf16.mxu1 %v2976_v20  ;;  %v2935_v20 = vunpack.c.l.s8.bf16 %v2103_v55  ;;  %v3056_v49 = vunpack.c.h.s8.bf16 %v2160_v12  ;;  %v2919_v57 = vunpack.c.l.s8.bf16 %v2095_v23  ;;  %v2079_v24 = vld [vmem:[%s9084_s4 + $0x940] sm:$0xff]  ;;  %v2888_v55 = vunpack.c.l.s8.bf16 %v2080_v29 }
 0x28c   :  { %v1615_v27 = vmul.f32 %v1558_v56, %v1413_v47  ;;  %v1747_v35 = vmax.f32 %v1715_v26, 0.0  ;;  %v2104_v56 = vld [vmem:[%s9084_s4 + $0xa08] sm:$0xff]  ;;  %v2159_v47 = vld [vmem:[%s9084_s4 + $0xbc0] sm:$0xff]  ;;  %v3048_v26 = vunpack.c.l.s8.bf16 %v2160_v12  ;;  %v1411_v12 = vadd.f32 %v6949_v51, %v6947_v9 }
 0x28d   :  { %3496 = vmatpush1.bf16.msra.mxu0 %v2847_v16  ;;  %v2944_v62 = vunpack.c.h.s8.bf16 %v2104_v56  ;;  %v2936_v10 = vunpack.c.l.s8.bf16 %v2104_v56  ;;  %v2927_v16 = vunpack.c.h.s8.bf16 %v2095_v23  ;;  %v3047_v58 = vunpack.c.l.s8.bf16 %v2159_v47  ;;  %v2135_v9 = vld [vmem:[%s9084_s4 + $0xb00] sm:$0xff] }
 0x28e   :  { %v1731_v38 = vadd.f32 %v1674_v28, %v1615_v27  ;;  %3539 = vmatpush1.bf16.msra.mxu1 %v2975_v15  ;;  %3497 = vmatprep.subr.bf16.mxu0 %v2840_v25  ;;  %v2807_v28 = vunpack.c.l.s8.bf16 %v2039_v6  ;;  %v3055_v15 = vunpack.c.h.s8.bf16 %v2159_v47  ;;  %v2920_v25 = vunpack.c.l.s8.bf16 %v2096_v14  ;;  %v2088_v27 = vld [vmem:[%s9084_s4 + $0x988] sm:$0xff] }
 0x28f   :  { %3540 = vmatprep.subr.bf16.mxu1 %v2968_v11  ;;  %v2152_v11 = vld [vmem:[%s9084_s4 + $0xb88] sm:$0xff]  ;;  %v2895_v6 = vunpack.c.h.s8.bf16 %v2079_v24  ;;  %v2887_v14 = vunpack.c.l.s8.bf16 %v2079_v24 }
 0x290   :  { %v1763_v37 = vmax.f32 %v1731_v38, 0.0  ;;  %v2912_v38 = vunpack.c.h.s8.bf16 %v2088_v27 }
 0x291   :  { %3498 = vmatpush1.bf16.msra.mxu0 %v2839_v39  ;;  %v2087_v39 = vld [vmem:[%s9084_s4 + $0x980] sm:$0xff] }
 0x292   :  { %v6972_v45 = vpack.c.bf16 %v1763_v37, %v1747_v35  ;;  %3541 = vmatpush1.bf16.msra.mxu1 %v2967_v30  ;;  %3499 = vmatprep.subr.bf16.mxu0 %v2832_v33  ;;  %v3040_v30 = vunpack.c.h.s8.bf16 %v2152_v11  ;;  %v2151_v33 = vld [vmem:[%s9084_s4 + $0xb80] sm:$0xff]  ;;  %v2911_v34 = vunpack.c.h.s8.bf16 %v2087_v39  ;;  %v2904_v37 = vunpack.c.l.s8.bf16 %v2088_v27 }
 0x293   :  { %3542 = vmatprep.subr.bf16.mxu1 %v2960_v42  ;;  %v3039_v35 = vunpack.c.h.s8.bf16 %v2151_v33  ;;  %v3032_v42 = vunpack.c.l.s8.bf16 %v2152_v11  ;;  %v3007_v27 = vunpack.c.h.s8.bf16 %v2135_v9 }
 0x295   :  { %3500 = vmatpush1.bf16.msra.mxu0 %v2831_v54  ;;  %v2144_v54 = vld [vmem:[%s9084_s4 + $0xb48] sm:$0xff] }
 0x296   :  { %3543 = vmatpush1.bf16.msra.mxu1 %v2959_v53  ;;  %3501 = vmatprep.subr.bf16.mxu0 %v2824_v17  ;;  %v2903_v53 = vunpack.c.l.s8.bf16 %v2087_v39  ;;  %v3031_v17 = vunpack.c.l.s8.bf16 %v2151_v33  ;;  %v3024_v56 = vunpack.c.h.s8.bf16 %v2144_v54  ;;  %v2256_v39 = vld [vmem:[%s9084_s4 + $0xec8] sm:$0xff] }
 0x297   :  { %3544 = vmatprep.subr.bf16.mxu1 %v2952_v41  ;;  %v2896_v41 = vunpack.c.h.s8.bf16 %v2080_v29  ;;  %v2255_v29 = vld [vmem:[%s9084_s4 + $0xec0] sm:$0xff] }
 0x299   :  { %3502 = vmatpush1.bf16.msra.mxu0 %v2823_v59  ;;  %v2143_v59 = vld [vmem:[%s9084_s4 + $0xb40] sm:$0xff] }
 0x29a   :  { %3545 = vmatpush1.bf16.msra.mxu1 %v2951_v60  ;;  %3503 = vmatprep.subr.bf16.mxu0 %v2816_v5  ;;  %v1371_v60 = vpop.f32.mrf.mxu0  ;;  %v1414_v5 = vpop.f32.mrf.mxu1 }
 0x29b   :  { %3546 = vmatprep.subr.bf16.mxu1 %v2944_v62  ;;  %v3023_v62 = vunpack.c.h.s8.bf16 %v2143_v59 }
 0x29d   :  { %3504 = vmatpush1.bf16.msra.mxu0 %v2815_v4  ;;  %v3016_v4 = vunpack.c.l.s8.bf16 %v2144_v54 }
 0x29e   :  { %3547 = vmatpush1.bf16.msra.mxu1 %v2943_v1  ;;  %3505 = vmatprep.subr.bf16.mxu0 %v2808_v2  ;;  %v2072_v1 = vld [vmem:[%s9084_s4 + $0x908] sm:$0xff]  ;;  %v1415_v2 = vadd.f32 %v1414_v5, %v1371_v60 }
 0x29f   :  { %3548 = vmatprep.subr.bf16.mxu1 %v2936_v10  ;;  %v2136_v10 = vld [vmem:[%s9084_s4 + $0xb08] sm:$0xff]  ;;  %v2880_v23 = vunpack.c.h.s8.bf16 %v2072_v1  ;;  %v2872_v11 = vunpack.c.l.s8.bf16 %v2072_v1 }
 0x2a0   :  { %v3008_v47 = vunpack.c.h.s8.bf16 %v2136_v10 }
 0x2a1   :  { %3506 = vmatpush1.bf16.msra.mxu0 %v2807_v28  ;;  %v7033_v28 = vld [vmem:[%s9082_s2 + $0x8] sm:$0xff] }
 0x2a2   :  { %3549 = vmatpush1.bf16.msra.mxu1 %v2935_v20  ;;  %3507 = vmatprep.subr.bf16.mxu0 %v2928_v22  ;;  %v1562_v20 = vrot.slane %v7033_v28, %v6755_v3  ;;  %v3015_v22 = vunpack.c.l.s8.bf16 %v2143_v59  ;;  %v2184_v59 = vld [vmem:[%s9084_s4 + $0xc88] sm:$0xff] }
 0x2a3   :  { %3550 = vmatprep.subr.bf16.mxu1 %v3056_v49  ;;  %v2071_v49 = vld [vmem:[%s9084_s4 + $0x900] sm:$0xff] }
 0x2a4   :  { %v1616_v51 = vmul.f32 %v1562_v20, %v1415_v2 }
 0x2a5   :  { %3508 = vmatpush2.bf16.msra.mxu0 %v2927_v16  ;;  %v2879_v16 = vunpack.c.h.s8.bf16 %v2071_v49 }
 0x2a6   :  { %3551 = vmatpush2.bf16.msra.mxu1 %v3055_v15  ;;  %3509 = vmatprep.subr.bf16.mxu0 %v2920_v25  ;;  %v1600_v15 = vmul.f32 %v1562_v20, %v1411_v12  ;;  %v7046_v25 = vld [vmem:[%s9083_s3 + $0x8] sm:$0xff]  ;;  %v2183_v12 = vld [vmem:[%s9084_s4 + $0xc80] sm:$0xff] }
 0x2a7   :  { %3552 = vmatprep.subr.bf16.mxu1 %v3048_v26  ;;  %v1678_v26 = vrot.slane %v7046_v25, %v6755_v3 }
 0x2a9   :  { %3510 = vmatpush2.bf16.msra.mxu0 %v2919_v57  ;;  %v3000_v57 = vunpack.c.l.s8.bf16 %v2136_v10  ;;  %v1716_v33 = vadd.f32 %v1678_v26, %v1600_v15  ;;  %v3239_v10 = vunpack.c.l.s8.bf16 %v2255_v29 }
 0x2aa   :  { %3553 = vmatpush2.bf16.msra.mxu1 %v3047_v58  ;;  %3511 = vmatprep.subr.bf16.mxu0 %v2912_v38  ;;  %v2192_v58 = vld [vmem:[%s9084_s4 + $0xcc8] sm:$0xff]  ;;  %v1732_v38 = vadd.f32 %v1678_v26, %v1616_v51  ;;  %v1686_v51 = vrot.slane %v7046_v25, %v6758_v31 }
 0x2ab   :  { %3554 = vmatprep.subr.bf16.mxu1 %v3040_v30  ;;  %v2871_v30 = vunpack.c.l.s8.bf16 %v2071_v49  ;;  %v3112_v24 = vunpack.c.l.s8.bf16 %v2192_v58 }
 0x2ac   :  { %v1764_v54 = vmax.f32 %v1732_v38, 0.0  ;;  %v2176_v38 = vld [vmem:[%s9084_s4 + $0xc48] sm:$0xff] }
 0x2ad   :  { %3512 = vmatpush2.bf16.msra.mxu0 %v2911_v34  ;;  %v2999_v34 = vunpack.c.l.s8.bf16 %v2135_v9 }
 0x2ae   :  { %3555 = vmatpush2.bf16.msra.mxu1 %v3039_v35  ;;  %3513 = vmatprep.subr.bf16.mxu0 %v2904_v37  ;;  %v3120_v35 = vunpack.c.h.s8.bf16 %v2192_v58  ;;  %v2191_v37 = vld [vmem:[%s9084_s4 + $0xcc0] sm:$0xff] }
 0x2af   :  { %3556 = vmatprep.subr.bf16.mxu1 %v3032_v42  ;;  %v3248_v42 = vunpack.c.h.s8.bf16 %v2256_v39 }
 0x2b1   :  { %3514 = vmatpush2.bf16.msra.mxu0 %v2903_v53  ;;  %v3119_v53 = vunpack.c.h.s8.bf16 %v2191_v37 }
 0x2b2   :  { %3557 = vmatpush2.bf16.msra.mxu1 %v3031_v17  ;;  %3515 = vmatprep.subr.bf16.mxu0 %v2896_v41  ;;  %v1748_v17 = vmax.f32 %v1716_v33, 0.0  ;;  %v3247_v41 = vunpack.c.h.s8.bf16 %v2255_v29 }
 0x2b3   :  { %3558 = vmatprep.subr.bf16.mxu1 %v3024_v56  ;;  %v3240_v56 = vunpack.c.l.s8.bf16 %v2256_v39  ;;  %v2240_v39 = vld [vmem:[%s9084_s4 + $0xe48] sm:$0xff] }
 0x2b4   :  { %v7065_v60 = vpack.c.bf16 %v1764_v54, %v1748_v17  ;;  %v3216_v54 = vunpack.c.h.s8.bf16 %v2240_v39 }
 0x2b5   :  { %3516 = vmatpush2.bf16.msra.mxu0 %v2895_v6 }
 0x2b6   :  { %3559 = vmatpush2.bf16.msra.mxu1 %v3023_v62  ;;  %3517 = vmatprep.subr.bf16.mxu0 %v2888_v55  ;;  %v2248_v62 = vld [vmem:[%s9084_s4 + $0xe88] sm:$0xff]  ;;  %v1570_v55 = vrot.slane %v7033_v28, %v6758_v31 }
 0x2b7   :  { %3560 = vmatprep.subr.bf16.mxu1 %v3016_v4  ;;  %v3111_v4 = vunpack.c.l.s8.bf16 %v2191_v37  ;;  %v3224_v58 = vunpack.c.l.s8.bf16 %v2248_v62  ;;  %v3088_v37 = vunpack.c.h.s8.bf16 %v2176_v38  ;;  %v1924_v31 = vld [vmem:[%s9084_s4 + $0x468] sm:$0xff] }
 0x2b9   :  { %3518 = vmatpush2.bf16.msra.mxu0 %v2887_v14  ;;  %v3104_v14 = vunpack.c.h.s8.bf16 %v2184_v59 }
 0x2ba   :  { %3561 = vmatpush2.bf16.msra.mxu1 %v3015_v22  ;;  %3519 = vmatprep.subr.bf16.mxu0 %v2880_v23  ;;  %v3232_v22 = vunpack.c.h.s8.bf16 %v2248_v62  ;;  %v2247_v23 = vld [vmem:[%s9084_s4 + $0xe80] sm:$0xff] }
 0x2bb   :  { %3562 = vmatprep.subr.bf16.mxu1 %v3008_v47 }
 0x2bd   :  { %3520 = vmatpush2.bf16.msra.mxu0 %v2879_v16  ;;  %v3103_v16 = vunpack.c.h.s8.bf16 %v2183_v12 }
 0x2be   :  { %3563 = vmatpush2.bf16.msra.mxu1 %v3007_v27  ;;  %3521 = vmatprep.subr.bf16.mxu0 %v2872_v11  ;;  %v3231_v27 = vunpack.c.h.s8.bf16 %v2247_v23  ;;  %v3096_v11 = vunpack.c.l.s8.bf16 %v2184_v59  ;;  %v3080_v59 = vunpack.c.l.s8.bf16 %v2176_v38 }
 0x2bf   :  { %3564 = vmatprep.subr.bf16.mxu1 %v3000_v57 }
 0x2c1   :  { %3522 = vmatpush2.bf16.msra.mxu0 %v2871_v30 }
 0x2c2   :  { %3565 = vmatpush2.bf16.msra.mxu1 %v2999_v34  ;;  %3577 = vmatprep.subr.bf16.mxu0 %v3120_v35  ;;  %v3095_v34 = vunpack.c.l.s8.bf16 %v2183_v12  ;;  %v3223_v35 = vunpack.c.l.s8.bf16 %v2247_v23  ;;  %v2167_v12 = vld [vmem:[%s9084_s4 + $0xc00] sm:$0xff] }
 0x2c3   :  { %3620 = vmatprep.subr.bf16.mxu1 %v3248_v42  ;;  %v2175_v42 = vld [vmem:[%s9084_s4 + $0xc40] sm:$0xff]  ;;  %v3071_v23 = vunpack.c.h.s8.bf16 %v2167_v12 }
 0x2c4   :  { %v7067_v5 = vpop.f32.mrf.mxu0  ;;  %3524 = vmatmul.mubr.bf16.vlgmr.msra.gmra.mxu0 %v6704_v18 }
 0x2c5   :  { %v7069_v6 = vpop.f32.mrf.mxu1  ;;  %3567 = vmatmul.mubr.bf16.vlgmr.msra.gmra.mxu1 %v6844_v50  ;;  %3578 = vmatpush1.bf16.msra.mxu0 %v3119_v53  ;;  %v2239_v53 = vld [vmem:[%s9084_s4 + $0xe40] sm:$0xff] }
 0x2c6   :  { %3609 = vmatprep.mubr.bf16.mxu0 %v7065_v60  ;;  %3621 = vmatpush1.bf16.msra.mxu1 %v3247_v41  ;;  %v1453_v1 = vpop.f32.mrf.mxu0 }
 0x2c7   :  { %v1496_v2 = vpop.f32.mrf.mxu1  ;;  %3579 = vmatprep.subr.bf16.mxu0 %v3112_v24  ;;  %3622 = vmatprep.subr.bf16.mxu1 %v3240_v56  ;;  %v3087_v24 = vunpack.c.h.s8.bf16 %v2175_v42  ;;  %v3215_v56 = vunpack.c.h.s8.bf16 %v2239_v53 }
 0x2c8   :  { %v1497_v20 = vadd.f32 %v1496_v2, %v1453_v1  ;;  %v7085_v49 = vpop.f32.mrf.mxu0  ;;  %v2232_v1 = vld [vmem:[%s9084_s4 + $0xe08] sm:$0xff]  ;;  %v3079_v2 = vunpack.c.l.s8.bf16 %v2175_v42 }
 0x2c9   :  { %v7087_v47 = vpop.f32.mrf.mxu1  ;;  %3580 = vmatpush1.bf16.msra.mxu0 %v3111_v4  ;;  %v2168_v4 = vld [vmem:[%s9084_s4 + $0xc08] sm:$0xff] }
 0x2ca   :  { %v1602_v9 = vmul.f32 %v1570_v55, %v1497_v20  ;;  %3623 = vmatpush1.bf16.msra.mxu1 %v3239_v10  ;;  %v1457_v15 = vpop.f32.mrf.mxu0  ;;  %3581 = vmatprep.subr.bf16.mxu0 %v3104_v14  ;;  %v3207_v10 = vunpack.c.l.s8.bf16 %v2239_v53  ;;  %v3072_v14 = vunpack.c.h.s8.bf16 %v2168_v4  ;;  %v3200_v20 = vunpack.c.h.s8.bf16 %v2232_v1  ;;  %v2280_v42 = vld [vmem:[%s9084_s4 + $0xf88] sm:$0xff] }
 0x2cb   :  { %v1500_v26 = vpop.f32.mrf.mxu1  ;;  %3624 = vmatprep.subr.bf16.mxu1 %v3232_v22  ;;  %v2231_v22 = vld [vmem:[%s9084_s4 + $0xe00] sm:$0xff] }
 0x2cc   :  { %v1501_v57 = vadd.f32 %v1500_v26, %v1457_v15  ;;  %v1718_v30 = vadd.f32 %v1686_v51, %v1602_v9  ;;  %v3199_v9 = vunpack.c.h.s8.bf16 %v2231_v22  ;;  %v2224_v15 = vld [vmem:[%s9084_s4 + $0xdc8] sm:$0xff] }
 0x2cd   :  { %3582 = vmatpush1.bf16.msra.mxu0 %v3103_v16  ;;  %v3192_v16 = vunpack.c.l.s8.bf16 %v2232_v1  ;;  %v2288_v26 = vld [vmem:[%s9084_s4 + $0xfc8] sm:$0xff] }
 0x2ce   :  { %v1618_v33 = vmul.f32 %v1570_v55, %v1501_v57  ;;  %3625 = vmatpush1.bf16.msra.mxu1 %v3231_v27  ;;  %3583 = vmatprep.subr.bf16.mxu0 %v3096_v11  ;;  %v1750_v17 = vmax.f32 %v1718_v30, 0.0  ;;  %v3208_v55 = vunpack.c.l.s8.bf16 %v2240_v39  ;;  %v3063_v27 = vunpack.c.l.s8.bf16 %v2167_v12  ;;  %v2287_v39 = vld [vmem:[%s9084_s4 + $0xfc0] sm:$0xff]  ;;  %v2208_v1 = vld [vmem:[%s9084_s4 + $0xd48] sm:$0xff] }
 0x2cf   :  { %3626 = vmatprep.subr.bf16.mxu1 %v3224_v58  ;;  %v3191_v11 = vunpack.c.l.s8.bf16 %v2231_v22  ;;  %v3184_v57 = vunpack.c.h.s8.bf16 %v2224_v15  ;;  %v2223_v58 = vld [vmem:[%s9084_s4 + $0xdc0] sm:$0xff]  ;;  %v3312_v38 = vunpack.c.h.s8.bf16 %v2288_v26  ;;  %v3152_v12 = vunpack.c.h.s8.bf16 %v2208_v1 }
 0x2d0   :  { %v1734_v29 = vadd.f32 %v1686_v51, %v1618_v33  ;;  %v3064_v51 = vunpack.c.l.s8.bf16 %v2168_v4  ;;  %v3183_v30 = vunpack.c.h.s8.bf16 %v2223_v58  ;;  %v3311_v33 = vunpack.c.h.s8.bf16 %v2287_v39 }
 0x2d1   :  { %3584 = vmatpush1.bf16.msra.mxu0 %v3095_v34  ;;  %v3176_v34 = vunpack.c.l.s8.bf16 %v2224_v15  ;;  %v3288_v4 = vunpack.c.l.s8.bf16 %v2280_v42  ;;  %v1499_v15 = vadd.f32 %v7087_v47, %v7085_v49 }
 0x2d2   :  { %v1766_v41 = vmax.f32 %v1734_v29, 0.0  ;;  %3627 = vmatpush1.bf16.msra.mxu1 %v3223_v35  ;;  %3585 = vmatprep.subr.bf16.mxu0 %v3088_v37  ;;  %v3304_v35 = vunpack.c.l.s8.bf16 %v2288_v26  ;;  %v2216_v37 = vld [vmem:[%s9084_s4 + $0xd88] sm:$0xff]  ;;  %v3175_v29 = vunpack.c.l.s8.bf16 %v2223_v58  ;;  %v1566_v58 = vrot.slane %v7033_v28, %v6502_v43 }
 0x2d3   :  { %3628 = vmatprep.subr.bf16.mxu1 %v3216_v54  ;;  %v3303_v54 = vunpack.c.l.s8.bf16 %v2287_v39  ;;  %v3168_v53 = vunpack.c.h.s8.bf16 %v2216_v37  ;;  %v2199_v39 = vld [vmem:[%s9084_s4 + $0xd00] sm:$0xff]  ;;  %v1682_v28 = vrot.slane %v7046_v25, %v6502_v43 }
 0x2d4   :  { %v7103_v62 = vpack.c.bf16 %v1766_v41, %v1750_v17  ;;  %v2215_v17 = vld [vmem:[%s9084_s4 + $0xd80] sm:$0xff]  ;;  %v3296_v41 = vunpack.c.h.s8.bf16 %v2280_v42  ;;  %v3127_v25 = vunpack.c.l.s8.bf16 %v2199_v39 }
 0x2d5   :  { %3586 = vmatpush1.bf16.msra.mxu0 %v3087_v24  ;;  %v2279_v24 = vld [vmem:[%s9084_s4 + $0xf80] sm:$0xff] }
 0x2d6   :  { %3652 = vmatprep.mubr.bf16.mxu1 %v7103_v62  ;;  %3629 = vmatpush1.bf16.msra.mxu1 %v3215_v56  ;;  %v3167_v56 = vunpack.c.h.s8.bf16 %v2215_v17 }
 0x2d7   :  { %3587 = vmatprep.subr.bf16.mxu0 %v3080_v59  ;;  %3630 = vmatprep.subr.bf16.mxu1 %v3208_v55  ;;  %v3295_v59 = vunpack.c.h.s8.bf16 %v2279_v24  ;;  %v3160_v55 = vunpack.c.l.s8.bf16 %v2216_v37 }
 0x2d9   :  { %3588 = vmatpush1.bf16.msra.mxu0 %v3079_v2  ;;  %v2272_v2 = vld [vmem:[%s9084_s4 + $0xf48] sm:$0xff] }
 0x2da   :  { %3631 = vmatpush1.bf16.msra.mxu1 %v3207_v10  ;;  %3589 = vmatprep.subr.bf16.mxu0 %v3072_v14  ;;  %v3159_v10 = vunpack.c.l.s8.bf16 %v2215_v17  ;;  %v3287_v14 = vunpack.c.l.s8.bf16 %v2279_v24  ;;  %v3280_v22 = vunpack.c.h.s8.bf16 %v2272_v2  ;;  %v3272_v26 = vunpack.c.l.s8.bf16 %v2272_v2 }
 0x2db   :  { %3632 = vmatprep.subr.bf16.mxu1 %v3200_v20  ;;  %v2207_v20 = vld [vmem:[%s9084_s4 + $0xd40] sm:$0xff] }
 0x2dd   :  { %3590 = vmatpush1.bf16.msra.mxu0 %v3071_v23  ;;  %v2271_v23 = vld [vmem:[%s9084_s4 + $0xf40] sm:$0xff] }
 0x2de   :  { %3633 = vmatpush1.bf16.msra.mxu1 %v3199_v9  ;;  %3591 = vmatprep.subr.bf16.mxu0 %v3064_v51  ;;  %v3151_v9 = vunpack.c.h.s8.bf16 %v2207_v20  ;;  %v3279_v51 = vunpack.c.h.s8.bf16 %v2271_v23  ;;  %v3271_v49 = vunpack.c.l.s8.bf16 %v2271_v23 }
 0x2df   :  { %3634 = vmatprep.subr.bf16.mxu1 %v3192_v16  ;;  %v3144_v16 = vunpack.c.l.s8.bf16 %v2208_v1 }
 0x2e1   :  { %3592 = vmatpush1.bf16.msra.mxu0 %v3063_v27  ;;  %v2200_v27 = vld [vmem:[%s9084_s4 + $0xd08] sm:$0xff] }
 0x2e2   :  { %3635 = vmatpush1.bf16.msra.mxu1 %v3191_v11  ;;  %3593 = vmatprep.subr.bf16.mxu0 %v3184_v57  ;;  %v2264_v11 = vld [vmem:[%s9084_s4 + $0xf08] sm:$0xff]  ;;  %v1495_v57 = vadd.f32 %v7069_v6, %v7067_v5  ;;  %v3136_v47 = vunpack.c.h.s8.bf16 %v2200_v27  ;;  %v2263_v5 = vld [vmem:[%s9084_s4 + $0xf00] sm:$0xff]  ;;  %v3128_v37 = vunpack.c.l.s8.bf16 %v2200_v27 }
 0x2e3   :  { %3636 = vmatprep.subr.bf16.mxu1 %v3312_v38  ;;  %v3143_v38 = vunpack.c.l.s8.bf16 %v2207_v20  ;;  %v1802_v20 = vld [vmem:[%s9084_s4 + $0x98] sm:$0xff] }
 0x2e4   :  { %v1601_v6 = vmul.f32 %v1566_v58, %v1495_v57  ;;  %v1801_v57 = vld [vmem:[%s9084_s4 + $0x90] sm:$0xff] }
 0x2e5   :  { %3594 = vmatpush2.bf16.msra.mxu0 %v3183_v30  ;;  %v1617_v30 = vmul.f32 %v1566_v58, %v1499_v15 }
 0x2e6   :  { %3637 = vmatpush2.bf16.msra.mxu1 %v3311_v33  ;;  %3595 = vmatprep.subr.bf16.mxu0 %v3176_v34  ;;  %v3264_v33 = vunpack.c.h.s8.bf16 %v2264_v11  ;;  %v3135_v34 = vunpack.c.h.s8.bf16 %v2199_v39  ;;  %v1717_v17 = vadd.f32 %v1682_v28, %v1601_v6  ;;  %v2330_v6 = vunpack.c.l.s8.bf16 %v1802_v20 }
 0x2e7   :  { %3638 = vmatprep.subr.bf16.mxu1 %v3304_v35  ;;  %v3263_v35 = vunpack.c.h.s8.bf16 %v2263_v5  ;;  %v1733_v42 = vadd.f32 %v1682_v28, %v1617_v30  ;;  %v2337_v30 = vunpack.c.h.s8.bf16 %v1801_v57 }
 0x2e8   :  { %v1749_v1 = vmax.f32 %v1717_v17, 0.0  ;;  %v1857_v17 = vld [vmem:[%s9084_s4 + $0x250] sm:$0xff] }
 0x2e9   :  { %3596 = vmatpush2.bf16.msra.mxu0 %v3175_v29  ;;  %v3256_v29 = vunpack.c.l.s8.bf16 %v2264_v11  ;;  %v2338_v11 = vunpack.c.h.s8.bf16 %v1802_v20  ;;  %v1849_v20 = vld [vmem:[%s9084_s4 + $0x210] sm:$0xff] }
 0x2ea   :  { %3639 = vmatpush2.bf16.msra.mxu1 %v3303_v54  ;;  %3597 = vmatprep.subr.bf16.mxu0 %v3168_v53  ;;  %v1810_v54 = vld [vmem:[%s9084_s4 + $0xd8] sm:$0xff] }
 0x2eb   :  { %3640 = vmatprep.subr.bf16.mxu1 %v3296_v41  ;;  %v1874_v53 = vld [vmem:[%s9084_s4 + $0x2d8] sm:$0xff]  ;;  %v3255_v41 = vunpack.c.l.s8.bf16 %v2263_v5  ;;  %v2354_v24 = vunpack.c.h.s8.bf16 %v1810_v54 }
 0x2ec   :  { %v2474_v23 = vunpack.c.l.s8.bf16 %v1874_v53 }
 0x2ed   :  { %3598 = vmatpush2.bf16.msra.mxu0 %v3167_v56  ;;  %v1809_v56 = vld [vmem:[%s9084_s4 + $0xd0] sm:$0xff] }
 0x2ee   :  { %3641 = vmatpush2.bf16.msra.mxu1 %v3295_v59  ;;  %3599 = vmatprep.subr.bf16.mxu0 %v3160_v55  ;;  %v1765_v59 = vmax.f32 %v1733_v42, 0.0  ;;  %v2482_v55 = vunpack.c.h.s8.bf16 %v1874_v53  ;;  %v2353_v2 = vunpack.c.h.s8.bf16 %v1809_v56 }
 0x2ef   :  { %3642 = vmatprep.subr.bf16.mxu1 %v3288_v4  ;;  %v1873_v4 = vld [vmem:[%s9084_s4 + $0x2d0] sm:$0xff] }
 0x2f0   :  { %v2473_v27 = vunpack.c.l.s8.bf16 %v1873_v4 }
 0x2f1   :  { %3600 = vmatpush2.bf16.msra.mxu0 %v3159_v10  ;;  %v2481_v10 = vunpack.c.h.s8.bf16 %v1873_v4 }
 0x2f2   :  { %3643 = vmatpush2.bf16.msra.mxu1 %v3287_v14  ;;  %3601 = vmatprep.subr.bf16.mxu0 %v3152_v12  ;;  %v7186_v14 = vpack.c.bf16 %v1765_v59, %v1749_v1  ;;  %v2346_v12 = vunpack.c.l.s8.bf16 %v1810_v54  ;;  %v1793_v54 = vld [vmem:[%s9084_s4 + $0x50] sm:$0xff]  ;;  %v1786_v59 = vld [vmem:[%s9084_s4 + $0x18] sm:$0xff]  ;;  %v2441_v1 = vunpack.c.l.s8.bf16 %v1857_v17 }
 0x2f3   :  { %3644 = vmatprep.subr.bf16.mxu1 %v3280_v22  ;;  %v2313_v4 = vunpack.c.l.s8.bf16 %v1793_v54 }
 0x2f5   :  { %3602 = vmatpush2.bf16.msra.mxu0 %v3151_v9  ;;  %v1866_v9 = vld [vmem:[%s9084_s4 + $0x298] sm:$0xff] }
 0x2f6   :  { %3645 = vmatpush2.bf16.msra.mxu1 %v3279_v51  ;;  %3603 = vmatprep.subr.bf16.mxu0 %v3144_v16  ;;  %v2345_v16 = vunpack.c.l.s8.bf16 %v1809_v56  ;;  %v2458_v28 = vunpack.c.l.s8.bf16 %v1866_v9 }
 0x2f7   :  { %3646 = vmatprep.subr.bf16.mxu1 %v3272_v26 }
 0x2f9   :  { %3604 = vmatpush2.bf16.msra.mxu0 %v3143_v38  ;;  %v2466_v38 = vunpack.c.h.s8.bf16 %v1866_v9  ;;  %v2298_v9 = vunpack.c.l.s8.bf16 %v1786_v59 }
 0x2fa   :  { %3647 = vmatpush2.bf16.msra.mxu1 %v3271_v49  ;;  %3605 = vmatprep.subr.bf16.mxu0 %v3136_v47  ;;  %v1865_v49 = vld [vmem:[%s9084_s4 + $0x290] sm:$0xff] }
 0x2fb   :  { %3648 = vmatprep.subr.bf16.mxu1 %v3264_v33  ;;  %v2465_v5 = vunpack.c.h.s8.bf16 %v1865_v49  ;;  %v2457_v42 = vunpack.c.l.s8.bf16 %v1865_v49  ;;  %v1841_v49 = vld [vmem:[%s9084_s4 + $0x1d0] sm:$0xff] }
 0x2fd   :  { %3606 = vmatpush2.bf16.msra.mxu0 %v3135_v34  ;;  %v1794_v34 = vld [vmem:[%s9084_s4 + $0x58] sm:$0xff] }
 0x2fe   :  { %3649 = vmatpush2.bf16.msra.mxu1 %v3263_v35  ;;  %3607 = vmatprep.subr.bf16.mxu0 %v3128_v37  ;;  %v1858_v35 = vld [vmem:[%s9084_s4 + $0x258] sm:$0xff]  ;;  %v2329_v37 = vunpack.c.l.s8.bf16 %v1801_v57  ;;  %v2425_v57 = vunpack.c.l.s8.bf16 %v1849_v20 }
 0x2ff   :  { %3650 = vmatprep.subr.bf16.mxu1 %v3256_v29  ;;  %v2322_v29 = vunpack.c.h.s8.bf16 %v1794_v34  ;;  %v2450_v53 = vunpack.c.h.s8.bf16 %v1858_v35  ;;  %v2442_v56 = vunpack.c.l.s8.bf16 %v1858_v35  ;;  %v1898_v35 = vld [vmem:[%s9084_s4 + $0x398] sm:$0xff] }
 0x301   :  { %3608 = vmatpush2.bf16.msra.mxu0 %v3127_v25  ;;  %v2321_v25 = vunpack.c.h.s8.bf16 %v1793_v54  ;;  %v1833_v54 = vld [vmem:[%s9084_s4 + $0x190] sm:$0xff] }
 0x302   :  { %3651 = vmatpush2.bf16.msra.mxu1 %v3255_v41  ;;  %3663 = vmatprep.subr.bf16.mxu0 %v2354_v24  ;;  %v2449_v41 = vunpack.c.h.s8.bf16 %v1857_v17  ;;  %v2314_v24 = vunpack.c.l.s8.bf16 %v1794_v34  ;;  %v1834_v34 = vld [vmem:[%s9084_s4 + $0x198] sm:$0xff]  ;;  %v1897_v17 = vld [vmem:[%s9084_s4 + $0x390] sm:$0xff] }
 0x303   :  { %3706 = vmatprep.subr.bf16.mxu1 %v2482_v55  ;;  %v1850_v55 = vld [vmem:[%s9084_s4 + $0x218] sm:$0xff] }
 0x304   :  { %v3353_v22 = vpop.f32.mrf.mxu0  ;;  %3610 = vmatmul.mubr.bf16.vlgmr.msra.gmra.mxu0 %v6972_v45 }
 0x305   :  { %v3396_v51 = vpop.f32.mrf.mxu1  ;;  %3653 = vmatmul.mubr.bf16.vlgmr.msra.gmra.mxu1 %v7186_v14  ;;  %3664 = vmatpush1.bf16.msra.mxu0 %v2353_v2  ;;  %v2306_v2 = vunpack.c.h.s8.bf16 %v1786_v59  ;;  %v1826_v59 = vld [vmem:[%s9084_s4 + $0x158] sm:$0xff] }
 0x306   :  { %v7196_v15 = vadd.f32 %v3396_v51, %v3353_v22  ;;  %3695 = vmatprep.mubr.bf16.mxu0 %v6659_v19  ;;  %3707 = vmatpush1.bf16.msra.mxu1 %v2481_v10  ;;  %v7199_v26 = vpop.f32.mrf.mxu0  ;;  %v1785_v10 = vld [vmem:[%s9084_s4 + $0x10] sm:$0xff]  ;;  %v2426_v51 = vunpack.c.l.s8.bf16 %v1850_v55 }
 0x307   :  { %3738 = vmatprep.mubr.bf16.mxu1 %v6666_v52  ;;  %v7205_v58 = vpop.f32.mrf.mxu1  ;;  %3665 = vmatprep.subr.bf16.mxu0 %v2346_v12  ;;  %v2434_v12 = vunpack.c.h.s8.bf16 %v1850_v55  ;;  %v2305_v22 = vunpack.c.h.s8.bf16 %v1785_v10  ;;  %v1890_v55 = vld [vmem:[%s9084_s4 + $0x358] sm:$0xff] }
 0x308   :  { %v3357_v47 = vpop.f32.mrf.mxu0  ;;  %3708 = vmatprep.subr.bf16.mxu1 %v2474_v23  ;;  %v2433_v23 = vunpack.c.h.s8.bf16 %v1849_v20  ;;  %v1889_v20 = vld [vmem:[%s9084_s4 + $0x350] sm:$0xff] }
 0x309   :  { %v3400_v39 = vpop.f32.mrf.mxu1  ;;  %3666 = vmatpush1.bf16.msra.mxu0 %v2345_v16  ;;  %v1842_v16 = vld [vmem:[%s9084_s4 + $0x1d8] sm:$0xff] }
 0x30a   :  { %v7210_v33 = vadd.f32 %v3400_v39, %v3357_v47  ;;  %3709 = vmatpush1.bf16.msra.mxu1 %v2473_v27  ;;  %3667 = vmatprep.subr.bf16.mxu0 %v2338_v11  ;;  %v1906_v27 = vld [vmem:[%s9084_s4 + $0x3d8] sm:$0xff]  ;;  %v2297_v11 = vunpack.c.l.s8.bf16 %v1785_v10  ;;  %v1905_v39 = vld [vmem:[%s9084_s4 + $0x3d0] sm:$0xff] }
 0x30b   :  { %3710 = vmatprep.subr.bf16.mxu1 %v2466_v38  ;;  %v2418_v38 = vunpack.c.h.s8.bf16 %v1842_v16  ;;  %v2546_v47 = vunpack.c.h.s8.bf16 %v1906_v27  ;;  %v1825_v10 = vld [vmem:[%s9084_s4 + $0x150] sm:$0xff] }
 0x30d   :  { %3668 = vmatpush1.bf16.msra.mxu0 %v2337_v30  ;;  %v2417_v30 = vunpack.c.h.s8.bf16 %v1841_v49 }
 0x30e   :  { %3711 = vmatpush1.bf16.msra.mxu1 %v2465_v5  ;;  %3669 = vmatprep.subr.bf16.mxu0 %v2330_v6  ;;  %v2545_v5 = vunpack.c.h.s8.bf16 %v1905_v39  ;;  %v2410_v6 = vunpack.c.l.s8.bf16 %v1842_v16  ;;  %v1818_v16 = vld [vmem:[%s9084_s4 + $0x118] sm:$0xff] }
 0x30f   :  { %3712 = vmatprep.subr.bf16.mxu1 %v2458_v28  ;;  %v2538_v28 = vunpack.c.l.s8.bf16 %v1906_v27  ;;  %v1882_v27 = vld [vmem:[%s9084_s4 + $0x318] sm:$0xff] }
 0x311   :  { %3670 = vmatpush1.bf16.msra.mxu0 %v2329_v37  ;;  %v2409_v37 = vunpack.c.l.s8.bf16 %v1841_v49  ;;  %v1817_v49 = vld [vmem:[%s9084_s4 + $0x110] sm:$0xff] }
 0x312   :  { %3713 = vmatpush1.bf16.msra.mxu1 %v2457_v42  ;;  %3671 = vmatprep.subr.bf16.mxu0 %v2322_v29  ;;  %v2537_v42 = vunpack.c.l.s8.bf16 %v1905_v39  ;;  %v2402_v29 = vunpack.c.h.s8.bf16 %v1834_v34  ;;  %v1881_v39 = vld [vmem:[%s9084_s4 + $0x310] sm:$0xff] }
 0x313   :  { %3714 = vmatprep.subr.bf16.mxu1 %v2450_v53  ;;  %v2530_v53 = vunpack.c.h.s8.bf16 %v1898_v35 }
 0x315   :  { %3672 = vmatpush1.bf16.msra.mxu0 %v2321_v25  ;;  %v2401_v25 = vunpack.c.h.s8.bf16 %v1833_v54 }
 0x316   :  { %3715 = vmatpush1.bf16.msra.mxu1 %v2449_v41  ;;  %3673 = vmatprep.subr.bf16.mxu0 %v2314_v24  ;;  %v2529_v41 = vunpack.c.h.s8.bf16 %v1897_v17  ;;  %v2394_v24 = vunpack.c.l.s8.bf16 %v1834_v34  ;;  %v1938_v34 = vld [vmem:[%s9084_s4 + $0x4d8] sm:$0xff] }
 0x317   :  { %3716 = vmatprep.subr.bf16.mxu1 %v2442_v56  ;;  %v2522_v56 = vunpack.c.l.s8.bf16 %v1898_v35  ;;  %v2002_v35 = vld [vmem:[%s9084_s4 + $0x6d8] sm:$0xff] }
 0x319   :  { %3674 = vmatpush1.bf16.msra.mxu0 %v2313_v4  ;;  %v2393_v4 = vunpack.c.l.s8.bf16 %v1833_v54  ;;  %v1937_v54 = vld [vmem:[%s9084_s4 + $0x4d0] sm:$0xff] }
 0x31a   :  { %3717 = vmatpush1.bf16.msra.mxu1 %v2441_v1  ;;  %3675 = vmatprep.subr.bf16.mxu0 %v2306_v2  ;;  %v2521_v1 = vunpack.c.l.s8.bf16 %v1897_v17  ;;  %v2386_v2 = vunpack.c.h.s8.bf16 %v1826_v59  ;;  %v2001_v17 = vld [vmem:[%s9084_s4 + $0x6d0] sm:$0xff] }
 0x31b   :  { %3718 = vmatprep.subr.bf16.mxu1 %v2434_v12  ;;  %v2514_v12 = vunpack.c.h.s8.bf16 %v1890_v55 }
 0x31d   :  { %3676 = vmatpush1.bf16.msra.mxu0 %v2305_v22  ;;  %v2385_v22 = vunpack.c.h.s8.bf16 %v1825_v10 }
 0x31e   :  { %3719 = vmatpush1.bf16.msra.mxu1 %v2433_v23  ;;  %3677 = vmatprep.subr.bf16.mxu0 %v2298_v9  ;;  %v2513_v23 = vunpack.c.h.s8.bf16 %v1889_v20  ;;  %v2378_v9 = vunpack.c.l.s8.bf16 %v1826_v59  ;;  %v2602_v59 = vunpack.c.l.s8.bf16 %v1938_v34 }
 0x31f   :  { %3720 = vmatprep.subr.bf16.mxu1 %v2426_v51  ;;  %v2506_v51 = vunpack.c.l.s8.bf16 %v1890_v55  ;;  %v1930_v55 = vld [vmem:[%s9084_s4 + $0x498] sm:$0xff] }
 0x321   :  { %3678 = vmatpush1.bf16.msra.mxu0 %v2297_v11  ;;  %v2377_v11 = vunpack.c.l.s8.bf16 %v1825_v10 }
 0x322   :  { %3721 = vmatpush1.bf16.msra.mxu1 %v2425_v57  ;;  %3679 = vmatprep.subr.bf16.mxu0 %v2418_v38  ;;  %v2505_v57 = vunpack.c.l.s8.bf16 %v1889_v20  ;;  %v2370_v38 = vunpack.c.h.s8.bf16 %v1818_v16  ;;  %v2601_v20 = vunpack.c.l.s8.bf16 %v1937_v54 }
 0x323   :  { %3722 = vmatprep.subr.bf16.mxu1 %v2546_v47  ;;  %v2498_v47 = vunpack.c.h.s8.bf16 %v1882_v27 }
 0x325   :  { %3680 = vmatpush2.bf16.msra.mxu0 %v2417_v30  ;;  %v2369_v30 = vunpack.c.h.s8.bf16 %v1817_v49 }
 0x326   :  { %3723 = vmatpush2.bf16.msra.mxu1 %v2545_v5  ;;  %3681 = vmatprep.subr.bf16.mxu0 %v2410_v6  ;;  %v2497_v5 = vunpack.c.h.s8.bf16 %v1881_v39  ;;  %v2362_v6 = vunpack.c.l.s8.bf16 %v1818_v16 }
 0x327   :  { %3724 = vmatprep.subr.bf16.mxu1 %v2538_v28  ;;  %v2490_v28 = vunpack.c.l.s8.bf16 %v1882_v27 }
 0x329   :  { %3682 = vmatpush2.bf16.msra.mxu0 %v2409_v37  ;;  %v2361_v37 = vunpack.c.l.s8.bf16 %v1817_v49 }
 0x32a   :  { %3725 = vmatpush2.bf16.msra.mxu1 %v2537_v42  ;;  %3683 = vmatprep.subr.bf16.mxu0 %v2402_v29  ;;  %v2489_v42 = vunpack.c.l.s8.bf16 %v1881_v39  ;;  %v2610_v29 = vunpack.c.h.s8.bf16 %v1938_v34  ;;  %v1986_v34 = vld [vmem:[%s9084_s4 + $0x658] sm:$0xff] }
 0x32b   :  { %3726 = vmatprep.subr.bf16.mxu1 %v2530_v53  ;;  %v2738_v53 = vunpack.c.h.s8.bf16 %v2002_v35 }
 0x32d   :  { %3684 = vmatpush2.bf16.msra.mxu0 %v2401_v25  ;;  %v2609_v25 = vunpack.c.h.s8.bf16 %v1937_v54  ;;  %v1985_v54 = vld [vmem:[%s9084_s4 + $0x650] sm:$0xff] }
 0x32e   :  { %3727 = vmatpush2.bf16.msra.mxu1 %v2529_v41  ;;  %3685 = vmatprep.subr.bf16.mxu0 %v2394_v24  ;;  %v7296_v41 = vpop.f32.mrf.mxu0  ;;  %v2737_v24 = vunpack.c.h.s8.bf16 %v2001_v17 }
 0x32f   :  { %3728 = vmatprep.subr.bf16.mxu1 %v2522_v56  ;;  %v7298_v56 = vpop.f32.mrf.mxu1 }
 0x331   :  { %3686 = vmatpush2.bf16.msra.mxu0 %v2393_v4 }
 0x332   :  { %3729 = vmatpush2.bf16.msra.mxu1 %v2521_v1  ;;  %3687 = vmatprep.subr.bf16.mxu0 %v2386_v2  ;;  %v2730_v1 = vunpack.c.l.s8.bf16 %v2002_v35  ;;  %v1994_v2 = vld [vmem:[%s9084_s4 + $0x698] sm:$0xff] }
 0x333   :  { %3730 = vmatprep.subr.bf16.mxu1 %v2514_v12  ;;  %v2722_v27 = vunpack.c.h.s8.bf16 %v1994_v2 }
 0x335   :  { %3688 = vmatpush2.bf16.msra.mxu0 %v2385_v22 }
 0x336   :  { %3731 = vmatpush2.bf16.msra.mxu1 %v2513_v23  ;;  %3689 = vmatprep.subr.bf16.mxu0 %v2378_v9  ;;  %v2729_v23 = vunpack.c.l.s8.bf16 %v2001_v17  ;;  %v2594_v9 = vunpack.c.h.s8.bf16 %v1930_v55  ;;  %v2705_v17 = vunpack.c.h.s8.bf16 %v1985_v54 }
 0x337   :  { %3732 = vmatprep.subr.bf16.mxu1 %v2506_v51  ;;  %v1929_v51 = vld [vmem:[%s9084_s4 + $0x490] sm:$0xff] }
 0x338   :  { %v2593_v49 = vunpack.c.h.s8.bf16 %v1929_v51 }
 0x339   :  { %3690 = vmatpush2.bf16.msra.mxu0 %v2377_v11  ;;  %v1993_v11 = vld [vmem:[%s9084_s4 + $0x690] sm:$0xff] }
 0x33a   :  { %3733 = vmatpush2.bf16.msra.mxu1 %v2505_v57  ;;  %3691 = vmatprep.subr.bf16.mxu0 %v2370_v38  ;;  %v2721_v39 = vunpack.c.h.s8.bf16 %v1993_v11  ;;  %v2713_v35 = vunpack.c.l.s8.bf16 %v1993_v11  ;;  %v1970_v11 = vld [vmem:[%s9084_s4 + $0x5d8] sm:$0xff] }
 0x33b   :  { %3734 = vmatprep.subr.bf16.mxu1 %v2498_v47 }
 0x33d   :  { %3692 = vmatpush2.bf16.msra.mxu0 %v2369_v30  ;;  %v2586_v30 = vunpack.c.l.s8.bf16 %v1930_v55  ;;  %v1978_v55 = vld [vmem:[%s9084_s4 + $0x618] sm:$0xff] }
 0x33e   :  { %3735 = vmatpush2.bf16.msra.mxu1 %v2497_v5  ;;  %3693 = vmatprep.subr.bf16.mxu0 %v2362_v6  ;;  %v2714_v6 = vunpack.c.l.s8.bf16 %v1994_v2 }
 0x33f   :  { %3736 = vmatprep.subr.bf16.mxu1 %v2490_v28  ;;  %v1922_v28 = vld [vmem:[%s9084_s4 + $0x458] sm:$0xff] }
 0x341   :  { %3694 = vmatpush2.bf16.msra.mxu0 %v2361_v37  ;;  %v2578_v37 = vunpack.c.h.s8.bf16 %v1922_v28 }
 0x342   :  { %3737 = vmatpush2.bf16.msra.mxu1 %v2489_v42  ;;  %3749 = vmatprep.subr.bf16.mxu0 %v2610_v29  ;;  %v1921_v42 = vld [vmem:[%s9084_s4 + $0x450] sm:$0xff]  ;;  %v2706_v29 = vunpack.c.h.s8.bf16 %v1986_v34 }
 0x343   :  { %3792 = vmatprep.subr.bf16.mxu1 %v2738_v53  ;;  %v2577_v53 = vunpack.c.h.s8.bf16 %v1921_v42 }
 0x344   :  { %v3439_v4 = vpop.f32.mrf.mxu0  ;;  %3696 = vmatmul.mubr.bf16.vlgmr.msra.gmra.mxu0 %v6193_v21 }
 0x345   :  { %v3440_v10 = vadd.f32 %v3439_v4, %v7196_v15  ;;  %v3482_v12 = vpop.f32.mrf.mxu1  ;;  %3739 = vmatmul.mubr.bf16.vlgmr.msra.gmra.mxu1 %v6310_v32  ;;  %3750 = vmatpush1.bf16.msra.mxu0 %v2609_v25  ;;  %v2570_v25 = vunpack.c.l.s8.bf16 %v1922_v28  ;;  %v2569_v4 = vunpack.c.l.s8.bf16 %v1921_v42  ;;  %v2026_v42 = vld [vmem:[%s9084_s4 + $0x798] sm:$0xff] }
 0x346   :  { %3781 = vmatprep.mubr.bf16.mxu0 %v6809_v36  ;;  %3793 = vmatpush1.bf16.msra.mxu1 %v2737_v24  ;;  %v7310_v22 = vpop.f32.mrf.mxu0  ;;  %v2698_v24 = vunpack.c.l.s8.bf16 %v1986_v34 }
 0x347   :  { %v7315_v16 = vadd.f32 %v3482_v12, %v3440_v10  ;;  %3824 = vmatprep.mubr.bf16.mxu1 %v6815_v48  ;;  %v7318_v15 = vpop.f32.mrf.mxu1  ;;  %3751 = vmatprep.subr.bf16.mxu0 %v2602_v59  ;;  %v1914_v59 = vld [vmem:[%s9084_s4 + $0x418] sm:$0xff]  ;;  %v1913_v10 = vld [vmem:[%s9084_s4 + $0x410] sm:$0xff]  ;;  %v2690_v12 = vunpack.c.h.s8.bf16 %v1978_v55 }
 0x348   :  { %v3443_v57 = vpop.f32.mrf.mxu0  ;;  %3794 = vmatprep.subr.bf16.mxu1 %v2730_v1  ;;  %v2697_v1 = vunpack.c.l.s8.bf16 %v1985_v54  ;;  %v2562_v2 = vunpack.c.h.s8.bf16 %v1914_v59 }
 0x349   :  { %v3444_v38 = vadd.f32 %v3443_v57, %v7210_v33  ;;  %3752 = vmatpush1.bf16.msra.mxu0 %v2601_v20  ;;  %v3486_v47 = vpop.f32.mrf.mxu1  ;;  %v2585_v33 = vunpack.c.l.s8.bf16 %v1929_v51  ;;  %v1977_v20 = vld [vmem:[%s9084_s4 + $0x610] sm:$0xff]  ;;  %v2554_v51 = vunpack.c.l.s8.bf16 %v1914_v59  ;;  %v2034_v57 = vld [vmem:[%s9084_s4 + $0x7d8] sm:$0xff] }
 0x34a   :  { %3795 = vmatpush1.bf16.msra.mxu1 %v2729_v23  ;;  %3753 = vmatprep.subr.bf16.mxu0 %v2594_v9  ;;  %v2561_v23 = vunpack.c.h.s8.bf16 %v1913_v10  ;;  %v2689_v9 = vunpack.c.h.s8.bf16 %v1977_v20 }
 0x34b   :  { %v7324_v5 = vadd.f32 %v3486_v47, %v3444_v38  ;;  %3796 = vmatprep.subr.bf16.mxu1 %v2722_v27  ;;  %v2682_v27 = vunpack.c.l.s8.bf16 %v1978_v55  ;;  %v2553_v38 = vunpack.c.l.s8.bf16 %v1913_v10  ;;  %v2674_v47 = vunpack.c.h.s8.bf16 %v1970_v11  ;;  %v2018_v10 = vld [vmem:[%s9084_s4 + $0x758] sm:$0xff] }
 0x34d   :  { %3754 = vmatpush1.bf16.msra.mxu0 %v2593_v49  ;;  %v2681_v49 = vunpack.c.l.s8.bf16 %v1977_v20 }
 0x34e   :  { %3797 = vmatpush1.bf16.msra.mxu1 %v2721_v39  ;;  %3755 = vmatprep.subr.bf16.mxu0 %v2586_v30  ;;  %v1969_v39 = vld [vmem:[%s9084_s4 + $0x5d0] sm:$0xff]  ;;  %v2802_v30 = vunpack.c.h.s8.bf16 %v2034_v57 }
 0x34f   :  { %3798 = vmatprep.subr.bf16.mxu1 %v2714_v6  ;;  %v2033_v6 = vld [vmem:[%s9084_s4 + $0x7d0] sm:$0xff]  ;;  %v2673_v28 = vunpack.c.h.s8.bf16 %v1969_v39 }
 0x350   :  { %v2801_v34 = vunpack.c.h.s8.bf16 %v2033_v6  ;;  %v2793_v54 = vunpack.c.l.s8.bf16 %v2033_v6 }
 0x351   :  { %3756 = vmatpush1.bf16.msra.mxu0 %v2585_v33  ;;  %v2666_v33 = vunpack.c.l.s8.bf16 %v1970_v11 }
 0x352   :  { %3799 = vmatpush1.bf16.msra.mxu1 %v2713_v35  ;;  %3757 = vmatprep.subr.bf16.mxu0 %v2578_v37  ;;  %v2794_v35 = vunpack.c.l.s8.bf16 %v2034_v57  ;;  %v1962_v37 = vld [vmem:[%s9084_s4 + $0x598] sm:$0xff] }
 0x353   :  { %3800 = vmatprep.subr.bf16.mxu1 %v2706_v29  ;;  %v2665_v29 = vunpack.c.l.s8.bf16 %v1969_v39  ;;  %v2010_v39 = vld [vmem:[%s9084_s4 + $0x718] sm:$0xff] }
 0x355   :  { %3758 = vmatpush1.bf16.msra.mxu0 %v2577_v53  ;;  %v2658_v53 = vunpack.c.h.s8.bf16 %v1962_v37 }
 0x356   :  { %3801 = vmatpush1.bf16.msra.mxu1 %v2705_v17  ;;  %3759 = vmatprep.subr.bf16.mxu0 %v2570_v25  ;;  %v1961_v17 = vld [vmem:[%s9084_s4 + $0x590] sm:$0xff]  ;;  %v2786_v25 = vunpack.c.h.s8.bf16 %v2026_v42 }
 0x357   :  { %3802 = vmatprep.subr.bf16.mxu1 %v2698_v24  ;;  %v2025_v24 = vld [vmem:[%s9084_s4 + $0x790] sm:$0xff]  ;;  %v2657_v59 = vunpack.c.h.s8.bf16 %v1961_v17 }
 0x358   :  { %v2785_v55 = vunpack.c.h.s8.bf16 %v2025_v24  ;;  %v2777_v20 = vunpack.c.l.s8.bf16 %v2025_v24 }
 0x359   :  { %3760 = vmatpush1.bf16.msra.mxu0 %v2569_v4  ;;  %v2650_v4 = vunpack.c.l.s8.bf16 %v1962_v37 }
 0x35a   :  { %3803 = vmatpush1.bf16.msra.mxu1 %v2697_v1  ;;  %3761 = vmatprep.subr.bf16.mxu0 %v2562_v2  ;;  %v2778_v1 = vunpack.c.l.s8.bf16 %v2026_v42  ;;  %v1954_v2 = vld [vmem:[%s9084_s4 + $0x558] sm:$0xff] }
 0x35b   :  { %3804 = vmatprep.subr.bf16.mxu1 %v2690_v12  ;;  %v2649_v12 = vunpack.c.l.s8.bf16 %v1961_v17  ;;  %v2130_v17 = vld [vmem:[%s9084_s4 + $0xad8] sm:$0xff] }
 0x35d   :  { %3762 = vmatpush1.bf16.msra.mxu0 %v2561_v23  ;;  %v2642_v23 = vunpack.c.h.s8.bf16 %v1954_v2 }
 0x35e   :  { %3805 = vmatpush1.bf16.msra.mxu1 %v2689_v9  ;;  %3763 = vmatprep.subr.bf16.mxu0 %v2554_v51  ;;  %v1953_v9 = vld [vmem:[%s9084_s4 + $0x550] sm:$0xff]  ;;  %v2770_v51 = vunpack.c.h.s8.bf16 %v2018_v10 }
 0x35f   :  { %3806 = vmatprep.subr.bf16.mxu1 %v2682_v27  ;;  %v2017_v27 = vld [vmem:[%s9084_s4 + $0x750] sm:$0xff]  ;;  %v2641_v11 = vunpack.c.h.s8.bf16 %v1953_v9 }
 0x360   :  { %v2769_v57 = vunpack.c.h.s8.bf16 %v2017_v27  ;;  %v2761_v6 = vunpack.c.l.s8.bf16 %v2017_v27  ;;  %v2986_v27 = vunpack.c.l.s8.bf16 %v2130_v17 }
 0x361   :  { %3764 = vmatpush1.bf16.msra.mxu0 %v2553_v38  ;;  %v2634_v38 = vunpack.c.l.s8.bf16 %v1954_v2 }
 0x362   :  { %3807 = vmatpush1.bf16.msra.mxu1 %v2681_v49  ;;  %3765 = vmatprep.subr.bf16.mxu0 %v2674_v47  ;;  %v2762_v49 = vunpack.c.l.s8.bf16 %v2018_v10  ;;  %v1946_v47 = vld [vmem:[%s9084_s4 + $0x518] sm:$0xff]  ;;  %v7410_v10 = vpop.f32.mrf.mxu0 }
 0x363   :  { %3808 = vmatprep.subr.bf16.mxu1 %v2802_v30  ;;  %v2633_v30 = vunpack.c.l.s8.bf16 %v1953_v9  ;;  %v2058_v9 = vld [vmem:[%s9084_s4 + $0x898] sm:$0xff] }
 0x365   :  { %3766 = vmatpush2.bf16.msra.mxu0 %v2673_v28  ;;  %v2626_v28 = vunpack.c.h.s8.bf16 %v1946_v47 }
 0x366   :  { %3809 = vmatpush2.bf16.msra.mxu1 %v2801_v34  ;;  %3767 = vmatprep.subr.bf16.mxu0 %v2666_v33  ;;  %v1945_v34 = vld [vmem:[%s9084_s4 + $0x510] sm:$0xff]  ;;  %v2754_v33 = vunpack.c.h.s8.bf16 %v2010_v39 }
 0x367   :  { %3810 = vmatprep.subr.bf16.mxu1 %v2794_v35  ;;  %v2009_v35 = vld [vmem:[%s9084_s4 + $0x710] sm:$0xff]  ;;  %v2625_v37 = vunpack.c.h.s8.bf16 %v1945_v34 }
 0x368   :  { %v2753_v42 = vunpack.c.h.s8.bf16 %v2009_v35  ;;  %v2745_v24 = vunpack.c.l.s8.bf16 %v2009_v35 }
 0x369   :  { %3768 = vmatpush2.bf16.msra.mxu0 %v2665_v29  ;;  %v2618_v29 = vunpack.c.l.s8.bf16 %v1946_v47 }
 0x36a   :  { %3811 = vmatpush2.bf16.msra.mxu1 %v2793_v54  ;;  %3769 = vmatprep.subr.bf16.mxu0 %v2658_v53  ;;  %v2746_v54 = vunpack.c.l.s8.bf16 %v2010_v39  ;;  %v2066_v53 = vld [vmem:[%s9084_s4 + $0x8d8] sm:$0xff] }
 0x36b   :  { %3812 = vmatprep.subr.bf16.mxu1 %v2786_v25  ;;  %v2617_v25 = vunpack.c.l.s8.bf16 %v1945_v34 }
 0x36d   :  { %3770 = vmatpush2.bf16.msra.mxu0 %v2657_v59  ;;  %v2866_v59 = vunpack.c.h.s8.bf16 %v2066_v53 }
 0x36e   :  { %3813 = vmatpush2.bf16.msra.mxu1 %v2785_v55  ;;  %3771 = vmatprep.subr.bf16.mxu0 %v2650_v4  ;;  %v2065_v55 = vld [vmem:[%s9084_s4 + $0x8d0] sm:$0xff]  ;;  %v2994_v4 = vunpack.c.h.s8.bf16 %v2130_v17 }
 0x36f   :  { %3814 = vmatprep.subr.bf16.mxu1 %v2778_v1  ;;  %v2129_v1 = vld [vmem:[%s9084_s4 + $0xad0] sm:$0xff]  ;;  %v2865_v2 = vunpack.c.h.s8.bf16 %v2065_v55 }
 0x370   :  { %v2985_v39 = vunpack.c.l.s8.bf16 %v2129_v1 }
 0x371   :  { %3772 = vmatpush2.bf16.msra.mxu0 %v2649_v12  ;;  %v2993_v12 = vunpack.c.h.s8.bf16 %v2129_v1  ;;  %v2049_v1 = vld [vmem:[%s9084_s4 + $0x850] sm:$0xff] }
 0x372   :  { %3815 = vmatpush2.bf16.msra.mxu1 %v2777_v20  ;;  %3773 = vmatprep.subr.bf16.mxu0 %v2642_v23  ;;  %v7412_v20 = vpop.f32.mrf.mxu1  ;;  %v2858_v23 = vunpack.c.l.s8.bf16 %v2066_v53  ;;  %v2842_v53 = vunpack.c.l.s8.bf16 %v2058_v9 }
 0x373   :  { %3816 = vmatprep.subr.bf16.mxu1 %v2770_v51 }
 0x375   :  { %3774 = vmatpush2.bf16.msra.mxu0 %v2641_v11  ;;  %v2122_v11 = vld [vmem:[%s9084_s4 + $0xa98] sm:$0xff] }
 0x376   :  { %3817 = vmatpush2.bf16.msra.mxu1 %v2769_v57  ;;  %3775 = vmatprep.subr.bf16.mxu0 %v2634_v38  ;;  %v2978_v34 = vunpack.c.h.s8.bf16 %v2122_v11 }
 0x377   :  { %3818 = vmatprep.subr.bf16.mxu1 %v2762_v49  ;;  %v2857_v49 = vunpack.c.l.s8.bf16 %v2065_v55 }
 0x379   :  { %3776 = vmatpush2.bf16.msra.mxu0 %v2633_v30  ;;  %v2850_v30 = vunpack.c.h.s8.bf16 %v2058_v9 }
 0x37a   :  { %3819 = vmatpush2.bf16.msra.mxu1 %v2761_v6  ;;  %3777 = vmatprep.subr.bf16.mxu0 %v2626_v28  ;;  %v2057_v6 = vld [vmem:[%s9084_s4 + $0x890] sm:$0xff] }
 0x37b   :  { %3820 = vmatprep.subr.bf16.mxu1 %v2754_v33  ;;  %v2121_v33 = vld [vmem:[%s9084_s4 + $0xa90] sm:$0xff] }
 0x37c   :  { %v2969_v55 = vunpack.c.l.s8.bf16 %v2121_v33 }
 0x37d   :  { %3778 = vmatpush2.bf16.msra.mxu0 %v2625_v37 }
 0x37e   :  { %3821 = vmatpush2.bf16.msra.mxu1 %v2753_v42  ;;  %3779 = vmatprep.subr.bf16.mxu0 %v2618_v29  ;;  %v2849_v42 = vunpack.c.h.s8.bf16 %v2057_v6 }
 0x37f   :  { %3822 = vmatprep.subr.bf16.mxu1 %v2746_v54  ;;  %v2977_v54 = vunpack.c.h.s8.bf16 %v2121_v33 }
 0x381   :  { %3780 = vmatpush2.bf16.msra.mxu0 %v2617_v25  ;;  %v2970_v25 = vunpack.c.l.s8.bf16 %v2122_v11  ;;  %v2042_v11 = vld [vmem:[%s9084_s4 + $0x818] sm:$0xff] }
 0x382   :  { %3823 = vmatpush2.bf16.msra.mxu1 %v2745_v24  ;;  %3835 = vmatprep.subr.bf16.mxu0 %v2866_v59  ;;  %v2050_v24 = vld [vmem:[%s9084_s4 + $0x858] sm:$0xff] }
 0x383   :  { %3878 = vmatprep.subr.bf16.mxu1 %v2994_v4  ;;  %v2114_v59 = vld [vmem:[%s9084_s4 + $0xa58] sm:$0xff]  ;;  %v2834_v4 = vunpack.c.h.s8.bf16 %v2050_v24 }
 0x384   :  { %v3525_v51 = vpop.f32.mrf.mxu0  ;;  %3782 = vmatmul.mubr.bf16.vlgmr.msra.gmra.mxu0 %v6427_v0 }
 0x385   :  { %v3526_v57 = vadd.f32 %v3525_v51, %v7315_v16  ;;  %v3568_v38 = vpop.f32.mrf.mxu1  ;;  %3825 = vmatmul.mubr.bf16.vlgmr.msra.gmra.mxu1 %v6554_v44  ;;  %3836 = vmatpush1.bf16.msra.mxu0 %v2865_v2  ;;  %v2962_v2 = vunpack.c.h.s8.bf16 %v2114_v59  ;;  %v2826_v51 = vunpack.c.l.s8.bf16 %v2050_v24 }
 0x386   :  { %3867 = vmatprep.mubr.bf16.mxu0 %v6937_v61  ;;  %3879 = vmatpush1.bf16.msra.mxu1 %v2993_v12  ;;  %v7424_v47 = vpop.f32.mrf.mxu0  ;;  %v2113_v12 = vld [vmem:[%s9084_s4 + $0xa50] sm:$0xff] }
 0x387   :  { %v7429_v28 = vadd.f32 %v3568_v38, %v3526_v57  ;;  %3910 = vmatprep.mubr.bf16.mxu1 %v6943_v63  ;;  %v7432_v16 = vpop.f32.mrf.mxu1  ;;  %3837 = vmatprep.subr.bf16.mxu0 %v2858_v23  ;;  %v2833_v23 = vunpack.c.h.s8.bf16 %v2049_v1  ;;  %v2961_v9 = vunpack.c.h.s8.bf16 %v2113_v12  ;;  %v2106_v57 = vld [vmem:[%s9084_s4 + $0xa18] sm:$0xff]  ;;  %v2825_v38 = vunpack.c.l.s8.bf16 %v2049_v1 }
 0x388   :  { %v3529_v35 = vpop.f32.mrf.mxu0  ;;  %3880 = vmatprep.subr.bf16.mxu1 %v2986_v27  ;;  %v2954_v27 = vunpack.c.l.s8.bf16 %v2114_v59  ;;  %v2097_v59 = vld [vmem:[%s9084_s4 + $0x9d0] sm:$0xff] }
 0x389   :  { %v3530_v37 = vadd.f32 %v3529_v35, %v7324_v5  ;;  %3838 = vmatpush1.bf16.msra.mxu0 %v2857_v49  ;;  %v3572_v29 = vpop.f32.mrf.mxu1  ;;  %v2841_v5 = vunpack.c.l.s8.bf16 %v2057_v6  ;;  %v2953_v49 = vunpack.c.l.s8.bf16 %v2113_v12  ;;  %v2946_v6 = vunpack.c.h.s8.bf16 %v2106_v57 }
 0x38a   :  { %3881 = vmatpush1.bf16.msra.mxu1 %v2985_v39  ;;  %3839 = vmatprep.subr.bf16.mxu0 %v2850_v30  ;;  %v2818_v39 = vunpack.c.h.s8.bf16 %v2042_v11  ;;  %v2041_v30 = vld [vmem:[%s9084_s4 + $0x810] sm:$0xff] }
 0x38b   :  { %v7438_v17 = vadd.f32 %v3572_v29, %v3530_v37  ;;  %3882 = vmatprep.subr.bf16.mxu1 %v2978_v34  ;;  %v2105_v34 = vld [vmem:[%s9084_s4 + $0xa10] sm:$0xff]  ;;  %v2817_v33 = vunpack.c.h.s8.bf16 %v2041_v30  ;;  %v2810_v37 = vunpack.c.l.s8.bf16 %v2042_v11  ;;  %v2098_v29 = vld [vmem:[%s9084_s4 + $0x9d8] sm:$0xff] }
 0x38c   :  { %v2945_v35 = vunpack.c.h.s8.bf16 %v2105_v34  ;;  %v2930_v24 = vunpack.c.h.s8.bf16 %v2098_v29 }
 0x38d   :  { %3840 = vmatpush1.bf16.msra.mxu0 %v2849_v42  ;;  %v2938_v42 = vunpack.c.l.s8.bf16 %v2106_v57  ;;  %v2089_v57 = vld [vmem:[%s9084_s4 + $0x990] sm:$0xff] }
 0x38e   :  { %3883 = vmatpush1.bf16.msra.mxu1 %v2977_v54  ;;  %3841 = vmatprep.subr.bf16.mxu0 %v2842_v53  ;;  %v2162_v54 = vld [vmem:[%s9084_s4 + $0xbd8] sm:$0xff]  ;;  %v2809_v53 = vunpack.c.l.s8.bf16 %v2041_v30 }
 0x38f   :  { %3884 = vmatprep.subr.bf16.mxu1 %v2970_v25  ;;  %v2937_v25 = vunpack.c.l.s8.bf16 %v2105_v34  ;;  %v3050_v12 = vunpack.c.l.s8.bf16 %v2162_v54 }
 0x391   :  { %3842 = vmatpush1.bf16.msra.mxu0 %v2841_v5  ;;  %v3058_v5 = vunpack.c.h.s8.bf16 %v2162_v54  ;;  %v2081_v54 = vld [vmem:[%s9084_s4 + $0x950] sm:$0xff] }
 0x392   :  { %3885 = vmatpush1.bf16.msra.mxu1 %v2969_v55  ;;  %3843 = vmatprep.subr.bf16.mxu0 %v2834_v4  ;;  %v2161_v55 = vld [vmem:[%s9084_s4 + $0xbd0] sm:$0xff]  ;;  %v2929_v4 = vunpack.c.h.s8.bf16 %v2097_v59 }
 0x393   :  { %3886 = vmatprep.subr.bf16.mxu1 %v2962_v2  ;;  %v3057_v1 = vunpack.c.h.s8.bf16 %v2161_v55  ;;  %v2922_v2 = vunpack.c.l.s8.bf16 %v2098_v29 }
 0x395   :  { %3844 = vmatpush1.bf16.msra.mxu0 %v2833_v23  ;;  %v2090_v23 = vld [vmem:[%s9084_s4 + $0x998] sm:$0xff] }
 0x396   :  { %3887 = vmatpush1.bf16.msra.mxu1 %v2961_v9  ;;  %3845 = vmatprep.subr.bf16.mxu0 %v2826_v51  ;;  %v2154_v9 = vld [vmem:[%s9084_s4 + $0xb98] sm:$0xff]  ;;  %v2921_v51 = vunpack.c.l.s8.bf16 %v2097_v59  ;;  %v2914_v11 = vunpack.c.h.s8.bf16 %v2090_v23 }
 0x397   :  { %3888 = vmatprep.subr.bf16.mxu1 %v2954_v27  ;;  %v3049_v27 = vunpack.c.l.s8.bf16 %v2161_v55  ;;  %v3034_v34 = vunpack.c.l.s8.bf16 %v2154_v9 }
 0x399   :  { %3846 = vmatpush1.bf16.msra.mxu0 %v2825_v38  ;;  %v3042_v38 = vunpack.c.h.s8.bf16 %v2154_v9  ;;  %v2073_v9 = vld [vmem:[%s9084_s4 + $0x910] sm:$0xff] }
 0x39a   :  { %3889 = vmatpush1.bf16.msra.mxu1 %v2953_v49  ;;  %3847 = vmatprep.subr.bf16.mxu0 %v2818_v39  ;;  %v2153_v49 = vld [vmem:[%s9084_s4 + $0xb90] sm:$0xff]  ;;  %v2913_v39 = vunpack.c.h.s8.bf16 %v2089_v57 }
 0x39b   :  { %3890 = vmatprep.subr.bf16.mxu1 %v2946_v6  ;;  %v3041_v30 = vunpack.c.h.s8.bf16 %v2153_v49  ;;  %v2906_v6 = vunpack.c.l.s8.bf16 %v2090_v23 }
 0x39d   :  { %3848 = vmatpush1.bf16.msra.mxu0 %v2817_v33  ;;  %v2082_v33 = vld [vmem:[%s9084_s4 + $0x958] sm:$0xff] }
 0x39e   :  { %3891 = vmatpush1.bf16.msra.mxu1 %v2945_v35  ;;  %3849 = vmatprep.subr.bf16.mxu0 %v2810_v37  ;;  %v2146_v35 = vld [vmem:[%s9084_s4 + $0xb58] sm:$0xff]  ;;  %v2905_v37 = vunpack.c.l.s8.bf16 %v2089_v57  ;;  %v2898_v29 = vunpack.c.h.s8.bf16 %v2082_v33 }
 0x39f   :  { %3892 = vmatprep.subr.bf16.mxu1 %v2938_v42  ;;  %v3033_v42 = vunpack.c.l.s8.bf16 %v2153_v49  ;;  %v3018_v55 = vunpack.c.l.s8.bf16 %v2146_v35 }
 0x3a1   :  { %3850 = vmatpush1.bf16.msra.mxu0 %v2809_v53  ;;  %v3026_v53 = vunpack.c.h.s8.bf16 %v2146_v35  ;;  %v2193_v35 = vld [vmem:[%s9084_s4 + $0xcd0] sm:$0xff] }
 0x3a2   :  { %3893 = vmatpush1.bf16.msra.mxu1 %v2937_v25  ;;  %3851 = vmatprep.subr.bf16.mxu0 %v2930_v24  ;;  %v2145_v25 = vld [vmem:[%s9084_s4 + $0xb50] sm:$0xff]  ;;  %v2897_v24 = vunpack.c.h.s8.bf16 %v2081_v54 }
 0x3a3   :  { %3894 = vmatprep.subr.bf16.mxu1 %v3058_v5  ;;  %v3025_v59 = vunpack.c.h.s8.bf16 %v2145_v25  ;;  %v2890_v5 = vunpack.c.l.s8.bf16 %v2082_v33 }
 0x3a5   :  { %3852 = vmatpush2.bf16.msra.mxu0 %v2929_v4  ;;  %v2074_v4 = vld [vmem:[%s9084_s4 + $0x918] sm:$0xff] }
 0x3a6   :  { %3895 = vmatpush2.bf16.msra.mxu1 %v3057_v1  ;;  %3853 = vmatprep.subr.bf16.mxu0 %v2922_v2  ;;  %v2138_v1 = vld [vmem:[%s9084_s4 + $0xb18] sm:$0xff]  ;;  %v2889_v2 = vunpack.c.l.s8.bf16 %v2081_v54  ;;  %v2882_v23 = vunpack.c.h.s8.bf16 %v2074_v4  ;;  %v7524_v54 = vpop.f32.mrf.mxu0 }
 0x3a7   :  { %3896 = vmatprep.subr.bf16.mxu1 %v3050_v12  ;;  %v3017_v12 = vunpack.c.l.s8.bf16 %v2145_v25  ;;  %v3002_v49 = vunpack.c.l.s8.bf16 %v2138_v1 }
 0x3a9   :  { %3854 = vmatpush2.bf16.msra.mxu0 %v2921_v51  ;;  %v3010_v51 = vunpack.c.h.s8.bf16 %v2138_v1  ;;  %v2250_v1 = vld [vmem:[%s9084_s4 + $0xe98] sm:$0xff] }
 0x3aa   :  { %3897 = vmatpush2.bf16.msra.mxu1 %v3049_v27  ;;  %3855 = vmatprep.subr.bf16.mxu0 %v2914_v11  ;;  %v2137_v27 = vld [vmem:[%s9084_s4 + $0xb10] sm:$0xff]  ;;  %v2881_v11 = vunpack.c.h.s8.bf16 %v2073_v9 }
 0x3ab   :  { %3898 = vmatprep.subr.bf16.mxu1 %v3042_v38  ;;  %v3009_v57 = vunpack.c.h.s8.bf16 %v2137_v27  ;;  %v2874_v38 = vunpack.c.l.s8.bf16 %v2074_v4 }
 0x3ad   :  { %3856 = vmatpush2.bf16.msra.mxu0 %v2913_v39  ;;  %v2194_v39 = vld [vmem:[%s9084_s4 + $0xcd8] sm:$0xff] }
 0x3ae   :  { %3899 = vmatpush2.bf16.msra.mxu1 %v3041_v30  ;;  %3857 = vmatprep.subr.bf16.mxu0 %v2906_v6  ;;  %v2258_v30 = vld [vmem:[%s9084_s4 + $0xed8] sm:$0xff]  ;;  %v2873_v6 = vunpack.c.l.s8.bf16 %v2073_v9  ;;  %v3122_v33 = vunpack.c.h.s8.bf16 %v2194_v39  ;;  %v3113_v9 = vunpack.c.l.s8.bf16 %v2193_v35 }
 0x3af   :  { %3900 = vmatprep.subr.bf16.mxu1 %v3034_v34  ;;  %v3001_v34 = vunpack.c.l.s8.bf16 %v2137_v27  ;;  %v3242_v4 = vunpack.c.l.s8.bf16 %v2258_v30 }
 0x3b1   :  { %3858 = vmatpush2.bf16.msra.mxu0 %v2905_v37  ;;  %v3250_v37 = vunpack.c.h.s8.bf16 %v2258_v30  ;;  %v2249_v30 = vld [vmem:[%s9084_s4 + $0xe90] sm:$0xff] }
 0x3b2   :  { %3901 = vmatpush2.bf16.msra.mxu1 %v3033_v42  ;;  %3859 = vmatprep.subr.bf16.mxu0 %v2898_v29  ;;  %v2257_v42 = vld [vmem:[%s9084_s4 + $0xed0] sm:$0xff]  ;;  %v3121_v29 = vunpack.c.h.s8.bf16 %v2193_v35 }
 0x3b3   :  { %3902 = vmatprep.subr.bf16.mxu1 %v3026_v53  ;;  %v4695_v53 = vld [vmem:[%s9085_s5] sm:$0xff]  ;;  %v3249_v25 = vunpack.c.h.s8.bf16 %v2257_v42 }
 0x3b5   :  { %3860 = vmatpush2.bf16.msra.mxu0 %v2897_v24  ;;  %v7529_v24 = vpop.f32.mrf.mxu1 }
 0x3b6   :  { %3903 = vmatpush2.bf16.msra.mxu1 %v3025_v59  ;;  %3861 = vmatprep.subr.bf16.mxu0 %v2890_v5  ;;  %v3114_v59 = vunpack.c.l.s8.bf16 %v2194_v39  ;;  %v2186_v5 = vld [vmem:[%s9084_s4 + $0xc98] sm:$0xff]  ;;  %v3234_v39 = vunpack.c.h.s8.bf16 %v2250_v1 }
 0x3b7   :  { %3904 = vmatprep.subr.bf16.mxu1 %v3018_v55 }
 0x3b9   :  { %3862 = vmatpush2.bf16.msra.mxu0 %v2889_v2 }
 0x3ba   :  { %3905 = vmatpush2.bf16.msra.mxu1 %v3017_v12  ;;  %3863 = vmatprep.subr.bf16.mxu0 %v2882_v23  ;;  %v4700_v23 = vrot.slane %v4695_v53, %v6145_v40  ;;  %v3098_v53 = vunpack.c.l.s8.bf16 %v2186_v5 }
 0x3bb   :  { %3906 = vmatprep.subr.bf16.mxu1 %v3010_v51  ;;  %v4753_v51 = vld [vmem:[%s9086_s6] sm:$0xff] }
 0x3bd   :  { %3864 = vmatpush2.bf16.msra.mxu0 %v2881_v11  ;;  %v3241_v11 = vunpack.c.l.s8.bf16 %v2257_v42 }
 0x3be   :  { %3907 = vmatpush2.bf16.msra.mxu1 %v3009_v57  ;;  %3865 = vmatprep.subr.bf16.mxu0 %v2874_v38  ;;  %v3106_v57 = vunpack.c.h.s8.bf16 %v2186_v5  ;;  %v2177_v5 = vld [vmem:[%s9084_s4 + $0xc50] sm:$0xff] }
 0x3bf   :  { %3908 = vmatprep.subr.bf16.mxu1 %v3002_v49 }
 0x3c1   :  { %3866 = vmatpush2.bf16.msra.mxu0 %v2873_v6 }
 0x3c2   :  { %3909 = vmatpush2.bf16.msra.mxu1 %v3001_v34  ;;  %3921 = vmatprep.subr.bf16.mxu0 %v3122_v33  ;;  %v4758_v33 = vrot.slane %v4753_v51, %v6145_v40 }
 0x3c3   :  { %3964 = vmatprep.subr.bf16.mxu1 %v3250_v37 }
 0x3c4   :  { %v3611_v55 = vpop.f32.mrf.mxu0  ;;  %3868 = vmatmul.mubr.bf16.vlgmr.msra.gmra.mxu0 %v6704_v18 }
 0x3c5   :  { %v3612_v2 = vadd.f32 %v3611_v55, %v7429_v28  ;;  %v3654_v12 = vpop.f32.mrf.mxu1  ;;  %3911 = vmatmul.mubr.bf16.vlgmr.msra.gmra.mxu1 %v6844_v50  ;;  %3922 = vmatpush1.bf16.msra.mxu0 %v3121_v29  ;;  %v2185_v28 = vld [vmem:[%s9084_s4 + $0xc90] sm:$0xff]  ;;  %v3233_v29 = vunpack.c.h.s8.bf16 %v2249_v30  ;;  %v2178_v55 = vld [vmem:[%s9084_s4 + $0xc58] sm:$0xff] }
 0x3c6   :  { %3953 = vmatprep.mubr.bf16.mxu0 %v7065_v60  ;;  %3965 = vmatpush1.bf16.msra.mxu1 %v3249_v25  ;;  %v7545_v27 = vpop.f32.mrf.mxu0  ;;  %v3105_v37 = vunpack.c.h.s8.bf16 %v2185_v28  ;;  %v3090_v51 = vunpack.c.h.s8.bf16 %v2178_v55 }
 0x3c7   :  { %9114 = vst [vmem:[#allocation9_spill] sm:$0xff] %v7545_v27  ;;  %v3655_v38 = vadd.f32 %v3654_v12, %v3612_v2  ;;  %3996 = vmatprep.mubr.bf16.mxu1 %v7103_v62  ;;  %v7551_v49 = vpop.f32.mrf.mxu1  ;;  %3923 = vmatprep.subr.bf16.mxu0 %v3114_v59  ;;  %v3226_v59 = vunpack.c.l.s8.bf16 %v2250_v1  ;;  %v3097_v12 = vunpack.c.l.s8.bf16 %v2185_v28 }
 0x3c8   :  { %9115 = vst [vmem:[#allocation10_spill] sm:$0xff] %v7551_v49  ;;  %v3615_v6 = vpop.f32.mrf.mxu0  ;;  %3966 = vmatprep.subr.bf16.mxu1 %v3242_v4  ;;  %v2242_v4 = vld [vmem:[%s9084_s4 + $0xe58] sm:$0xff] }
 0x3c9   :  { %v4737_v34 = vmul.f32 %v4700_v23, %v3655_v38  ;;  %v3616_v35 = vadd.f32 %v3615_v6, %v7438_v17  ;;  %3924 = vmatpush1.bf16.msra.mxu0 %v3113_v9  ;;  %v3658_v42 = vpop.f32.mrf.mxu1  ;;  %v3225_v9 = vunpack.c.l.s8.bf16 %v2249_v30  ;;  %v3082_v30 = vunpack.c.l.s8.bf16 %v2178_v55 }
 0x3ca   :  { %3967 = vmatpush1.bf16.msra.mxu1 %v3241_v11  ;;  %3925 = vmatprep.subr.bf16.mxu0 %v3106_v57  ;;  %v3218_v11 = vunpack.c.h.s8.bf16 %v2242_v4  ;;  %v2241_v57 = vld [vmem:[%s9084_s4 + $0xe50] sm:$0xff] }
 0x3cb   :  { %v3659_v25 = vadd.f32 %v3658_v42, %v3616_v35  ;;  %3968 = vmatprep.subr.bf16.mxu1 %v3234_v39  ;;  %v4795_v2 = vadd.f32 %v4758_v33, %v4737_v34  ;;  %v3217_v28 = vunpack.c.h.s8.bf16 %v2241_v57  ;;  %v3210_v34 = vunpack.c.l.s8.bf16 %v2242_v4  ;;  %v2234_v35 = vld [vmem:[%s9084_s4 + $0xe18] sm:$0xff] }
 0x3cc   :  { %v3209_v42 = vunpack.c.l.s8.bf16 %v2241_v57 }
 0x3cd   :  { %v4745_v17 = vmul.f32 %v4700_v23, %v3659_v25  ;;  %3926 = vmatpush1.bf16.msra.mxu0 %v3105_v37  ;;  %v4811_v38 = vmax.f32 %v4795_v2, 0.0  ;;  %v3089_v23 = vunpack.c.h.s8.bf16 %v2177_v5  ;;  %v3081_v37 = vunpack.c.l.s8.bf16 %v2177_v5 }
 0x3ce   :  { %3969 = vmatpush1.bf16.msra.mxu1 %v3233_v29  ;;  %3927 = vmatprep.subr.bf16.mxu0 %v3098_v53  ;;  %v2169_v53 = vld [vmem:[%s9084_s4 + $0xc10] sm:$0xff]  ;;  %v3202_v25 = vunpack.c.h.s8.bf16 %v2234_v35 }
 0x3cf   :  { %v4803_v1 = vadd.f32 %v4758_v33, %v4745_v17  ;;  %3970 = vmatprep.subr.bf16.mxu1 %v3226_v59  ;;  %v2170_v33 = vld [vmem:[%s9084_s4 + $0xc18] sm:$0xff]  ;;  %v2233_v59 = vld [vmem:[%s9084_s4 + $0xe10] sm:$0xff]  ;;  %v3073_v55 = vunpack.c.h.s8.bf16 %v2169_v53  ;;  %v3194_v17 = vunpack.c.l.s8.bf16 %v2234_v35 }
 0x3d0   :  { %v3074_v29 = vunpack.c.h.s8.bf16 %v2170_v33  ;;  %v3201_v4 = vunpack.c.h.s8.bf16 %v2233_v59  ;;  %v3066_v2 = vunpack.c.l.s8.bf16 %v2170_v33  ;;  %v3193_v5 = vunpack.c.l.s8.bf16 %v2233_v59  ;;  %v2282_v33 = vld [vmem:[%s9084_s4 + $0xf98] sm:$0xff] }
 0x3d1   :  { %v4819_v39 = vmax.f32 %v4803_v1, 0.0  ;;  %3928 = vmatpush1.bf16.msra.mxu0 %v3097_v12  ;;  %v2226_v12 = vld [vmem:[%s9084_s4 + $0xdd8] sm:$0xff] }
 0x3d2   :  { %3971 = vmatpush1.bf16.msra.mxu1 %v3225_v9  ;;  %3929 = vmatprep.subr.bf16.mxu0 %v3090_v51  ;;  %v2290_v9 = vld [vmem:[%s9084_s4 + $0xfd8] sm:$0xff]  ;;  %v3065_v51 = vunpack.c.l.s8.bf16 %v2169_v53  ;;  %v3186_v1 = vunpack.c.h.s8.bf16 %v2226_v12  ;;  %v3298_v53 = vunpack.c.h.s8.bf16 %v2282_v33 }
 0x3d3   :  { %v7570_v6 = vpack.c.bf16 %v4819_v39, %v4811_v38  ;;  %3972 = vmatprep.subr.bf16.mxu1 %v3218_v11  ;;  %v2225_v11 = vld [vmem:[%s9084_s4 + $0xdd0] sm:$0xff]  ;;  %v3314_v57 = vunpack.c.h.s8.bf16 %v2290_v9 }
 0x3d4   :  { %v2289_v38 = vld [vmem:[%s9084_s4 + $0xfd0] sm:$0xff]  ;;  %v3185_v39 = vunpack.c.h.s8.bf16 %v2225_v11  ;;  %v3177_v35 = vunpack.c.l.s8.bf16 %v2225_v11 }
 0x3d5   :  { %9116 = vst [vmem:[#allocation11_spill] sm:$0xff] %v7570_v6  ;;  %3930 = vmatpush1.bf16.msra.mxu0 %v3089_v23  ;;  %v3313_v23 = vunpack.c.h.s8.bf16 %v2289_v38 }
 0x3d6   :  { %3973 = vmatpush1.bf16.msra.mxu1 %v3217_v28  ;;  %3931 = vmatprep.subr.bf16.mxu0 %v3082_v30  ;;  %v3178_v28 = vunpack.c.l.s8.bf16 %v2226_v12  ;;  %v3306_v30 = vunpack.c.l.s8.bf16 %v2290_v9  ;;  %v2274_v12 = vld [vmem:[%s9084_s4 + $0xf58] sm:$0xff] }
 0x3d7   :  { %3974 = vmatprep.subr.bf16.mxu1 %v3210_v34  ;;  %v2218_v34 = vld [vmem:[%s9084_s4 + $0xd98] sm:$0xff]  ;;  %v3282_v11 = vunpack.c.h.s8.bf16 %v2274_v12 }
 0x3d9   :  { %3932 = vmatpush1.bf16.msra.mxu0 %v3081_v37  ;;  %v3305_v37 = vunpack.c.l.s8.bf16 %v2289_v38 }
 0x3da   :  { %3975 = vmatpush1.bf16.msra.mxu1 %v3209_v42  ;;  %3933 = vmatprep.subr.bf16.mxu0 %v3074_v29  ;;  %v3170_v42 = vunpack.c.h.s8.bf16 %v2218_v34  ;;  %v2217_v29 = vld [vmem:[%s9084_s4 + $0xd90] sm:$0xff] }
 0x3db   :  { %3976 = vmatprep.subr.bf16.mxu1 %v3202_v25  ;;  %v2281_v25 = vld [vmem:[%s9084_s4 + $0xf90] sm:$0xff]  ;;  %v3169_v59 = vunpack.c.h.s8.bf16 %v2217_v29  ;;  %v3161_v9 = vunpack.c.l.s8.bf16 %v2217_v29 }
 0x3dd   :  { %3934 = vmatpush1.bf16.msra.mxu0 %v3073_v55  ;;  %v3297_v55 = vunpack.c.h.s8.bf16 %v2281_v25 }
 0x3de   :  { %3977 = vmatpush1.bf16.msra.mxu1 %v3201_v4  ;;  %3935 = vmatprep.subr.bf16.mxu0 %v3066_v2  ;;  %v3162_v4 = vunpack.c.l.s8.bf16 %v2218_v34  ;;  %v3290_v2 = vunpack.c.l.s8.bf16 %v2282_v33  ;;  %v2266_v34 = vld [vmem:[%s9084_s4 + $0xf18] sm:$0xff] }
 0x3df   :  { %3978 = vmatprep.subr.bf16.mxu1 %v3194_v17  ;;  %v2210_v17 = vld [vmem:[%s9084_s4 + $0xd58] sm:$0xff]  ;;  %v3266_v29 = vunpack.c.h.s8.bf16 %v2266_v34 }
 0x3e1   :  { %3936 = vmatpush1.bf16.msra.mxu0 %v3065_v51  ;;  %v3289_v51 = vunpack.c.l.s8.bf16 %v2281_v25 }
 0x3e2   :  { %3979 = vmatpush1.bf16.msra.mxu1 %v3193_v5  ;;  %3937 = vmatprep.subr.bf16.mxu0 %v3186_v1  ;;  %v3154_v5 = vunpack.c.h.s8.bf16 %v2210_v17  ;;  %v2209_v1 = vld [vmem:[%s9084_s4 + $0xd50] sm:$0xff] }
 0x3e3   :  { %3980 = vmatprep.subr.bf16.mxu1 %v3314_v57  ;;  %v2273_v57 = vld [vmem:[%s9084_s4 + $0xf50] sm:$0xff]  ;;  %v3153_v38 = vunpack.c.h.s8.bf16 %v2209_v1  ;;  %v3145_v33 = vunpack.c.l.s8.bf16 %v2209_v1 }
 0x3e5   :  { %3938 = vmatpush2.bf16.msra.mxu0 %v3185_v39  ;;  %v3281_v39 = vunpack.c.h.s8.bf16 %v2273_v57 }
 0x3e6   :  { %3981 = vmatpush2.bf16.msra.mxu1 %v3313_v23  ;;  %3939 = vmatprep.subr.bf16.mxu0 %v3178_v28  ;;  %v3146_v23 = vunpack.c.l.s8.bf16 %v2210_v17  ;;  %v3274_v28 = vunpack.c.l.s8.bf16 %v2274_v12  ;;  %v1876_v17 = vld [vmem:[%s9084_s4 + $0x2e8] sm:$0xff] }
 0x3e7   :  { %3982 = vmatprep.subr.bf16.mxu1 %v3306_v30  ;;  %v2202_v30 = vld [vmem:[%s9084_s4 + $0xd18] sm:$0xff]  ;;  %v2484_v1 = vunpack.c.h.s8.bf16 %v1876_v17 }
 0x3e9   :  { %3940 = vmatpush2.bf16.msra.mxu0 %v3177_v35  ;;  %v3273_v35 = vunpack.c.l.s8.bf16 %v2273_v57 }
 0x3ea   :  { %3983 = vmatpush2.bf16.msra.mxu1 %v3305_v37  ;;  %3941 = vmatprep.subr.bf16.mxu0 %v3170_v42  ;;  %v3138_v37 = vunpack.c.h.s8.bf16 %v2202_v30  ;;  %v2201_v42 = vld [vmem:[%s9084_s4 + $0xd10] sm:$0xff] }
 0x3eb   :  { %3984 = vmatprep.subr.bf16.mxu1 %v3298_v53  ;;  %v2265_v53 = vld [vmem:[%s9084_s4 + $0xf10] sm:$0xff]  ;;  %v3137_v25 = vunpack.c.h.s8.bf16 %v2201_v42  ;;  %v3129_v12 = vunpack.c.l.s8.bf16 %v2201_v42 }
 0x3ed   :  { %3942 = vmatpush2.bf16.msra.mxu0 %v3169_v59  ;;  %v3265_v59 = vunpack.c.h.s8.bf16 %v2265_v53 }
 0x3ee   :  { %3985 = vmatpush2.bf16.msra.mxu1 %v3297_v55  ;;  %3943 = vmatprep.subr.bf16.mxu0 %v3162_v4  ;;  %v3130_v55 = vunpack.c.l.s8.bf16 %v2202_v30  ;;  %v3258_v4 = vunpack.c.l.s8.bf16 %v2266_v34  ;;  %v1804_v30 = vld [vmem:[%s9084_s4 + $0xa8] sm:$0xff] }
 0x3ef   :  { %3986 = vmatprep.subr.bf16.mxu1 %v3290_v2  ;;  %v1812_v2 = vld [vmem:[%s9084_s4 + $0xe8] sm:$0xff] }
 0x3f1   :  { %3944 = vmatpush2.bf16.msra.mxu0 %v3161_v9  ;;  %v3257_v9 = vunpack.c.l.s8.bf16 %v2265_v53 }
 0x3f2   :  { %3987 = vmatpush2.bf16.msra.mxu1 %v3289_v51  ;;  %3945 = vmatprep.subr.bf16.mxu0 %v3154_v5  ;;  %v2356_v51 = vunpack.c.h.s8.bf16 %v1812_v2  ;;  %v1811_v5 = vld [vmem:[%s9084_s4 + $0xe0] sm:$0xff] }
 0x3f3   :  { %3988 = vmatprep.subr.bf16.mxu1 %v3282_v11  ;;  %v1875_v11 = vld [vmem:[%s9084_s4 + $0x2e0] sm:$0xff]  ;;  %v2355_v57 = vunpack.c.h.s8.bf16 %v1811_v5  ;;  %v2347_v42 = vunpack.c.l.s8.bf16 %v1811_v5 }
 0x3f5   :  { %3946 = vmatpush2.bf16.msra.mxu0 %v3153_v38  ;;  %v7644_v38 = vpop.f32.mrf.mxu0 }
 0x3f6   :  { %3989 = vmatpush2.bf16.msra.mxu1 %v3281_v39  ;;  %3947 = vmatprep.subr.bf16.mxu0 %v3146_v23  ;;  %9117 = vst [vmem:[#allocation12_spill] sm:$0xff] %v7644_v38  ;;  %v2483_v39 = vunpack.c.h.s8.bf16 %v1875_v11  ;;  %v7646_v23 = vpop.f32.mrf.mxu1 }
 0x3f7   :  { %3990 = vmatprep.subr.bf16.mxu1 %v3274_v28  ;;  %9118 = vst [vmem:[#allocation13_spill] sm:$0xff] %v7646_v23  ;;  %v2348_v28 = vunpack.c.l.s8.bf16 %v1812_v2 }
 0x3f9   :  { %3948 = vmatpush2.bf16.msra.mxu0 %v3145_v33  ;;  %v2476_v33 = vunpack.c.l.s8.bf16 %v1876_v17  ;;  %v1867_v17 = vld [vmem:[%s9084_s4 + $0x2a0] sm:$0xff] }
 0x3fa   :  { %3991 = vmatpush2.bf16.msra.mxu1 %v3273_v35  ;;  %3949 = vmatprep.subr.bf16.mxu0 %v3138_v37  ;;  %v1868_v35 = vld [vmem:[%s9084_s4 + $0x2a8] sm:$0xff] }
 0x3fb   :  { %3992 = vmatprep.subr.bf16.mxu1 %v3266_v29  ;;  %v2468_v2 = vunpack.c.h.s8.bf16 %v1868_v35 }
 0x3fd   :  { %3950 = vmatpush2.bf16.msra.mxu0 %v3137_v25  ;;  %v2475_v25 = vunpack.c.l.s8.bf16 %v1875_v11  ;;  %v2332_v11 = vunpack.c.l.s8.bf16 %v1804_v30 }
 0x3fe   :  { %3993 = vmatpush2.bf16.msra.mxu1 %v3265_v59  ;;  %3951 = vmatprep.subr.bf16.mxu0 %v3130_v55  ;;  %v2340_v59 = vunpack.c.h.s8.bf16 %v1804_v30  ;;  %v1803_v55 = vld [vmem:[%s9084_s4 + $0xa0] sm:$0xff] }
 0x3ff   :  { %3994 = vmatprep.subr.bf16.mxu1 %v3258_v4  ;;  %v1795_v30 = vld [vmem:[%s9084_s4 + $0x60] sm:$0xff] }
 0x401   :  { %3952 = vmatpush2.bf16.msra.mxu0 %v3129_v12 }
 0x402   :  { %3995 = vmatpush2.bf16.msra.mxu1 %v3257_v9  ;;  %4007 = vmatprep.subr.bf16.mxu0 %v2356_v51  ;;  %v2339_v51 = vunpack.c.h.s8.bf16 %v1803_v55 }
 0x403   :  { %4050 = vmatprep.subr.bf16.mxu1 %v2484_v1  ;;  %v2467_v1 = vunpack.c.h.s8.bf16 %v1867_v17 }
 0x404   :  { %v3697_v34 = vpop.f32.mrf.mxu0  ;;  %3954 = vmatmul.mubr.bf16.vlgmr.msra.gmra.mxu0 %v6972_v45 }
 0x405   :  { %v3740_v37 = vpop.f32.mrf.mxu1  ;;  %3997 = vmatmul.mubr.bf16.vlgmr.msra.gmra.mxu1 %v7186_v14  ;;  %4008 = vmatpush1.bf16.msra.mxu0 %v2355_v57  ;;  %v2460_v57 = vunpack.c.l.s8.bf16 %v1868_v35 }
 0x406   :  { %v7656_v29 = vadd.f32 %v3740_v37, %v3697_v34  ;;  %4039 = vmatprep.mubr.bf16.mxu0 %v6659_v19  ;;  %4051 = vmatpush1.bf16.msra.mxu1 %v2483_v39  ;;  %v7659_v53 = vpop.f32.mrf.mxu0  ;;  %v1796_v39 = vld [vmem:[%s9084_s4 + $0x68] sm:$0xff]  ;;  %v2331_v34 = vunpack.c.l.s8.bf16 %v1803_v55 }
 0x407   :  { %4082 = vmatprep.mubr.bf16.mxu1 %v6666_v52  ;;  %v7665_v4 = vpop.f32.mrf.mxu1  ;;  %4009 = vmatprep.subr.bf16.mxu0 %v2348_v28  ;;  %v1860_v28 = vld [vmem:[%s9084_s4 + $0x268] sm:$0xff]  ;;  %v2324_v37 = vunpack.c.h.s8.bf16 %v1796_v39  ;;  %v2316_v55 = vunpack.c.l.s8.bf16 %v1796_v39  ;;  %v1851_v39 = vld [vmem:[%s9084_s4 + $0x220] sm:$0xff] }
 0x408   :  { %v3701_v12 = vpop.f32.mrf.mxu0  ;;  %4052 = vmatprep.subr.bf16.mxu1 %v2476_v33  ;;  %v2459_v33 = vunpack.c.l.s8.bf16 %v1867_v17  ;;  %v2452_v35 = vunpack.c.h.s8.bf16 %v1860_v28  ;;  %v1788_v17 = vld [vmem:[%s9084_s4 + $0x28] sm:$0xff] }
 0x409   :  { %v3744_v9 = vpop.f32.mrf.mxu1  ;;  %4010 = vmatpush1.bf16.msra.mxu0 %v2347_v42  ;;  %v1859_v42 = vld [vmem:[%s9084_s4 + $0x260] sm:$0xff] }
 0x40a   :  { %v7670_v5 = vadd.f32 %v3744_v9, %v3701_v12  ;;  %4053 = vmatpush1.bf16.msra.mxu1 %v2475_v25  ;;  %4011 = vmatprep.subr.bf16.mxu0 %v2340_v59  ;;  %v2323_v25 = vunpack.c.h.s8.bf16 %v1795_v30  ;;  %v2451_v59 = vunpack.c.h.s8.bf16 %v1859_v42  ;;  %v1852_v12 = vld [vmem:[%s9084_s4 + $0x228] sm:$0xff]  ;;  %v2315_v9 = vunpack.c.l.s8.bf16 %v1795_v30 }
 0x40b   :  { %4054 = vmatprep.subr.bf16.mxu1 %v2468_v2  ;;  %v2444_v2 = vunpack.c.l.s8.bf16 %v1860_v28  ;;  %v1844_v30 = vld [vmem:[%s9084_s4 + $0x1e8] sm:$0xff] }
 0x40d   :  { %4012 = vmatpush1.bf16.msra.mxu0 %v2339_v51  ;;  %v2443_v51 = vunpack.c.l.s8.bf16 %v1859_v42 }
 0x40e   :  { %4055 = vmatpush1.bf16.msra.mxu1 %v2467_v1  ;;  %4013 = vmatprep.subr.bf16.mxu0 %v2332_v11  ;;  %v2308_v1 = vunpack.c.h.s8.bf16 %v1788_v17  ;;  %v1787_v11 = vld [vmem:[%s9084_s4 + $0x20] sm:$0xff] }
 0x40f   :  { %4056 = vmatprep.subr.bf16.mxu1 %v2460_v57  ;;  %v2436_v57 = vunpack.c.h.s8.bf16 %v1852_v12  ;;  %v2307_v28 = vunpack.c.h.s8.bf16 %v1787_v11  ;;  %v2299_v42 = vunpack.c.l.s8.bf16 %v1787_v11  ;;  %v1836_v11 = vld [vmem:[%s9084_s4 + $0x1a8] sm:$0xff] }
 0x411   :  { %4014 = vmatpush1.bf16.msra.mxu0 %v2331_v34  ;;  %v2435_v34 = vunpack.c.h.s8.bf16 %v1851_v39 }
 0x412   :  { %4057 = vmatpush1.bf16.msra.mxu1 %v2459_v33  ;;  %4015 = vmatprep.subr.bf16.mxu0 %v2324_v37  ;;  %v2300_v33 = vunpack.c.l.s8.bf16 %v1788_v17  ;;  %v2428_v37 = vunpack.c.l.s8.bf16 %v1852_v12  ;;  %v1907_v17 = vld [vmem:[%s9084_s4 + $0x3e0] sm:$0xff] }
 0x413   :  { %4058 = vmatprep.subr.bf16.mxu1 %v2452_v35  ;;  %v1908_v35 = vld [vmem:[%s9084_s4 + $0x3e8] sm:$0xff] }
 0x415   :  { %4016 = vmatpush1.bf16.msra.mxu0 %v2323_v25  ;;  %v2427_v25 = vunpack.c.l.s8.bf16 %v1851_v39 }
 0x416   :  { %4059 = vmatpush1.bf16.msra.mxu1 %v2451_v59  ;;  %4017 = vmatprep.subr.bf16.mxu0 %v2316_v55  ;;  %v2420_v59 = vunpack.c.h.s8.bf16 %v1844_v30  ;;  %v1843_v55 = vld [vmem:[%s9084_s4 + $0x1e0] sm:$0xff] }
 0x417   :  { %4060 = vmatprep.subr.bf16.mxu1 %v2444_v2  ;;  %v2548_v2 = vunpack.c.h.s8.bf16 %v1908_v35  ;;  %v2419_v12 = vunpack.c.h.s8.bf16 %v1843_v55  ;;  %v2411_v39 = vunpack.c.l.s8.bf16 %v1843_v55  ;;  %v1828_v55 = vld [vmem:[%s9084_s4 + $0x168] sm:$0xff] }
 0x419   :  { %4018 = vmatpush1.bf16.msra.mxu0 %v2315_v9  ;;  %v2547_v9 = vunpack.c.h.s8.bf16 %v1907_v17 }
 0x41a   :  { %4061 = vmatpush1.bf16.msra.mxu1 %v2443_v51  ;;  %4019 = vmatprep.subr.bf16.mxu0 %v2308_v1  ;;  %v2412_v51 = vunpack.c.l.s8.bf16 %v1844_v30  ;;  %v2540_v1 = vunpack.c.l.s8.bf16 %v1908_v35  ;;  %v1899_v30 = vld [vmem:[%s9084_s4 + $0x3a0] sm:$0xff] }
 0x41b   :  { %4062 = vmatprep.subr.bf16.mxu1 %v2436_v57  ;;  %v1900_v57 = vld [vmem:[%s9084_s4 + $0x3a8] sm:$0xff] }
 0x41d   :  { %4020 = vmatpush1.bf16.msra.mxu0 %v2307_v28  ;;  %v2539_v28 = vunpack.c.l.s8.bf16 %v1907_v17 }
 0x41e   :  { %4063 = vmatpush1.bf16.msra.mxu1 %v2435_v34  ;;  %4021 = vmatprep.subr.bf16.mxu0 %v2300_v33  ;;  %v2404_v34 = vunpack.c.h.s8.bf16 %v1836_v11  ;;  %v1835_v33 = vld [vmem:[%s9084_s4 + $0x1a0] sm:$0xff] }
 0x41f   :  { %4064 = vmatprep.subr.bf16.mxu1 %v2428_v37  ;;  %v2532_v37 = vunpack.c.h.s8.bf16 %v1900_v57  ;;  %v2403_v35 = vunpack.c.h.s8.bf16 %v1835_v33  ;;  %v2395_v17 = vunpack.c.l.s8.bf16 %v1835_v33  ;;  %v1820_v33 = vld [vmem:[%s9084_s4 + $0x128] sm:$0xff] }
 0x421   :  { %4022 = vmatpush1.bf16.msra.mxu0 %v2299_v42  ;;  %v2531_v42 = vunpack.c.h.s8.bf16 %v1899_v30 }
 0x422   :  { %4065 = vmatpush1.bf16.msra.mxu1 %v2427_v25  ;;  %4023 = vmatprep.subr.bf16.mxu0 %v2420_v59  ;;  %v2396_v25 = vunpack.c.l.s8.bf16 %v1836_v11  ;;  %v2524_v59 = vunpack.c.l.s8.bf16 %v1900_v57  ;;  %v1891_v11 = vld [vmem:[%s9084_s4 + $0x360] sm:$0xff] }
 0x423   :  { %4066 = vmatprep.subr.bf16.mxu1 %v2548_v2  ;;  %v1892_v2 = vld [vmem:[%s9084_s4 + $0x368] sm:$0xff] }
 0x425   :  { %4024 = vmatpush2.bf16.msra.mxu0 %v2419_v12  ;;  %v2523_v12 = vunpack.c.l.s8.bf16 %v1899_v30 }
 0x426   :  { %4067 = vmatpush2.bf16.msra.mxu1 %v2547_v9  ;;  %4025 = vmatprep.subr.bf16.mxu0 %v2412_v51  ;;  %v2388_v9 = vunpack.c.h.s8.bf16 %v1828_v55  ;;  %v1827_v51 = vld [vmem:[%s9084_s4 + $0x160] sm:$0xff] }
 0x427   :  { %4068 = vmatprep.subr.bf16.mxu1 %v2540_v1  ;;  %v2516_v1 = vunpack.c.h.s8.bf16 %v1892_v2  ;;  %v2387_v57 = vunpack.c.h.s8.bf16 %v1827_v51  ;;  %v2379_v30 = vunpack.c.l.s8.bf16 %v1827_v51  ;;  %v1940_v51 = vld [vmem:[%s9084_s4 + $0x4e8] sm:$0xff] }
 0x429   :  { %4026 = vmatpush2.bf16.msra.mxu0 %v2411_v39  ;;  %v2515_v39 = vunpack.c.h.s8.bf16 %v1891_v11 }
 0x42a   :  { %4069 = vmatpush2.bf16.msra.mxu1 %v2539_v28  ;;  %4027 = vmatprep.subr.bf16.mxu0 %v2404_v34  ;;  %v2380_v28 = vunpack.c.l.s8.bf16 %v1828_v55  ;;  %v2508_v34 = vunpack.c.l.s8.bf16 %v1892_v2  ;;  %v1883_v55 = vld [vmem:[%s9084_s4 + $0x320] sm:$0xff] }
 0x42b   :  { %4070 = vmatprep.subr.bf16.mxu1 %v2532_v37  ;;  %v1884_v37 = vld [vmem:[%s9084_s4 + $0x328] sm:$0xff] }
 0x42d   :  { %4028 = vmatpush2.bf16.msra.mxu0 %v2403_v35  ;;  %v2507_v35 = vunpack.c.l.s8.bf16 %v1891_v11 }
 0x42e   :  { %4071 = vmatpush2.bf16.msra.mxu1 %v2531_v42  ;;  %4029 = vmatprep.subr.bf16.mxu0 %v2396_v25  ;;  %v2372_v42 = vunpack.c.h.s8.bf16 %v1820_v33  ;;  %v1819_v25 = vld [vmem:[%s9084_s4 + $0x120] sm:$0xff] }
 0x42f   :  { %4072 = vmatprep.subr.bf16.mxu1 %v2524_v59  ;;  %v2500_v59 = vunpack.c.h.s8.bf16 %v1884_v37  ;;  %v2371_v2 = vunpack.c.h.s8.bf16 %v1819_v25  ;;  %v2363_v11 = vunpack.c.l.s8.bf16 %v1819_v25  ;;  %v2604_v25 = vunpack.c.l.s8.bf16 %v1940_v51 }
 0x431   :  { %4030 = vmatpush2.bf16.msra.mxu0 %v2395_v17  ;;  %v2499_v17 = vunpack.c.h.s8.bf16 %v1883_v55 }
 0x432   :  { %4073 = vmatpush2.bf16.msra.mxu1 %v2523_v12  ;;  %4031 = vmatprep.subr.bf16.mxu0 %v2388_v9  ;;  %v2364_v12 = vunpack.c.l.s8.bf16 %v1820_v33  ;;  %v2492_v9 = vunpack.c.l.s8.bf16 %v1884_v37  ;;  %v2003_v33 = vld [vmem:[%s9084_s4 + $0x6e0] sm:$0xff] }
 0x433   :  { %4074 = vmatprep.subr.bf16.mxu1 %v2516_v1  ;;  %v2004_v1 = vld [vmem:[%s9084_s4 + $0x6e8] sm:$0xff] }
 0x435   :  { %4032 = vmatpush2.bf16.msra.mxu0 %v2387_v57  ;;  %v2491_v57 = vunpack.c.l.s8.bf16 %v1883_v55 }
 0x436   :  { %4075 = vmatpush2.bf16.msra.mxu1 %v2515_v39  ;;  %4033 = vmatprep.subr.bf16.mxu0 %v2380_v28  ;;  %v2612_v39 = vunpack.c.h.s8.bf16 %v1940_v51  ;;  %v1939_v28 = vld [vmem:[%s9084_s4 + $0x4e0] sm:$0xff] }
 0x437   :  { %4076 = vmatprep.subr.bf16.mxu1 %v2508_v34  ;;  %v2740_v34 = vunpack.c.h.s8.bf16 %v2004_v1  ;;  %v2611_v37 = vunpack.c.h.s8.bf16 %v1939_v28 }
 0x439   :  { %4034 = vmatpush2.bf16.msra.mxu0 %v2379_v30  ;;  %v7756_v30 = vpop.f32.mrf.mxu0 }
 0x43a   :  { %4077 = vmatpush2.bf16.msra.mxu1 %v2507_v35  ;;  %4035 = vmatprep.subr.bf16.mxu0 %v2372_v42  ;;  %v2739_v35 = vunpack.c.h.s8.bf16 %v2003_v33  ;;  %v7758_v42 = vpop.f32.mrf.mxu1 }
 0x43b   :  { %4078 = vmatprep.subr.bf16.mxu1 %v2500_v59  ;;  %v1932_v59 = vld [vmem:[%s9084_s4 + $0x4a8] sm:$0xff] }
 0x43d   :  { %4036 = vmatpush2.bf16.msra.mxu0 %v2371_v2  ;;  %v2732_v2 = vunpack.c.l.s8.bf16 %v2004_v1  ;;  %v1931_v1 = vld [vmem:[%s9084_s4 + $0x4a0] sm:$0xff] }
 0x43e   :  { %4079 = vmatpush2.bf16.msra.mxu1 %v2499_v17  ;;  %4037 = vmatprep.subr.bf16.mxu0 %v2364_v12  ;;  %v1996_v17 = vld [vmem:[%s9084_s4 + $0x6a8] sm:$0xff] }
 0x43f   :  { %4080 = vmatprep.subr.bf16.mxu1 %v2492_v9 }
 0x441   :  { %4038 = vmatpush2.bf16.msra.mxu0 %v2363_v11  ;;  %v2603_v11 = vunpack.c.l.s8.bf16 %v1939_v28  ;;  %v1995_v28 = vld [vmem:[%s9084_s4 + $0x6a0] sm:$0xff] }
 0x442   :  { %4081 = vmatpush2.bf16.msra.mxu1 %v2491_v57  ;;  %4093 = vmatprep.subr.bf16.mxu0 %v2612_v39  ;;  %v2731_v57 = vunpack.c.l.s8.bf16 %v2003_v33  ;;  %v2596_v39 = vunpack.c.h.s8.bf16 %v1932_v59 }
 0x443   :  { %4136 = vmatprep.subr.bf16.mxu1 %v2740_v34 }
 0x444   :  { %v3783_v55 = vpop.f32.mrf.mxu0  ;;  %4040 = vmatmul.mubr.bf16.vlgmr.msra.gmra.mxu0 %v6193_v21 }
 0x445   :  { %v3784_v12 = vadd.f32 %v3783_v55, %v7656_v29  ;;  %v3826_v9 = vpop.f32.mrf.mxu1  ;;  %4083 = vmatmul.mubr.bf16.vlgmr.msra.gmra.mxu1 %v6310_v32  ;;  %4094 = vmatpush1.bf16.msra.mxu0 %v2611_v37  ;;  %v2724_v37 = vunpack.c.h.s8.bf16 %v1996_v17  ;;  %v2595_v55 = vunpack.c.h.s8.bf16 %v1931_v1 }
 0x446   :  { %4125 = vmatprep.mubr.bf16.mxu0 %v6809_v36  ;;  %4137 = vmatpush1.bf16.msra.mxu1 %v2739_v35  ;;  %v7770_v51 = vpop.f32.mrf.mxu0 }
 0x447   :  { %v7775_v34 = vadd.f32 %v3826_v9, %v3784_v12  ;;  %4168 = vmatprep.mubr.bf16.mxu1 %v6815_v48  ;;  %v7778_v29 = vpop.f32.mrf.mxu1  ;;  %4095 = vmatprep.subr.bf16.mxu0 %v2604_v25  ;;  %v2723_v12 = vunpack.c.h.s8.bf16 %v1995_v28  ;;  %v2588_v9 = vunpack.c.l.s8.bf16 %v1932_v59  ;;  %v2716_v25 = vunpack.c.l.s8.bf16 %v1996_v17  ;;  %v1987_v17 = vld [vmem:[%s9084_s4 + $0x660] sm:$0xff] }
 0x448   :  { %v3787_v35 = vpop.f32.mrf.mxu0  ;;  %4138 = vmatprep.subr.bf16.mxu1 %v2732_v2  ;;  %v1988_v2 = vld [vmem:[%s9084_s4 + $0x668] sm:$0xff] }
 0x449   :  { %v3788_v33 = vadd.f32 %v3787_v35, %v7670_v5  ;;  %4096 = vmatpush1.bf16.msra.mxu0 %v2603_v11  ;;  %v3830_v40 = vpop.f32.mrf.mxu1  ;;  %v2587_v5 = vunpack.c.l.s8.bf16 %v1931_v1  ;;  %v2715_v11 = vunpack.c.l.s8.bf16 %v1995_v28  ;;  %v2708_v59 = vunpack.c.h.s8.bf16 %v1988_v2  ;;  %v1916_v28 = vld [vmem:[%s9084_s4 + $0x428] sm:$0xff] }
 0x44a   :  { %4139 = vmatpush1.bf16.msra.mxu1 %v2731_v57  ;;  %4097 = vmatprep.subr.bf16.mxu0 %v2596_v39  ;;  %v2580_v57 = vunpack.c.h.s8.bf16 %v1924_v31  ;;  %v2572_v1 = vunpack.c.l.s8.bf16 %v1924_v31  ;;  %v2700_v35 = vunpack.c.l.s8.bf16 %v1988_v2  ;;  %v1915_v31 = vld [vmem:[%s9084_s4 + $0x420] sm:$0xff] }
 0x44b   :  { %v7784_v43 = vadd.f32 %v3830_v40, %v3788_v33  ;;  %4140 = vmatprep.subr.bf16.mxu1 %v2724_v37  ;;  %v1923_v40 = vld [vmem:[%s9084_s4 + $0x460] sm:$0xff]  ;;  %v2707_v37 = vunpack.c.h.s8.bf16 %v1987_v17  ;;  %v1980_v33 = vld [vmem:[%s9084_s4 + $0x628] sm:$0xff] }
 0x44c   :  { %v2579_v39 = vunpack.c.h.s8.bf16 %v1923_v40  ;;  %v1979_v2 = vld [vmem:[%s9084_s4 + $0x620] sm:$0xff] }
 0x44d   :  { %4098 = vmatpush1.bf16.msra.mxu0 %v2595_v55  ;;  %v2571_v55 = vunpack.c.l.s8.bf16 %v1923_v40  ;;  %v2684_v40 = vunpack.c.l.s8.bf16 %v1980_v33 }
 0x44e   :  { %4141 = vmatpush1.bf16.msra.mxu1 %v2723_v12  ;;  %4099 = vmatprep.subr.bf16.mxu0 %v2588_v9  ;;  %v2699_v12 = vunpack.c.l.s8.bf16 %v1987_v17  ;;  %v2564_v9 = vunpack.c.h.s8.bf16 %v1916_v28  ;;  %v2036_v17 = vld [vmem:[%s9084_s4 + $0x7e8] sm:$0xff] }
 0x44f   :  { %4142 = vmatprep.subr.bf16.mxu1 %v2716_v25  ;;  %v2692_v25 = vunpack.c.h.s8.bf16 %v1980_v33  ;;  %v2035_v33 = vld [vmem:[%s9084_s4 + $0x7e0] sm:$0xff] }
 0x451   :  { %4100 = vmatpush1.bf16.msra.mxu0 %v2587_v5  ;;  %v2563_v5 = vunpack.c.h.s8.bf16 %v1915_v31 }
 0x452   :  { %4143 = vmatpush1.bf16.msra.mxu1 %v2715_v11  ;;  %4101 = vmatprep.subr.bf16.mxu0 %v2580_v57  ;;  %v2691_v11 = vunpack.c.h.s8.bf16 %v1979_v2  ;;  %v2556_v57 = vunpack.c.l.s8.bf16 %v1916_v28  ;;  %v2804_v28 = vunpack.c.h.s8.bf16 %v2036_v17 }
 0x453   :  { %4144 = vmatprep.subr.bf16.mxu1 %v2708_v59  ;;  %v1972_v59 = vld [vmem:[%s9084_s4 + $0x5e8] sm:$0xff] }
 0x455   :  { %4102 = vmatpush1.bf16.msra.mxu0 %v2579_v39  ;;  %v2555_v39 = vunpack.c.l.s8.bf16 %v1915_v31  ;;  %v2796_v31 = vunpack.c.l.s8.bf16 %v2036_v17  ;;  %v2027_v17 = vld [vmem:[%s9084_s4 + $0x7a0] sm:$0xff] }
 0x456   :  { %4145 = vmatpush1.bf16.msra.mxu1 %v2707_v37  ;;  %4103 = vmatprep.subr.bf16.mxu0 %v2572_v1  ;;  %v2683_v37 = vunpack.c.l.s8.bf16 %v1979_v2  ;;  %v2676_v1 = vunpack.c.h.s8.bf16 %v1972_v59  ;;  %v2028_v2 = vld [vmem:[%s9084_s4 + $0x7a8] sm:$0xff] }
 0x457   :  { %4146 = vmatprep.subr.bf16.mxu1 %v2700_v35  ;;  %v1971_v35 = vld [vmem:[%s9084_s4 + $0x5e0] sm:$0xff] }
 0x459   :  { %4104 = vmatpush1.bf16.msra.mxu0 %v2571_v55  ;;  %v2675_v55 = vunpack.c.h.s8.bf16 %v1971_v35 }
 0x45a   :  { %4147 = vmatpush1.bf16.msra.mxu1 %v2699_v12  ;;  %4105 = vmatprep.subr.bf16.mxu0 %v2564_v9  ;;  %v2803_v12 = vunpack.c.h.s8.bf16 %v2035_v33  ;;  %v2668_v9 = vunpack.c.l.s8.bf16 %v1972_v59  ;;  %v2788_v59 = vunpack.c.h.s8.bf16 %v2028_v2 }
 0x45b   :  { %4148 = vmatprep.subr.bf16.mxu1 %v2692_v25  ;;  %v1964_v25 = vld [vmem:[%s9084_s4 + $0x5a8] sm:$0xff] }
 0x45d   :  { %4106 = vmatpush1.bf16.msra.mxu0 %v2563_v5  ;;  %v2667_v5 = vunpack.c.l.s8.bf16 %v1971_v35  ;;  %v2780_v35 = vunpack.c.l.s8.bf16 %v2028_v2  ;;  %v2019_v2 = vld [vmem:[%s9084_s4 + $0x760] sm:$0xff] }
 0x45e   :  { %4149 = vmatpush1.bf16.msra.mxu1 %v2691_v11  ;;  %4107 = vmatprep.subr.bf16.mxu0 %v2556_v57  ;;  %v2795_v11 = vunpack.c.l.s8.bf16 %v2035_v33  ;;  %v2660_v57 = vunpack.c.h.s8.bf16 %v1964_v25  ;;  %v2020_v33 = vld [vmem:[%s9084_s4 + $0x768] sm:$0xff] }
 0x45f   :  { %4150 = vmatprep.subr.bf16.mxu1 %v2684_v40  ;;  %v1963_v40 = vld [vmem:[%s9084_s4 + $0x5a0] sm:$0xff] }
 0x461   :  { %4108 = vmatpush1.bf16.msra.mxu0 %v2555_v39  ;;  %v2659_v39 = vunpack.c.h.s8.bf16 %v1963_v40 }
 0x462   :  { %4151 = vmatpush1.bf16.msra.mxu1 %v2683_v37  ;;  %4109 = vmatprep.subr.bf16.mxu0 %v2676_v1  ;;  %v2787_v37 = vunpack.c.h.s8.bf16 %v2027_v17  ;;  %v2652_v1 = vunpack.c.l.s8.bf16 %v1964_v25  ;;  %v2772_v25 = vunpack.c.h.s8.bf16 %v2020_v33 }
 0x463   :  { %4152 = vmatprep.subr.bf16.mxu1 %v2804_v28  ;;  %v1956_v28 = vld [vmem:[%s9084_s4 + $0x568] sm:$0xff] }
 0x465   :  { %4110 = vmatpush2.bf16.msra.mxu0 %v2675_v55  ;;  %v2651_v55 = vunpack.c.l.s8.bf16 %v1963_v40  ;;  %v2764_v40 = vunpack.c.l.s8.bf16 %v2020_v33  ;;  %v2011_v33 = vld [vmem:[%s9084_s4 + $0x720] sm:$0xff] }
 0x466   :  { %4153 = vmatpush2.bf16.msra.mxu1 %v2803_v12  ;;  %4111 = vmatprep.subr.bf16.mxu0 %v2668_v9  ;;  %v2779_v12 = vunpack.c.l.s8.bf16 %v2027_v17  ;;  %v2644_v9 = vunpack.c.h.s8.bf16 %v1956_v28  ;;  %v2012_v17 = vld [vmem:[%s9084_s4 + $0x728] sm:$0xff] }
 0x467   :  { %4154 = vmatprep.subr.bf16.mxu1 %v2796_v31  ;;  %v1955_v31 = vld [vmem:[%s9084_s4 + $0x560] sm:$0xff] }
 0x469   :  { %4112 = vmatpush2.bf16.msra.mxu0 %v2667_v5  ;;  %v2643_v5 = vunpack.c.h.s8.bf16 %v1955_v31 }
 0x46a   :  { %4155 = vmatpush2.bf16.msra.mxu1 %v2795_v11  ;;  %4113 = vmatprep.subr.bf16.mxu0 %v2660_v57  ;;  %v2771_v11 = vunpack.c.h.s8.bf16 %v2019_v2  ;;  %v2636_v57 = vunpack.c.l.s8.bf16 %v1956_v28  ;;  %v2756_v28 = vunpack.c.h.s8.bf16 %v2012_v17 }
 0x46b   :  { %4156 = vmatprep.subr.bf16.mxu1 %v2788_v59  ;;  %v1948_v59 = vld [vmem:[%s9084_s4 + $0x528] sm:$0xff] }
 0x46d   :  { %4114 = vmatpush2.bf16.msra.mxu0 %v2659_v39  ;;  %v2635_v39 = vunpack.c.l.s8.bf16 %v1955_v31  ;;  %v2748_v31 = vunpack.c.l.s8.bf16 %v2012_v17  ;;  %v2131_v17 = vld [vmem:[%s9084_s4 + $0xae0] sm:$0xff] }
 0x46e   :  { %4157 = vmatpush2.bf16.msra.mxu1 %v2787_v37  ;;  %4115 = vmatprep.subr.bf16.mxu0 %v2652_v1  ;;  %v2763_v37 = vunpack.c.l.s8.bf16 %v2019_v2  ;;  %v2628_v1 = vunpack.c.h.s8.bf16 %v1948_v59  ;;  %v2132_v2 = vld [vmem:[%s9084_s4 + $0xae8] sm:$0xff] }
 0x46f   :  { %4158 = vmatprep.subr.bf16.mxu1 %v2780_v35  ;;  %v1947_v35 = vld [vmem:[%s9084_s4 + $0x520] sm:$0xff] }
 0x471   :  { %4116 = vmatpush2.bf16.msra.mxu0 %v2651_v55  ;;  %v2627_v55 = vunpack.c.h.s8.bf16 %v1947_v35 }
 0x472   :  { %4159 = vmatpush2.bf16.msra.mxu1 %v2779_v12  ;;  %4117 = vmatprep.subr.bf16.mxu0 %v2644_v9  ;;  %v2755_v12 = vunpack.c.h.s8.bf16 %v2011_v33  ;;  %v2620_v9 = vunpack.c.l.s8.bf16 %v1948_v59  ;;  %v2996_v59 = vunpack.c.h.s8.bf16 %v2132_v2 }
 0x473   :  { %4160 = vmatprep.subr.bf16.mxu1 %v2772_v25  ;;  %v2068_v25 = vld [vmem:[%s9084_s4 + $0x8e8] sm:$0xff] }
 0x475   :  { %4118 = vmatpush2.bf16.msra.mxu0 %v2643_v5  ;;  %v2619_v5 = vunpack.c.l.s8.bf16 %v1947_v35  ;;  %v7872_v35 = vpop.f32.mrf.mxu1 }
 0x476   :  { %4161 = vmatpush2.bf16.msra.mxu1 %v2771_v11  ;;  %4119 = vmatprep.subr.bf16.mxu0 %v2636_v57  ;;  %v2747_v11 = vunpack.c.l.s8.bf16 %v2011_v33  ;;  %v2868_v57 = vunpack.c.h.s8.bf16 %v2068_v25  ;;  %v2060_v33 = vld [vmem:[%s9084_s4 + $0x8a8] sm:$0xff] }
 0x477   :  { %4162 = vmatprep.subr.bf16.mxu1 %v2764_v40  ;;  %v2067_v40 = vld [vmem:[%s9084_s4 + $0x8e0] sm:$0xff] }
 0x479   :  { %4120 = vmatpush2.bf16.msra.mxu0 %v2635_v39  ;;  %v2867_v39 = vunpack.c.h.s8.bf16 %v2067_v40 }
 0x47a   :  { %4163 = vmatpush2.bf16.msra.mxu1 %v2763_v37  ;;  %4121 = vmatprep.subr.bf16.mxu0 %v2628_v1  ;;  %v7870_v37 = vpop.f32.mrf.mxu0  ;;  %v2995_v1 = vunpack.c.h.s8.bf16 %v2131_v17 }
 0x47b   :  { %4164 = vmatprep.subr.bf16.mxu1 %v2756_v28  ;;  %v2860_v28 = vunpack.c.l.s8.bf16 %v2068_v25 }
 0x47d   :  { %4122 = vmatpush2.bf16.msra.mxu0 %v2627_v55 }
 0x47e   :  { %4165 = vmatpush2.bf16.msra.mxu1 %v2755_v12  ;;  %4123 = vmatprep.subr.bf16.mxu0 %v2620_v9  ;;  %v2988_v12 = vunpack.c.l.s8.bf16 %v2132_v2  ;;  %v2124_v9 = vld [vmem:[%s9084_s4 + $0xaa8] sm:$0xff]  ;;  %v2059_v2 = vld [vmem:[%s9084_s4 + $0x8a0] sm:$0xff] }
 0x47f   :  { %4166 = vmatprep.subr.bf16.mxu1 %v2748_v31 }
 0x481   :  { %4124 = vmatpush2.bf16.msra.mxu0 %v2619_v5 }
 0x482   :  { %4167 = vmatpush2.bf16.msra.mxu1 %v2747_v11  ;;  %4179 = vmatprep.subr.bf16.mxu0 %v2868_v57  ;;  %v2859_v11 = vunpack.c.l.s8.bf16 %v2067_v40  ;;  %v2987_v57 = vunpack.c.l.s8.bf16 %v2131_v17  ;;  %v2123_v40 = vld [vmem:[%s9084_s4 + $0xaa0] sm:$0xff] }
 0x483   :  { %4222 = vmatprep.subr.bf16.mxu1 %v2996_v59  ;;  %v2852_v59 = vunpack.c.h.s8.bf16 %v2060_v33 }
 0x484   :  { %v3869_v55 = vpop.f32.mrf.mxu0  ;;  %4126 = vmatmul.mubr.bf16.vlgmr.msra.gmra.mxu0 %v6427_v0 }
 0x485   :  { %v3870_v31 = vadd.f32 %v3869_v55, %v7775_v34  ;;  %v3912_v5 = vpop.f32.mrf.mxu1  ;;  %4169 = vmatmul.mubr.bf16.vlgmr.msra.gmra.mxu1 %v6554_v44  ;;  %4180 = vmatpush1.bf16.msra.mxu0 %v2867_v39  ;;  %v2980_v39 = vunpack.c.h.s8.bf16 %v2124_v9  ;;  %v2851_v55 = vunpack.c.h.s8.bf16 %v2059_v2 }
 0x486   :  { %4211 = vmatprep.mubr.bf16.mxu0 %v6937_v61  ;;  %4223 = vmatpush1.bf16.msra.mxu1 %v2995_v1  ;;  %v7884_v25 = vpop.f32.mrf.mxu0 }
 0x487   :  { %v7889_v6 = vadd.f32 %v3912_v5, %v3870_v31  ;;  %4254 = vmatprep.mubr.bf16.mxu1 %v6943_v63  ;;  %v7892_v34 = vpop.f32.mrf.mxu1  ;;  %4181 = vmatprep.subr.bf16.mxu0 %v2860_v28  ;;  %v2979_v31 = vunpack.c.h.s8.bf16 %v2123_v40  ;;  %v2844_v5 = vunpack.c.l.s8.bf16 %v2060_v33  ;;  %v2972_v28 = vunpack.c.l.s8.bf16 %v2124_v9  ;;  %v2115_v9 = vld [vmem:[%s9084_s4 + $0xa60] sm:$0xff] }
 0x488   :  { %9119 = vst [vmem:[#allocation14_spill] sm:$0xff] %v7892_v34  ;;  %v3873_v1 = vpop.f32.mrf.mxu0  ;;  %4224 = vmatprep.subr.bf16.mxu1 %v2988_v12  ;;  %v2116_v12 = vld [vmem:[%s9084_s4 + $0xa68] sm:$0xff] }
 0x489   :  { %v3874_v17 = vadd.f32 %v3873_v1, %v7784_v43  ;;  %4182 = vmatpush1.bf16.msra.mxu0 %v2859_v11  ;;  %v3916_v3 = vpop.f32.mrf.mxu1  ;;  %v2843_v43 = vunpack.c.l.s8.bf16 %v2059_v2  ;;  %v2971_v11 = vunpack.c.l.s8.bf16 %v2123_v40  ;;  %v2964_v33 = vunpack.c.h.s8.bf16 %v2116_v12  ;;  %v2044_v40 = vld [vmem:[%s9084_s4 + $0x828] sm:$0xff] }
 0x48a   :  { %4225 = vmatpush1.bf16.msra.mxu1 %v2987_v57  ;;  %4183 = vmatprep.subr.bf16.mxu0 %v2852_v59  ;;  %v2836_v57 = vunpack.c.h.s8.bf16 %v2052_v7  ;;  %v2828_v2 = vunpack.c.l.s8.bf16 %v2052_v7  ;;  %v2956_v1 = vunpack.c.l.s8.bf16 %v2116_v12  ;;  %v2043_v7 = vld [vmem:[%s9084_s4 + $0x820] sm:$0xff] }
 0x48b   :  { %v7898_v13 = vadd.f32 %v3916_v3, %v3874_v17  ;;  %4226 = vmatprep.subr.bf16.mxu1 %v2980_v39  ;;  %v2051_v3 = vld [vmem:[%s9084_s4 + $0x860] sm:$0xff]  ;;  %v2963_v39 = vunpack.c.h.s8.bf16 %v2115_v9  ;;  %v2108_v17 = vld [vmem:[%s9084_s4 + $0xa28] sm:$0xff] }
 0x48c   :  { %v2835_v59 = vunpack.c.h.s8.bf16 %v2051_v3  ;;  %v2107_v12 = vld [vmem:[%s9084_s4 + $0xa20] sm:$0xff] }
 0x48d   :  { %4184 = vmatpush1.bf16.msra.mxu0 %v2851_v55  ;;  %v2827_v55 = vunpack.c.l.s8.bf16 %v2051_v3  ;;  %v2940_v3 = vunpack.c.l.s8.bf16 %v2108_v17 }
 0x48e   :  { %4227 = vmatpush1.bf16.msra.mxu1 %v2979_v31  ;;  %4185 = vmatprep.subr.bf16.mxu0 %v2844_v5  ;;  %v2955_v31 = vunpack.c.l.s8.bf16 %v2115_v9  ;;  %v2820_v5 = vunpack.c.h.s8.bf16 %v2044_v40  ;;  %v2164_v9 = vld [vmem:[%s9084_s4 + $0xbe8] sm:$0xff] }
 0x48f   :  { %4228 = vmatprep.subr.bf16.mxu1 %v2972_v28  ;;  %v2948_v28 = vunpack.c.h.s8.bf16 %v2108_v17  ;;  %v2163_v17 = vld [vmem:[%s9084_s4 + $0xbe0] sm:$0xff] }
 0x491   :  { %4186 = vmatpush1.bf16.msra.mxu0 %v2843_v43  ;;  %v2819_v43 = vunpack.c.h.s8.bf16 %v2043_v7 }
 0x492   :  { %4229 = vmatpush1.bf16.msra.mxu1 %v2971_v11  ;;  %4187 = vmatprep.subr.bf16.mxu0 %v2836_v57  ;;  %v2947_v11 = vunpack.c.h.s8.bf16 %v2107_v12  ;;  %v2812_v57 = vunpack.c.l.s8.bf16 %v2044_v40  ;;  %v3060_v40 = vunpack.c.h.s8.bf16 %v2164_v9 }
 0x493   :  { %4230 = vmatprep.subr.bf16.mxu1 %v2964_v33  ;;  %v2100_v33 = vld [vmem:[%s9084_s4 + $0x9e8] sm:$0xff] }
 0x495   :  { %4188 = vmatpush1.bf16.msra.mxu0 %v2835_v59  ;;  %v2811_v59 = vunpack.c.l.s8.bf16 %v2043_v7  ;;  %v3052_v7 = vunpack.c.l.s8.bf16 %v2164_v9  ;;  %v2155_v9 = vld [vmem:[%s9084_s4 + $0xba0] sm:$0xff] }
 0x496   :  { %4231 = vmatpush1.bf16.msra.mxu1 %v2963_v39  ;;  %4189 = vmatprep.subr.bf16.mxu0 %v2828_v2  ;;  %v2939_v39 = vunpack.c.l.s8.bf16 %v2107_v12  ;;  %v2932_v2 = vunpack.c.h.s8.bf16 %v2100_v33  ;;  %v2156_v12 = vld [vmem:[%s9084_s4 + $0xba8] sm:$0xff] }
 0x497   :  { %4232 = vmatprep.subr.bf16.mxu1 %v2956_v1  ;;  %v2099_v1 = vld [vmem:[%s9084_s4 + $0x9e0] sm:$0xff] }
 0x499   :  { %4190 = vmatpush1.bf16.msra.mxu0 %v2827_v55  ;;  %v2931_v55 = vunpack.c.h.s8.bf16 %v2099_v1 }
 0x49a   :  { %4233 = vmatpush1.bf16.msra.mxu1 %v2955_v31  ;;  %4191 = vmatprep.subr.bf16.mxu0 %v2820_v5  ;;  %v3059_v31 = vunpack.c.h.s8.bf16 %v2163_v17  ;;  %v2924_v5 = vunpack.c.l.s8.bf16 %v2100_v33  ;;  %v3044_v33 = vunpack.c.h.s8.bf16 %v2156_v12 }
 0x49b   :  { %4234 = vmatprep.subr.bf16.mxu1 %v2948_v28  ;;  %v2092_v28 = vld [vmem:[%s9084_s4 + $0x9a8] sm:$0xff] }
 0x49d   :  { %4192 = vmatpush1.bf16.msra.mxu0 %v2819_v43  ;;  %v2923_v43 = vunpack.c.l.s8.bf16 %v2099_v1  ;;  %v3036_v1 = vunpack.c.l.s8.bf16 %v2156_v12  ;;  %v2147_v12 = vld [vmem:[%s9084_s4 + $0xb60] sm:$0xff] }
 0x49e   :  { %4235 = vmatpush1.bf16.msra.mxu1 %v2947_v11  ;;  %4193 = vmatprep.subr.bf16.mxu0 %v2812_v57  ;;  %v3051_v11 = vunpack.c.l.s8.bf16 %v2163_v17  ;;  %v2916_v57 = vunpack.c.h.s8.bf16 %v2092_v28  ;;  %v2148_v17 = vld [vmem:[%s9084_s4 + $0xb68] sm:$0xff] }
 0x49f   :  { %4236 = vmatprep.subr.bf16.mxu1 %v2940_v3  ;;  %v2091_v3 = vld [vmem:[%s9084_s4 + $0x9a0] sm:$0xff] }
 0x4a1   :  { %4194 = vmatpush1.bf16.msra.mxu0 %v2811_v59  ;;  %v2915_v59 = vunpack.c.h.s8.bf16 %v2091_v3 }
 0x4a2   :  { %4237 = vmatpush1.bf16.msra.mxu1 %v2939_v39  ;;  %4195 = vmatprep.subr.bf16.mxu0 %v2932_v2  ;;  %v3043_v39 = vunpack.c.h.s8.bf16 %v2155_v9  ;;  %v2908_v2 = vunpack.c.l.s8.bf16 %v2092_v28  ;;  %v3028_v28 = vunpack.c.h.s8.bf16 %v2148_v17 }
 0x4a3   :  { %4238 = vmatprep.subr.bf16.mxu1 %v3060_v40  ;;  %v2084_v40 = vld [vmem:[%s9084_s4 + $0x968] sm:$0xff] }
 0x4a5   :  { %4196 = vmatpush2.bf16.msra.mxu0 %v2931_v55  ;;  %v2907_v55 = vunpack.c.l.s8.bf16 %v2091_v3  ;;  %v3020_v3 = vunpack.c.l.s8.bf16 %v2148_v17  ;;  %v2139_v17 = vld [vmem:[%s9084_s4 + $0xb20] sm:$0xff] }
 0x4a6   :  { %4239 = vmatpush2.bf16.msra.mxu1 %v3059_v31  ;;  %4197 = vmatprep.subr.bf16.mxu0 %v2924_v5  ;;  %v3035_v31 = vunpack.c.l.s8.bf16 %v2155_v9  ;;  %v2900_v5 = vunpack.c.h.s8.bf16 %v2084_v40  ;;  %v2140_v9 = vld [vmem:[%s9084_s4 + $0xb28] sm:$0xff] }
 0x4a7   :  { %4240 = vmatprep.subr.bf16.mxu1 %v3052_v7  ;;  %v2083_v7 = vld [vmem:[%s9084_s4 + $0x960] sm:$0xff] }
 0x4a9   :  { %4198 = vmatpush2.bf16.msra.mxu0 %v2923_v43  ;;  %v2899_v43 = vunpack.c.h.s8.bf16 %v2083_v7 }
 0x4aa   :  { %4241 = vmatpush2.bf16.msra.mxu1 %v3051_v11  ;;  %4199 = vmatprep.subr.bf16.mxu0 %v2916_v57  ;;  %v3027_v11 = vunpack.c.h.s8.bf16 %v2147_v12  ;;  %v2892_v57 = vunpack.c.l.s8.bf16 %v2084_v40  ;;  %v3012_v40 = vunpack.c.h.s8.bf16 %v2140_v9 }
 0x4ab   :  { %4242 = vmatprep.subr.bf16.mxu1 %v3044_v33  ;;  %v2076_v33 = vld [vmem:[%s9084_s4 + $0x928] sm:$0xff] }
 0x4ad   :  { %4200 = vmatpush2.bf16.msra.mxu0 %v2915_v59  ;;  %v2891_v59 = vunpack.c.l.s8.bf16 %v2083_v7  ;;  %v3004_v7 = vunpack.c.l.s8.bf16 %v2140_v9  ;;  %v2259_v9 = vld [vmem:[%s9084_s4 + $0xee0] sm:$0xff] }
 0x4ae   :  { %4243 = vmatpush2.bf16.msra.mxu1 %v3043_v39  ;;  %4201 = vmatprep.subr.bf16.mxu0 %v2908_v2  ;;  %v3019_v39 = vunpack.c.l.s8.bf16 %v2147_v12  ;;  %v2884_v2 = vunpack.c.h.s8.bf16 %v2076_v33  ;;  %v2260_v12 = vld [vmem:[%s9084_s4 + $0xee8] sm:$0xff] }
 0x4af   :  { %4244 = vmatprep.subr.bf16.mxu1 %v3036_v1  ;;  %v2075_v1 = vld [vmem:[%s9084_s4 + $0x920] sm:$0xff] }
 0x4b1   :  { %4202 = vmatpush2.bf16.msra.mxu0 %v2907_v55  ;;  %v2883_v55 = vunpack.c.h.s8.bf16 %v2075_v1 }
 0x4b2   :  { %4245 = vmatpush2.bf16.msra.mxu1 %v3035_v31  ;;  %4203 = vmatprep.subr.bf16.mxu0 %v2900_v5  ;;  %v3011_v31 = vunpack.c.h.s8.bf16 %v2139_v17  ;;  %v2876_v5 = vunpack.c.l.s8.bf16 %v2076_v33  ;;  %v3252_v33 = vunpack.c.h.s8.bf16 %v2260_v12 }
 0x4b3   :  { %4246 = vmatprep.subr.bf16.mxu1 %v3028_v28  ;;  %v2196_v28 = vld [vmem:[%s9084_s4 + $0xce8] sm:$0xff] }
 0x4b5   :  { %4204 = vmatpush2.bf16.msra.mxu0 %v2899_v43  ;;  %v2875_v43 = vunpack.c.l.s8.bf16 %v2075_v1  ;;  %v7986_v1 = vpop.f32.mrf.mxu1 }
 0x4b6   :  { %4247 = vmatpush2.bf16.msra.mxu1 %v3027_v11  ;;  %4205 = vmatprep.subr.bf16.mxu0 %v2892_v57  ;;  %v3003_v11 = vunpack.c.l.s8.bf16 %v2139_v17  ;;  %v3124_v57 = vunpack.c.h.s8.bf16 %v2196_v28  ;;  %v2188_v17 = vld [vmem:[%s9084_s4 + $0xca8] sm:$0xff] }
 0x4b7   :  { %4248 = vmatprep.subr.bf16.mxu1 %v3020_v3  ;;  %v2195_v3 = vld [vmem:[%s9084_s4 + $0xce0] sm:$0xff]  ;;  %v3108_v49 = vunpack.c.h.s8.bf16 %v2188_v17  ;;  %v3100_v27 = vunpack.c.l.s8.bf16 %v2188_v17 }
 0x4b9   :  { %4206 = vmatpush2.bf16.msra.mxu0 %v2891_v59  ;;  %v3123_v59 = vunpack.c.h.s8.bf16 %v2195_v3 }
 0x4ba   :  { %4249 = vmatpush2.bf16.msra.mxu1 %v3019_v39  ;;  %4207 = vmatprep.subr.bf16.mxu0 %v2884_v2  ;;  %v7984_v39 = vpop.f32.mrf.mxu0  ;;  %v3251_v2 = vunpack.c.h.s8.bf16 %v2259_v9 }
 0x4bb   :  { %4250 = vmatprep.subr.bf16.mxu1 %v3012_v40  ;;  %v3116_v40 = vunpack.c.l.s8.bf16 %v2196_v28 }
 0x4bd   :  { %4208 = vmatpush2.bf16.msra.mxu0 %v2883_v55 }
 0x4be   :  { %4251 = vmatpush2.bf16.msra.mxu1 %v3011_v31  ;;  %4209 = vmatprep.subr.bf16.mxu0 %v2876_v5  ;;  %v3244_v31 = vunpack.c.l.s8.bf16 %v2260_v12  ;;  %v2252_v5 = vld [vmem:[%s9084_s4 + $0xea8] sm:$0xff] }
 0x4bf   :  { %4252 = vmatprep.subr.bf16.mxu1 %v3004_v7  ;;  %v3228_v38 = vunpack.c.l.s8.bf16 %v2252_v5 }
 0x4c1   :  { %4210 = vmatpush2.bf16.msra.mxu0 %v2875_v43 }
 0x4c2   :  { %4253 = vmatpush2.bf16.msra.mxu1 %v3003_v11  ;;  %4265 = vmatprep.subr.bf16.mxu0 %v3124_v57  ;;  %v5639_v11 = vld [vmem:[%s9085_s5] sm:$0xff]  ;;  %v3115_v57 = vunpack.c.l.s8.bf16 %v2195_v3 }
 0x4c3   :  { %4308 = vmatprep.subr.bf16.mxu1 %v3252_v33  ;;  %v4708_v28 = vrot.slane %v5639_v11, %v6268_v46  ;;  %v3243_v33 = vunpack.c.l.s8.bf16 %v2259_v9  ;;  %v3236_v11 = vunpack.c.h.s8.bf16 %v2252_v5  ;;  %v2251_v3 = vld [vmem:[%s9084_s4 + $0xea0] sm:$0xff] }
 0x4c4   :  { %v3955_v55 = vpop.f32.mrf.mxu0  ;;  %4212 = vmatmul.mubr.bf16.vlgmr.msra.gmra.mxu0 %v6704_v18  ;;  %v5640_v9 = vld [vmem:[%s9086_s6] sm:$0xff] }
 0x4c5   :  { %v3956_v7 = vadd.f32 %v3955_v55, %v7889_v6  ;;  %v3998_v43 = vpop.f32.mrf.mxu1  ;;  %4255 = vmatmul.mubr.bf16.vlgmr.msra.gmra.mxu1 %v6844_v50  ;;  %4266 = vmatpush1.bf16.msra.mxu0 %v3123_v59  ;;  %v2187_v6 = vld [vmem:[%s9084_s4 + $0xca0] sm:$0xff] }
 0x4c6   :  { %4297 = vmatprep.mubr.bf16.mxu0 %v7065_v60  ;;  %4309 = vmatpush1.bf16.msra.mxu1 %v3251_v2  ;;  %v8002_v12 = vpop.f32.mrf.mxu0 }
 0x4c7   :  { %9120 = vst [vmem:[#allocation15_spill] sm:$0xff] %v8002_v12  ;;  %v3999_v55 = vadd.f32 %v3998_v43, %v3956_v7  ;;  %4340 = vmatprep.mubr.bf16.mxu1 %v7103_v62  ;;  %v8008_v23 = vpop.f32.mrf.mxu1  ;;  %4267 = vmatprep.subr.bf16.mxu0 %v3116_v40  ;;  %v4766_v12 = vrot.slane %v5640_v9, %v6268_v46  ;;  %v3107_v43 = vunpack.c.h.s8.bf16 %v2187_v6  ;;  %v3235_v40 = vunpack.c.h.s8.bf16 %v2251_v3 }
 0x4c8   :  { %9121 = vst [vmem:[#allocation16_spill] sm:$0xff] %v8008_v23  ;;  %v3959_v59 = vpop.f32.mrf.mxu0  ;;  %4310 = vmatprep.subr.bf16.mxu1 %v3244_v31  ;;  %v2180_v31 = vld [vmem:[%s9084_s4 + $0xc68] sm:$0xff] }
 0x4c9   :  { %v4739_v2 = vmul.f32 %v4708_v28, %v3999_v55  ;;  %v3960_v7 = vadd.f32 %v3959_v59, %v7898_v13  ;;  %4268 = vmatpush1.bf16.msra.mxu0 %v3115_v57  ;;  %v4002_v23 = vpop.f32.mrf.mxu1  ;;  %v2244_v55 = vld [vmem:[%s9084_s4 + $0xe68] sm:$0xff]  ;;  %v3099_v57 = vunpack.c.l.s8.bf16 %v2187_v6 }
 0x4ca   :  { %4311 = vmatpush1.bf16.msra.mxu1 %v3243_v33  ;;  %4269 = vmatprep.subr.bf16.mxu0 %v3108_v49  ;;  %v3227_v49 = vunpack.c.l.s8.bf16 %v2251_v3  ;;  %v3092_v33 = vunpack.c.h.s8.bf16 %v2180_v31  ;;  %v3220_v5 = vunpack.c.h.s8.bf16 %v2244_v55  ;;  %v3212_v3 = vunpack.c.l.s8.bf16 %v2244_v55 }
 0x4cb   :  { %v4003_v34 = vadd.f32 %v4002_v23, %v3960_v7  ;;  %4312 = vmatprep.subr.bf16.mxu1 %v3236_v11  ;;  %v4797_v9 = vadd.f32 %v4766_v12, %v4739_v2  ;;  %v2179_v23 = vld [vmem:[%s9084_s4 + $0xc60] sm:$0xff] }
 0x4cc   :  { %v2243_v11 = vld [vmem:[%s9084_s4 + $0xe60] sm:$0xff]  ;;  %v3083_v7 = vunpack.c.l.s8.bf16 %v2179_v23 }
 0x4cd   :  { %v4747_v13 = vmul.f32 %v4708_v28, %v4003_v34  ;;  %4270 = vmatpush1.bf16.msra.mxu0 %v3107_v43  ;;  %v4813_v59 = vmax.f32 %v4797_v9, 0.0  ;;  %v3091_v34 = vunpack.c.h.s8.bf16 %v2179_v23  ;;  %v3084_v28 = vunpack.c.l.s8.bf16 %v2180_v31  ;;  %v2171_v31 = vld [vmem:[%s9084_s4 + $0xc20] sm:$0xff]  ;;  %v2228_v23 = vld [vmem:[%s9084_s4 + $0xde8] sm:$0xff] }
 0x4ce   :  { %4313 = vmatpush1.bf16.msra.mxu1 %v3235_v40  ;;  %4271 = vmatprep.subr.bf16.mxu0 %v3100_v27  ;;  %v3219_v27 = vunpack.c.h.s8.bf16 %v2243_v11  ;;  %v3211_v43 = vunpack.c.l.s8.bf16 %v2243_v11  ;;  %v2235_v9 = vld [vmem:[%s9084_s4 + $0xe20] sm:$0xff] }
 0x4cf   :  { %v4805_v17 = vadd.f32 %v4766_v12, %v4747_v13  ;;  %4314 = vmatprep.subr.bf16.mxu1 %v3228_v38  ;;  %v2172_v38 = vld [vmem:[%s9084_s4 + $0xc28] sm:$0xff]  ;;  %v3075_v13 = vunpack.c.h.s8.bf16 %v2171_v31  ;;  %v3195_v11 = vunpack.c.l.s8.bf16 %v2235_v9 }
 0x4d0   :  { %v2236_v12 = vld [vmem:[%s9084_s4 + $0xe28] sm:$0xff]  ;;  %v3076_v40 = vunpack.c.h.s8.bf16 %v2172_v38 }
 0x4d1   :  { %v4821_v2 = vmax.f32 %v4805_v17, 0.0  ;;  %4272 = vmatpush1.bf16.msra.mxu0 %v3099_v57  ;;  %v3204_v55 = vunpack.c.h.s8.bf16 %v2236_v12  ;;  %v3203_v57 = vunpack.c.h.s8.bf16 %v2235_v9  ;;  %v2292_v17 = vld [vmem:[%s9084_s4 + $0xfe8] sm:$0xff]  ;;  %v2219_v9 = vld [vmem:[%s9084_s4 + $0xda0] sm:$0xff] }
 0x4d2   :  { %4315 = vmatpush1.bf16.msra.mxu1 %v3227_v49  ;;  %4273 = vmatprep.subr.bf16.mxu0 %v3092_v33  ;;  %v3068_v49 = vunpack.c.l.s8.bf16 %v2172_v38  ;;  %v3196_v33 = vunpack.c.l.s8.bf16 %v2236_v12  ;;  %v3180_v38 = vunpack.c.l.s8.bf16 %v2228_v23  ;;  %v3308_v12 = vunpack.c.l.s8.bf16 %v2292_v17 }
 0x4d3   :  { %v8030_v6 = vpack.c.bf16 %v4821_v2, %v4813_v59  ;;  %4316 = vmatprep.subr.bf16.mxu1 %v3220_v5  ;;  %v3067_v5 = vunpack.c.l.s8.bf16 %v2171_v31  ;;  %v3188_v59 = vunpack.c.h.s8.bf16 %v2228_v23  ;;  %v2227_v2 = vld [vmem:[%s9084_s4 + $0xde0] sm:$0xff] }
 0x4d5   :  { %9122 = vst [vmem:[#allocation17_spill] sm:$0xff] %v8030_v6  ;;  %4274 = vmatpush1.bf16.msra.mxu0 %v3091_v34  ;;  %v3316_v34 = vunpack.c.h.s8.bf16 %v2292_v17 }
 0x4d6   :  { %4317 = vmatpush1.bf16.msra.mxu1 %v3219_v27  ;;  %4275 = vmatprep.subr.bf16.mxu0 %v3084_v28  ;;  %v2291_v27 = vld [vmem:[%s9084_s4 + $0xfe0] sm:$0xff]  ;;  %v3187_v28 = vunpack.c.h.s8.bf16 %v2227_v2 }
 0x4d7   :  { %4318 = vmatprep.subr.bf16.mxu1 %v3212_v3  ;;  %v3315_v3 = vunpack.c.h.s8.bf16 %v2291_v27  ;;  %v3307_v31 = vunpack.c.l.s8.bf16 %v2291_v27  ;;  %v2211_v27 = vld [vmem:[%s9084_s4 + $0xd60] sm:$0xff] }
 0x4d9   :  { %4276 = vmatpush1.bf16.msra.mxu0 %v3083_v7  ;;  %v2220_v7 = vld [vmem:[%s9084_s4 + $0xda8] sm:$0xff] }
 0x4da   :  { %4319 = vmatpush1.bf16.msra.mxu1 %v3211_v43  ;;  %4277 = vmatprep.subr.bf16.mxu0 %v3076_v40  ;;  %v2284_v43 = vld [vmem:[%s9084_s4 + $0xfa8] sm:$0xff]  ;;  %v3179_v40 = vunpack.c.l.s8.bf16 %v2227_v2  ;;  %v3164_v23 = vunpack.c.l.s8.bf16 %v2220_v7 }
 0x4db   :  { %4320 = vmatprep.subr.bf16.mxu1 %v3204_v55  ;;  %v3172_v55 = vunpack.c.h.s8.bf16 %v2220_v7  ;;  %v3292_v17 = vunpack.c.l.s8.bf16 %v2284_v43 }
 0x4dd   :  { %4278 = vmatpush1.bf16.msra.mxu0 %v3075_v13  ;;  %v3300_v13 = vunpack.c.h.s8.bf16 %v2284_v43 }
 0x4de   :  { %4321 = vmatpush1.bf16.msra.mxu1 %v3203_v57  ;;  %4279 = vmatprep.subr.bf16.mxu0 %v3068_v49  ;;  %v2283_v57 = vld [vmem:[%s9084_s4 + $0xfa0] sm:$0xff]  ;;  %v3171_v49 = vunpack.c.h.s8.bf16 %v2219_v9 }
 0x4df   :  { %4322 = vmatprep.subr.bf16.mxu1 %v3196_v33  ;;  %v3299_v33 = vunpack.c.h.s8.bf16 %v2283_v57  ;;  %v3291_v2 = vunpack.c.l.s8.bf16 %v2283_v57  ;;  %v2203_v57 = vld [vmem:[%s9084_s4 + $0xd20] sm:$0xff] }
 0x4e1   :  { %4280 = vmatpush1.bf16.msra.mxu0 %v3067_v5  ;;  %v2212_v5 = vld [vmem:[%s9084_s4 + $0xd68] sm:$0xff] }
 0x4e2   :  { %4323 = vmatpush1.bf16.msra.mxu1 %v3195_v11  ;;  %4281 = vmatprep.subr.bf16.mxu0 %v3188_v59  ;;  %v2276_v11 = vld [vmem:[%s9084_s4 + $0xf68] sm:$0xff]  ;;  %v3163_v59 = vunpack.c.l.s8.bf16 %v2219_v9  ;;  %v3148_v7 = vunpack.c.l.s8.bf16 %v2212_v5 }
 0x4e3   :  { %4324 = vmatprep.subr.bf16.mxu1 %v3316_v34  ;;  %v3156_v34 = vunpack.c.h.s8.bf16 %v2212_v5  ;;  %v3276_v43 = vunpack.c.l.s8.bf16 %v2276_v11 }
 0x4e5   :  { %4282 = vmatpush2.bf16.msra.mxu0 %v3187_v28  ;;  %v3284_v28 = vunpack.c.h.s8.bf16 %v2276_v11 }
 0x4e6   :  { %4325 = vmatpush2.bf16.msra.mxu1 %v3315_v3  ;;  %4283 = vmatprep.subr.bf16.mxu0 %v3180_v38  ;;  %v2275_v3 = vld [vmem:[%s9084_s4 + $0xf60] sm:$0xff]  ;;  %v3155_v38 = vunpack.c.h.s8.bf16 %v2211_v27 }
 0x4e7   :  { %4326 = vmatprep.subr.bf16.mxu1 %v3308_v12  ;;  %v3283_v12 = vunpack.c.h.s8.bf16 %v2275_v3  ;;  %v3275_v9 = vunpack.c.l.s8.bf16 %v2275_v3  ;;  %v1813_v3 = vld [vmem:[%s9084_s4 + $0xf0] sm:$0xff] }
 0x4e9   :  { %4284 = vmatpush2.bf16.msra.mxu0 %v3179_v40  ;;  %v2204_v40 = vld [vmem:[%s9084_s4 + $0xd28] sm:$0xff] }
 0x4ea   :  { %4327 = vmatpush2.bf16.msra.mxu1 %v3307_v31  ;;  %4285 = vmatprep.subr.bf16.mxu0 %v3172_v55  ;;  %v2268_v31 = vld [vmem:[%s9084_s4 + $0xf28] sm:$0xff]  ;;  %v3147_v55 = vunpack.c.l.s8.bf16 %v2211_v27  ;;  %v3132_v5 = vunpack.c.l.s8.bf16 %v2204_v40 }
 0x4eb   :  { %4328 = vmatprep.subr.bf16.mxu1 %v3300_v13  ;;  %v3140_v13 = vunpack.c.h.s8.bf16 %v2204_v40  ;;  %v3260_v11 = vunpack.c.l.s8.bf16 %v2268_v31 }
 0x4ed   :  { %4286 = vmatpush2.bf16.msra.mxu0 %v3171_v49  ;;  %v3268_v49 = vunpack.c.h.s8.bf16 %v2268_v31  ;;  %v8106_v31 = vpop.f32.mrf.mxu1 }
 0x4ee   :  { %4329 = vmatpush2.bf16.msra.mxu1 %v3299_v33  ;;  %4287 = vmatprep.subr.bf16.mxu0 %v3164_v23  ;;  %v2267_v33 = vld [vmem:[%s9084_s4 + $0xf20] sm:$0xff]  ;;  %v3139_v23 = vunpack.c.h.s8.bf16 %v2203_v57 }
 0x4ef   :  { %4330 = vmatprep.subr.bf16.mxu1 %v3292_v17  ;;  %v3267_v17 = vunpack.c.h.s8.bf16 %v2267_v33  ;;  %v3259_v27 = vunpack.c.l.s8.bf16 %v2267_v33 }
 0x4f1   :  { %4288 = vmatpush2.bf16.msra.mxu0 %v3163_v59  ;;  %v1814_v59 = vld [vmem:[%s9084_s4 + $0xf8] sm:$0xff] }
 0x4f2   :  { %4331 = vmatpush2.bf16.msra.mxu1 %v3291_v2  ;;  %4289 = vmatprep.subr.bf16.mxu0 %v3156_v34  ;;  %v1878_v2 = vld [vmem:[%s9084_s4 + $0x2f8] sm:$0xff]  ;;  %v3131_v34 = vunpack.c.l.s8.bf16 %v2203_v57 }
 0x4f3   :  { %4332 = vmatprep.subr.bf16.mxu1 %v3284_v28  ;;  %v2358_v28 = vunpack.c.h.s8.bf16 %v1814_v59  ;;  %v2478_v57 = vunpack.c.l.s8.bf16 %v1878_v2 }
 0x4f5   :  { %4290 = vmatpush2.bf16.msra.mxu0 %v3155_v38  ;;  %v2486_v38 = vunpack.c.h.s8.bf16 %v1878_v2  ;;  %v1805_v2 = vld [vmem:[%s9084_s4 + $0xb0] sm:$0xff] }
 0x4f6   :  { %4333 = vmatpush2.bf16.msra.mxu1 %v3283_v12  ;;  %4291 = vmatprep.subr.bf16.mxu0 %v3148_v7  ;;  %v1877_v12 = vld [vmem:[%s9084_s4 + $0x2f0] sm:$0xff]  ;;  %v2357_v7 = vunpack.c.h.s8.bf16 %v1813_v3 }
 0x4f7   :  { %4334 = vmatprep.subr.bf16.mxu1 %v3276_v43  ;;  %v8104_v43 = vpop.f32.mrf.mxu0  ;;  %v2485_v40 = vunpack.c.h.s8.bf16 %v1877_v12 }
 0x4f9   :  { %4292 = vmatpush2.bf16.msra.mxu0 %v3147_v55  ;;  %v2350_v55 = vunpack.c.l.s8.bf16 %v1814_v59 }
 0x4fa   :  { %4335 = vmatpush2.bf16.msra.mxu1 %v3275_v9  ;;  %4293 = vmatprep.subr.bf16.mxu0 %v3140_v13  ;;  %v1806_v9 = vld [vmem:[%s9084_s4 + $0xb8] sm:$0xff] }
 0x4fb   :  { %4336 = vmatprep.subr.bf16.mxu1 %v3268_v49  ;;  %v1870_v49 = vld [vmem:[%s9084_s4 + $0x2b8] sm:$0xff]  ;;  %v2342_v59 = vunpack.c.h.s8.bf16 %v1806_v9 }
 0x4fd   :  { %4294 = vmatpush2.bf16.msra.mxu0 %v3139_v23  ;;  %v2349_v23 = vunpack.c.l.s8.bf16 %v1813_v3 }
 0x4fe   :  { %4337 = vmatpush2.bf16.msra.mxu1 %v3267_v17  ;;  %4295 = vmatprep.subr.bf16.mxu0 %v3132_v5 }
 0x4ff   :  { %4338 = vmatprep.subr.bf16.mxu1 %v3260_v11  ;;  %v2477_v11 = vunpack.c.l.s8.bf16 %v1877_v12 }
 0x501   :  { %4296 = vmatpush2.bf16.msra.mxu0 %v3131_v34 }
 0x502   :  { %4339 = vmatpush2.bf16.msra.mxu1 %v3259_v27  ;;  %4351 = vmatprep.subr.bf16.mxu0 %v2358_v28  ;;  %v2470_v27 = vunpack.c.h.s8.bf16 %v1870_v49  ;;  %v1869_v28 = vld [vmem:[%s9084_s4 + $0x2b0] sm:$0xff] }
 0x503   :  { %4394 = vmatprep.subr.bf16.mxu1 %v2486_v38  ;;  %v2341_v38 = vunpack.c.h.s8.bf16 %v1805_v2 }
 0x504   :  { %v4041_v13 = vpop.f32.mrf.mxu0  ;;  %4298 = vmatmul.mubr.bf16.vlgmr.msra.gmra.mxu0 %v6972_v45 }
 0x505   :  { %v4084_v33 = vpop.f32.mrf.mxu1  ;;  %4341 = vmatmul.mubr.bf16.vlgmr.msra.gmra.mxu1 %v7186_v14  ;;  %4352 = vmatpush1.bf16.msra.mxu0 %v2357_v7  ;;  %v2469_v7 = vunpack.c.h.s8.bf16 %v1869_v28 }
 0x506   :  { %v8116_v17 = vadd.f32 %v4084_v33, %v4041_v13  ;;  %4383 = vmatprep.mubr.bf16.mxu0 %v6659_v19  ;;  %4395 = vmatpush1.bf16.msra.mxu1 %v2485_v40  ;;  %v8119_v5 = vpop.f32.mrf.mxu0  ;;  %v2334_v40 = vunpack.c.l.s8.bf16 %v1806_v9  ;;  %v1862_v13 = vld [vmem:[%s9084_s4 + $0x278] sm:$0xff]  ;;  %v2461_v33 = vunpack.c.l.s8.bf16 %v1869_v28  ;;  %v1797_v9 = vld [vmem:[%s9084_s4 + $0x70] sm:$0xff] }
 0x507   :  { %4426 = vmatprep.mubr.bf16.mxu1 %v6666_v52  ;;  %v8125_v34 = vpop.f32.mrf.mxu1  ;;  %4353 = vmatprep.subr.bf16.mxu0 %v2350_v55  ;;  %v2462_v52 = vunpack.c.l.s8.bf16 %v1870_v49  ;;  %v1798_v55 = vld [vmem:[%s9084_s4 + $0x78] sm:$0xff]  ;;  %v2454_v49 = vunpack.c.h.s8.bf16 %v1862_v13 }
 0x508   :  { %v4045_v19 = vpop.f32.mrf.mxu0  ;;  %4396 = vmatprep.subr.bf16.mxu1 %v2478_v57  ;;  %v2333_v57 = vunpack.c.l.s8.bf16 %v1805_v2  ;;  %v2318_v2 = vunpack.c.l.s8.bf16 %v1798_v55  ;;  %v1790_v28 = vld [vmem:[%s9084_s4 + $0x38] sm:$0xff] }
 0x509   :  { %v4088_v3 = vpop.f32.mrf.mxu1  ;;  %4354 = vmatpush1.bf16.msra.mxu0 %v2349_v23  ;;  %v2326_v23 = vunpack.c.h.s8.bf16 %v1798_v55 }
 0x50a   :  { %v8130_v12 = vadd.f32 %v4088_v3, %v4045_v19  ;;  %4397 = vmatpush1.bf16.msra.mxu1 %v2477_v11  ;;  %4355 = vmatprep.subr.bf16.mxu0 %v2342_v59  ;;  %v1861_v11 = vld [vmem:[%s9084_s4 + $0x270] sm:$0xff]  ;;  %v2325_v59 = vunpack.c.h.s8.bf16 %v1797_v9  ;;  %v2446_v19 = vunpack.c.l.s8.bf16 %v1862_v13  ;;  %v1854_v3 = vld [vmem:[%s9084_s4 + $0x238] sm:$0xff] }
 0x50b   :  { %4398 = vmatprep.subr.bf16.mxu1 %v2470_v27  ;;  %v2453_v27 = vunpack.c.h.s8.bf16 %v1861_v11  ;;  %v2438_v55 = vunpack.c.h.s8.bf16 %v1854_v3  ;;  %v1853_v13 = vld [vmem:[%s9084_s4 + $0x230] sm:$0xff] }
 0x50d   :  { %4356 = vmatpush1.bf16.msra.mxu0 %v2341_v38  ;;  %v2317_v38 = vunpack.c.l.s8.bf16 %v1797_v9  ;;  %v2430_v9 = vunpack.c.l.s8.bf16 %v1854_v3  ;;  %v1909_v3 = vld [vmem:[%s9084_s4 + $0x3f0] sm:$0xff] }
 0x50e   :  { %4399 = vmatpush1.bf16.msra.mxu1 %v2469_v7  ;;  %4357 = vmatprep.subr.bf16.mxu0 %v2334_v40  ;;  %v2445_v7 = vunpack.c.l.s8.bf16 %v1861_v11  ;;  %v2310_v40 = vunpack.c.h.s8.bf16 %v1790_v28  ;;  %v1910_v11 = vld [vmem:[%s9084_s4 + $0x3f8] sm:$0xff] }
 0x50f   :  { %4400 = vmatprep.subr.bf16.mxu1 %v2462_v52  ;;  %v1789_v52 = vld [vmem:[%s9084_s4 + $0x30] sm:$0xff] }
 0x511   :  { %4358 = vmatpush1.bf16.msra.mxu0 %v2333_v57  ;;  %v2309_v57 = vunpack.c.h.s8.bf16 %v1789_v52 }
 0x512   :  { %4401 = vmatpush1.bf16.msra.mxu1 %v2461_v33  ;;  %4359 = vmatprep.subr.bf16.mxu0 %v2326_v23  ;;  %v2437_v33 = vunpack.c.h.s8.bf16 %v1853_v13  ;;  %v2302_v23 = vunpack.c.l.s8.bf16 %v1790_v28  ;;  %v2550_v28 = vunpack.c.h.s8.bf16 %v1910_v11 }
 0x513   :  { %4402 = vmatprep.subr.bf16.mxu1 %v2454_v49  ;;  %v1846_v49 = vld [vmem:[%s9084_s4 + $0x1f8] sm:$0xff] }
 0x515   :  { %4360 = vmatpush1.bf16.msra.mxu0 %v2325_v59  ;;  %v2301_v59 = vunpack.c.l.s8.bf16 %v1789_v52  ;;  %v2542_v52 = vunpack.c.l.s8.bf16 %v1910_v11  ;;  %v1901_v11 = vld [vmem:[%s9084_s4 + $0x3b0] sm:$0xff] }
 0x516   :  { %4403 = vmatpush1.bf16.msra.mxu1 %v2453_v27  ;;  %4361 = vmatprep.subr.bf16.mxu0 %v2318_v2  ;;  %v2429_v27 = vunpack.c.l.s8.bf16 %v1853_v13  ;;  %v2422_v2 = vunpack.c.h.s8.bf16 %v1846_v49  ;;  %v1902_v13 = vld [vmem:[%s9084_s4 + $0x3b8] sm:$0xff] }
 0x517   :  { %4404 = vmatprep.subr.bf16.mxu1 %v2446_v19  ;;  %v1845_v19 = vld [vmem:[%s9084_s4 + $0x1f0] sm:$0xff] }
 0x519   :  { %4362 = vmatpush1.bf16.msra.mxu0 %v2317_v38  ;;  %v2421_v38 = vunpack.c.h.s8.bf16 %v1845_v19 }
 0x51a   :  { %4405 = vmatpush1.bf16.msra.mxu1 %v2445_v7  ;;  %4363 = vmatprep.subr.bf16.mxu0 %v2310_v40  ;;  %v2549_v7 = vunpack.c.h.s8.bf16 %v1909_v3  ;;  %v2414_v40 = vunpack.c.l.s8.bf16 %v1846_v49  ;;  %v2534_v49 = vunpack.c.h.s8.bf16 %v1902_v13 }
 0x51b   :  { %4406 = vmatprep.subr.bf16.mxu1 %v2438_v55  ;;  %v1838_v55 = vld [vmem:[%s9084_s4 + $0x1b8] sm:$0xff] }
 0x51d   :  { %4364 = vmatpush1.bf16.msra.mxu0 %v2309_v57  ;;  %v2413_v57 = vunpack.c.l.s8.bf16 %v1845_v19  ;;  %v2526_v19 = vunpack.c.l.s8.bf16 %v1902_v13  ;;  %v1893_v13 = vld [vmem:[%s9084_s4 + $0x370] sm:$0xff] }
 0x51e   :  { %4407 = vmatpush1.bf16.msra.mxu1 %v2437_v33  ;;  %4365 = vmatprep.subr.bf16.mxu0 %v2302_v23  ;;  %v2541_v33 = vunpack.c.l.s8.bf16 %v1909_v3  ;;  %v2406_v23 = vunpack.c.h.s8.bf16 %v1838_v55  ;;  %v1894_v3 = vld [vmem:[%s9084_s4 + $0x378] sm:$0xff] }
 0x51f   :  { %4408 = vmatprep.subr.bf16.mxu1 %v2430_v9  ;;  %v1837_v9 = vld [vmem:[%s9084_s4 + $0x1b0] sm:$0xff] }
 0x521   :  { %4366 = vmatpush1.bf16.msra.mxu0 %v2301_v59  ;;  %v2405_v59 = vunpack.c.h.s8.bf16 %v1837_v9 }
 0x522   :  { %4409 = vmatpush1.bf16.msra.mxu1 %v2429_v27  ;;  %4367 = vmatprep.subr.bf16.mxu0 %v2422_v2  ;;  %v2533_v27 = vunpack.c.h.s8.bf16 %v1901_v11  ;;  %v2398_v2 = vunpack.c.l.s8.bf16 %v1838_v55  ;;  %v2518_v55 = vunpack.c.h.s8.bf16 %v1894_v3 }
 0x523   :  { %4410 = vmatprep.subr.bf16.mxu1 %v2550_v28  ;;  %v1830_v28 = vld [vmem:[%s9084_s4 + $0x178] sm:$0xff] }
 0x525   :  { %4368 = vmatpush2.bf16.msra.mxu0 %v2421_v38  ;;  %v2397_v38 = vunpack.c.l.s8.bf16 %v1837_v9  ;;  %v2510_v9 = vunpack.c.l.s8.bf16 %v1894_v3  ;;  %v1885_v3 = vld [vmem:[%s9084_s4 + $0x330] sm:$0xff] }
 0x526   :  { %4411 = vmatpush2.bf16.msra.mxu1 %v2549_v7  ;;  %4369 = vmatprep.subr.bf16.mxu0 %v2414_v40  ;;  %v2525_v7 = vunpack.c.l.s8.bf16 %v1901_v11  ;;  %v2390_v40 = vunpack.c.h.s8.bf16 %v1830_v28  ;;  %v1886_v11 = vld [vmem:[%s9084_s4 + $0x338] sm:$0xff] }
 0x527   :  { %4412 = vmatprep.subr.bf16.mxu1 %v2542_v52  ;;  %v1829_v52 = vld [vmem:[%s9084_s4 + $0x170] sm:$0xff] }
 0x529   :  { %4370 = vmatpush2.bf16.msra.mxu0 %v2413_v57  ;;  %v2389_v57 = vunpack.c.h.s8.bf16 %v1829_v52 }
 0x52a   :  { %4413 = vmatpush2.bf16.msra.mxu1 %v2541_v33  ;;  %4371 = vmatprep.subr.bf16.mxu0 %v2406_v23  ;;  %v2517_v33 = vunpack.c.h.s8.bf16 %v1893_v13  ;;  %v2382_v23 = vunpack.c.l.s8.bf16 %v1830_v28  ;;  %v2502_v28 = vunpack.c.h.s8.bf16 %v1886_v11 }
 0x52b   :  { %4414 = vmatprep.subr.bf16.mxu1 %v2534_v49  ;;  %v1822_v49 = vld [vmem:[%s9084_s4 + $0x138] sm:$0xff] }
 0x52d   :  { %4372 = vmatpush2.bf16.msra.mxu0 %v2405_v59  ;;  %v2381_v59 = vunpack.c.l.s8.bf16 %v1829_v52  ;;  %v2494_v52 = vunpack.c.l.s8.bf16 %v1886_v11  ;;  %v2005_v11 = vld [vmem:[%s9084_s4 + $0x6f0] sm:$0xff] }
 0x52e   :  { %4415 = vmatpush2.bf16.msra.mxu1 %v2533_v27  ;;  %4373 = vmatprep.subr.bf16.mxu0 %v2398_v2  ;;  %v2509_v27 = vunpack.c.l.s8.bf16 %v1893_v13  ;;  %v2374_v2 = vunpack.c.h.s8.bf16 %v1822_v49  ;;  %v2006_v13 = vld [vmem:[%s9084_s4 + $0x6f8] sm:$0xff] }
 0x52f   :  { %4416 = vmatprep.subr.bf16.mxu1 %v2526_v19  ;;  %v1821_v19 = vld [vmem:[%s9084_s4 + $0x130] sm:$0xff] }
 0x531   :  { %4374 = vmatpush2.bf16.msra.mxu0 %v2397_v38  ;;  %v2373_v38 = vunpack.c.h.s8.bf16 %v1821_v19 }
 0x532   :  { %4417 = vmatpush2.bf16.msra.mxu1 %v2525_v7  ;;  %4375 = vmatprep.subr.bf16.mxu0 %v2390_v40  ;;  %v2501_v7 = vunpack.c.h.s8.bf16 %v1885_v3  ;;  %v2366_v40 = vunpack.c.l.s8.bf16 %v1822_v49  ;;  %v2742_v49 = vunpack.c.h.s8.bf16 %v2006_v13 }
 0x533   :  { %4418 = vmatprep.subr.bf16.mxu1 %v2518_v55  ;;  %v1942_v55 = vld [vmem:[%s9084_s4 + $0x4f8] sm:$0xff] }
 0x535   :  { %4376 = vmatpush2.bf16.msra.mxu0 %v2389_v57  ;;  %v2365_v57 = vunpack.c.l.s8.bf16 %v1821_v19  ;;  %v8218_v19 = vpop.f32.mrf.mxu1 }
 0x536   :  { %4419 = vmatpush2.bf16.msra.mxu1 %v2517_v33  ;;  %4377 = vmatprep.subr.bf16.mxu0 %v2382_v23  ;;  %v2493_v33 = vunpack.c.l.s8.bf16 %v1885_v3  ;;  %v2614_v23 = vunpack.c.h.s8.bf16 %v1942_v55  ;;  %v1934_v3 = vld [vmem:[%s9084_s4 + $0x4b8] sm:$0xff] }
 0x537   :  { %4420 = vmatprep.subr.bf16.mxu1 %v2510_v9  ;;  %v1941_v9 = vld [vmem:[%s9084_s4 + $0x4f0] sm:$0xff] }
 0x539   :  { %4378 = vmatpush2.bf16.msra.mxu0 %v2381_v59  ;;  %v2613_v59 = vunpack.c.h.s8.bf16 %v1941_v9 }
 0x53a   :  { %4421 = vmatpush2.bf16.msra.mxu1 %v2509_v27  ;;  %4379 = vmatprep.subr.bf16.mxu0 %v2374_v2  ;;  %v8216_v27 = vpop.f32.mrf.mxu0  ;;  %v2741_v2 = vunpack.c.h.s8.bf16 %v2005_v11 }
 0x53b   :  { %4422 = vmatprep.subr.bf16.mxu1 %v2502_v28  ;;  %v2606_v28 = vunpack.c.l.s8.bf16 %v1942_v55 }
 0x53d   :  { %4380 = vmatpush2.bf16.msra.mxu0 %v2373_v38 }
 0x53e   :  { %4423 = vmatpush2.bf16.msra.mxu1 %v2501_v7  ;;  %4381 = vmatprep.subr.bf16.mxu0 %v2366_v40  ;;  %v2734_v7 = vunpack.c.l.s8.bf16 %v2006_v13  ;;  %v1998_v40 = vld [vmem:[%s9084_s4 + $0x6b8] sm:$0xff] }
 0x53f   :  { %4424 = vmatprep.subr.bf16.mxu1 %v2494_v52 }
 0x541   :  { %4382 = vmatpush2.bf16.msra.mxu0 %v2365_v57 }
 0x542   :  { %4425 = vmatpush2.bf16.msra.mxu1 %v2493_v33  ;;  %4437 = vmatprep.subr.bf16.mxu0 %v2614_v23  ;;  %v2605_v33 = vunpack.c.l.s8.bf16 %v1941_v9  ;;  %v2733_v23 = vunpack.c.l.s8.bf16 %v2005_v11 }
 0x543   :  { %4480 = vmatprep.subr.bf16.mxu1 %v2742_v49  ;;  %v2598_v49 = vunpack.c.h.s8.bf16 %v1934_v3 }
 0x544   :  { %v4127_v38 = vpop.f32.mrf.mxu0  ;;  %4384 = vmatmul.mubr.bf16.vlgmr.msra.gmra.mxu0 %v6193_v21  ;;  %v1933_v21 = vld [vmem:[%s9084_s4 + $0x4b0] sm:$0xff] }
 0x545   :  { %v4128_v52 = vadd.f32 %v4127_v38, %v8116_v17  ;;  %v4170_v57 = vpop.f32.mrf.mxu1  ;;  %4427 = vmatmul.mubr.bf16.vlgmr.msra.gmra.mxu1 %v6310_v32  ;;  %4438 = vmatpush1.bf16.msra.mxu0 %v2613_v59  ;;  %v2726_v32 = vunpack.c.h.s8.bf16 %v1998_v40  ;;  %v2597_v59 = vunpack.c.h.s8.bf16 %v1933_v21 }
 0x546   :  { %4469 = vmatprep.mubr.bf16.mxu0 %v6809_v36  ;;  %4481 = vmatpush1.bf16.msra.mxu1 %v2741_v2  ;;  %v8230_v55 = vpop.f32.mrf.mxu0  ;;  %v1997_v36 = vld [vmem:[%s9084_s4 + $0x6b0] sm:$0xff] }
 0x547   :  { %v8235_v13 = vadd.f32 %v4170_v57, %v4128_v52  ;;  %4512 = vmatprep.mubr.bf16.mxu1 %v6815_v48  ;;  %v8238_v17 = vpop.f32.mrf.mxu1  ;;  %4439 = vmatprep.subr.bf16.mxu0 %v2606_v28  ;;  %v2725_v38 = vunpack.c.h.s8.bf16 %v1997_v36  ;;  %v2590_v52 = vunpack.c.l.s8.bf16 %v1934_v3  ;;  %v2718_v28 = vunpack.c.l.s8.bf16 %v1998_v40  ;;  %v1926_v57 = vld [vmem:[%s9084_s4 + $0x478] sm:$0xff]  ;;  %v1925_v3 = vld [vmem:[%s9084_s4 + $0x470] sm:$0xff] }
 0x548   :  { %v4131_v9 = vpop.f32.mrf.mxu0  ;;  %4482 = vmatprep.subr.bf16.mxu1 %v2734_v7  ;;  %v1990_v7 = vld [vmem:[%s9084_s4 + $0x678] sm:$0xff] }
 0x549   :  { %v4132_v11 = vadd.f32 %v4131_v9, %v8130_v12  ;;  %4440 = vmatpush1.bf16.msra.mxu0 %v2605_v33  ;;  %v4174_v2 = vpop.f32.mrf.mxu1  ;;  %v2589_v12 = vunpack.c.l.s8.bf16 %v1933_v21  ;;  %v2717_v33 = vunpack.c.l.s8.bf16 %v1997_v36  ;;  %v2710_v40 = vunpack.c.h.s8.bf16 %v1990_v7  ;;  %v1918_v36 = vld [vmem:[%s9084_s4 + $0x438] sm:$0xff] }
 0x54a   :  { %4483 = vmatpush1.bf16.msra.mxu1 %v2733_v23  ;;  %4441 = vmatprep.subr.bf16.mxu0 %v2598_v49  ;;  %v2582_v23 = vunpack.c.h.s8.bf16 %v1926_v57  ;;  %v1989_v49 = vld [vmem:[%s9084_s4 + $0x670] sm:$0xff]  ;;  %v2574_v21 = vunpack.c.l.s8.bf16 %v1926_v57 }
 0x54b   :  { %v8244_v48 = vadd.f32 %v4174_v2, %v4132_v11  ;;  %4484 = vmatprep.subr.bf16.mxu1 %v2726_v32  ;;  %v2581_v32 = vunpack.c.h.s8.bf16 %v1925_v3  ;;  %v2709_v9 = vunpack.c.h.s8.bf16 %v1989_v49  ;;  %v2702_v11 = vunpack.c.l.s8.bf16 %v1990_v7  ;;  %v1981_v7 = vld [vmem:[%s9084_s4 + $0x630] sm:$0xff] }
 0x54c   :  { %v2573_v2 = vunpack.c.l.s8.bf16 %v1925_v3 }
 0x54d   :  { %4442 = vmatpush1.bf16.msra.mxu0 %v2597_v59  ;;  %v1982_v59 = vld [vmem:[%s9084_s4 + $0x638] sm:$0xff] }
 0x54e   :  { %4485 = vmatpush1.bf16.msra.mxu1 %v2725_v38  ;;  %4443 = vmatprep.subr.bf16.mxu0 %v2590_v52  ;;  %v2701_v38 = vunpack.c.l.s8.bf16 %v1989_v49  ;;  %v2566_v52 = vunpack.c.h.s8.bf16 %v1918_v36  ;;  %v2694_v57 = vunpack.c.h.s8.bf16 %v1982_v59  ;;  %v2686_v3 = vunpack.c.l.s8.bf16 %v1982_v59  ;;  %v2038_v49 = vld [vmem:[%s9084_s4 + $0x7f8] sm:$0xff]  ;;  %v2037_v59 = vld [vmem:[%s9084_s4 + $0x7f0] sm:$0xff] }
 0x54f   :  { %4486 = vmatprep.subr.bf16.mxu1 %v2718_v28  ;;  %v1917_v28 = vld [vmem:[%s9084_s4 + $0x430] sm:$0xff] }
 0x551   :  { %4444 = vmatpush1.bf16.msra.mxu0 %v2589_v12  ;;  %v2565_v12 = vunpack.c.h.s8.bf16 %v1917_v28 }
 0x552   :  { %4487 = vmatpush1.bf16.msra.mxu1 %v2717_v33  ;;  %4445 = vmatprep.subr.bf16.mxu0 %v2582_v23  ;;  %v2693_v33 = vunpack.c.h.s8.bf16 %v1981_v7  ;;  %v2558_v23 = vunpack.c.l.s8.bf16 %v1918_v36  ;;  %v2806_v36 = vunpack.c.h.s8.bf16 %v2038_v49 }
 0x553   :  { %4488 = vmatprep.subr.bf16.mxu1 %v2710_v40  ;;  %v1974_v40 = vld [vmem:[%s9084_s4 + $0x5f8] sm:$0xff] }
 0x555   :  { %4446 = vmatpush1.bf16.msra.mxu0 %v2581_v32  ;;  %v2557_v32 = vunpack.c.l.s8.bf16 %v1917_v28  ;;  %v2798_v28 = vunpack.c.l.s8.bf16 %v2038_v49  ;;  %v2029_v49 = vld [vmem:[%s9084_s4 + $0x7b0] sm:$0xff] }
 0x556   :  { %4489 = vmatpush1.bf16.msra.mxu1 %v2709_v9  ;;  %4447 = vmatprep.subr.bf16.mxu0 %v2574_v21  ;;  %v2685_v9 = vunpack.c.l.s8.bf16 %v1981_v7  ;;  %v2678_v21 = vunpack.c.h.s8.bf16 %v1974_v40  ;;  %v2030_v7 = vld [vmem:[%s9084_s4 + $0x7b8] sm:$0xff] }
 0x557   :  { %4490 = vmatprep.subr.bf16.mxu1 %v2702_v11  ;;  %v1973_v11 = vld [vmem:[%s9084_s4 + $0x5f0] sm:$0xff] }
 0x559   :  { %4448 = vmatpush1.bf16.msra.mxu0 %v2573_v2  ;;  %v2677_v2 = vunpack.c.h.s8.bf16 %v1973_v11 }
 0x55a   :  { %4491 = vmatpush1.bf16.msra.mxu1 %v2701_v38  ;;  %4449 = vmatprep.subr.bf16.mxu0 %v2566_v52  ;;  %v2805_v38 = vunpack.c.h.s8.bf16 %v2037_v59  ;;  %v2670_v52 = vunpack.c.l.s8.bf16 %v1974_v40  ;;  %v2790_v40 = vunpack.c.h.s8.bf16 %v2030_v7 }
 0x55b   :  { %4492 = vmatprep.subr.bf16.mxu1 %v2694_v57  ;;  %v1966_v57 = vld [vmem:[%s9084_s4 + $0x5b8] sm:$0xff] }
 0x55d   :  { %4450 = vmatpush1.bf16.msra.mxu0 %v2565_v12  ;;  %v2669_v12 = vunpack.c.l.s8.bf16 %v1973_v11  ;;  %v2782_v11 = vunpack.c.l.s8.bf16 %v2030_v7  ;;  %v2021_v7 = vld [vmem:[%s9084_s4 + $0x770] sm:$0xff] }
 0x55e   :  { %4493 = vmatpush1.bf16.msra.mxu1 %v2693_v33  ;;  %4451 = vmatprep.subr.bf16.mxu0 %v2558_v23  ;;  %v2797_v33 = vunpack.c.l.s8.bf16 %v2037_v59  ;;  %v2662_v23 = vunpack.c.h.s8.bf16 %v1966_v57  ;;  %v2022_v59 = vld [vmem:[%s9084_s4 + $0x778] sm:$0xff] }
 0x55f   :  { %4494 = vmatprep.subr.bf16.mxu1 %v2686_v3  ;;  %v1965_v3 = vld [vmem:[%s9084_s4 + $0x5b0] sm:$0xff] }
 0x561   :  { %4452 = vmatpush1.bf16.msra.mxu0 %v2557_v32  ;;  %v2661_v32 = vunpack.c.h.s8.bf16 %v1965_v3 }
 0x562   :  { %4495 = vmatpush1.bf16.msra.mxu1 %v2685_v9  ;;  %4453 = vmatprep.subr.bf16.mxu0 %v2678_v21  ;;  %v2789_v9 = vunpack.c.h.s8.bf16 %v2029_v49  ;;  %v2654_v21 = vunpack.c.l.s8.bf16 %v1966_v57  ;;  %v2774_v57 = vunpack.c.h.s8.bf16 %v2022_v59 }
 0x563   :  { %4496 = vmatprep.subr.bf16.mxu1 %v2806_v36  ;;  %v1958_v36 = vld [vmem:[%s9084_s4 + $0x578] sm:$0xff] }
 0x565   :  { %4454 = vmatpush2.bf16.msra.mxu0 %v2677_v2  ;;  %v2653_v2 = vunpack.c.l.s8.bf16 %v1965_v3  ;;  %v2766_v3 = vunpack.c.l.s8.bf16 %v2022_v59  ;;  %v2013_v59 = vld [vmem:[%s9084_s4 + $0x730] sm:$0xff] }
 0x566   :  { %4497 = vmatpush2.bf16.msra.mxu1 %v2805_v38  ;;  %4455 = vmatprep.subr.bf16.mxu0 %v2670_v52  ;;  %v2781_v38 = vunpack.c.l.s8.bf16 %v2029_v49  ;;  %v2646_v52 = vunpack.c.h.s8.bf16 %v1958_v36  ;;  %v2014_v49 = vld [vmem:[%s9084_s4 + $0x738] sm:$0xff] }
 0x567   :  { %4498 = vmatprep.subr.bf16.mxu1 %v2798_v28  ;;  %v1957_v28 = vld [vmem:[%s9084_s4 + $0x570] sm:$0xff] }
 0x569   :  { %4456 = vmatpush2.bf16.msra.mxu0 %v2669_v12  ;;  %v2645_v12 = vunpack.c.h.s8.bf16 %v1957_v28 }
 0x56a   :  { %4499 = vmatpush2.bf16.msra.mxu1 %v2797_v33  ;;  %4457 = vmatprep.subr.bf16.mxu0 %v2662_v23  ;;  %v2773_v33 = vunpack.c.h.s8.bf16 %v2021_v7  ;;  %v2638_v23 = vunpack.c.l.s8.bf16 %v1958_v36  ;;  %v2758_v36 = vunpack.c.h.s8.bf16 %v2014_v49 }
 0x56b   :  { %4500 = vmatprep.subr.bf16.mxu1 %v2790_v40  ;;  %v1950_v40 = vld [vmem:[%s9084_s4 + $0x538] sm:$0xff] }
 0x56d   :  { %4458 = vmatpush2.bf16.msra.mxu0 %v2661_v32  ;;  %v2637_v32 = vunpack.c.l.s8.bf16 %v1957_v28  ;;  %v2750_v28 = vunpack.c.l.s8.bf16 %v2014_v49  ;;  %v2133_v49 = vld [vmem:[%s9084_s4 + $0xaf0] sm:$0xff] }
 0x56e   :  { %4501 = vmatpush2.bf16.msra.mxu1 %v2789_v9  ;;  %4459 = vmatprep.subr.bf16.mxu0 %v2654_v21  ;;  %v2765_v9 = vunpack.c.l.s8.bf16 %v2021_v7  ;;  %v2630_v21 = vunpack.c.h.s8.bf16 %v1950_v40  ;;  %v2134_v7 = vld [vmem:[%s9084_s4 + $0xaf8] sm:$0xff] }
 0x56f   :  { %4502 = vmatprep.subr.bf16.mxu1 %v2782_v11  ;;  %v1949_v11 = vld [vmem:[%s9084_s4 + $0x530] sm:$0xff] }
 0x571   :  { %4460 = vmatpush2.bf16.msra.mxu0 %v2653_v2  ;;  %v2629_v2 = vunpack.c.h.s8.bf16 %v1949_v11 }
 0x572   :  { %4503 = vmatpush2.bf16.msra.mxu1 %v2781_v38  ;;  %4461 = vmatprep.subr.bf16.mxu0 %v2646_v52  ;;  %v2757_v38 = vunpack.c.h.s8.bf16 %v2013_v59  ;;  %v2622_v52 = vunpack.c.l.s8.bf16 %v1950_v40  ;;  %v2998_v40 = vunpack.c.h.s8.bf16 %v2134_v7 }
 0x573   :  { %4504 = vmatprep.subr.bf16.mxu1 %v2774_v57  ;;  %v2070_v57 = vld [vmem:[%s9084_s4 + $0x8f8] sm:$0xff] }
 0x575   :  { %4462 = vmatpush2.bf16.msra.mxu0 %v2645_v12  ;;  %v2621_v12 = vunpack.c.l.s8.bf16 %v1949_v11  ;;  %v8332_v11 = vpop.f32.mrf.mxu1 }
 0x576   :  { %4505 = vmatpush2.bf16.msra.mxu1 %v2773_v33  ;;  %4463 = vmatprep.subr.bf16.mxu0 %v2638_v23  ;;  %v2749_v33 = vunpack.c.l.s8.bf16 %v2013_v59  ;;  %v2870_v23 = vunpack.c.h.s8.bf16 %v2070_v57  ;;  %v2062_v59 = vld [vmem:[%s9084_s4 + $0x8b8] sm:$0xff] }
 0x577   :  { %4506 = vmatprep.subr.bf16.mxu1 %v2766_v3  ;;  %v2069_v3 = vld [vmem:[%s9084_s4 + $0x8f0] sm:$0xff] }
 0x579   :  { %4464 = vmatpush2.bf16.msra.mxu0 %v2637_v32  ;;  %v2869_v32 = vunpack.c.h.s8.bf16 %v2069_v3 }
 0x57a   :  { %4507 = vmatpush2.bf16.msra.mxu1 %v2765_v9  ;;  %4465 = vmatprep.subr.bf16.mxu0 %v2630_v21  ;;  %v8330_v9 = vpop.f32.mrf.mxu0  ;;  %v2997_v21 = vunpack.c.h.s8.bf16 %v2133_v49 }
 0x57b   :  { %4508 = vmatprep.subr.bf16.mxu1 %v2758_v36  ;;  %v2862_v36 = vunpack.c.l.s8.bf16 %v2070_v57 }
 0x57d   :  { %4466 = vmatpush2.bf16.msra.mxu0 %v2629_v2 }
 0x57e   :  { %4509 = vmatpush2.bf16.msra.mxu1 %v2757_v38  ;;  %4467 = vmatprep.subr.bf16.mxu0 %v2622_v52  ;;  %v2990_v38 = vunpack.c.l.s8.bf16 %v2134_v7  ;;  %v2126_v52 = vld [vmem:[%s9084_s4 + $0xab8] sm:$0xff] }
 0x57f   :  { %4510 = vmatprep.subr.bf16.mxu1 %v2750_v28 }
 0x581   :  { %4468 = vmatpush2.bf16.msra.mxu0 %v2621_v12 }
 0x582   :  { %4511 = vmatpush2.bf16.msra.mxu1 %v2749_v33  ;;  %4523 = vmatprep.subr.bf16.mxu0 %v2870_v23  ;;  %v2861_v33 = vunpack.c.l.s8.bf16 %v2069_v3  ;;  %v2989_v23 = vunpack.c.l.s8.bf16 %v2133_v49 }
 0x583   :  { %4566 = vmatprep.subr.bf16.mxu1 %v2998_v40  ;;  %v2854_v40 = vunpack.c.h.s8.bf16 %v2062_v59 }
 0x584   :  { %v4213_v2 = vpop.f32.mrf.mxu0  ;;  %4470 = vmatmul.mubr.bf16.vlgmr.msra.gmra.mxu0 %v6427_v0  ;;  %v2061_v0 = vld [vmem:[%s9084_s4 + $0x8b0] sm:$0xff] }
 0x585   :  { %v4214_v28 = vadd.f32 %v4213_v2, %v8235_v13  ;;  %v4256_v12 = vpop.f32.mrf.mxu1  ;;  %4513 = vmatmul.mubr.bf16.vlgmr.msra.gmra.mxu1 %v6554_v44  ;;  %4524 = vmatpush1.bf16.msra.mxu0 %v2869_v32  ;;  %v2982_v44 = vunpack.c.h.s8.bf16 %v2126_v52  ;;  %v2853_v32 = vunpack.c.h.s8.bf16 %v2061_v0 }
 0x586   :  { %4555 = vmatprep.mubr.bf16.mxu0 %v6937_v61  ;;  %4567 = vmatpush1.bf16.msra.mxu1 %v2997_v21  ;;  %v8344_v57 = vpop.f32.mrf.mxu0  ;;  %v2125_v61 = vld [vmem:[%s9084_s4 + $0xab0] sm:$0xff] }
 0x587   :  { %v8349_v7 = vadd.f32 %v4256_v12, %v4214_v28  ;;  %4598 = vmatprep.mubr.bf16.mxu1 %v6943_v63  ;;  %v8352_v13 = vpop.f32.mrf.mxu1  ;;  %4525 = vmatprep.subr.bf16.mxu0 %v2862_v36  ;;  %v2981_v2 = vunpack.c.h.s8.bf16 %v2125_v61  ;;  %v2846_v28 = vunpack.c.l.s8.bf16 %v2062_v59  ;;  %v2974_v36 = vunpack.c.l.s8.bf16 %v2126_v52  ;;  %v2054_v12 = vld [vmem:[%s9084_s4 + $0x878] sm:$0xff]  ;;  %v2053_v59 = vld [vmem:[%s9084_s4 + $0x870] sm:$0xff] }
 0x588   :  { %v4217_v3 = vpop.f32.mrf.mxu0  ;;  %4568 = vmatprep.subr.bf16.mxu1 %v2990_v38  ;;  %v2118_v38 = vld [vmem:[%s9084_s4 + $0xa78] sm:$0xff] }
 0x589   :  { %v4218_v49 = vadd.f32 %v4217_v3, %v8244_v48  ;;  %4526 = vmatpush1.bf16.msra.mxu0 %v2861_v33  ;;  %v4260_v21 = vpop.f32.mrf.mxu1  ;;  %v2845_v48 = vunpack.c.l.s8.bf16 %v2061_v0  ;;  %v2973_v33 = vunpack.c.l.s8.bf16 %v2125_v61  ;;  %v2966_v52 = vunpack.c.h.s8.bf16 %v2118_v38  ;;  %v2046_v61 = vld [vmem:[%s9084_s4 + $0x838] sm:$0xff] }
 0x58a   :  { %4569 = vmatpush1.bf16.msra.mxu1 %v2989_v23  ;;  %4527 = vmatprep.subr.bf16.mxu0 %v2854_v40  ;;  %v2838_v23 = vunpack.c.h.s8.bf16 %v2054_v12  ;;  %v2117_v40 = vld [vmem:[%s9084_s4 + $0xa70] sm:$0xff]  ;;  %v2830_v0 = vunpack.c.l.s8.bf16 %v2054_v12 }
 0x58b   :  { %v8358_v63 = vadd.f32 %v4260_v21, %v4218_v49  ;;  %4570 = vmatprep.subr.bf16.mxu1 %v2982_v44  ;;  %v2837_v44 = vunpack.c.h.s8.bf16 %v2053_v59  ;;  %v2965_v3 = vunpack.c.h.s8.bf16 %v2117_v40  ;;  %v2958_v49 = vunpack.c.l.s8.bf16 %v2118_v38  ;;  %v2109_v38 = vld [vmem:[%s9084_s4 + $0xa30] sm:$0xff] }
 0x58c   :  { %v2829_v21 = vunpack.c.l.s8.bf16 %v2053_v59 }
 0x58d   :  { %4528 = vmatpush1.bf16.msra.mxu0 %v2853_v32  ;;  %v2110_v32 = vld [vmem:[%s9084_s4 + $0xa38] sm:$0xff] }
 0x58e   :  { %4571 = vmatpush1.bf16.msra.mxu1 %v2981_v2  ;;  %4529 = vmatprep.subr.bf16.mxu0 %v2846_v28  ;;  %v2957_v2 = vunpack.c.l.s8.bf16 %v2117_v40  ;;  %v2822_v28 = vunpack.c.h.s8.bf16 %v2046_v61  ;;  %v2950_v12 = vunpack.c.h.s8.bf16 %v2110_v32  ;;  %v2942_v59 = vunpack.c.l.s8.bf16 %v2110_v32  ;;  %v2166_v40 = vld [vmem:[%s9084_s4 + $0xbf8] sm:$0xff]  ;;  %v2165_v32 = vld [vmem:[%s9084_s4 + $0xbf0] sm:$0xff] }
 0x58f   :  { %4572 = vmatprep.subr.bf16.mxu1 %v2974_v36  ;;  %v2045_v36 = vld [vmem:[%s9084_s4 + $0x830] sm:$0xff] }
 0x591   :  { %4530 = vmatpush1.bf16.msra.mxu0 %v2845_v48  ;;  %v2821_v48 = vunpack.c.h.s8.bf16 %v2045_v36 }
 0x592   :  { %4573 = vmatpush1.bf16.msra.mxu1 %v2973_v33  ;;  %4531 = vmatprep.subr.bf16.mxu0 %v2838_v23  ;;  %v2949_v33 = vunpack.c.h.s8.bf16 %v2109_v38  ;;  %v2814_v23 = vunpack.c.l.s8.bf16 %v2046_v61  ;;  %v3062_v61 = vunpack.c.h.s8.bf16 %v2166_v40 }
 0x593   :  { %4574 = vmatprep.subr.bf16.mxu1 %v2966_v52  ;;  %v2102_v52 = vld [vmem:[%s9084_s4 + $0x9f8] sm:$0xff] }
 0x595   :  { %4532 = vmatpush1.bf16.msra.mxu0 %v2837_v44  ;;  %v2813_v44 = vunpack.c.l.s8.bf16 %v2045_v36  ;;  %v3054_v36 = vunpack.c.l.s8.bf16 %v2166_v40  ;;  %v2157_v40 = vld [vmem:[%s9084_s4 + $0xbb0] sm:$0xff] }
 0x596   :  { %4575 = vmatpush1.bf16.msra.mxu1 %v2965_v3  ;;  %4533 = vmatprep.subr.bf16.mxu0 %v2830_v0  ;;  %v2941_v3 = vunpack.c.l.s8.bf16 %v2109_v38  ;;  %v2934_v0 = vunpack.c.h.s8.bf16 %v2102_v52  ;;  %v2158_v38 = vld [vmem:[%s9084_s4 + $0xbb8] sm:$0xff] }
 0x597   :  { %4576 = vmatprep.subr.bf16.mxu1 %v2958_v49  ;;  %v2101_v49 = vld [vmem:[%s9084_s4 + $0x9f0] sm:$0xff] }
 0x599   :  { %4534 = vmatpush1.bf16.msra.mxu0 %v2829_v21  ;;  %v2933_v21 = vunpack.c.h.s8.bf16 %v2101_v49 }
 0x59a   :  { %4577 = vmatpush1.bf16.msra.mxu1 %v2957_v2  ;;  %4535 = vmatprep.subr.bf16.mxu0 %v2822_v28  ;;  %v3061_v2 = vunpack.c.h.s8.bf16 %v2165_v32  ;;  %v2926_v28 = vunpack.c.l.s8.bf16 %v2102_v52  ;;  %v3046_v52 = vunpack.c.h.s8.bf16 %v2158_v38 }
 0x59b   :  { %4578 = vmatprep.subr.bf16.mxu1 %v2950_v12  ;;  %v2094_v12 = vld [vmem:[%s9084_s4 + $0x9b8] sm:$0xff] }
 0x59d   :  { %4536 = vmatpush1.bf16.msra.mxu0 %v2821_v48  ;;  %v2925_v48 = vunpack.c.l.s8.bf16 %v2101_v49  ;;  %v3038_v49 = vunpack.c.l.s8.bf16 %v2158_v38  ;;  %v2149_v38 = vld [vmem:[%s9084_s4 + $0xb70] sm:$0xff] }
 0x59e   :  { %4579 = vmatpush1.bf16.msra.mxu1 %v2949_v33  ;;  %4537 = vmatprep.subr.bf16.mxu0 %v2814_v23  ;;  %v3053_v33 = vunpack.c.l.s8.bf16 %v2165_v32  ;;  %v2918_v23 = vunpack.c.h.s8.bf16 %v2094_v12  ;;  %v2150_v32 = vld [vmem:[%s9084_s4 + $0xb78] sm:$0xff] }
 0x59f   :  { %4580 = vmatprep.subr.bf16.mxu1 %v2942_v59  ;;  %v2093_v59 = vld [vmem:[%s9084_s4 + $0x9b0] sm:$0xff] }
 0x5a1   :  { %4538 = vmatpush1.bf16.msra.mxu0 %v2813_v44  ;;  %v2917_v44 = vunpack.c.h.s8.bf16 %v2093_v59 }
 0x5a2   :  { %4581 = vmatpush1.bf16.msra.mxu1 %v2941_v3  ;;  %4539 = vmatprep.subr.bf16.mxu0 %v2934_v0  ;;  %v3045_v3 = vunpack.c.h.s8.bf16 %v2157_v40  ;;  %v2910_v0 = vunpack.c.l.s8.bf16 %v2094_v12  ;;  %v3030_v12 = vunpack.c.h.s8.bf16 %v2150_v32 }
 0x5a3   :  { %4582 = vmatprep.subr.bf16.mxu1 %v3062_v61  ;;  %v2086_v61 = vld [vmem:[%s9084_s4 + $0x978] sm:$0xff] }
 0x5a5   :  { %4540 = vmatpush2.bf16.msra.mxu0 %v2933_v21  ;;  %v2909_v21 = vunpack.c.l.s8.bf16 %v2093_v59  ;;  %v3022_v59 = vunpack.c.l.s8.bf16 %v2150_v32  ;;  %v2141_v32 = vld [vmem:[%s9084_s4 + $0xb30] sm:$0xff] }
 0x5a6   :  { %4583 = vmatpush2.bf16.msra.mxu1 %v3061_v2  ;;  %4541 = vmatprep.subr.bf16.mxu0 %v2926_v28  ;;  %v3037_v2 = vunpack.c.l.s8.bf16 %v2157_v40  ;;  %v2902_v28 = vunpack.c.h.s8.bf16 %v2086_v61  ;;  %v2142_v40 = vld [vmem:[%s9084_s4 + $0xb38] sm:$0xff] }
 0x5a7   :  { %4584 = vmatprep.subr.bf16.mxu1 %v3054_v36  ;;  %v2085_v36 = vld [vmem:[%s9084_s4 + $0x970] sm:$0xff] }
 0x5a9   :  { %4542 = vmatpush2.bf16.msra.mxu0 %v2925_v48  ;;  %v2901_v48 = vunpack.c.h.s8.bf16 %v2085_v36 }
 0x5aa   :  { %4585 = vmatpush2.bf16.msra.mxu1 %v3053_v33  ;;  %4543 = vmatprep.subr.bf16.mxu0 %v2918_v23  ;;  %v3029_v33 = vunpack.c.h.s8.bf16 %v2149_v38  ;;  %v2894_v23 = vunpack.c.l.s8.bf16 %v2086_v61  ;;  %v3014_v61 = vunpack.c.h.s8.bf16 %v2142_v40 }
 0x5ab   :  { %4586 = vmatprep.subr.bf16.mxu1 %v3046_v52  ;;  %v2078_v52 = vld [vmem:[%s9084_s4 + $0x938] sm:$0xff] }
 0x5ad   :  { %4544 = vmatpush2.bf16.msra.mxu0 %v2917_v44  ;;  %v2893_v44 = vunpack.c.l.s8.bf16 %v2085_v36  ;;  %v3006_v36 = vunpack.c.l.s8.bf16 %v2142_v40  ;;  %v2261_v40 = vld [vmem:[%s9084_s4 + $0xef0] sm:$0xff] }
 0x5ae   :  { %4587 = vmatpush2.bf16.msra.mxu1 %v3045_v3  ;;  %4545 = vmatprep.subr.bf16.mxu0 %v2910_v0  ;;  %v3021_v3 = vunpack.c.l.s8.bf16 %v2149_v38  ;;  %v2886_v0 = vunpack.c.h.s8.bf16 %v2078_v52  ;;  %v2262_v38 = vld [vmem:[%s9084_s4 + $0xef8] sm:$0xff] }
 0x5af   :  { %4588 = vmatprep.subr.bf16.mxu1 %v3038_v49  ;;  %v2077_v49 = vld [vmem:[%s9084_s4 + $0x930] sm:$0xff] }
 0x5b1   :  { %4546 = vmatpush2.bf16.msra.mxu0 %v2909_v21  ;;  %v2885_v21 = vunpack.c.h.s8.bf16 %v2077_v49 }
 0x5b2   :  { %4589 = vmatpush2.bf16.msra.mxu1 %v3037_v2  ;;  %4547 = vmatprep.subr.bf16.mxu0 %v2902_v28  ;;  %v3013_v2 = vunpack.c.h.s8.bf16 %v2141_v32  ;;  %v2878_v28 = vunpack.c.l.s8.bf16 %v2078_v52  ;;  %v3254_v52 = vunpack.c.h.s8.bf16 %v2262_v38 }
 0x5b3   :  { %4590 = vmatprep.subr.bf16.mxu1 %v3030_v12  ;;  %v2198_v12 = vld [vmem:[%s9084_s4 + $0xcf8] sm:$0xff] }
 0x5b5   :  { %4548 = vmatpush2.bf16.msra.mxu0 %v2901_v48  ;;  %v2877_v48 = vunpack.c.l.s8.bf16 %v2077_v49  ;;  %v8446_v49 = vpop.f32.mrf.mxu1 }
 0x5b6   :  { %4591 = vmatpush2.bf16.msra.mxu1 %v3029_v33  ;;  %4549 = vmatprep.subr.bf16.mxu0 %v2894_v23  ;;  %v3005_v33 = vunpack.c.l.s8.bf16 %v2141_v32  ;;  %v3126_v23 = vunpack.c.h.s8.bf16 %v2198_v12  ;;  %v2190_v32 = vld [vmem:[%s9084_s4 + $0xcb8] sm:$0xff] }
 0x5b7   :  { %4592 = vmatprep.subr.bf16.mxu1 %v3022_v59  ;;  %v2197_v59 = vld [vmem:[%s9084_s4 + $0xcf0] sm:$0xff]  ;;  %v3102_v6 = vunpack.c.l.s8.bf16 %v2190_v32 }
 0x5b9   :  { %4550 = vmatpush2.bf16.msra.mxu0 %v2893_v44  ;;  %v3125_v44 = vunpack.c.h.s8.bf16 %v2197_v59 }
 0x5ba   :  { %4593 = vmatpush2.bf16.msra.mxu1 %v3021_v3  ;;  %4551 = vmatprep.subr.bf16.mxu0 %v2886_v0  ;;  %v8444_v3 = vpop.f32.mrf.mxu0  ;;  %v3253_v0 = vunpack.c.h.s8.bf16 %v2261_v40 }
 0x5bb   :  { %4594 = vmatprep.subr.bf16.mxu1 %v3014_v61  ;;  %v3118_v61 = vunpack.c.l.s8.bf16 %v2198_v12 }
 0x5bd   :  { %4552 = vmatpush2.bf16.msra.mxu0 %v2885_v21 }
 0x5be   :  { %4595 = vmatpush2.bf16.msra.mxu1 %v3013_v2  ;;  %4553 = vmatprep.subr.bf16.mxu0 %v2878_v28  ;;  %v3246_v2 = vunpack.c.l.s8.bf16 %v2262_v38  ;;  %v2254_v28 = vld [vmem:[%s9084_s4 + $0xeb8] sm:$0xff] }
 0x5bf   :  { %4596 = vmatprep.subr.bf16.mxu1 %v3006_v36 }
 0x5c1   :  { %4554 = vmatpush2.bf16.msra.mxu0 %v2877_v48 }
 0x5c2   :  { %4597 = vmatpush2.bf16.msra.mxu1 %v3005_v33  ;;  %4609 = vmatprep.subr.bf16.mxu0 %v3126_v23  ;;  %v8459_v33 = vld [vmem:[%s9085_s5] sm:$0xff]  ;;  %v3245_v23 = vunpack.c.l.s8.bf16 %v2261_v40 }
 0x5c3   :  { %4652 = vmatprep.subr.bf16.mxu1 %v3254_v52  ;;  %v4716_v12 = vrot.slane %v8459_v33, %v6385_v8  ;;  %v2189_v52 = vld [vmem:[%s9084_s4 + $0xcb0] sm:$0xff]  ;;  %v8479_v40 = vld [vmem:[%s9086_s6] sm:$0xff] }
 0x5c4   :  { %v4299_v21 = vpop.f32.mrf.mxu0  ;;  %4556 = vmatmul.mubr.bf16.vlgmr.msra.gmra.mxu0 %v6704_v18  ;;  %v3117_v18 = vunpack.c.l.s8.bf16 %v2197_v59 }
 0x5c5   :  { %v4300_v36 = vadd.f32 %v4299_v21, %v8349_v7  ;;  %v4342_v48 = vpop.f32.mrf.mxu1  ;;  %4599 = vmatmul.mubr.bf16.vlgmr.msra.gmra.mxu1 %v6844_v50  ;;  %4610 = vmatpush1.bf16.msra.mxu0 %v3125_v44  ;;  %v3110_v7 = vunpack.c.h.s8.bf16 %v2190_v32  ;;  %v3238_v50 = vunpack.c.h.s8.bf16 %v2254_v28  ;;  %v2181_v32 = vld [vmem:[%s9084_s4 + $0xc70] sm:$0xff] }
 0x5c6   :  { %4641 = vmatprep.mubr.bf16.mxu0 %v7065_v60  ;;  %4653 = vmatpush1.bf16.msra.mxu1 %v3253_v0  ;;  %v8465_v38 = vpop.f32.mrf.mxu0  ;;  %v2253_v60 = vld [vmem:[%s9084_s4 + $0xeb0] sm:$0xff]  ;;  %v4774_v0 = vrot.slane %v8479_v40, %v6385_v8  ;;  %v2246_v8 = vld [vmem:[%s9084_s4 + $0xe78] sm:$0xff] }
 0x5c7   :  { %9123 = vst [vmem:[#allocation18_spill] sm:$0xff] %v8465_v38  ;;  %v4343_v21 = vadd.f32 %v4342_v48, %v4300_v36  ;;  %4684 = vmatprep.mubr.bf16.mxu1 %v7103_v62  ;;  %v8471_v46 = vpop.f32.mrf.mxu1  ;;  %4611 = vmatprep.subr.bf16.mxu0 %v3118_v61  ;;  %v3109_v61 = vunpack.c.h.s8.bf16 %v2189_v52  ;;  %v3237_v48 = vunpack.c.h.s8.bf16 %v2253_v60 }
 0x5c8   :  { %9124 = vst [vmem:[#allocation19_spill] sm:$0xff] %v8471_v46  ;;  %v4303_v59 = vpop.f32.mrf.mxu0  ;;  %4654 = vmatprep.subr.bf16.mxu1 %v3246_v2  ;;  %v3230_v2 = vunpack.c.l.s8.bf16 %v2254_v28 }
 0x5c9   :  { %v4741_v44 = vmul.f32 %v4716_v12, %v4343_v21  ;;  %v4304_v62 = vadd.f32 %v4303_v59, %v8358_v63  ;;  %4612 = vmatpush1.bf16.msra.mxu0 %v3117_v18  ;;  %v4346_v36 = vpop.f32.mrf.mxu1  ;;  %v2182_v21 = vld [vmem:[%s9084_s4 + $0xc78] sm:$0xff]  ;;  %v3101_v18 = vunpack.c.l.s8.bf16 %v2189_v52  ;;  %v2245_v59 = vld [vmem:[%s9084_s4 + $0xe70] sm:$0xff] }
 0x5ca   :  { %4655 = vmatpush1.bf16.msra.mxu1 %v3245_v23  ;;  %4613 = vmatprep.subr.bf16.mxu0 %v3110_v7  ;;  %v3229_v23 = vunpack.c.l.s8.bf16 %v2253_v60  ;;  %v3094_v7 = vunpack.c.h.s8.bf16 %v2182_v21  ;;  %v3214_v60 = vunpack.c.l.s8.bf16 %v2246_v8 }
 0x5cb   :  { %v4347_v46 = vadd.f32 %v4346_v36, %v4304_v62  ;;  %4656 = vmatprep.subr.bf16.mxu1 %v3238_v50  ;;  %v4799_v38 = vadd.f32 %v4774_v0, %v4741_v44  ;;  %v3222_v50 = vunpack.c.h.s8.bf16 %v2246_v8  ;;  %v3213_v36 = vunpack.c.l.s8.bf16 %v2245_v59  ;;  %v2237_v8 = vld [vmem:[%s9084_s4 + $0xe30] sm:$0xff] }
 0x5cd   :  { %v4749_v63 = vmul.f32 %v4716_v12, %v4347_v46  ;;  %4614 = vmatpush1.bf16.msra.mxu0 %v3109_v61  ;;  %v4815_v62 = vmax.f32 %v4799_v38, 0.0  ;;  %v3093_v46 = vunpack.c.h.s8.bf16 %v2181_v32  ;;  %v3086_v12 = vunpack.c.l.s8.bf16 %v2182_v21  ;;  %v2238_v61 = vld [vmem:[%s9084_s4 + $0xe38] sm:$0xff] }
 0x5ce   :  { %4657 = vmatpush1.bf16.msra.mxu1 %v3237_v48  ;;  %4615 = vmatprep.subr.bf16.mxu0 %v3102_v6  ;;  %v3221_v6 = vunpack.c.h.s8.bf16 %v2245_v59  ;;  %v3085_v38 = vunpack.c.l.s8.bf16 %v2181_v32  ;;  %v3206_v21 = vunpack.c.h.s8.bf16 %v2238_v61  ;;  %v2230_v32 = vld [vmem:[%s9084_s4 + $0xdf8] sm:$0xff]  ;;  %v3197_v59 = vunpack.c.l.s8.bf16 %v2237_v8 }
 0x5cf   :  { %v4807_v28 = vadd.f32 %v4774_v0, %v4749_v63  ;;  %4658 = vmatprep.subr.bf16.mxu1 %v3230_v2  ;;  %v2174_v0 = vld [vmem:[%s9084_s4 + $0xc38] sm:$0xff]  ;;  %v2173_v2 = vld [vmem:[%s9084_s4 + $0xc30] sm:$0xff] }
 0x5d0   :  { %v3078_v48 = vunpack.c.h.s8.bf16 %v2174_v0  ;;  %v3077_v63 = vunpack.c.h.s8.bf16 %v2173_v2 }
 0x5d1   :  { %v4823_v44 = vmax.f32 %v4807_v28, 0.0  ;;  %4616 = vmatpush1.bf16.msra.mxu0 %v3101_v18  ;;  %v3205_v18 = vunpack.c.h.s8.bf16 %v2237_v8  ;;  %v2294_v28 = vld [vmem:[%s9084_s4 + $0xff8] sm:$0xff] }
 0x5d2   :  { %4659 = vmatpush1.bf16.msra.mxu1 %v3229_v23  ;;  %4617 = vmatprep.subr.bf16.mxu0 %v3094_v7  ;;  %v3070_v23 = vunpack.c.l.s8.bf16 %v2174_v0  ;;  %v3198_v7 = vunpack.c.l.s8.bf16 %v2238_v61  ;;  %v3182_v61 = vunpack.c.l.s8.bf16 %v2230_v32 }
 0x5d3   :  { %v8496_v52 = vpack.c.bf16 %v4823_v44, %v4815_v62  ;;  %4660 = vmatprep.subr.bf16.mxu1 %v3222_v50  ;;  %v3069_v50 = vunpack.c.l.s8.bf16 %v2173_v2  ;;  %v3190_v62 = vunpack.c.h.s8.bf16 %v2230_v32  ;;  %v2229_v44 = vld [vmem:[%s9084_s4 + $0xdf0] sm:$0xff]  ;;  %v3399_v2 = vadd.f32 %v7205_v58, %v7199_v26 }
 0x5d4   :  { %v2221_v26 = vld [vmem:[%s9084_s4 + $0xdb0] sm:$0xff] }
 0x5d5   :  { %4618 = vmatpush1.bf16.msra.mxu0 %v3093_v46  ;;  %v3318_v46 = vunpack.c.h.s8.bf16 %v2294_v28  ;;  %v3442_v8 = vadd.f32 %v7310_v22, %v3399_v2 }
 0x5d6   :  { %4661 = vmatpush1.bf16.msra.mxu1 %v3221_v6  ;;  %4619 = vmatprep.subr.bf16.mxu0 %v3086_v12  ;;  %v2293_v6 = vld [vmem:[%s9084_s4 + $0xff0] sm:$0xff]  ;;  %v3189_v12 = vunpack.c.h.s8.bf16 %v2229_v44 }
 0x5d7   :  { %4662 = vmatprep.subr.bf16.mxu1 %v3214_v60  ;;  %v3403_v60 = vadd.f32 %v7298_v56, %v7296_v41  ;;  %v3317_v0 = vunpack.c.h.s8.bf16 %v2293_v6  ;;  %v2286_v41 = vld [vmem:[%s9084_s4 + $0xfb8] sm:$0xff]  ;;  %v3743_v56 = vadd.f32 %v7665_v4, %v7659_v53  ;;  %v2285_v53 = vld [vmem:[%s9084_s4 + $0xfb0] sm:$0xff] }
 0x5d8   :  { %v3301_v32 = vunpack.c.h.s8.bf16 %v2285_v53 }
 0x5d9   :  { %4620 = vmatpush1.bf16.msra.mxu0 %v3085_v38  ;;  %v3747_v38 = vadd.f32 %v7758_v42, %v7756_v30  ;;  %v3181_v42 = vunpack.c.l.s8.bf16 %v2229_v44  ;;  %v3786_v58 = vadd.f32 %v7770_v51, %v3743_v56 }
 0x5da   :  { %4663 = vmatpush1.bf16.msra.mxu1 %v3213_v36  ;;  %4621 = vmatprep.subr.bf16.mxu0 %v3078_v48  ;;  %v3310_v36 = vunpack.c.l.s8.bf16 %v2294_v28  ;;  %v2222_v48 = vld [vmem:[%s9084_s4 + $0xdb8] sm:$0xff] }
 0x5db   :  { %4664 = vmatprep.subr.bf16.mxu1 %v3206_v21  ;;  %v3446_v21 = vadd.f32 %v7410_v10, %v3403_v60  ;;  %v3790_v30 = vadd.f32 %v7870_v37, %v3747_v38  ;;  %v3302_v10 = vunpack.c.h.s8.bf16 %v2286_v41  ;;  %v3173_v37 = vunpack.c.h.s8.bf16 %v2221_v26  ;;  %v9125_v60 = vld [vmem:[#allocation12_spill] sm:$0xff] }
 0x5dc   :  { %v3166_v51 = vunpack.c.l.s8.bf16 %v2222_v48  ;;  %v3829_v28 = vadd.f32 %v7778_v29, %v3786_v58 }
 0x5dd   :  { %4622 = vmatpush1.bf16.msra.mxu0 %v3077_v63  ;;  %v3309_v63 = vunpack.c.l.s8.bf16 %v2293_v6  ;;  %v3489_v4 = vadd.f32 %v7412_v20, %v3446_v21  ;;  %v3833_v22 = vadd.f32 %v7872_v35, %v3790_v30  ;;  %v2214_v20 = vld [vmem:[%s9084_s4 + $0xd78] sm:$0xff] }
 0x5de   :  { %4665 = vmatpush1.bf16.msra.mxu1 %v3205_v18  ;;  %4623 = vmatprep.subr.bf16.mxu0 %v3070_v23  ;;  %v3174_v18 = vunpack.c.h.s8.bf16 %v2222_v48  ;;  %v3485_v23 = vadd.f32 %v7318_v15, %v3442_v8  ;;  %v2278_v15 = vld [vmem:[%s9084_s4 + $0xf78] sm:$0xff]  ;;  %v3158_v44 = vunpack.c.h.s8.bf16 %v2214_v20  ;;  %v3150_v21 = vunpack.c.l.s8.bf16 %v2214_v20 }
 0x5df   :  { %4666 = vmatprep.subr.bf16.mxu1 %v3198_v7  ;;  %v3532_v7 = vadd.f32 %v7524_v54, %v3489_v4  ;;  %v3872_v54 = vadd.f32 %v7884_v25, %v3829_v28  ;;  %v3286_v6 = vunpack.c.h.s8.bf16 %v2278_v15  ;;  %v2277_v25 = vld [vmem:[%s9084_s4 + $0xf70] sm:$0xff]  ;;  %v9127_v48 = vld [vmem:[#allocation9_spill] sm:$0xff]  ;;  %v3278_v30 = vunpack.c.l.s8.bf16 %v2278_v15 }
 0x5e0   :  { %v3528_v35 = vadd.f32 %v7424_v47, %v3485_v23  ;;  %v3277_v4 = vunpack.c.l.s8.bf16 %v2277_v25  ;;  %v9132_v23 = vld [vmem:[#allocation16_spill] sm:$0xff] }
 0x5e1   :  { %4624 = vmatpush1.bf16.msra.mxu0 %v3069_v50  ;;  %v3876_v50 = vadd.f32 %v7984_v39, %v3833_v22  ;;  %v3575_v29 = vadd.f32 %v7529_v24, %v3532_v7  ;;  %v3293_v39 = vunpack.c.l.s8.bf16 %v2285_v53  ;;  %v2269_v28 = vld [vmem:[%s9084_s4 + $0xf30] sm:$0xff] }
 0x5e2   :  { %4667 = vmatpush1.bf16.msra.mxu1 %v3197_v59  ;;  %4625 = vmatprep.subr.bf16.mxu0 %v3190_v62  ;;  %v3294_v59 = vunpack.c.l.s8.bf16 %v2286_v41  ;;  %v3165_v62 = vunpack.c.l.s8.bf16 %v2221_v26  ;;  %v9128_v41 = vld [vmem:[#allocation15_spill] sm:$0xff]  ;;  %v9130_v26 = vld [vmem:[#allocation10_spill] sm:$0xff] }
 0x5e3   :  { %4668 = vmatprep.subr.bf16.mxu1 %v3318_v46  ;;  %v2213_v46 = vld [vmem:[%s9084_s4 + $0xd70] sm:$0xff]  ;;  %v3919_v47 = vadd.f32 %v7986_v1, %v3876_v50  ;;  %v3618_v24 = vadd.f32 %v9125_v60, %v3575_v29  ;;  %v3285_v1 = vunpack.c.h.s8.bf16 %v2277_v25 }
 0x5e5   :  { %4626 = vmatpush2.bf16.msra.mxu0 %v3189_v12  ;;  %v3571_v12 = vadd.f32 %v7432_v16, %v3528_v35  ;;  %v3962_v38 = vadd.f32 %v8104_v43, %v3919_v47  ;;  %v2206_v16 = vld [vmem:[%s9084_s4 + $0xd38] sm:$0xff] }
 0x5e6   :  { %4669 = vmatpush2.bf16.msra.mxu1 %v3317_v0  ;;  %4627 = vmatprep.subr.bf16.mxu0 %v3182_v61  ;;  %v9126_v0 = vld [vmem:[#allocation14_spill] sm:$0xff]  ;;  %v2270_v43 = vld [vmem:[%s9084_s4 + $0xf38] sm:$0xff]  ;;  %v3142_v22 = vunpack.c.h.s8.bf16 %v2206_v16 }
 0x5e7   :  { %4670 = vmatprep.subr.bf16.mxu1 %v3310_v36  ;;  %v3915_v61 = vadd.f32 %v9126_v0, %v3872_v54  ;;  %v3157_v36 = vunpack.c.h.s8.bf16 %v2213_v46  ;;  %v3614_v2 = vadd.f32 %v9127_v48, %v3571_v12  ;;  %v3269_v54 = vunpack.c.h.s8.bf16 %v2269_v28  ;;  %v4879_v48 = vld [vmem:[%s9087_s7 + $0x160] sm:$0xff] }
 0x5e9   :  { %4628 = vmatpush2.bf16.msra.mxu0 %v3181_v42  ;;  %v3958_v56 = vadd.f32 %v9128_v41, %v3915_v61  ;;  %v9129_v42 = vld [vmem:[#allocation13_spill] sm:$0xff]  ;;  %v3657_v58 = vadd.f32 %v9130_v26, %v3614_v2  ;;  %v4847_v61 = vld [vmem:[%s9087_s7 + $0x60] sm:$0xff] }
 0x5ea   :  { %4671 = vmatpush2.bf16.msra.mxu1 %v3309_v63  ;;  %4629 = vmatprep.subr.bf16.mxu0 %v3174_v18  ;;  %v3661_v8 = vadd.f32 %v9129_v42, %v3618_v24  ;;  %v4005_v63 = vadd.f32 %v8106_v31, %v3962_v38  ;;  %v3149_v18 = vunpack.c.l.s8.bf16 %v2213_v46  ;;  %v4848_v46 = vld [vmem:[%s9087_s7 + $0x68] sm:$0xff]  ;;  %v3261_v24 = vunpack.c.l.s8.bf16 %v2269_v28 }
 0x5eb   :  { %4672 = vmatprep.subr.bf16.mxu1 %v3302_v10  ;;  %v9131_v10 = vld [vmem:[#allocation5_spill] sm:$0xff]  ;;  %v4001_v7 = vadd.f32 %v9132_v23, %v3958_v56  ;;  %v4992_v0 = vunpack.c.h.s8.bf16 %v4848_v46  ;;  %v5055_v56 = vunpack.c.h.s8.bf16 %v4879_v48  ;;  %v4844_v42 = vld [vmem:[%s9087_s7 + $0x48] sm:$0xff]  ;;  %v4987_v26 = vunpack.c.l.s8.bf16 %v4847_v61 }
 0x5ec   :  { %v4704_v53 = vrot.slane %v8459_v33, %v9131_v10  ;;  %v4762_v15 = vrot.slane %v8479_v40, %v9131_v10  ;;  %v4980_v23 = vunpack.c.l.s8.bf16 %v4844_v42 }
 0x5ed   :  { %4630 = vmatpush2.bf16.msra.mxu0 %v3173_v37  ;;  %v2205_v37 = vld [vmem:[%s9084_s4 + $0xd30] sm:$0xff] }
 0x5ee   :  { %4673 = vmatpush2.bf16.msra.mxu1 %v3301_v32  ;;  %4631 = vmatprep.subr.bf16.mxu0 %v3166_v51  ;;  %v9133_v32 = vld [vmem:[#allocation6_spill] sm:$0xff]  ;;  %v3270_v51 = vunpack.c.h.s8.bf16 %v2270_v43  ;;  %v4746_v50 = vmul.f32 %v4704_v53, %v3661_v8  ;;  %v3141_v20 = vunpack.c.h.s8.bf16 %v2205_v37  ;;  %v4738_v35 = vmul.f32 %v4704_v53, %v3657_v58 }
 0x5ef   :  { %4674 = vmatprep.subr.bf16.mxu1 %v3294_v59  ;;  %v4712_v31 = vrot.slane %v8459_v33, %v9133_v32  ;;  %v3133_v12 = vunpack.c.l.s8.bf16 %v2205_v37  ;;  %v5051_v58 = vunpack.c.l.s8.bf16 %v4879_v48  ;;  %v4984_v53 = vunpack.c.h.s8.bf16 %v4844_v42  ;;  %v4864_v48 = vld [vmem:[%s9087_s7 + $0xe8] sm:$0xff] }
 0x5f0   :  { %v4804_v47 = vadd.f32 %v4762_v15, %v4746_v50  ;;  %v4796_v60 = vadd.f32 %v4762_v15, %v4738_v35  ;;  %v4871_v15 = vld [vmem:[%s9087_s7 + $0x120] sm:$0xff] }
 0x5f1   :  { %4632 = vmatpush2.bf16.msra.mxu0 %v3165_v62  ;;  %v4748_v59 = vmul.f32 %v4712_v31, %v4005_v63  ;;  %v3134_v62 = vunpack.c.l.s8.bf16 %v2206_v16  ;;  %v4740_v29 = vmul.f32 %v4712_v31, %v4001_v7  ;;  %v4988_v16 = vunpack.c.l.s8.bf16 %v4848_v46  ;;  %v4876_v63 = vld [vmem:[%s9087_s7 + $0x148] sm:$0xff] }
 0x5f2   :  { %4675 = vmatpush2.bf16.msra.mxu1 %v3293_v39  ;;  %4633 = vmatprep.subr.bf16.mxu0 %v3158_v44  ;;  %v4770_v39 = vrot.slane %v8479_v40, %v9133_v32  ;;  %v3262_v44 = vunpack.c.l.s8.bf16 %v2270_v43  ;;  %v4820_v2 = vmax.f32 %v4804_v47, 0.0  ;;  %v4812_v41 = vmax.f32 %v4796_v60, 0.0  ;;  %v4840_v31 = vld [vmem:[%s9087_s7 + $0x28] sm:$0xff] }
 0x5f3   :  { %4676 = vmatprep.subr.bf16.mxu1 %v3286_v6  ;;  %v4880_v6 = vld [vmem:[%s9087_s7 + $0x168] sm:$0xff]  ;;  %v5044_v7 = vunpack.c.l.s8.bf16 %v4876_v63 }
 0x5f4   :  { %v4806_v25 = vadd.f32 %v4770_v39, %v4748_v59  ;;  %v4798_v38 = vadd.f32 %v4770_v39, %v4740_v29  ;;  %v8614_v8 = vpack.c.bf16 %v4820_v2, %v4812_v41  ;;  %v5052_v43 = vunpack.c.l.s8.bf16 %v4880_v6  ;;  %v4868_v46 = vld [vmem:[%s9087_s7 + $0x108] sm:$0xff] }
 0x5f5   :  { %4634 = vmatpush2.bf16.msra.mxu0 %v3157_v36  ;;  %v5056_v36 = vunpack.c.h.s8.bf16 %v4880_v6  ;;  %v4976_v59 = vunpack.c.h.s8.bf16 %v4840_v31  ;;  %v4972_v29 = vunpack.c.l.s8.bf16 %v4840_v31  ;;  %v5035_v6 = vunpack.c.l.s8.bf16 %v4871_v15  ;;  %v4896_v2 = vld [vmem:[%s9087_s7 + $0x1e8] sm:$0xff] }
 0x5f6   :  { %4677 = vmatpush2.bf16.msra.mxu1 %v3285_v1  ;;  %4635 = vmatprep.subr.bf16.mxu0 %v3150_v21  ;;  %v4822_v1 = vmax.f32 %v4806_v25, 0.0  ;;  %v4991_v21 = vunpack.c.h.s8.bf16 %v4847_v61  ;;  %v5032_v60 = vunpack.c.h.s8.bf16 %v4868_v46  ;;  %v5024_v41 = vunpack.c.h.s8.bf16 %v4864_v48 }
 0x5f7   :  { %4678 = vmatprep.subr.bf16.mxu1 %v3278_v30  ;;  %v4814_v30 = vmax.f32 %v4798_v38, 0.0 }
 0x5f9   :  { %4636 = vmatpush2.bf16.msra.mxu0 %v3149_v18  ;;  %v8620_v18 = vpack.c.bf16 %v4822_v1, %v4814_v30  ;;  %v5088_v30 = vunpack.c.h.s8.bf16 %v4896_v2 }
 0x5fa   :  { %4679 = vmatpush2.bf16.msra.mxu1 %v3277_v4  ;;  %4637 = vmatprep.subr.bf16.mxu0 %v3142_v22  ;;  %v5048_v4 = vunpack.c.h.s8.bf16 %v4876_v63 }
 0x5fb   :  { %4680 = vmatprep.subr.bf16.mxu1 %v3270_v51  ;;  %v4872_v51 = vld [vmem:[%s9087_s7 + $0x128] sm:$0xff] }
 0x5fc   :  { %v5040_v35 = vunpack.c.h.s8.bf16 %v4872_v51  ;;  %v5036_v39 = vunpack.c.l.s8.bf16 %v4872_v51 }
 0x5fd   :  { %4638 = vmatpush2.bf16.msra.mxu0 %v3141_v20  ;;  %v4839_v20 = vld [vmem:[%s9087_s7 + $0x20] sm:$0xff] }
 0x5fe   :  { %4681 = vmatpush2.bf16.msra.mxu1 %v3269_v54  ;;  %4639 = vmatprep.subr.bf16.mxu0 %v3134_v62  ;;  %v4975_v54 = vunpack.c.h.s8.bf16 %v4839_v20  ;;  %v5039_v62 = vunpack.c.h.s8.bf16 %v4871_v15  ;;  %v4971_v47 = vunpack.c.l.s8.bf16 %v4839_v20 }
 0x5ff   :  { %4682 = vmatprep.subr.bf16.mxu1 %v3262_v44  ;;  %v4836_v44 = vld [vmem:[%s9087_s7 + $0x8] sm:$0xff] }
 0x600   :  { %v4968_v25 = vunpack.c.h.s8.bf16 %v4836_v44  ;;  %v4964_v38 = vunpack.c.l.s8.bf16 %v4836_v44 }
 0x601   :  { %4640 = vmatpush2.bf16.msra.mxu0 %v3133_v12  ;;  %v4835_v12 = vld [vmem:[%s9087_s7] sm:$0xff] }
 0x602   :  { %4683 = vmatpush2.bf16.msra.mxu1 %v3261_v24  ;;  %5219 = vmatprep.subr.bf16.mxu0 %v4992_v0  ;;  %v4867_v24 = vld [vmem:[%s9087_s7 + $0x100] sm:$0xff]  ;;  %v4967_v0 = vunpack.c.h.s8.bf16 %v4835_v12  ;;  %v4963_v1 = vunpack.c.l.s8.bf16 %v4835_v12  ;;  %v4348_v12 = vpop.f32.mrf.mxu1 }
 0x603   :  { %5262 = vmatprep.subr.bf16.mxu1 %v5056_v36  ;;  %v5031_v61 = vunpack.c.h.s8.bf16 %v4867_v24  ;;  %v5028_v36 = vunpack.c.l.s8.bf16 %v4868_v46 }
 0x604   :  { %4642 = vmatmul.mubr.bf16.vlgmr.msra.gmra.mxu0 %v6972_v45  ;;  %v4843_v45 = vld [vmem:[%s9087_s7 + $0x40] sm:$0xff] }
 0x605   :  { %4685 = vmatmul.mubr.bf16.vlgmr.msra.gmra.mxu1 %v7186_v14  ;;  %5220 = vmatpush1.bf16.msra.mxu0 %v4991_v21  ;;  %v4875_v14 = vld [vmem:[%s9087_s7 + $0x140] sm:$0xff]  ;;  %v4983_v22 = vunpack.c.h.s8.bf16 %v4843_v45  ;;  %v4979_v28 = vunpack.c.l.s8.bf16 %v4843_v45  ;;  %v5027_v21 = vunpack.c.l.s8.bf16 %v4867_v24  ;;  %v4087_v45 = vadd.f32 %v8125_v34, %v8119_v5  ;;  %v4852_v24 = vld [vmem:[%s9087_s7 + $0x88] sm:$0xff] }
 0x606   :  { %5251 = vmatprep.mubr.bf16.mxu0 %v8614_v8  ;;  %5263 = vmatpush1.bf16.msra.mxu1 %v5055_v56  ;;  %v5047_v37 = vunpack.c.h.s8.bf16 %v4875_v14  ;;  %v5043_v50 = vunpack.c.l.s8.bf16 %v4875_v14  ;;  %v4863_v56 = vld [vmem:[%s9087_s7 + $0xe0] sm:$0xff]  ;;  %v4892_v14 = vld [vmem:[%s9087_s7 + $0x1c8] sm:$0xff] }
 0x607   :  { %5294 = vmatprep.mubr.bf16.mxu1 %v8620_v18  ;;  %5221 = vmatprep.subr.bf16.mxu0 %v4988_v16  ;;  %v4895_v16 = vld [vmem:[%s9087_s7 + $0x1e0] sm:$0xff]  ;;  %v5023_v42 = vunpack.c.h.s8.bf16 %v4863_v56  ;;  %v5080_v5 = vunpack.c.h.s8.bf16 %v4892_v14 }
 0x608   :  { %5264 = vmatprep.subr.bf16.mxu1 %v5052_v43  ;;  %v4091_v43 = vadd.f32 %v8218_v19, %v8216_v27  ;;  %v5087_v63 = vunpack.c.h.s8.bf16 %v4895_v16  ;;  %v5019_v27 = vunpack.c.l.s8.bf16 %v4863_v56  ;;  %v4130_v19 = vadd.f32 %v8230_v55, %v4087_v45  ;;  %v4891_v34 = vld [vmem:[%s9087_s7 + $0x1c0] sm:$0xff] }
 0x609   :  { %5222 = vmatpush1.bf16.msra.mxu0 %v4987_v26  ;;  %v5020_v26 = vunpack.c.l.s8.bf16 %v4864_v48  ;;  %v5079_v51 = vunpack.c.h.s8.bf16 %v4891_v34  ;;  %v5075_v15 = vunpack.c.l.s8.bf16 %v4891_v34  ;;  %v9136_v48 = vld [vmem:[#allocation7_spill] sm:$0xff] }
 0x60a   :  { %5265 = vmatpush1.bf16.msra.mxu1 %v5051_v58  ;;  %5223 = vmatprep.subr.bf16.mxu0 %v4984_v53  ;;  %v5084_v58 = vunpack.c.l.s8.bf16 %v4896_v2  ;;  %v4860_v53 = vld [vmem:[%s9087_s7 + $0xc8] sm:$0xff]  ;;  %v4173_v55 = vadd.f32 %v8238_v17, %v4130_v19  ;;  %v4720_v2 = vrot.slane %v8459_v33, %v9136_v48  ;;  %v4778_v33 = vrot.slane %v8479_v40, %v9136_v48 }
 0x60b   :  { %5266 = vmatprep.subr.bf16.mxu1 %v5048_v4  ;;  %v4134_v4 = vadd.f32 %v8330_v9, %v4091_v43  ;;  %v4932_v48 = vld [vmem:[%s9087_s7 + $0x308] sm:$0xff] }
 0x60c   :  { %v4216_v20 = vadd.f32 %v8344_v57, %v4173_v55  ;;  %v4887_v57 = vld [vmem:[%s9087_s7 + $0x1a0] sm:$0xff]  ;;  %v4908_v55 = vld [vmem:[%s9087_s7 + $0x248] sm:$0xff] }
 0x60d   :  { %5224 = vmatpush1.bf16.msra.mxu0 %v4983_v22  ;;  %v5083_v22 = vunpack.c.l.s8.bf16 %v4895_v16  ;;  %v4177_v9 = vadd.f32 %v8332_v11, %v4134_v4  ;;  %v4888_v11 = vld [vmem:[%s9087_s7 + $0x1a8] sm:$0xff] }
 0x60e   :  { %5267 = vmatpush1.bf16.msra.mxu1 %v5047_v37  ;;  %5225 = vmatprep.subr.bf16.mxu0 %v4980_v23  ;;  %v5016_v37 = vunpack.c.h.s8.bf16 %v4860_v53  ;;  %v4859_v23 = vld [vmem:[%s9087_s7 + $0xc0] sm:$0xff]  ;;  %v4944_v4 = vld [vmem:[%s9087_s7 + $0x368] sm:$0xff] }
 0x60f   :  { %5268 = vmatprep.subr.bf16.mxu1 %v5044_v7  ;;  %v5015_v7 = vunpack.c.h.s8.bf16 %v4859_v23  ;;  %v4220_v31 = vadd.f32 %v8444_v3, %v4177_v9  ;;  %v5011_v17 = vunpack.c.l.s8.bf16 %v4859_v23 }
 0x611   :  { %5226 = vmatpush1.bf16.msra.mxu0 %v4979_v28  ;;  %v5012_v28 = vunpack.c.l.s8.bf16 %v4860_v53  ;;  %v4263_v3 = vadd.f32 %v8446_v49, %v4220_v31  ;;  %v9134_v49 = vld [vmem:[#allocation18_spill] sm:$0xff]  ;;  %v4912_v53 = vld [vmem:[%s9087_s7 + $0x268] sm:$0xff] }
 0x612   :  { %5269 = vmatpush1.bf16.msra.mxu1 %v5043_v50  ;;  %5227 = vmatprep.subr.bf16.mxu0 %v4976_v59  ;;  %v5076_v50 = vunpack.c.l.s8.bf16 %v4892_v14  ;;  %v4856_v59 = vld [vmem:[%s9087_s7 + $0xa8] sm:$0xff]  ;;  %v5120_v19 = vunpack.c.h.s8.bf16 %v4912_v53 }
 0x613   :  { %5270 = vmatprep.subr.bf16.mxu1 %v5040_v35  ;;  %v4305_v35 = vpop.f32.mrf.mxu0 }
 0x614   :  { %v4306_v44 = vadd.f32 %v4305_v35, %v4263_v3  ;;  %v5112_v35 = vunpack.c.h.s8.bf16 %v4908_v55 }
 0x615   :  { %5228 = vmatpush1.bf16.msra.mxu0 %v4975_v54  ;;  %v5008_v54 = vunpack.c.h.s8.bf16 %v4856_v59 }
 0x616   :  { %5271 = vmatpush1.bf16.msra.mxu1 %v5039_v62  ;;  %5229 = vmatprep.subr.bf16.mxu0 %v4972_v29  ;;  %v4855_v62 = vld [vmem:[%s9087_s7 + $0xa0] sm:$0xff]  ;;  %v5072_v29 = vunpack.c.h.s8.bf16 %v4888_v11 }
 0x617   :  { %5272 = vmatprep.subr.bf16.mxu1 %v5036_v39  ;;  %v4259_v39 = vadd.f32 %v8352_v13, %v4216_v20  ;;  %v5007_v46 = vunpack.c.h.s8.bf16 %v4855_v62  ;;  %v4884_v13 = vld [vmem:[%s9087_s7 + $0x188] sm:$0xff] }
 0x618   :  { %v5064_v56 = vunpack.c.h.s8.bf16 %v4884_v13 }
 0x619   :  { %5230 = vmatpush1.bf16.msra.mxu0 %v4971_v47  ;;  %v4302_v47 = vadd.f32 %v9134_v49, %v4259_v39  ;;  %v4936_v49 = vld [vmem:[%s9087_s7 + $0x328] sm:$0xff] }
 0x61a   :  { %5273 = vmatpush1.bf16.msra.mxu1 %v5035_v6  ;;  %5231 = vmatprep.subr.bf16.mxu0 %v4968_v25  ;;  %v5071_v6 = vunpack.c.h.s8.bf16 %v4887_v57  ;;  %v5004_v25 = vunpack.c.l.s8.bf16 %v4856_v59  ;;  %v9138_v59 = vld [vmem:[#allocation17_spill] sm:$0xff] }
 0x61b   :  { %5274 = vmatprep.subr.bf16.mxu1 %v5032_v60  ;;  %v5068_v60 = vunpack.c.l.s8.bf16 %v4888_v11  ;;  %v4940_v11 = vld [vmem:[%s9087_s7 + $0x348] sm:$0xff] }
 0x61d   :  { %5232 = vmatpush1.bf16.msra.mxu0 %v4967_v0  ;;  %v4349_v0 = vadd.f32 %v4348_v12, %v4306_v44  ;;  %v5172_v44 = vunpack.c.l.s8.bf16 %v4940_v11  ;;  %v5168_v12 = vunpack.c.h.s8.bf16 %v4936_v49 }
 0x61e   :  { %5275 = vmatpush1.bf16.msra.mxu1 %v5031_v61  ;;  %5233 = vmatprep.subr.bf16.mxu0 %v4964_v38  ;;  %v5003_v61 = vunpack.c.l.s8.bf16 %v4855_v62  ;;  %v9135_v38 = vld [vmem:[#allocation19_spill] sm:$0xff] }
 0x61f   :  { %5276 = vmatprep.subr.bf16.mxu1 %v5028_v36  ;;  %v4345_v36 = vadd.f32 %v9135_v38, %v4302_v47  ;;  %v4750_v16 = vmul.f32 %v4720_v2, %v4349_v0  ;;  %v5164_v38 = vunpack.c.l.s8.bf16 %v4936_v49  ;;  %v4916_v49 = vld [vmem:[%s9087_s7 + $0x288] sm:$0xff] }
 0x621   :  { %5234 = vmatpush1.bf16.msra.mxu0 %v4963_v1  ;;  %v5067_v1 = vunpack.c.l.s8.bf16 %v4887_v57  ;;  %v4742_v43 = vmul.f32 %v4720_v2, %v4345_v36  ;;  %v4808_v45 = vadd.f32 %v4778_v33, %v4750_v16  ;;  %v4904_v57 = vld [vmem:[%s9087_s7 + $0x228] sm:$0xff] }
 0x622   :  { %5277 = vmatpush1.bf16.msra.mxu1 %v5027_v21  ;;  %5235 = vmatprep.subr.bf16.mxu0 %v5024_v41  ;;  %v5000_v21 = vunpack.c.h.s8.bf16 %v4852_v24  ;;  %v4851_v41 = vld [vmem:[%s9087_s7 + $0x80] sm:$0xff]  ;;  %v5104_v47 = vunpack.c.h.s8.bf16 %v4904_v57  ;;  %v5100_v0 = vunpack.c.l.s8.bf16 %v4904_v57 }
 0x623   :  { %5278 = vmatprep.subr.bf16.mxu1 %v5088_v30  ;;  %v4883_v30 = vld [vmem:[%s9087_s7 + $0x180] sm:$0xff]  ;;  %v4995_v14 = vunpack.c.l.s8.bf16 %v4851_v41  ;;  %v4824_v23 = vmax.f32 %v4808_v45, 0.0 }
 0x624   :  { %v5059_v40 = vunpack.c.l.s8.bf16 %v4883_v30 }
 0x625   :  { %5236 = vmatpush2.bf16.msra.mxu0 %v5023_v42  ;;  %v4999_v42 = vunpack.c.h.s8.bf16 %v4851_v41  ;;  %v5160_v41 = vunpack.c.h.s8.bf16 %v4932_v48 }
 0x626   :  { %5279 = vmatpush2.bf16.msra.mxu1 %v5087_v63  ;;  %5237 = vmatprep.subr.bf16.mxu0 %v5020_v26  ;;  %v5063_v63 = vunpack.c.h.s8.bf16 %v4883_v30  ;;  %v4996_v26 = vunpack.c.l.s8.bf16 %v4852_v24 }
 0x627   :  { %5280 = vmatprep.subr.bf16.mxu1 %v5084_v58  ;;  %v5060_v58 = vunpack.c.l.s8.bf16 %v4884_v13  ;;  %v4900_v13 = vld [vmem:[%s9087_s7 + $0x208] sm:$0xff] }
 0x628   :  { %v5096_v2 = vunpack.c.h.s8.bf16 %v4900_v13  ;;  %v5092_v16 = vunpack.c.l.s8.bf16 %v4900_v13 }
 0x629   :  { %5238 = vmatpush2.bf16.msra.mxu0 %v5019_v27  ;;  %v4800_v27 = vadd.f32 %v4778_v33, %v4742_v43  ;;  %v5156_v33 = vunpack.c.l.s8.bf16 %v4932_v48  ;;  %v4850_v48 = vld [vmem:[%s9087_s7 + $0x78] sm:$0xff] }
 0x62a   :  { %5281 = vmatpush2.bf16.msra.mxu1 %v5083_v22  ;;  %5239 = vmatprep.subr.bf16.mxu0 %v5016_v37  ;;  %v4911_v22 = vld [vmem:[%s9087_s7 + $0x260] sm:$0xff]  ;;  %v5184_v37 = vunpack.c.h.s8.bf16 %v4944_v4 }
 0x62b   :  { %5282 = vmatprep.subr.bf16.mxu1 %v5080_v5  ;;  %v4943_v5 = vld [vmem:[%s9087_s7 + $0x360] sm:$0xff]  ;;  %v5119_v34 = vunpack.c.h.s8.bf16 %v4911_v22  ;;  %v4816_v9 = vmax.f32 %v4800_v27, 0.0  ;;  %v5115_v20 = vunpack.c.l.s8.bf16 %v4911_v22 }
 0x62c   :  { %v5183_v31 = vunpack.c.h.s8.bf16 %v4943_v5  ;;  %v5179_v3 = vunpack.c.l.s8.bf16 %v4943_v5  ;;  %v4956_v5 = vld [vmem:[%s9087_s7 + $0x3c8] sm:$0xff] }
 0x62d   :  { %5240 = vmatpush2.bf16.msra.mxu0 %v5015_v7  ;;  %v5116_v7 = vunpack.c.l.s8.bf16 %v4912_v53  ;;  %v4927_v53 = vld [vmem:[%s9087_s7 + $0x2e0] sm:$0xff] }
 0x62e   :  { %5283 = vmatpush2.bf16.msra.mxu1 %v5079_v51  ;;  %5241 = vmatprep.subr.bf16.mxu0 %v5012_v28  ;;  %v9137_v51 = vld [vmem:[#allocation11_spill] sm:$0xff]  ;;  %v8736_v28 = vpack.c.bf16 %v4824_v23, %v4816_v9  ;;  %v5151_v27 = vunpack.c.h.s8.bf16 %v4927_v53  ;;  %v5147_v23 = vunpack.c.l.s8.bf16 %v4927_v53  ;;  %v4923_v9 = vld [vmem:[%s9087_s7 + $0x2c0] sm:$0xff]  ;;  %v4845_v53 = vld [vmem:[%s9087_s7 + $0x50] sm:$0xff] }
 0x62f   :  { %5284 = vmatprep.subr.bf16.mxu1 %v5076_v50  ;;  %v5180_v50 = vunpack.c.l.s8.bf16 %v4944_v4 }
 0x631   :  { %5242 = vmatpush2.bf16.msra.mxu0 %v5011_v17  ;;  %v4907_v17 = vld [vmem:[%s9087_s7 + $0x240] sm:$0xff] }
 0x632   :  { %5285 = vmatpush2.bf16.msra.mxu1 %v5075_v15  ;;  %5243 = vmatprep.subr.bf16.mxu0 %v5008_v54  ;;  %v5176_v15 = vunpack.c.h.s8.bf16 %v4940_v11  ;;  %v4939_v54 = vld [vmem:[%s9087_s7 + $0x340] sm:$0xff]  ;;  %v5111_v62 = vunpack.c.h.s8.bf16 %v4907_v17  ;;  %v4920_v11 = vld [vmem:[%s9087_s7 + $0x2a8] sm:$0xff] }
 0x633   :  { %5286 = vmatprep.subr.bf16.mxu1 %v5072_v29  ;;  %v5108_v29 = vunpack.c.l.s8.bf16 %v4908_v55  ;;  %v5175_v39 = vunpack.c.h.s8.bf16 %v4939_v54  ;;  %v5208_v55 = vunpack.c.h.s8.bf16 %v4956_v5 }
 0x635   :  { %5244 = vmatpush2.bf16.msra.mxu0 %v5007_v46  ;;  %v5107_v46 = vunpack.c.l.s8.bf16 %v4907_v17  ;;  %v5204_v17 = vunpack.c.l.s8.bf16 %v4956_v5 }
 0x636   :  { %5287 = vmatpush2.bf16.msra.mxu1 %v5071_v6  ;;  %5245 = vmatprep.subr.bf16.mxu0 %v5004_v25  ;;  %v4903_v6 = vld [vmem:[%s9087_s7 + $0x220] sm:$0xff]  ;;  %v5171_v25 = vunpack.c.l.s8.bf16 %v4939_v54  ;;  %v5136_v54 = vunpack.c.h.s8.bf16 %v4920_v11 }
 0x637   :  { %5288 = vmatprep.subr.bf16.mxu1 %v5068_v60  ;;  %v4935_v60 = vld [vmem:[%s9087_s7 + $0x320] sm:$0xff]  ;;  %v5103_v24 = vunpack.c.h.s8.bf16 %v4903_v6  ;;  %v5099_v36 = vunpack.c.l.s8.bf16 %v4903_v6 }
 0x639   :  { %5246 = vmatpush2.bf16.msra.mxu0 %v5003_v61  ;;  %v5167_v61 = vunpack.c.h.s8.bf16 %v4935_v60 }
 0x63a   :  { %5289 = vmatpush2.bf16.msra.mxu1 %v5067_v1  ;;  %5247 = vmatprep.subr.bf16.mxu0 %v5000_v21  ;;  %v4899_v1 = vld [vmem:[%s9087_s7 + $0x200] sm:$0xff]  ;;  %v5163_v21 = vunpack.c.l.s8.bf16 %v4935_v60  ;;  %v5128_v60 = vunpack.c.h.s8.bf16 %v4916_v49 }
 0x63b   :  { %5290 = vmatprep.subr.bf16.mxu1 %v5064_v56  ;;  %v4931_v56 = vld [vmem:[%s9087_s7 + $0x300] sm:$0xff]  ;;  %v5095_v30 = vunpack.c.h.s8.bf16 %v4899_v1 }
 0x63c   :  { %v5159_v43 = vunpack.c.h.s8.bf16 %v4931_v56  ;;  %v5155_v45 = vunpack.c.l.s8.bf16 %v4931_v56  ;;  %v4994_v56 = vunpack.c.h.s8.bf16 %v4850_v48 }
 0x63d   :  { %5248 = vmatpush2.bf16.msra.mxu0 %v4999_v42  ;;  %v4928_v42 = vld [vmem:[%s9087_s7 + $0x2e8] sm:$0xff] }
 0x63e   :  { %5291 = vmatpush2.bf16.msra.mxu1 %v5063_v63  ;;  %5249 = vmatprep.subr.bf16.mxu0 %v4996_v26  ;;  %v5091_v63 = vunpack.c.l.s8.bf16 %v4899_v1  ;;  %v4960_v26 = vld [vmem:[%s9087_s7 + $0x3e8] sm:$0xff] }
 0x63f   :  { %5292 = vmatprep.subr.bf16.mxu1 %v5060_v58  ;;  %v5152_v58 = vunpack.c.h.s8.bf16 %v4928_v42  ;;  %v5216_v4 = vunpack.c.h.s8.bf16 %v4960_v26 }
 0x641   :  { %5250 = vmatpush2.bf16.msra.mxu0 %v4995_v14  ;;  %v4959_v14 = vld [vmem:[%s9087_s7 + $0x3e0] sm:$0xff] }
 0x642   :  { %5293 = vmatpush2.bf16.msra.mxu1 %v5059_v40  ;;  %5305 = vmatprep.subr.bf16.mxu0 %v5120_v19  ;;  %v5148_v40 = vunpack.c.l.s8.bf16 %v4928_v42  ;;  %v4924_v19 = vld [vmem:[%s9087_s7 + $0x2c8] sm:$0xff]  ;;  %v5215_v22 = vunpack.c.h.s8.bf16 %v4959_v14 }
 0x643   :  { %5348 = vmatprep.subr.bf16.mxu1 %v5184_v37  ;;  %v5212_v37 = vunpack.c.l.s8.bf16 %v4960_v26 }
 0x644   :  { %5252 = vmatmul.mubr.bf16.vlgmr.msra.gmra.mxu0 %v9137_v51 }
 0x645   :  { %5295 = vmatmul.mubr.bf16.vlgmr.msra.gmra.mxu1 %v9138_v59  ;;  %5306 = vmatpush1.bf16.msra.mxu0 %v5119_v34  ;;  %v5144_v34 = vunpack.c.h.s8.bf16 %v4924_v19 }
 0x646   :  { %5337 = vmatprep.mubr.bf16.mxu0 %v8736_v28  ;;  %5307 = vmatprep.subr.bf16.mxu0 %v5116_v7  ;;  %v5211_v7 = vunpack.c.l.s8.bf16 %v4959_v14  ;;  %v4842_v14 = vld [vmem:[%s9087_s7 + $0x38] sm:$0xff] }
 0x647   :  { %5349 = vmatpush1.bf16.msra.mxu1 %v5183_v31  ;;  %v4955_v31 = vld [vmem:[%s9087_s7 + $0x3c0] sm:$0xff] }
 0x648   :  { %5350 = vmatprep.subr.bf16.mxu1 %v5180_v50  ;;  %v5143_v50 = vunpack.c.h.s8.bf16 %v4923_v9 }
 0x649   :  { %5308 = vmatpush1.bf16.msra.mxu0 %v5115_v20  ;;  %v5140_v20 = vunpack.c.l.s8.bf16 %v4924_v19 }
 0x64a   :  { %5309 = vmatprep.subr.bf16.mxu0 %v5112_v35  ;;  %v5207_v35 = vunpack.c.h.s8.bf16 %v4955_v31 }
 0x64b   :  { %5351 = vmatpush1.bf16.msra.mxu1 %v5179_v3  ;;  %v5139_v3 = vunpack.c.l.s8.bf16 %v4923_v9 }
 0x64c   :  { %5352 = vmatprep.subr.bf16.mxu1 %v5176_v15  ;;  %v4952_v15 = vld [vmem:[%s9087_s7 + $0x3a8] sm:$0xff] }
 0x64d   :  { %5310 = vmatpush1.bf16.msra.mxu0 %v5111_v62  ;;  %v4919_v62 = vld [vmem:[%s9087_s7 + $0x2a0] sm:$0xff]  ;;  %v5200_v57 = vunpack.c.h.s8.bf16 %v4952_v15  ;;  %v5196_v6 = vunpack.c.l.s8.bf16 %v4952_v15 }
 0x64e   :  { %5311 = vmatprep.subr.bf16.mxu0 %v5108_v29  ;;  %v5203_v29 = vunpack.c.l.s8.bf16 %v4955_v31  ;;  %v4428_v31 = vpop.f32.mrf.mxu1 }
 0x64f   :  { %5353 = vmatpush1.bf16.msra.mxu1 %v5175_v39  ;;  %v4951_v39 = vld [vmem:[%s9087_s7 + $0x3a0] sm:$0xff] }
 0x650   :  { %5354 = vmatprep.subr.bf16.mxu1 %v5172_v44  ;;  %v5135_v44 = vunpack.c.h.s8.bf16 %v4919_v62 }
 0x651   :  { %5312 = vmatpush1.bf16.msra.mxu0 %v5107_v46  ;;  %v5132_v46 = vunpack.c.l.s8.bf16 %v4920_v11 }
 0x652   :  { %5313 = vmatprep.subr.bf16.mxu0 %v5104_v47  ;;  %v5199_v47 = vunpack.c.h.s8.bf16 %v4951_v39 }
 0x653   :  { %5355 = vmatpush1.bf16.msra.mxu1 %v5171_v25  ;;  %v5131_v25 = vunpack.c.l.s8.bf16 %v4919_v62 }
 0x654   :  { %5356 = vmatprep.subr.bf16.mxu1 %v5168_v12  ;;  %v4948_v12 = vld [vmem:[%s9087_s7 + $0x388] sm:$0xff] }
 0x655   :  { %5314 = vmatpush1.bf16.msra.mxu0 %v5103_v24  ;;  %v4915_v24 = vld [vmem:[%s9087_s7 + $0x280] sm:$0xff]  ;;  %v5192_v13 = vunpack.c.h.s8.bf16 %v4948_v12  ;;  %v5188_v1 = vunpack.c.l.s8.bf16 %v4948_v12 }
 0x656   :  { %5315 = vmatprep.subr.bf16.mxu0 %v5100_v0  ;;  %v5195_v0 = vunpack.c.l.s8.bf16 %v4951_v39 }
 0x657   :  { %5357 = vmatpush1.bf16.msra.mxu1 %v5167_v61  ;;  %v4947_v61 = vld [vmem:[%s9087_s7 + $0x380] sm:$0xff] }
 0x658   :  { %5358 = vmatprep.subr.bf16.mxu1 %v5164_v38  ;;  %v5127_v38 = vunpack.c.h.s8.bf16 %v4915_v24 }
 0x659   :  { %5316 = vmatpush1.bf16.msra.mxu0 %v5099_v36  ;;  %v5124_v36 = vunpack.c.l.s8.bf16 %v4916_v49  ;;  %v4861_v49 = vld [vmem:[%s9087_s7 + $0xd0] sm:$0xff] }
 0x65a   :  { %5317 = vmatprep.subr.bf16.mxu0 %v5096_v2  ;;  %v5191_v2 = vunpack.c.h.s8.bf16 %v4947_v61  ;;  %v5017_v12 = vunpack.c.h.s8.bf16 %v4861_v49 }
 0x65b   :  { %5359 = vmatpush1.bf16.msra.mxu1 %v5163_v21  ;;  %v5123_v21 = vunpack.c.l.s8.bf16 %v4915_v24  ;;  %v4858_v24 = vld [vmem:[%s9087_s7 + $0xb8] sm:$0xff] }
 0x65c   :  { %5360 = vmatprep.subr.bf16.mxu1 %v5160_v41  ;;  %v8827_v41 = vld [vmem:[%s9087_s7 + $0x178] sm:$0xff] }
 0x65d   :  { %5318 = vmatpush1.bf16.msra.mxu0 %v5095_v30  ;;  %v4849_v30 = vld [vmem:[%s9087_s7 + $0x70] sm:$0xff]  ;;  %v5058_v42 = vunpack.c.h.s8.bf16 %v8827_v41 }
 0x65e   :  { %5319 = vmatprep.subr.bf16.mxu0 %v5092_v16  ;;  %v5187_v16 = vunpack.c.l.s8.bf16 %v4947_v61  ;;  %v4989_v26 = vunpack.c.l.s8.bf16 %v4849_v30  ;;  %v5013_v61 = vunpack.c.l.s8.bf16 %v4861_v49 }
 0x65f   :  { %5361 = vmatpush1.bf16.msra.mxu1 %v5159_v43  ;;  %v4993_v43 = vunpack.c.h.s8.bf16 %v4849_v30 }
 0x660   :  { %5362 = vmatprep.subr.bf16.mxu1 %v5156_v33  ;;  %v4990_v33 = vunpack.c.l.s8.bf16 %v4850_v48 }
 0x661   :  { %5320 = vmatpush1.bf16.msra.mxu0 %v5091_v63  ;;  %v4846_v63 = vld [vmem:[%s9087_s7 + $0x58] sm:$0xff] }
 0x662   :  { %5321 = vmatprep.subr.bf16.mxu0 %v5152_v58  ;;  %v4986_v58 = vunpack.c.h.s8.bf16 %v4846_v63 }
 0x663   :  { %5363 = vmatpush1.bf16.msra.mxu1 %v5155_v45  ;;  %v4985_v45 = vunpack.c.h.s8.bf16 %v4845_v53 }
 0x664   :  { %5364 = vmatprep.subr.bf16.mxu1 %v5216_v4  ;;  %v4982_v4 = vunpack.c.l.s8.bf16 %v4846_v63  ;;  %v4853_v63 = vld [vmem:[%s9087_s7 + $0x90] sm:$0xff] }
 0x665   :  { %5322 = vmatpush2.bf16.msra.mxu0 %v5151_v27  ;;  %v4981_v27 = vunpack.c.l.s8.bf16 %v4845_v53 }
 0x666   :  { %5323 = vmatprep.subr.bf16.mxu0 %v5148_v40  ;;  %v4978_v40 = vunpack.c.h.s8.bf16 %v4842_v14 }
 0x667   :  { %5365 = vmatpush2.bf16.msra.mxu1 %v5215_v22  ;;  %v4974_v22 = vunpack.c.l.s8.bf16 %v4842_v14 }
 0x668   :  { %5366 = vmatprep.subr.bf16.mxu1 %v5212_v37  ;;  %v4838_v37 = vld [vmem:[%s9087_s7 + $0x18] sm:$0xff] }
 0x669   :  { %5324 = vmatpush2.bf16.msra.mxu0 %v5147_v23  ;;  %v4970_v5 = vunpack.c.h.s8.bf16 %v4838_v37 }
 0x66a   :  { %5325 = vmatprep.subr.bf16.mxu0 %v5144_v34  ;;  %v4837_v34 = vld [vmem:[%s9087_s7 + $0x10] sm:$0xff] }
 0x66b   :  { %5367 = vmatpush2.bf16.msra.mxu1 %v5211_v7  ;;  %v4969_v9 = vunpack.c.h.s8.bf16 %v4837_v34  ;;  %v4385_v7 = vpop.f32.mrf.mxu0 }
 0x66c   :  { %5368 = vmatprep.subr.bf16.mxu1 %v5208_v55  ;;  %v4966_v55 = vunpack.c.l.s8.bf16 %v4838_v37 }
 0x66d   :  { %5326 = vmatpush2.bf16.msra.mxu0 %v5143_v50  ;;  %v4866_v50 = vld [vmem:[%s9087_s7 + $0xf8] sm:$0xff]  ;;  %v4387_v11 = vpop.f32.mrf.mxu0 }
 0x66e   :  { %5327 = vmatprep.subr.bf16.mxu0 %v5140_v20  ;;  %v4965_v20 = vunpack.c.l.s8.bf16 %v4837_v34  ;;  %v5022_v62 = vunpack.c.l.s8.bf16 %v4866_v50  ;;  %v4997_v34 = vunpack.c.l.s8.bf16 %v4853_v63 }
 0x66f   :  { %5369 = vmatpush2.bf16.msra.mxu1 %v5207_v35  ;;  %v5026_v35 = vunpack.c.h.s8.bf16 %v4866_v50 }
 0x670   :  { %5370 = vmatprep.subr.bf16.mxu1 %v5204_v17  ;;  %v4865_v17 = vld [vmem:[%s9087_s7 + $0xf0] sm:$0xff] }
 0x671   :  { %5328 = vmatpush2.bf16.msra.mxu0 %v5139_v3  ;;  %v4430_v3 = vpop.f32.mrf.mxu1  ;;  %v5025_v15 = vunpack.c.h.s8.bf16 %v4865_v17  ;;  %v5021_v39 = vunpack.c.l.s8.bf16 %v4865_v17 }
 0x672   :  { %5329 = vmatprep.subr.bf16.mxu0 %v5136_v54  ;;  %v4389_v54 = vpop.f32.mrf.mxu0  ;;  %v4431_v53 = vadd.f32 %v4430_v3, %v4387_v11 }
 0x673   :  { %5371 = vmatpush2.bf16.msra.mxu1 %v5203_v29  ;;  %v4432_v29 = vpop.f32.mrf.mxu1 }
 0x674   :  { %5372 = vmatprep.subr.bf16.mxu1 %v5200_v57  ;;  %v4862_v57 = vld [vmem:[%s9087_s7 + $0xd8] sm:$0xff] }
 0x675   :  { %5330 = vmatpush2.bf16.msra.mxu0 %v5135_v44  ;;  %v4391_v44 = vpop.f32.mrf.mxu0 }
 0x676   :  { %5331 = vmatprep.subr.bf16.mxu0 %v5132_v46  ;;  %v5018_v46 = vunpack.c.h.s8.bf16 %v4862_v57 }
 0x677   :  { %5373 = vmatpush2.bf16.msra.mxu1 %v5199_v47  ;;  %v4434_v47 = vpop.f32.mrf.mxu1 }
 0x678   :  { %5374 = vmatprep.subr.bf16.mxu1 %v5196_v6  ;;  %v4471_v6 = vpop.f32.mrf.mxu0  ;;  %v4435_v37 = vadd.f32 %v4434_v47, %v4391_v44  ;;  %v4910_v44 = vld [vmem:[%s9087_s7 + $0x258] sm:$0xff] }
 0x679   :  { %5332 = vmatpush2.bf16.msra.mxu0 %v5131_v25  ;;  %v4514_v25 = vpop.f32.mrf.mxu1 }
 0x67a   :  { %5333 = vmatprep.subr.bf16.mxu0 %v5128_v60  ;;  %v5014_v60 = vunpack.c.l.s8.bf16 %v4862_v57 }
 0x67b   :  { %5375 = vmatpush2.bf16.msra.mxu1 %v5195_v0  ;;  %v4473_v0 = vpop.f32.mrf.mxu0 }
 0x67c   :  { %5376 = vmatprep.subr.bf16.mxu1 %v5192_v13  ;;  %v4516_v13 = vpop.f32.mrf.mxu1 }
 0x67d   :  { %5334 = vmatpush2.bf16.msra.mxu0 %v5127_v38  ;;  %v5010_v38 = vunpack.c.h.s8.bf16 %v4858_v24  ;;  %v4475_v48 = vpop.f32.mrf.mxu0 }
 0x67e   :  { %5335 = vmatprep.subr.bf16.mxu0 %v5124_v36  ;;  %v4857_v36 = vld [vmem:[%s9087_s7 + $0xb0] sm:$0xff] }
 0x67f   :  { %5377 = vmatpush2.bf16.msra.mxu1 %v5191_v2  ;;  %v4518_v2 = vpop.f32.mrf.mxu1  ;;  %v4477_v30 = vpop.f32.mrf.mxu0 }
 0x680   :  { %5378 = vmatprep.subr.bf16.mxu1 %v5188_v1  ;;  %v5009_v1 = vunpack.c.h.s8.bf16 %v4857_v36  ;;  %v4478_v50 = vadd.f32 %v4477_v30, %v4435_v37 }
 0x681   :  { %5336 = vmatpush2.bf16.msra.mxu0 %v5123_v21  ;;  %v5006_v21 = vunpack.c.l.s8.bf16 %v4858_v24  ;;  %v5114_v24 = vunpack.c.h.s8.bf16 %v4910_v44 }
 0x682   :  { %5391 = vmatprep.subr.bf16.mxu0 %v4994_v56  ;;  %v4854_v56 = vld [vmem:[%s9087_s7 + $0x98] sm:$0xff] }
 0x683   :  { %5379 = vmatpush2.bf16.msra.mxu1 %v5187_v16  ;;  %v4520_v16 = vpop.f32.mrf.mxu1 }
 0x684   :  { %5338 = vmatmul.mubr.bf16.vlgmr.msra.gmra.mxu0 %v8496_v52  ;;  %5434 = vmatprep.subr.bf16.mxu1 %v5058_v42  ;;  %v5005_v42 = vunpack.c.l.s8.bf16 %v4857_v36  ;;  %v9139_v36 = vld [vmem:[#allocation8_spill] sm:$0xff] }
 0x685   :  { %5392 = vmatpush1.bf16.msra.mxu0 %v4993_v43  ;;  %5423 = vmatprep.mubr.bf16.mxu0 %v8614_v8  ;;  %v4841_v8 = vld [vmem:[%s9087_s7 + $0x30] sm:$0xff]  ;;  %v4557_v43 = vpop.f32.mrf.mxu0 }
 0x686   :  { %5393 = vmatprep.subr.bf16.mxu0 %v4990_v33  ;;  %v4977_v19 = vunpack.c.h.s8.bf16 %v4841_v8  ;;  %v4973_v23 = vunpack.c.l.s8.bf16 %v4841_v8  ;;  %v5002_v33 = vunpack.c.h.s8.bf16 %v4854_v56  ;;  %v4474_v8 = vadd.f32 %v4473_v0, %v4431_v53  ;;  %v4909_v0 = vld [vmem:[%s9087_s7 + $0x250] sm:$0xff] }
 0x687   :  { %v4559_v14 = vpop.f32.mrf.mxu0  ;;  %v5109_v37 = vunpack.c.l.s8.bf16 %v4909_v0 }
 0x689   :  { %5394 = vmatpush1.bf16.msra.mxu0 %v4989_v26  ;;  %v4429_v26 = vadd.f32 %v4428_v31, %v4385_v7  ;;  %v4517_v31 = vadd.f32 %v4516_v13, %v4474_v8 }
 0x68a   :  { %5395 = vmatprep.subr.bf16.mxu0 %v4986_v58  ;;  %v4600_v58 = vpop.f32.mrf.mxu1 }
 0x68b   :  { %v4560_v17 = vadd.f32 %v4559_v14, %v4517_v31  ;;  %v4906_v14 = vld [vmem:[%s9087_s7 + $0x238] sm:$0xff] }
 0x68d   :  { %5396 = vmatpush1.bf16.msra.mxu0 %v4985_v45  ;;  %v4472_v45 = vadd.f32 %v4471_v6, %v4429_v26 }
 0x68e   :  { %5397 = vmatprep.subr.bf16.mxu0 %v4982_v4  ;;  %v5001_v4 = vunpack.c.h.s8.bf16 %v4853_v63  ;;  %v5110_v63 = vunpack.c.l.s8.bf16 %v4910_v44  ;;  %v5054_v44 = vunpack.c.l.s8.bf16 %v8827_v41 }
 0x691   :  { %5398 = vmatpush1.bf16.msra.mxu0 %v4981_v27  ;;  %v4998_v27 = vunpack.c.l.s8.bf16 %v4854_v56 }
 0x692   :  { %5399 = vmatprep.subr.bf16.mxu0 %v4978_v40  ;;  %v4433_v40 = vadd.f32 %v4432_v29, %v4389_v54 }
 0x695   :  { %5400 = vmatpush1.bf16.msra.mxu0 %v4977_v19  ;;  %v4602_v19 = vpop.f32.mrf.mxu1 }
 0x696   :  { %5401 = vmatprep.subr.bf16.mxu0 %v4974_v22  ;;  %v4914_v22 = vld [vmem:[%s9087_s7 + $0x278] sm:$0xff]  ;;  %v4603_v49 = vadd.f32 %v4602_v19, %v4560_v17 }
 0x697   :  { %v5122_v7 = vunpack.c.h.s8.bf16 %v4914_v22  ;;  %v4604_v11 = vpop.f32.mrf.mxu1  ;;  %v5118_v54 = vunpack.c.l.s8.bf16 %v4914_v22 }
 0x699   :  { %5402 = vmatpush1.bf16.msra.mxu0 %v4973_v23  ;;  %v4515_v23 = vadd.f32 %v4514_v25, %v4472_v45 }
 0x69a   :  { %5403 = vmatprep.subr.bf16.mxu0 %v4970_v5  ;;  %v4476_v5 = vadd.f32 %v4475_v48, %v4433_v40 }
 0x69d   :  { %5404 = vmatpush1.bf16.msra.mxu0 %v4969_v9  ;;  %v4561_v9 = vpop.f32.mrf.mxu0 }
 0x69e   :  { %5405 = vmatprep.subr.bf16.mxu0 %v4966_v55  ;;  %v4913_v55 = vld [vmem:[%s9087_s7 + $0x270] sm:$0xff] }
 0x69f   :  { %v5121_v3 = vunpack.c.h.s8.bf16 %v4913_v55 }
 0x6a1   :  { %5406 = vmatpush1.bf16.msra.mxu0 %v4965_v20  ;;  %v4558_v20 = vadd.f32 %v4557_v43, %v4515_v23  ;;  %v5113_v43 = vunpack.c.h.s8.bf16 %v4909_v0  ;;  %v5106_v23 = vunpack.c.h.s8.bf16 %v4906_v14 }
 0x6a2   :  { %5407 = vmatprep.subr.bf16.mxu0 %v5026_v35  ;;  %v4519_v35 = vadd.f32 %v4518_v2, %v4476_v5  ;;  %v4905_v5 = vld [vmem:[%s9087_s7 + $0x230] sm:$0xff] }
 0x6a3   :  { %v4601_v29 = vadd.f32 %v4600_v58, %v4558_v20  ;;  %v5644_v58 = vld [vmem:[%s9086_s6] sm:$0xff] }
 0x6a4   :  { %v4562_v57 = vadd.f32 %v4561_v9, %v4519_v35  ;;  %v4786_v53 = vrot.slane %v5644_v58, %v9139_v36  ;;  %v5102_v35 = vunpack.c.l.s8.bf16 %v4906_v14 }
 0x6a5   :  { %5408 = vmatpush2.bf16.msra.mxu0 %v5025_v15  ;;  %v4563_v15 = vpop.f32.mrf.mxu0 }
 0x6a6   :  { %5409 = vmatprep.subr.bf16.mxu0 %v5022_v62  ;;  %v4521_v62 = vadd.f32 %v4520_v16, %v4478_v50  ;;  %v4605_v13 = vadd.f32 %v4604_v11, %v4562_v57  ;;  %v5105_v50 = vunpack.c.h.s8.bf16 %v4905_v5  ;;  %v4881_v11 = vld [vmem:[%s9087_s7 + $0x170] sm:$0xff] }
 0x6a8   :  { %v4564_v47 = vadd.f32 %v4563_v15, %v4521_v62 }
 0x6a9   :  { %5410 = vmatpush2.bf16.msra.mxu0 %v5021_v39  ;;  %v4606_v39 = vpop.f32.mrf.mxu1 }
 0x6aa   :  { %5411 = vmatprep.subr.bf16.mxu0 %v5018_v46  ;;  %v4607_v56 = vadd.f32 %v4606_v39, %v4564_v47  ;;  %v5101_v39 = vunpack.c.l.s8.bf16 %v4905_v5  ;;  %v4878_v47 = vld [vmem:[%s9087_s7 + $0x158] sm:$0xff] }
 0x6ad   :  { %5412 = vmatpush2.bf16.msra.mxu0 %v5017_v12  ;;  %v5117_v12 = vunpack.c.l.s8.bf16 %v4913_v55 }
 0x6ae   :  { %5413 = vmatprep.subr.bf16.mxu0 %v5014_v60 }
 0x6b1   :  { %5414 = vmatpush2.bf16.msra.mxu0 %v5013_v61 }
 0x6b2   :  { %5415 = vmatprep.subr.bf16.mxu0 %v5010_v38 }
 0x6b5   :  { %5416 = vmatpush2.bf16.msra.mxu0 %v5009_v1  ;;  %v9140_v1 = vld [vmem:[#allocation4_spill] sm:$0xff] }
 0x6b6   :  { %5417 = vmatprep.subr.bf16.mxu0 %v5006_v21  ;;  %v4782_v40 = vrot.slane %v5644_v58, %v9140_v1 }
 0x6b9   :  { %5418 = vmatpush2.bf16.msra.mxu0 %v5005_v42 }
 0x6ba   :  { %5419 = vmatprep.subr.bf16.mxu0 %v5002_v33 }
 0x6bd   :  { %5420 = vmatpush2.bf16.msra.mxu0 %v5001_v4 }
 0x6be   :  { %5421 = vmatprep.subr.bf16.mxu0 %v4998_v27 }
 0x6c1   :  { %5422 = vmatpush2.bf16.msra.mxu0 %v4997_v34 }
 0x6c2   :  { %5477 = vmatprep.subr.bf16.mxu0 %v5122_v7 }
 0x6c4   :  { %v4643_v46 = vpop.f32.mrf.mxu0  ;;  %5424 = vmatmul.mubr.bf16.vlgmr.msra.gmra.mxu0 %v9137_v51  ;;  %v5643_v51 = vld [vmem:[%s9085_s5] sm:$0xff] }
 0x6c5   :  { %v4644_v6 = vadd.f32 %v4643_v46, %v4601_v29  ;;  %v4686_v25 = vpop.f32.mrf.mxu1  ;;  %5478 = vmatpush1.bf16.msra.mxu0 %v5121_v3  ;;  %5509 = vmatprep.mubr.bf16.mxu0 %v8736_v28  ;;  %v4728_v48 = vrot.slane %v5643_v51, %v9139_v36  ;;  %v4724_v28 = vrot.slane %v5643_v51, %v9140_v1  ;;  %v5057_v29 = vunpack.c.h.s8.bf16 %v4881_v11  ;;  %v4874_v51 = vld [vmem:[%s9087_s7 + $0x138] sm:$0xff]  ;;  %v4873_v1 = vld [vmem:[%s9087_s7 + $0x130] sm:$0xff] }
 0x6c6   :  { %v4645_v60 = vpop.f32.mrf.mxu0  ;;  %5479 = vmatprep.subr.bf16.mxu0 %v5118_v54  ;;  %v4902_v54 = vld [vmem:[%s9087_s7 + $0x218] sm:$0xff] }
 0x6c7   :  { %v4646_v61 = vadd.f32 %v4645_v60, %v4603_v49  ;;  %v4688_v38 = vpop.f32.mrf.mxu1  ;;  %v4687_v2 = vadd.f32 %v4686_v25, %v4644_v6  ;;  %v5098_v46 = vunpack.c.h.s8.bf16 %v4902_v54  ;;  %v4901_v49 = vld [vmem:[%s9087_s7 + $0x210] sm:$0xff]  ;;  %v5053_v6 = vunpack.c.l.s8.bf16 %v4881_v11 }
 0x6c8   :  { %v4647_v21 = vpop.f32.mrf.mxu0  ;;  %v5097_v41 = vunpack.c.h.s8.bf16 %v4901_v49  ;;  %v5050_v25 = vunpack.c.h.s8.bf16 %v4878_v47  ;;  %v5094_v60 = vunpack.c.l.s8.bf16 %v4902_v54  ;;  %v4917_v11 = vld [vmem:[%s9087_s7 + $0x290] sm:$0xff] }
 0x6c9   :  { %v4689_v30 = vadd.f32 %v4688_v38, %v4646_v61  ;;  %v4648_v16 = vadd.f32 %v4647_v21, %v4605_v13  ;;  %v4690_v42 = vpop.f32.mrf.mxu1  ;;  %5480 = vmatpush1.bf16.msra.mxu0 %v5117_v12  ;;  %v4743_v27 = vmul.f32 %v4724_v28, %v4687_v2  ;;  %v4877_v12 = vld [vmem:[%s9087_s7 + $0x150] sm:$0xff]  ;;  %v5046_v13 = vunpack.c.l.s8.bf16 %v4878_v47  ;;  %v4926_v21 = vld [vmem:[%s9087_s7 + $0x2d8] sm:$0xff] }
 0x6ca   :  { %v4649_v33 = vpop.f32.mrf.mxu0  ;;  %5481 = vmatprep.subr.bf16.mxu0 %v5114_v24  ;;  %v4930_v24 = vld [vmem:[%s9087_s7 + $0x2f8] sm:$0xff]  ;;  %v5049_v0 = vunpack.c.h.s8.bf16 %v4877_v12  ;;  %v4929_v38 = vld [vmem:[%s9087_s7 + $0x2f0] sm:$0xff]  ;;  %v5045_v36 = vunpack.c.l.s8.bf16 %v4877_v12  ;;  %v5042_v2 = vunpack.c.h.s8.bf16 %v4874_v51 }
 0x6cb   :  { %v4744_v26 = vmul.f32 %v4728_v48, %v4689_v30  ;;  %v4691_v45 = vadd.f32 %v4690_v42, %v4648_v16  ;;  %v4650_v4 = vadd.f32 %v4649_v33, %v4607_v56  ;;  %v4692_v8 = vpop.f32.mrf.mxu1  ;;  %v4801_v55 = vadd.f32 %v4782_v40, %v4743_v27  ;;  %v4870_v33 = vld [vmem:[%s9087_s7 + $0x118] sm:$0xff]  ;;  %v4893_v54 = vld [vmem:[%s9087_s7 + $0x1d0] sm:$0xff] }
 0x6cc   :  { %v5154_v61 = vunpack.c.h.s8.bf16 %v4930_v24  ;;  %v5041_v56 = vunpack.c.h.s8.bf16 %v4873_v1  ;;  %v5149_v30 = vunpack.c.l.s8.bf16 %v4929_v38  ;;  %v5038_v16 = vunpack.c.l.s8.bf16 %v4874_v51 }
 0x6cd   :  { %v4751_v19 = vmul.f32 %v4724_v28, %v4691_v45  ;;  %v4693_v22 = vadd.f32 %v4692_v8, %v4650_v4  ;;  %5482 = vmatpush1.bf16.msra.mxu0 %v5113_v43  ;;  %v4802_v34 = vadd.f32 %v4786_v53, %v4744_v26  ;;  %v4817_v15 = vmax.f32 %v4801_v55, 0.0  ;;  %v4925_v43 = vld [vmem:[%s9087_s7 + $0x2d0] sm:$0xff]  ;;  %v4922_v4 = vld [vmem:[%s9087_s7 + $0x2b8] sm:$0xff] }
 0x6ce   :  { %5483 = vmatprep.subr.bf16.mxu0 %v5110_v63  ;;  %v5150_v28 = vunpack.c.l.s8.bf16 %v4930_v24  ;;  %v5146_v42 = vunpack.c.h.s8.bf16 %v4926_v21  ;;  %v5037_v63 = vunpack.c.l.s8.bf16 %v4873_v1  ;;  %v5145_v26 = vunpack.c.h.s8.bf16 %v4925_v43  ;;  %v4942_v1 = vld [vmem:[%s9087_s7 + $0x358] sm:$0xff] }
 0x6cf   :  { %v4809_v9 = vadd.f32 %v4782_v40, %v4751_v19  ;;  %v4752_v7 = vmul.f32 %v4728_v48, %v4693_v22  ;;  %v4818_v17 = vmax.f32 %v4802_v34, 0.0  ;;  %v5153_v48 = vunpack.c.h.s8.bf16 %v4929_v38  ;;  %v4921_v19 = vld [vmem:[%s9087_s7 + $0x2b0] sm:$0xff]  ;;  %v4898_v22 = vld [vmem:[%s9087_s7 + $0x1f8] sm:$0xff] }
 0x6d0   :  { %v5034_v58 = vunpack.c.h.s8.bf16 %v4870_v33  ;;  %v5142_v45 = vunpack.c.l.s8.bf16 %v4926_v21  ;;  %v5141_v27 = vunpack.c.l.s8.bf16 %v4925_v43  ;;  %v5030_v40 = vunpack.c.l.s8.bf16 %v4870_v33  ;;  %v4897_v34 = vld [vmem:[%s9087_s7 + $0x1f0] sm:$0xff] }
 0x6d1   :  { %v4810_v31 = vadd.f32 %v4786_v53, %v4752_v7  ;;  %5484 = vmatpush1.bf16.msra.mxu0 %v5109_v37  ;;  %v4825_v20 = vmax.f32 %v4809_v9, 0.0  ;;  %v4869_v53 = vld [vmem:[%s9087_s7 + $0x110] sm:$0xff]  ;;  %v5138_v8 = vunpack.c.h.s8.bf16 %v4922_v4  ;;  %v5090_v5 = vunpack.c.h.s8.bf16 %v4898_v22  ;;  %v4918_v7 = vld [vmem:[%s9087_s7 + $0x298] sm:$0xff] }
 0x6d2   :  { %5485 = vmatprep.subr.bf16.mxu0 %v5106_v23  ;;  %v5033_v14 = vunpack.c.h.s8.bf16 %v4869_v53  ;;  %v5029_v37 = vunpack.c.l.s8.bf16 %v4869_v53  ;;  %v5137_v23 = vunpack.c.h.s8.bf16 %v4921_v19  ;;  %v5134_v9 = vunpack.c.l.s8.bf16 %v4922_v4 }
 0x6d3   :  { %v4826_v3 = vmax.f32 %v4810_v31, 0.0  ;;  %v8915_v57 = vpack.c.bf16 %v4825_v20, %v4817_v15  ;;  %v5089_v55 = vunpack.c.h.s8.bf16 %v4897_v34  ;;  %v5133_v31 = vunpack.c.l.s8.bf16 %v4921_v19  ;;  %v4961_v19 = vld [vmem:[%s9087_s7 + $0x3f0] sm:$0xff] }
 0x6d4   :  { %v5130_v20 = vunpack.c.h.s8.bf16 %v4918_v7  ;;  %v5077_v47 = vunpack.c.l.s8.bf16 %v4893_v54  ;;  %v5178_v21 = vunpack.c.h.s8.bf16 %v4942_v1 }
 0x6d5   :  { %5486 = vmatpush1.bf16.msra.mxu0 %v5105_v50  ;;  %v8913_v62 = vpack.c.bf16 %v4826_v3, %v4818_v17  ;;  %v5086_v50 = vunpack.c.l.s8.bf16 %v4898_v22  ;;  %v5085_v17 = vunpack.c.l.s8.bf16 %v4897_v34  ;;  %v5129_v3 = vunpack.c.h.s8.bf16 %v4917_v11 }
 0x6d6   :  { %5487 = vmatprep.subr.bf16.mxu0 %v5102_v35  ;;  %v4894_v35 = vld [vmem:[%s9087_s7 + $0x1d8] sm:$0xff]  ;;  %v5217_v22 = vunpack.c.h.s8.bf16 %v4961_v19 }
 0x6d7   :  { %5380 = vmatprep.mubr.bf16.mxu1 %v8913_v62  ;;  %v5082_v15 = vunpack.c.h.s8.bf16 %v4894_v35 }
 0x6d8   :  { %5381 = vmatmul.mubr.bf16.vlgmr.msra.gmra.mxu1 %v8915_v57 }
 0x6d9   :  { %5435 = vmatpush1.bf16.msra.mxu1 %v5057_v29  ;;  %5466 = vmatprep.mubr.bf16.mxu1 %v8620_v18  ;;  %v5093_v18 = vunpack.c.l.s8.bf16 %v4901_v49  ;;  %v5126_v29 = vunpack.c.l.s8.bf16 %v4918_v7  ;;  %v4890_v49 = vld [vmem:[%s9087_s7 + $0x1b8] sm:$0xff] }
 0x6da   :  { %5488 = vmatpush1.bf16.msra.mxu0 %v5101_v39  ;;  %5436 = vmatprep.subr.bf16.mxu1 %v5054_v44  ;;  %v5081_v39 = vunpack.c.h.s8.bf16 %v4893_v54  ;;  %v5125_v44 = vunpack.c.l.s8.bf16 %v4917_v11  ;;  %v5070_v12 = vunpack.c.l.s8.bf16 %v4890_v49  ;;  %v4953_v11 = vld [vmem:[%s9087_s7 + $0x3b0] sm:$0xff] }
 0x6db   :  { %5489 = vmatprep.subr.bf16.mxu0 %v5098_v46  ;;  %v5078_v46 = vunpack.c.l.s8.bf16 %v4894_v35  ;;  %v5201_v35 = vunpack.c.h.s8.bf16 %v4953_v11 }
 0x6dd   :  { %5437 = vmatpush1.bf16.msra.mxu1 %v5053_v6  ;;  %v5074_v6 = vunpack.c.h.s8.bf16 %v4890_v49 }
 0x6de   :  { %5490 = vmatpush1.bf16.msra.mxu0 %v5097_v41  ;;  %5438 = vmatprep.subr.bf16.mxu1 %v5050_v25  ;;  %v4889_v41 = vld [vmem:[%s9087_s7 + $0x1b0] sm:$0xff] }
 0x6df   :  { %5491 = vmatprep.subr.bf16.mxu0 %v5094_v60  ;;  %v5073_v25 = vunpack.c.h.s8.bf16 %v4889_v41  ;;  %v4886_v60 = vld [vmem:[%s9087_s7 + $0x198] sm:$0xff]  ;;  %v5069_v24 = vunpack.c.l.s8.bf16 %v4889_v41 }
 0x6e1   :  { %5439 = vmatpush1.bf16.msra.mxu1 %v5049_v0  ;;  %v5066_v0 = vunpack.c.h.s8.bf16 %v4886_v60 }
 0x6e2   :  { %5492 = vmatpush1.bf16.msra.mxu0 %v5093_v18  ;;  %5440 = vmatprep.subr.bf16.mxu1 %v5046_v13  ;;  %v4885_v18 = vld [vmem:[%s9087_s7 + $0x190] sm:$0xff] }
 0x6e3   :  { %5493 = vmatprep.subr.bf16.mxu0 %v5154_v61  ;;  %v5065_v13 = vunpack.c.h.s8.bf16 %v4885_v18  ;;  %v5062_v61 = vunpack.c.l.s8.bf16 %v4886_v60  ;;  %v5061_v38 = vunpack.c.l.s8.bf16 %v4885_v18  ;;  %v5563_v18 = vld [vmem:[%s9088_s8] sm:$0xf] }
 0x6e5   :  { %5441 = vmatpush1.bf16.msra.mxu1 %v5045_v36  ;;  %v4945_v36 = vld [vmem:[%s9087_s7 + $0x370] sm:$0xff] }
 0x6e6   :  { %5494 = vmatpush2.bf16.msra.mxu0 %v5153_v48  ;;  %5442 = vmatprep.subr.bf16.mxu1 %v5042_v2  ;;  %v5185_v48 = vunpack.c.h.s8.bf16 %v4945_v36 }
 0x6e7   :  { %5495 = vmatprep.subr.bf16.mxu0 %v5150_v28  ;;  %v5181_v28 = vunpack.c.l.s8.bf16 %v4945_v36  ;;  %v9141_v36 = vld [vmem:[#allocation2_spill] sm:$0xff] }
 0x6e9   :  { %5443 = vmatpush1.bf16.msra.mxu1 %v5041_v56  ;;  %v4941_v56 = vld [vmem:[%s9087_s7 + $0x350] sm:$0xff] }
 0x6ea   :  { %5496 = vmatpush2.bf16.msra.mxu0 %v5149_v30  ;;  %5444 = vmatprep.subr.bf16.mxu1 %v5038_v16  ;;  %v5177_v30 = vunpack.c.h.s8.bf16 %v4941_v56  ;;  %v5174_v16 = vunpack.c.l.s8.bf16 %v4942_v1 }
 0x6eb   :  { %5497 = vmatprep.subr.bf16.mxu0 %v5146_v42  ;;  %v4938_v42 = vld [vmem:[%s9087_s7 + $0x338] sm:$0xff] }
 0x6ec   :  { %v5170_v43 = vunpack.c.h.s8.bf16 %v4938_v42 }
 0x6ed   :  { %5445 = vmatpush1.bf16.msra.mxu1 %v5037_v63  ;;  %v5166_v63 = vunpack.c.l.s8.bf16 %v4938_v42 }
 0x6ee   :  { %5498 = vmatpush2.bf16.msra.mxu0 %v5145_v26  ;;  %5446 = vmatprep.subr.bf16.mxu1 %v5034_v58  ;;  %v4934_v26 = vld [vmem:[%s9087_s7 + $0x318] sm:$0xff] }
 0x6ef   :  { %5499 = vmatprep.subr.bf16.mxu0 %v5142_v45  ;;  %v5162_v53 = vunpack.c.h.s8.bf16 %v4934_v26  ;;  %v4933_v45 = vld [vmem:[%s9087_s7 + $0x310] sm:$0xff] }
 0x6f0   :  { %v5161_v4 = vunpack.c.h.s8.bf16 %v4933_v45 }
 0x6f1   :  { %5447 = vmatpush1.bf16.msra.mxu1 %v5033_v14  ;;  %v5158_v14 = vunpack.c.l.s8.bf16 %v4934_v26 }
 0x6f2   :  { %5500 = vmatpush2.bf16.msra.mxu0 %v5141_v27  ;;  %5448 = vmatprep.subr.bf16.mxu1 %v5030_v40  ;;  %v4962_v27 = vld [vmem:[%s9087_s7 + $0x3f8] sm:$0xff]  ;;  %v5157_v40 = vunpack.c.l.s8.bf16 %v4933_v45 }
 0x6f3   :  { %5501 = vmatprep.subr.bf16.mxu0 %v5138_v8  ;;  %v5218_v8 = vunpack.c.h.s8.bf16 %v4962_v27 }
 0x6f5   :  { %5449 = vmatpush1.bf16.msra.mxu1 %v5029_v37  ;;  %v5214_v37 = vunpack.c.l.s8.bf16 %v4962_v27 }
 0x6f6   :  { %5502 = vmatpush2.bf16.msra.mxu0 %v5137_v23  ;;  %5450 = vmatprep.subr.bf16.mxu1 %v5090_v5  ;;  %v4958_v23 = vld [vmem:[%s9087_s7 + $0x3d8] sm:$0xff]  ;;  %v5213_v5 = vunpack.c.l.s8.bf16 %v4961_v19 }
 0x6f7   :  { %5503 = vmatprep.subr.bf16.mxu0 %v5134_v9  ;;  %v5210_v34 = vunpack.c.h.s8.bf16 %v4958_v23  ;;  %v4957_v9 = vld [vmem:[%s9087_s7 + $0x3d0] sm:$0xff] }
 0x6f8   :  { %v5209_v7 = vunpack.c.h.s8.bf16 %v4957_v9 }
 0x6f9   :  { %5451 = vmatpush2.bf16.msra.mxu1 %v5089_v55  ;;  %v5206_v55 = vunpack.c.l.s8.bf16 %v4958_v23 }
 0x6fa   :  { %5504 = vmatpush2.bf16.msra.mxu0 %v5133_v31  ;;  %5452 = vmatprep.subr.bf16.mxu1 %v5086_v50  ;;  %v4954_v31 = vld [vmem:[%s9087_s7 + $0x3b8] sm:$0xff]  ;;  %v5205_v50 = vunpack.c.l.s8.bf16 %v4957_v9 }
 0x6fb   :  { %5505 = vmatprep.subr.bf16.mxu0 %v5130_v20  ;;  %v5202_v20 = vunpack.c.h.s8.bf16 %v4954_v31 }
 0x6fd   :  { %5453 = vmatpush2.bf16.msra.mxu1 %v5085_v17  ;;  %v5198_v17 = vunpack.c.l.s8.bf16 %v4954_v31 }
 0x6fe   :  { %5506 = vmatpush2.bf16.msra.mxu0 %v5129_v3  ;;  %5454 = vmatprep.subr.bf16.mxu1 %v5082_v15  ;;  %v4950_v3 = vld [vmem:[%s9087_s7 + $0x398] sm:$0xff]  ;;  %v5197_v15 = vunpack.c.l.s8.bf16 %v4953_v11 }
 0x6ff   :  { %5507 = vmatprep.subr.bf16.mxu0 %v5126_v29  ;;  %v5194_v54 = vunpack.c.h.s8.bf16 %v4950_v3  ;;  %v4949_v29 = vld [vmem:[%s9087_s7 + $0x390] sm:$0xff] }
 0x701   :  { %5455 = vmatpush2.bf16.msra.mxu1 %v5081_v39  ;;  %v5193_v39 = vunpack.c.h.s8.bf16 %v4949_v29 }
 0x702   :  { %5508 = vmatpush2.bf16.msra.mxu0 %v5125_v44  ;;  %5456 = vmatprep.subr.bf16.mxu1 %v5078_v46  ;;  %v5190_v44 = vunpack.c.l.s8.bf16 %v4950_v3  ;;  %v5189_v46 = vunpack.c.l.s8.bf16 %v4949_v29 }
 0x704   :  { %v5253_v49 = vpop.f32.mrf.mxu0 }
 0x705   :  { %5457 = vmatpush2.bf16.msra.mxu1 %v5077_v47  ;;  %5510 = vmatmul.mubr.bf16.vlgmr.msra.gmra.mxu0 %v8496_v52  ;;  %v4946_v52 = vld [vmem:[%s9087_s7 + $0x378] sm:$0xff]  ;;  %v5296_v41 = vpop.f32.mrf.mxu1 }
 0x706   :  { %5458 = vmatprep.subr.bf16.mxu1 %v5074_v6  ;;  %v5186_v51 = vunpack.c.h.s8.bf16 %v4946_v52  ;;  %v5182_v2 = vunpack.c.l.s8.bf16 %v4946_v52  ;;  %v5255_v47 = vpop.f32.mrf.mxu0 }
 0x708   :  { %v5257_v6 = vpop.f32.mrf.mxu0 }
 0x709   :  { %5459 = vmatpush2.bf16.msra.mxu1 %v5073_v25 }
 0x70a   :  { %5460 = vmatprep.subr.bf16.mxu1 %v5070_v12  ;;  %v5259_v25 = vpop.f32.mrf.mxu0  ;;  %v5298_v12 = vpop.f32.mrf.mxu1 }
 0x70d   :  { %5461 = vmatpush2.bf16.msra.mxu1 %v5069_v24  ;;  %v5300_v24 = vpop.f32.mrf.mxu1 }
 0x70e   :  { %5462 = vmatprep.subr.bf16.mxu1 %v5066_v0 }
 0x711   :  { %5463 = vmatpush2.bf16.msra.mxu1 %v5065_v13  ;;  %v5297_v13 = vadd.f32 %v5296_v41, %v5253_v49 }
 0x712   :  { %5464 = vmatprep.subr.bf16.mxu1 %v5062_v61  ;;  %v5302_v61 = vpop.f32.mrf.mxu1 }
 0x715   :  { %5465 = vmatpush2.bf16.msra.mxu1 %v5061_v38  ;;  %v5299_v38 = vadd.f32 %v5298_v12, %v5255_v47 }
 0x716   :  { %5520 = vmatprep.subr.bf16.mxu1 %v5186_v51 }
 0x718   :  { %5467 = vmatmul.mubr.bf16.vlgmr.msra.gmra.mxu1 %v9138_v59  ;;  %v5173_v59 = vunpack.c.l.s8.bf16 %v4941_v56 }
 0x719   :  { %5521 = vmatpush1.bf16.msra.mxu1 %v5185_v48  ;;  %5552 = vmatprep.mubr.bf16.mxu1 %v8913_v62  ;;  %v4937_v62 = vld [vmem:[%s9087_s7 + $0x330] sm:$0xff]  ;;  %v5568_v48 = vrot.slane %v5563_v18, %v9141_v36 }
 0x71a   :  { %5522 = vmatprep.subr.bf16.mxu1 %v5182_v2  ;;  %v5169_v33 = vunpack.c.h.s8.bf16 %v4937_v62  ;;  %v5165_v58 = vunpack.c.l.s8.bf16 %v4937_v62  ;;  %v5301_v2 = vadd.f32 %v5300_v24, %v5257_v6  ;;  %v5580_v6 = vrot.slane %v5563_v18, %v9133_v32 }
 0x71d   :  { %5523 = vmatpush1.bf16.msra.mxu1 %v5181_v28 }
 0x71e   :  { %5524 = vmatprep.subr.bf16.mxu1 %v5178_v21 }
 0x721   :  { %5525 = vmatpush1.bf16.msra.mxu1 %v5177_v30  ;;  %v5572_v30 = vrot.slane %v5563_v18, %v9131_v10 }
 0x722   :  { %5526 = vmatprep.subr.bf16.mxu1 %v5174_v16  ;;  %v5303_v16 = vadd.f32 %v5302_v61, %v5259_v25 }
 0x725   :  { %5527 = vmatpush1.bf16.msra.mxu1 %v5173_v59 }
 0x726   :  { %5528 = vmatprep.subr.bf16.mxu1 %v5170_v43 }
 0x729   :  { %5529 = vmatpush1.bf16.msra.mxu1 %v5169_v33 }
 0x72a   :  { %5530 = vmatprep.subr.bf16.mxu1 %v5166_v63 }
 0x72d   :  { %5531 = vmatpush1.bf16.msra.mxu1 %v5165_v58 }
 0x72e   :  { %5532 = vmatprep.subr.bf16.mxu1 %v5162_v53 }
 0x731   :  { %5533 = vmatpush1.bf16.msra.mxu1 %v5161_v4 }
 0x732   :  { %5534 = vmatprep.subr.bf16.mxu1 %v5158_v14 }
 0x735   :  { %5535 = vmatpush1.bf16.msra.mxu1 %v5157_v40 }
 0x736   :  { %5536 = vmatprep.subr.bf16.mxu1 %v5218_v8 }
 0x739   :  { %5537 = vmatpush2.bf16.msra.mxu1 %v5217_v22 }
 0x73a   :  { %5538 = vmatprep.subr.bf16.mxu1 %v5214_v37 }
 0x73d   :  { %5539 = vmatpush2.bf16.msra.mxu1 %v5213_v5 }
 0x73e   :  { %5540 = vmatprep.subr.bf16.mxu1 %v5210_v34 }
 0x741   :  { %5541 = vmatpush2.bf16.msra.mxu1 %v5209_v7 }
 0x742   :  { %5542 = vmatprep.subr.bf16.mxu1 %v5206_v55 }
 0x744   :  { %v5339_v60 = vpop.f32.mrf.mxu0 }
 0x745   :  { %5543 = vmatpush2.bf16.msra.mxu1 %v5205_v50  ;;  %v5340_v51 = vadd.f32 %v5339_v60, %v5297_v13 }
 0x746   :  { %5544 = vmatprep.subr.bf16.mxu1 %v5202_v20  ;;  %v5341_v0 = vpop.f32.mrf.mxu0 }
 0x747   :  { %v5342_v28 = vadd.f32 %v5341_v0, %v5299_v38 }
 0x748   :  { %v5343_v52 = vpop.f32.mrf.mxu0 }
 0x749   :  { %5545 = vmatpush2.bf16.msra.mxu1 %v5201_v35  ;;  %v5344_v43 = vadd.f32 %v5343_v52, %v5301_v2 }
 0x74a   :  { %5546 = vmatprep.subr.bf16.mxu1 %v5198_v17  ;;  %v5345_v42 = vpop.f32.mrf.mxu0 }
 0x74b   :  { %v5346_v58 = vadd.f32 %v5345_v42, %v5303_v16 }
 0x74d   :  { %5547 = vmatpush2.bf16.msra.mxu1 %v5197_v15  ;;  %v9142_v15 = vld [vmem:[#allocation3_spill] sm:$0xff] }
 0x74e   :  { %5548 = vmatprep.subr.bf16.mxu1 %v5194_v54  ;;  %v5576_v54 = vrot.slane %v5563_v18, %v9142_v15 }
 0x751   :  { %5549 = vmatpush2.bf16.msra.mxu1 %v5193_v39 }
 0x752   :  { %5550 = vmatprep.subr.bf16.mxu1 %v5190_v44 }
 0x755   :  { %5551 = vmatpush2.bf16.msra.mxu1 %v5189_v46 }
 0x758   :  { %5553 = vmatmul.mubr.bf16.vlgmr.msra.gmra.mxu1 %v8915_v57  ;;  %v5593_v57 = vld [vmem:[%s9089_s9] sm:$0xf] }
 0x759   :  { %v5598_v56 = vrot.slane %v5593_v57, %v9141_v36  ;;  %v5602_v63 = vrot.slane %v5593_v57, %v9131_v10  ;;  %v5606_v44 = vrot.slane %v5593_v57, %v9142_v15  ;;  %v5610_v60 = vrot.slane %v5593_v57, %v9133_v32 }
 0x784   :  { %v5425_v37 = vpop.f32.mrf.mxu0 }
 0x786   :  { %v5427_v23 = vpop.f32.mrf.mxu0 }
 0x788   :  { %v5429_v5 = vpop.f32.mrf.mxu0 }
 0x78a   :  { %v5431_v9 = vpop.f32.mrf.mxu0 }
 0x798   :  { %v5382_v1 = vpop.f32.mrf.mxu1 }
 0x799   :  { %v5383_v21 = vadd.f32 %v5382_v1, %v5340_v51 }
 0x79a   :  { %v5384_v59 = vpop.f32.mrf.mxu1 }
 0x79b   :  { %v5585_v62 = vmul.f32 %v5568_v48, %v5383_v21  ;;  %v5385_v33 = vadd.f32 %v5384_v59, %v5342_v28 }
 0x79c   :  { %v5386_v26 = vpop.f32.mrf.mxu1 }
 0x79d   :  { %v5615_v53 = vadd.f32 %v5598_v56, %v5585_v62  ;;  %v5586_v45 = vmul.f32 %v5572_v30, %v5385_v33  ;;  %v5387_v4 = vadd.f32 %v5386_v26, %v5344_v43 }
 0x79e   :  { %v5388_v14 = vpop.f32.mrf.mxu1 }
 0x79f   :  { %5623 = vst [vmem:[%s9090_s10] sm:$0xff] %v5615_v53  ;;  %v5616_v27 = vadd.f32 %v5602_v63, %v5586_v45  ;;  %v5589_v40 = vmul.f32 %v5568_v48, %v5387_v4  ;;  %v5389_v8 = vadd.f32 %v5388_v14, %v5346_v58 }
 0x7a1   :  { %5624 = vst [vmem:[%s9090_s10 + $0x8] sm:$0xff] %v5616_v27  ;;  %v5619_v19 = vadd.f32 %v5598_v56, %v5589_v40  ;;  %v5590_v22 = vmul.f32 %v5572_v30, %v5389_v8 }
 0x7a3   :  { %5627 = vst [vmem:[%s9090_s10 + $0x20] sm:$0xff] %v5619_v19  ;;  %v5620_v10 = vadd.f32 %v5602_v63, %v5590_v22 }
 0x7a5   :  { %5628 = vst [vmem:[%s9090_s10 + $0x28] sm:$0xff] %v5620_v10 }
 0x7c5   :  { %v5511_v55 = vpop.f32.mrf.mxu0 }
 0x7c7   :  { %v5513_v20 = vpop.f32.mrf.mxu0 }
 0x7c9   :  { %v5515_v29 = vpop.f32.mrf.mxu0 }
 0x7cb   :  { %v5517_v0 = vpop.f32.mrf.mxu0 }
 0x7d8   :  { %v5468_v34 = vpop.f32.mrf.mxu1 }
 0x7d9   :  { %v5469_v50 = vadd.f32 %v5468_v34, %v5425_v37 }
 0x7da   :  { %v5470_v7 = vpop.f32.mrf.mxu1 }
 0x7db   :  { %v5471_v11 = vadd.f32 %v5470_v7, %v5427_v23  ;;  %v5512_v3 = vadd.f32 %v5511_v55, %v5469_v50 }
 0x7dc   :  { %v5472_v31 = vpop.f32.mrf.mxu1 }
 0x7dd   :  { %v5473_v17 = vadd.f32 %v5472_v31, %v5429_v5  ;;  %v5514_v47 = vadd.f32 %v5513_v20, %v5471_v11 }
 0x7de   :  { %v5474_v35 = vpop.f32.mrf.mxu1 }
 0x7df   :  { %v5475_v46 = vadd.f32 %v5474_v35, %v5431_v9  ;;  %v5516_v24 = vadd.f32 %v5515_v29, %v5473_v17 }
 0x7e1   :  { %v5518_v51 = vadd.f32 %v5517_v0, %v5475_v46 }
 0x818   :  { %v5554_v39 = vpop.f32.mrf.mxu1 }
 0x819   :  { %v5555_v49 = vadd.f32 %v5554_v39, %v5512_v3 }
 0x81a   :  { %v5556_v41 = vpop.f32.mrf.mxu1 }
 0x81b   :  { %v5587_v25 = vmul.f32 %v5576_v54, %v5555_v49  ;;  %v5557_v12 = vadd.f32 %v5556_v41, %v5514_v47 }
 0x81c   :  { %v5558_v13 = vpop.f32.mrf.mxu1 }
 0x81d   :  { %v5617_v61 = vadd.f32 %v5606_v44, %v5587_v25  ;;  %v5588_v52 = vmul.f32 %v5580_v6, %v5557_v12  ;;  %v5559_v38 = vadd.f32 %v5558_v13, %v5516_v24 }
 0x81e   :  { %v5560_v36 = vpop.f32.mrf.mxu1 }
 0x81f   :  { %5625 = vst [vmem:[%s9090_s10 + $0x10] sm:$0xff] %v5617_v61  ;;  %v5618_v48 = vadd.f32 %v5610_v60, %v5588_v52  ;;  %v5591_v2 = vmul.f32 %v5576_v54, %v5559_v38  ;;  %v5561_v18 = vadd.f32 %v5560_v36, %v5518_v51 }
 0x821   :  { %5626 = vst [vmem:[%s9090_s10 + $0x18] sm:$0xff] %v5618_v48  ;;  %v5621_v32 = vadd.f32 %v5606_v44, %v5591_v2  ;;  %v5592_v57 = vmul.f32 %v5580_v6, %v5561_v18 }
 0x823   :  { %5629 = vst [vmem:[%s9090_s10 + $0x30] sm:$0xff] %v5621_v32  ;;  %v5622_v1 = vadd.f32 %v5610_v60, %v5592_v57 }
 0x825   :  { %5630 = vst [vmem:[%s9090_s10 + $0x38] sm:$0xff] %v5622_v1 }

</bundles_post_ra>
